<compile_context>
chip_gen: v6e
topology: v6e:2x2x1
jax: 0.10.0
libtpu: 0.0.40
codegen_flags: <defaults>
</compile_context>

<pallas_src>
import jax
import jax.numpy as jnp
from jax.experimental import pallas as pl
from jax.experimental.pallas import tpu as pltpu


# ---------------------------------------------------------------------------
# In-kernel helpers (operate on VMEM-resident refs/values; no HBM traffic)
# ---------------------------------------------------------------------------
def _maxpool2x2_nhwc(y):
    """2x2 / stride-2 max pool on a (B, H, W, C) value (H, W even)."""
    B, H, W, C = y.shape
    y = y.reshape(B * H, W // 2, 2, C)
    y = jnp.maximum(y[:, :, 0, :], y[:, :, 1, :])            # (B*H, W/2, C)
    y = y.reshape(B, H // 2, 2, (W // 2) * C)
    y = jnp.maximum(y[:, :, 0, :], y[:, :, 1, :])            # (B, H/2, W/2*C)
    return y.reshape(B, H // 2, W // 2, C)


def _conv3x3_relu(xp_ref, w, b_row, out_h, out_w):
    """3x3 'same' conv + bias + ReLU on a pre-padded batch.

    xp_ref: (B, out_h+2, out_w+2, Cin) ref (zero halo already present)
    w     : (3, 3, Cin, Cout) value (HWIO)
    b_row : (1, Cout) value
    Returns (B, out_h, out_w, Cout) f32.

    Nine accumulated K=Cin matmuls; no lane-axis concats (the MXU is nearly
    idle at these sizes, the relayout path is the binding resource).
    """
    B = xp_ref.shape[0]
    cin = xp_ref.shape[3]
    cout = w.shape[3]
    acc = None
    for kh in range(3):
        for kw in range(3):
            tap = xp_ref[:, kh:kh + out_h, kw:kw + out_w, :]
            tap = tap.reshape(B * out_h * out_w, cin)
            part = jnp.dot(tap, w[kh, kw], preferred_element_type=jnp.float32)
            acc = part if acc is None else acc + part
    y = jnp.maximum(acc + b_row, 0.0)                        # bias + ReLU
    return y.reshape(B, out_h, out_w, cout)


def _fused_convnet_kernel(x_ref, w1_ref, b1_ref, w2_ref, b2_ref,
                          wf_ref, bf_ref, o_ref, pad2_ref):
    """Whole ConvNet forward for a block of B images; VMEM-resident throughout."""
    B, Hp, Wp, _ = x_ref.shape
    H, W = Hp - 2, Wp - 2
    Hh, Wh = H // 2, W // 2
    Hq, Wq = Hh // 2, Wh // 2
    C2 = w2_ref.shape[3]

    # conv1 (+ReLU) on the wrapper-pre-padded input, then 2x2 max-pool.
    y1 = _conv3x3_relu(x_ref, w1_ref[...], b1_ref[...], H, W)   # (B, H, W, C1)
    y1 = _maxpool2x2_nhwc(y1)                                   # (B, Hh, Wh, C1)

    # 'same' padding for conv2 via a zeroed VMEM scratch: zero the buffer,
    # store the pooled activation into the interior (no concat relayouts).
    pad2_ref[...] = jnp.zeros_like(pad2_ref)
    pad2_ref[:, 1:1 + Hh, 1:1 + Wh, :] = y1

    # conv2 (+ReLU) + pool.
    y2 = _conv3x3_relu(pad2_ref, w2_ref[...], b2_ref[...], Hh, Wh)  # (B,Hh,Wh,C2)
    y2 = _maxpool2x2_nhwc(y2)                                   # (B, Hq, Wq, C2)

    # Flatten with ONE reshape ((h, w, c) order; wf was reordered to match in
    # the wrapper) and a single FC matmul; lane-dense (B, 128) output store.
    feat = y2.reshape(B, Hq * Wq * C2)
    logits = jnp.dot(feat, wf_ref[...],
                     preferred_element_type=jnp.float32) + bf_ref[...]
    o_ref[...] = logits.astype(o_ref.dtype)


# ---------------------------------------------------------------------------
# Parameter init + forward wrapper (single fused pallas_call)
# ---------------------------------------------------------------------------
def init_params(num_classes=10, in_channels=4, spatial=16, seed=42):
    ks = jax.random.split(jax.random.PRNGKey(seed), 6)
    c1, c2 = 8, 16
    w1 = jax.random.normal(ks[0], (3, 3, in_channels, c1), jnp.float32) * 0.1
    b1 = jax.random.normal(ks[1], (c1,), jnp.float32) * 0.1
    w2 = jax.random.normal(ks[2], (3, 3, c1, c2), jnp.float32) * 0.1
    b2 = jax.random.normal(ks[3], (c2,), jnp.float32) * 0.1
    feat = c2 * (spatial // 4) * (spatial // 4)
    wf = jax.random.normal(ks[4], (feat, num_classes), jnp.float32) * 0.1
    bf = jax.random.normal(ks[5], (num_classes,), jnp.float32) * 0.1
    return dict(w1=w1, b1=b1, w2=w2, b2=b2, wf=wf, bf=bf)


def _pick_batch_block(n):
    """Images per grid step.

    - n <= 8: one step with the whole batch (block == full extent).
    - otherwise: a multiple of 8 images per step, >= 2 steps (v7x has two
      TensorCores), capped at 128 images so the per-step working set stays a
      few MiB (safe for v7x's 64 MiB VMEM at default scoped limits).
    """
    if n <= 8:
        return n
    half = -(-n // 2)                     # ceil(n / 2) -> at least 2 steps
    return min(128, -(-half // 8) * 8)    # round up to a multiple of 8


@jax.jit
def downstream_forward(params, x_nchw):
    """Forward pass of DownstreamModel (ConvNet arch).  x_nchw: (N, Cin, H, W)."""
    N, Cin, H, W = x_nchw.shape
    assert H % 4 == 0 and W % 4 == 0, "spatial dims must be divisible by 4"
    C1 = params["w1"].shape[-1]
    C2 = params["w2"].shape[-1]
    ncls = params["bf"].shape[-1]
    Hh, Wh = H // 2, W // 2
    Hq, Wq = H // 4, W // 4
    ncls_pad = max(128, -(-ncls // 128) * 128)   # lane-dense logits slab

    B = _pick_batch_block(N)
    steps = -(-N // B)
    n_pad = steps * B

    # NCHW -> NHWC; pre-pad the conv1 halo (1 px each side) and the batch to
    # n_pad in one jnp.pad (fuses with the transpose in XLA).
    x_nhwc = jnp.transpose(x_nchw, (0, 2, 3, 1))
    xp = jnp.pad(x_nhwc, ((0, n_pad - N), (1, 1), (1, 1), (0, 0)))

    b1r = params["b1"].reshape(1, C1)
    b2r = params["b2"].reshape(1, C2)
    # FC weight rows are in torch NCHW-flatten order (c, h, w); reorder to the
    # kernel's NHWC-flatten order (h, w, c) and zero-pad columns to 128 so the
    # kernel's output store is lane-dense.
    wfr = (params["wf"].reshape(C2, Hq, Wq, ncls)
           .transpose(1, 2, 0, 3).reshape(Hq * Wq * C2, ncls))
    wfr = jnp.pad(wfr, ((0, 0), (0, ncls_pad - ncls)))
    bfr = jnp.pad(params["bf"].reshape(1, ncls), ((0, 0), (0, ncls_pad - ncls)))

    out = pl.pallas_call(
        _fused_convnet_kernel,
        out_shape=jax.ShapeDtypeStruct((n_pad, ncls_pad), jnp.float32),
        grid=(steps,),
        in_specs=[
            pl.BlockSpec((B, H + 2, W + 2, Cin), lambda n: (n, 0, 0, 0)),  # x
            pl.BlockSpec((3, 3, Cin, C1), lambda n: (0, 0, 0, 0)),         # w1
            pl.BlockSpec((1, C1), lambda n: (0, 0)),                       # b1
            pl.BlockSpec((3, 3, C1, C2), lambda n: (0, 0, 0, 0)),          # w2
            pl.BlockSpec((1, C2), lambda n: (0, 0)),                       # b2
            pl.BlockSpec((Hq * Wq * C2, ncls_pad), lambda n: (0, 0)),      # wf
            pl.BlockSpec((1, ncls_pad), lambda n: (0, 0)),                 # bf
        ],
        out_specs=pl.BlockSpec((B, ncls_pad), lambda n: (n, 0)),
        scratch_shapes=[pltpu.VMEM((B, Hh + 2, Wh + 2, C1), jnp.float32)],
        compiler_params=pltpu.CompilerParams(
            dimension_semantics=("parallel",)),
    )(xp, params["w1"], b1r, params["w2"], b2r, wfr, bfr)
    return out[:N, :ncls]


# ---------------------------------------------------------------------------
# Pure-JAX reference for correctness checking.
# ---------------------------------------------------------------------------
def reference_forward(params, x_nchw):
    x = jnp.transpose(x_nchw, (0, 2, 3, 1))

    def conv(x, w, b):
        y = jax.lax.conv_general_dilated(
            x, w, window_strides=(1, 1), padding="SAME",
            dimension_numbers=("NHWC", "HWIO", "NHWC"))
        return jnp.maximum(y + b, 0.0)

    def pool(x):
        N, H, W, C = x.shape
        return jnp.max(x.reshape(N, H // 2, 2, W // 2, 2, C), axis=(2, 4))

    y = pool(conv(x, params["w1"], params["b1"]))
    y = pool(conv(y, params["w2"], params["b2"]))
    feat = jnp.transpose(y, (0, 3, 1, 2)).reshape(y.shape[0], -1)
    return feat @ params["wf"] + params["bf"]


if __name__ == "__main__":
    N, C, S, NUM_CLASSES = 2, 4, 16, 10
    x = jax.random.normal(jax.random.PRNGKey(0), (N, C, S, S), jnp.float32)
    params = init_params(num_classes=NUM_CLASSES, in_channels=C, spatial=S)

    logits = downstream_forward(params, x)
    logits = jax.block_until_ready(logits)

    ref = reference_forward(params, x)
    assert logits.shape == (N, NUM_CLASSES), logits.shape
    assert jnp.allclose(logits, ref, atol=1e-4, rtol=1e-4), (
        f"max abs err = {jnp.max(jnp.abs(logits - ref))}")

    print("KERNEL_OK")
</pallas_src>

<mosaic_0001>
module attributes {stable_mosaic.version = 11 : i64} {
  func.func @_fused_convnet_kernel(%arg0: i32, %arg1: memref<2x18x18x4xf32, #tpu.memory_space<vmem>>, %arg2: memref<3x3x4x8xf32, #tpu.memory_space<vmem>>, %arg3: memref<1x8xf32, #tpu.memory_space<vmem>>, %arg4: memref<3x3x8x16xf32, #tpu.memory_space<vmem>>, %arg5: memref<1x16xf32, #tpu.memory_space<vmem>>, %arg6: memref<256x128xf32, #tpu.memory_space<vmem>>, %arg7: memref<1x128xf32, #tpu.memory_space<vmem>>, %arg8: memref<2x128xf32, #tpu.memory_space<vmem>>, %arg9: memref<2x10x10x8xf32, #tpu.memory_space<vmem>>) attributes {dimension_semantics = [#tpu.dimension_semantics<parallel>], iteration_bounds = array<i64: 1>, scalar_prefetch = 0 : i64, scratch_operands = 1 : i64, tpu.core_type = #tpu.core_type<tc>, window_params = [{transform_indices = @transform_0, window_bounds = array<i64: 2, 18, 18, 4>}, {pipeline_mode = #tpu.pipeline_mode<synchronous>, transform_indices = @transform_1, window_bounds = array<i64: 3, 3, 4, 8>}, {pipeline_mode = #tpu.pipeline_mode<synchronous>, transform_indices = @transform_2, window_bounds = array<i64: 1, 8>}, {pipeline_mode = #tpu.pipeline_mode<synchronous>, transform_indices = @transform_3, window_bounds = array<i64: 3, 3, 8, 16>}, {pipeline_mode = #tpu.pipeline_mode<synchronous>, transform_indices = @transform_4, window_bounds = array<i64: 1, 16>}, {pipeline_mode = #tpu.pipeline_mode<synchronous>, transform_indices = @transform_5, window_bounds = array<i64: 256, 128>}, {pipeline_mode = #tpu.pipeline_mode<synchronous>, transform_indices = @transform_6, window_bounds = array<i64: 1, 128>}, {transform_indices = @transform_7, window_bounds = array<i64: 2, 128>}]} {
    %c0 = arith.constant 0 : index
    %c0_0 = arith.constant 0 : index
    %c0_1 = arith.constant 0 : index
    %c0_2 = arith.constant 0 : index
    %0 = vector.load %arg2[%c0, %c0_0, %c0_1, %c0_2] : memref<3x3x4x8xf32, #tpu.memory_space<vmem>>, vector<3x3x4x8xf32>
    %c0_3 = arith.constant 0 : index
    %c0_4 = arith.constant 0 : index
    %1 = vector.load %arg3[%c0_3, %c0_4] : memref<1x8xf32, #tpu.memory_space<vmem>>, vector<1x8xf32>
    %c0_5 = arith.constant 0 : index
    %c0_6 = arith.constant 0 : index
    %c0_7 = arith.constant 0 : index
    %c0_8 = arith.constant 0 : index
    %2 = vector.load %arg1[%c0_5, %c0_6, %c0_7, %c0_8] : memref<2x18x18x4xf32, #tpu.memory_space<vmem>>, vector<2x16x16x4xf32>
    %3 = vector.shape_cast %2 : vector<2x16x16x4xf32> to vector<512x4xf32>
    %4 = vector.extract_strided_slice %0 {offsets = [0, 0, 0, 0], sizes = [1, 1, 4, 8], strides = [1, 1, 1, 1]} : vector<3x3x4x8xf32> to vector<1x1x4x8xf32>
    %5 = vector.shape_cast %4 : vector<1x1x4x8xf32> to vector<4x8xf32>
    %cst = arith.constant dense<0.000000e+00> : vector<512x8xf32>
    %6 = tpu.matmul %3, %5, %cst {dimension_numbers = #tpu.dot_dimension_numbers<[1], [0], [0], [1], [0, 0, 1, 1], [], []>} : vector<512x4xf32>, vector<4x8xf32>, vector<512x8xf32> -> vector<512x8xf32>
    %c0_9 = arith.constant 0 : index
    %c0_10 = arith.constant 0 : index
    %c1 = arith.constant 1 : index
    %c0_11 = arith.constant 0 : index
    %7 = vector.load %arg1[%c0_9, %c0_10, %c1, %c0_11] : memref<2x18x18x4xf32, #tpu.memory_space<vmem>>, vector<2x16x16x4xf32>
    %8 = vector.shape_cast %7 : vector<2x16x16x4xf32> to vector<512x4xf32>
    %9 = vector.extract_strided_slice %0 {offsets = [0, 1, 0, 0], sizes = [1, 1, 4, 8], strides = [1, 1, 1, 1]} : vector<3x3x4x8xf32> to vector<1x1x4x8xf32>
    %10 = vector.shape_cast %9 : vector<1x1x4x8xf32> to vector<4x8xf32>
    %cst_12 = arith.constant dense<0.000000e+00> : vector<512x8xf32>
    %11 = tpu.matmul %8, %10, %cst_12 {dimension_numbers = #tpu.dot_dimension_numbers<[1], [0], [0], [1], [0, 0, 1, 1], [], []>} : vector<512x4xf32>, vector<4x8xf32>, vector<512x8xf32> -> vector<512x8xf32>
    %12 = arith.addf %6, %11 : vector<512x8xf32>
    %c0_13 = arith.constant 0 : index
    %c0_14 = arith.constant 0 : index
    %c2 = arith.constant 2 : index
    %c0_15 = arith.constant 0 : index
    %13 = vector.load %arg1[%c0_13, %c0_14, %c2, %c0_15] : memref<2x18x18x4xf32, #tpu.memory_space<vmem>>, vector<2x16x16x4xf32>
    %14 = vector.shape_cast %13 : vector<2x16x16x4xf32> to vector<512x4xf32>
    %15 = vector.extract_strided_slice %0 {offsets = [0, 2, 0, 0], sizes = [1, 1, 4, 8], strides = [1, 1, 1, 1]} : vector<3x3x4x8xf32> to vector<1x1x4x8xf32>
    %16 = vector.shape_cast %15 : vector<1x1x4x8xf32> to vector<4x8xf32>
    %cst_16 = arith.constant dense<0.000000e+00> : vector<512x8xf32>
    %17 = tpu.matmul %14, %16, %cst_16 {dimension_numbers = #tpu.dot_dimension_numbers<[1], [0], [0], [1], [0, 0, 1, 1], [], []>} : vector<512x4xf32>, vector<4x8xf32>, vector<512x8xf32> -> vector<512x8xf32>
    %18 = arith.addf %12, %17 : vector<512x8xf32>
    %c0_17 = arith.constant 0 : index
    %c1_18 = arith.constant 1 : index
    %c0_19 = arith.constant 0 : index
    %c0_20 = arith.constant 0 : index
    %19 = vector.load %arg1[%c0_17, %c1_18, %c0_19, %c0_20] : memref<2x18x18x4xf32, #tpu.memory_space<vmem>>, vector<2x16x16x4xf32>
    %20 = vector.shape_cast %19 : vector<2x16x16x4xf32> to vector<512x4xf32>
    %21 = vector.extract_strided_slice %0 {offsets = [1, 0, 0, 0], sizes = [1, 1, 4, 8], strides = [1, 1, 1, 1]} : vector<3x3x4x8xf32> to vector<1x1x4x8xf32>
    %22 = vector.shape_cast %21 : vector<1x1x4x8xf32> to vector<4x8xf32>
    %cst_21 = arith.constant dense<0.000000e+00> : vector<512x8xf32>
    %23 = tpu.matmul %20, %22, %cst_21 {dimension_numbers = #tpu.dot_dimension_numbers<[1], [0], [0], [1], [0, 0, 1, 1], [], []>} : vector<512x4xf32>, vector<4x8xf32>, vector<512x8xf32> -> vector<512x8xf32>
    %24 = arith.addf %18, %23 : vector<512x8xf32>
    %c0_22 = arith.constant 0 : index
    %c1_23 = arith.constant 1 : index
    %c1_24 = arith.constant 1 : index
    %c0_25 = arith.constant 0 : index
    %25 = vector.load %arg1[%c0_22, %c1_23, %c1_24, %c0_25] : memref<2x18x18x4xf32, #tpu.memory_space<vmem>>, vector<2x16x16x4xf32>
    %26 = vector.shape_cast %25 : vector<2x16x16x4xf32> to vector<512x4xf32>
    %27 = vector.extract_strided_slice %0 {offsets = [1, 1, 0, 0], sizes = [1, 1, 4, 8], strides = [1, 1, 1, 1]} : vector<3x3x4x8xf32> to vector<1x1x4x8xf32>
    %28 = vector.shape_cast %27 : vector<1x1x4x8xf32> to vector<4x8xf32>
    %cst_26 = arith.constant dense<0.000000e+00> : vector<512x8xf32>
    %29 = tpu.matmul %26, %28, %cst_26 {dimension_numbers = #tpu.dot_dimension_numbers<[1], [0], [0], [1], [0, 0, 1, 1], [], []>} : vector<512x4xf32>, vector<4x8xf32>, vector<512x8xf32> -> vector<512x8xf32>
    %30 = arith.addf %24, %29 : vector<512x8xf32>
    %c0_27 = arith.constant 0 : index
    %c1_28 = arith.constant 1 : index
    %c2_29 = arith.constant 2 : index
    %c0_30 = arith.constant 0 : index
    %31 = vector.load %arg1[%c0_27, %c1_28, %c2_29, %c0_30] : memref<2x18x18x4xf32, #tpu.memory_space<vmem>>, vector<2x16x16x4xf32>
    %32 = vector.shape_cast %31 : vector<2x16x16x4xf32> to vector<512x4xf32>
    %33 = vector.extract_strided_slice %0 {offsets = [1, 2, 0, 0], sizes = [1, 1, 4, 8], strides = [1, 1, 1, 1]} : vector<3x3x4x8xf32> to vector<1x1x4x8xf32>
    %34 = vector.shape_cast %33 : vector<1x1x4x8xf32> to vector<4x8xf32>
    %cst_31 = arith.constant dense<0.000000e+00> : vector<512x8xf32>
    %35 = tpu.matmul %32, %34, %cst_31 {dimension_numbers = #tpu.dot_dimension_numbers<[1], [0], [0], [1], [0, 0, 1, 1], [], []>} : vector<512x4xf32>, vector<4x8xf32>, vector<512x8xf32> -> vector<512x8xf32>
    %36 = arith.addf %30, %35 : vector<512x8xf32>
    %c0_32 = arith.constant 0 : index
    %c2_33 = arith.constant 2 : index
    %c0_34 = arith.constant 0 : index
    %c0_35 = arith.constant 0 : index
    %37 = vector.load %arg1[%c0_32, %c2_33, %c0_34, %c0_35] : memref<2x18x18x4xf32, #tpu.memory_space<vmem>>, vector<2x16x16x4xf32>
    %38 = vector.shape_cast %37 : vector<2x16x16x4xf32> to vector<512x4xf32>
    %39 = vector.extract_strided_slice %0 {offsets = [2, 0, 0, 0], sizes = [1, 1, 4, 8], strides = [1, 1, 1, 1]} : vector<3x3x4x8xf32> to vector<1x1x4x8xf32>
    %40 = vector.shape_cast %39 : vector<1x1x4x8xf32> to vector<4x8xf32>
    %cst_36 = arith.constant dense<0.000000e+00> : vector<512x8xf32>
    %41 = tpu.matmul %38, %40, %cst_36 {dimension_numbers = #tpu.dot_dimension_numbers<[1], [0], [0], [1], [0, 0, 1, 1], [], []>} : vector<512x4xf32>, vector<4x8xf32>, vector<512x8xf32> -> vector<512x8xf32>
    %42 = arith.addf %36, %41 : vector<512x8xf32>
    %c0_37 = arith.constant 0 : index
    %c2_38 = arith.constant 2 : index
    %c1_39 = arith.constant 1 : index
    %c0_40 = arith.constant 0 : index
    %43 = vector.load %arg1[%c0_37, %c2_38, %c1_39, %c0_40] : memref<2x18x18x4xf32, #tpu.memory_space<vmem>>, vector<2x16x16x4xf32>
    %44 = vector.shape_cast %43 : vector<2x16x16x4xf32> to vector<512x4xf32>
    %45 = vector.extract_strided_slice %0 {offsets = [2, 1, 0, 0], sizes = [1, 1, 4, 8], strides = [1, 1, 1, 1]} : vector<3x3x4x8xf32> to vector<1x1x4x8xf32>
    %46 = vector.shape_cast %45 : vector<1x1x4x8xf32> to vector<4x8xf32>
    %cst_41 = arith.constant dense<0.000000e+00> : vector<512x8xf32>
    %47 = tpu.matmul %44, %46, %cst_41 {dimension_numbers = #tpu.dot_dimension_numbers<[1], [0], [0], [1], [0, 0, 1, 1], [], []>} : vector<512x4xf32>, vector<4x8xf32>, vector<512x8xf32> -> vector<512x8xf32>
    %48 = arith.addf %42, %47 : vector<512x8xf32>
    %c0_42 = arith.constant 0 : index
    %c2_43 = arith.constant 2 : index
    %c2_44 = arith.constant 2 : index
    %c0_45 = arith.constant 0 : index
    %49 = vector.load %arg1[%c0_42, %c2_43, %c2_44, %c0_45] : memref<2x18x18x4xf32, #tpu.memory_space<vmem>>, vector<2x16x16x4xf32>
    %50 = vector.shape_cast %49 : vector<2x16x16x4xf32> to vector<512x4xf32>
    %51 = vector.extract_strided_slice %0 {offsets = [2, 2, 0, 0], sizes = [1, 1, 4, 8], strides = [1, 1, 1, 1]} : vector<3x3x4x8xf32> to vector<1x1x4x8xf32>
    %52 = vector.shape_cast %51 : vector<1x1x4x8xf32> to vector<4x8xf32>
    %cst_46 = arith.constant dense<0.000000e+00> : vector<512x8xf32>
    %53 = tpu.matmul %50, %52, %cst_46 {dimension_numbers = #tpu.dot_dimension_numbers<[1], [0], [0], [1], [0, 0, 1, 1], [], []>} : vector<512x4xf32>, vector<4x8xf32>, vector<512x8xf32> -> vector<512x8xf32>
    %54 = arith.addf %48, %53 : vector<512x8xf32>
    %55 = vector.broadcast %1 : vector<1x8xf32> to vector<512x8xf32>
    %56 = arith.addf %54, %55 : vector<512x8xf32>
    %cst_47 = arith.constant 0.000000e+00 : f32
    %57 = vector.broadcast %cst_47 : f32 to vector<512x8xf32>
    %58 = arith.maximumf %56, %57 : vector<512x8xf32>
    %59 = vector.shape_cast %58 : vector<512x8xf32> to vector<2x16x16x8xf32>
    %60 = vector.shape_cast %59 : vector<2x16x16x8xf32> to vector<32x8x2x8xf32>
    %61 = vector.extract_strided_slice %60 {offsets = [0, 0, 0, 0], sizes = [32, 8, 1, 8], strides = [1, 1, 1, 1]} : vector<32x8x2x8xf32> to vector<32x8x1x8xf32>
    %62 = vector.shape_cast %61 : vector<32x8x1x8xf32> to vector<32x8x8xf32>
    %63 = vector.extract_strided_slice %60 {offsets = [0, 0, 1, 0], sizes = [32, 8, 1, 8], strides = [1, 1, 1, 1]} : vector<32x8x2x8xf32> to vector<32x8x1x8xf32>
    %64 = vector.shape_cast %63 : vector<32x8x1x8xf32> to vector<32x8x8xf32>
    %65 = arith.maximumf %62, %64 : vector<32x8x8xf32>
    %66 = vector.shape_cast %65 : vector<32x8x8xf32> to vector<2x8x2x64xf32>
    %67 = vector.extract_strided_slice %66 {offsets = [0, 0, 0, 0], sizes = [2, 8, 1, 64], strides = [1, 1, 1, 1]} : vector<2x8x2x64xf32> to vector<2x8x1x64xf32>
    %68 = vector.shape_cast %67 : vector<2x8x1x64xf32> to vector<2x8x64xf32>
    %69 = vector.extract_strided_slice %66 {offsets = [0, 0, 1, 0], sizes = [2, 8, 1, 64], strides = [1, 1, 1, 1]} : vector<2x8x2x64xf32> to vector<2x8x1x64xf32>
    %70 = vector.shape_cast %69 : vector<2x8x1x64xf32> to vector<2x8x64xf32>
    %71 = arith.maximumf %68, %70 : vector<2x8x64xf32>
    %72 = vector.shape_cast %71 : vector<2x8x64xf32> to vector<2x8x8x8xf32>
    %cst_48 = arith.constant 0.000000e+00 : f32
    %73 = vector.broadcast %cst_48 : f32 to vector<2x10x10x8xf32>
    %c0_49 = arith.constant 0 : index
    %c0_50 = arith.constant 0 : index
    %c0_51 = arith.constant 0 : index
    %c0_52 = arith.constant 0 : index
    %74 = vector.load %arg9[%c0_49, %c0_50, %c0_51, %c0_52] : memref<2x10x10x8xf32, #tpu.memory_space<vmem>>, vector<2x10x10x8xf32>
    tpu.vector_store %arg9[%c0_49, %c0_50, %c0_51, %c0_52], %73 {strides = array<i32>} : memref<2x10x10x8xf32, #tpu.memory_space<vmem>>, vector<2x10x10x8xf32>,
    %c0_53 = arith.constant 0 : index
    %c1_54 = arith.constant 1 : index
    %c1_55 = arith.constant 1 : index
    %c0_56 = arith.constant 0 : index
    %75 = vector.load %arg9[%c0_53, %c1_54, %c1_55, %c0_56] : memref<2x10x10x8xf32, #tpu.memory_space<vmem>>, vector<2x8x8x8xf32>
    tpu.vector_store %arg9[%c0_53, %c1_54, %c1_55, %c0_56], %72 {strides = array<i32>} : memref<2x10x10x8xf32, #tpu.memory_space<vmem>>, vector<2x8x8x8xf32>,
    %c0_57 = arith.constant 0 : index
    %c0_58 = arith.constant 0 : index
    %c0_59 = arith.constant 0 : index
    %c0_60 = arith.constant 0 : index
    %76 = vector.load %arg4[%c0_57, %c0_58, %c0_59, %c0_60] : memref<3x3x8x16xf32, #tpu.memory_space<vmem>>, vector<3x3x8x16xf32>
    %c0_61 = arith.constant 0 : index
    %c0_62 = arith.constant 0 : index
    %77 = vector.load %arg5[%c0_61, %c0_62] : memref<1x16xf32, #tpu.memory_space<vmem>>, vector<1x16xf32>
    %c0_63 = arith.constant 0 : index
    %c0_64 = arith.constant 0 : index
    %c0_65 = arith.constant 0 : index
    %c0_66 = arith.constant 0 : index
    %78 = vector.load %arg9[%c0_63, %c0_64, %c0_65, %c0_66] : memref<2x10x10x8xf32, #tpu.memory_space<vmem>>, vector<2x8x8x8xf32>
    %79 = vector.shape_cast %78 : vector<2x8x8x8xf32> to vector<128x8xf32>
    %80 = vector.extract_strided_slice %76 {offsets = [0, 0, 0, 0], sizes = [1, 1, 8, 16], strides = [1, 1, 1, 1]} : vector<3x3x8x16xf32> to vector<1x1x8x16xf32>
    %81 = vector.shape_cast %80 : vector<1x1x8x16xf32> to vector<8x16xf32>
    %cst_67 = arith.constant dense<0.000000e+00> : vector<128x16xf32>
    %82 = tpu.matmul %79, %81, %cst_67 {dimension_numbers = #tpu.dot_dimension_numbers<[1], [0], [0], [1], [0, 0, 1, 1], [], []>} : vector<128x8xf32>, vector<8x16xf32>, vector<128x16xf32> -> vector<128x16xf32>
    %c0_68 = arith.constant 0 : index
    %c0_69 = arith.constant 0 : index
    %c1_70 = arith.constant 1 : index
    %c0_71 = arith.constant 0 : index
    %83 = vector.load %arg9[%c0_68, %c0_69, %c1_70, %c0_71] : memref<2x10x10x8xf32, #tpu.memory_space<vmem>>, vector<2x8x8x8xf32>
    %84 = vector.shape_cast %83 : vector<2x8x8x8xf32> to vector<128x8xf32>
    %85 = vector.extract_strided_slice %76 {offsets = [0, 1, 0, 0], sizes = [1, 1, 8, 16], strides = [1, 1, 1, 1]} : vector<3x3x8x16xf32> to vector<1x1x8x16xf32>
    %86 = vector.shape_cast %85 : vector<1x1x8x16xf32> to vector<8x16xf32>
    %cst_72 = arith.constant dense<0.000000e+00> : vector<128x16xf32>
    %87 = tpu.matmul %84, %86, %cst_72 {dimension_numbers = #tpu.dot_dimension_numbers<[1], [0], [0], [1], [0, 0, 1, 1], [], []>} : vector<128x8xf32>, vector<8x16xf32>, vector<128x16xf32> -> vector<128x16xf32>
    %88 = arith.addf %82, %87 : vector<128x16xf32>
    %c0_73 = arith.constant 0 : index
    %c0_74 = arith.constant 0 : index
    %c2_75 = arith.constant 2 : index
    %c0_76 = arith.constant 0 : index
    %89 = vector.load %arg9[%c0_73, %c0_74, %c2_75, %c0_76] : memref<2x10x10x8xf32, #tpu.memory_space<vmem>>, vector<2x8x8x8xf32>
    %90 = vector.shape_cast %89 : vector<2x8x8x8xf32> to vector<128x8xf32>
    %91 = vector.extract_strided_slice %76 {offsets = [0, 2, 0, 0], sizes = [1, 1, 8, 16], strides = [1, 1, 1, 1]} : vector<3x3x8x16xf32> to vector<1x1x8x16xf32>
    %92 = vector.shape_cast %91 : vector<1x1x8x16xf32> to vector<8x16xf32>
    %cst_77 = arith.constant dense<0.000000e+00> : vector<128x16xf32>
    %93 = tpu.matmul %90, %92, %cst_77 {dimension_numbers = #tpu.dot_dimension_numbers<[1], [0], [0], [1], [0, 0, 1, 1], [], []>} : vector<128x8xf32>, vector<8x16xf32>, vector<128x16xf32> -> vector<128x16xf32>
    %94 = arith.addf %88, %93 : vector<128x16xf32>
    %c0_78 = arith.constant 0 : index
    %c1_79 = arith.constant 1 : index
    %c0_80 = arith.constant 0 : index
    %c0_81 = arith.constant 0 : index
    %95 = vector.load %arg9[%c0_78, %c1_79, %c0_80, %c0_81] : memref<2x10x10x8xf32, #tpu.memory_space<vmem>>, vector<2x8x8x8xf32>
    %96 = vector.shape_cast %95 : vector<2x8x8x8xf32> to vector<128x8xf32>
    %97 = vector.extract_strided_slice %76 {offsets = [1, 0, 0, 0], sizes = [1, 1, 8, 16], strides = [1, 1, 1, 1]} : vector<3x3x8x16xf32> to vector<1x1x8x16xf32>
    %98 = vector.shape_cast %97 : vector<1x1x8x16xf32> to vector<8x16xf32>
    %cst_82 = arith.constant dense<0.000000e+00> : vector<128x16xf32>
    %99 = tpu.matmul %96, %98, %cst_82 {dimension_numbers = #tpu.dot_dimension_numbers<[1], [0], [0], [1], [0, 0, 1, 1], [], []>} : vector<128x8xf32>, vector<8x16xf32>, vector<128x16xf32> -> vector<128x16xf32>
    %100 = arith.addf %94, %99 : vector<128x16xf32>
    %c0_83 = arith.constant 0 : index
    %c1_84 = arith.constant 1 : index
    %c1_85 = arith.constant 1 : index
    %c0_86 = arith.constant 0 : index
    %101 = vector.load %arg9[%c0_83, %c1_84, %c1_85, %c0_86] : memref<2x10x10x8xf32, #tpu.memory_space<vmem>>, vector<2x8x8x8xf32>
    %102 = vector.shape_cast %101 : vector<2x8x8x8xf32> to vector<128x8xf32>
    %103 = vector.extract_strided_slice %76 {offsets = [1, 1, 0, 0], sizes = [1, 1, 8, 16], strides = [1, 1, 1, 1]} : vector<3x3x8x16xf32> to vector<1x1x8x16xf32>
    %104 = vector.shape_cast %103 : vector<1x1x8x16xf32> to vector<8x16xf32>
    %cst_87 = arith.constant dense<0.000000e+00> : vector<128x16xf32>
    %105 = tpu.matmul %102, %104, %cst_87 {dimension_numbers = #tpu.dot_dimension_numbers<[1], [0], [0], [1], [0, 0, 1, 1], [], []>} : vector<128x8xf32>, vector<8x16xf32>, vector<128x16xf32> -> vector<128x16xf32>
    %106 = arith.addf %100, %105 : vector<128x16xf32>
    %c0_88 = arith.constant 0 : index
    %c1_89 = arith.constant 1 : index
    %c2_90 = arith.constant 2 : index
    %c0_91 = arith.constant 0 : index
    %107 = vector.load %arg9[%c0_88, %c1_89, %c2_90, %c0_91] : memref<2x10x10x8xf32, #tpu.memory_space<vmem>>, vector<2x8x8x8xf32>
    %108 = vector.shape_cast %107 : vector<2x8x8x8xf32> to vector<128x8xf32>
    %109 = vector.extract_strided_slice %76 {offsets = [1, 2, 0, 0], sizes = [1, 1, 8, 16], strides = [1, 1, 1, 1]} : vector<3x3x8x16xf32> to vector<1x1x8x16xf32>
    %110 = vector.shape_cast %109 : vector<1x1x8x16xf32> to vector<8x16xf32>
    %cst_92 = arith.constant dense<0.000000e+00> : vector<128x16xf32>
    %111 = tpu.matmul %108, %110, %cst_92 {dimension_numbers = #tpu.dot_dimension_numbers<[1], [0], [0], [1], [0, 0, 1, 1], [], []>} : vector<128x8xf32>, vector<8x16xf32>, vector<128x16xf32> -> vector<128x16xf32>
    %112 = arith.addf %106, %111 : vector<128x16xf32>
    %c0_93 = arith.constant 0 : index
    %c2_94 = arith.constant 2 : index
    %c0_95 = arith.constant 0 : index
    %c0_96 = arith.constant 0 : index
    %113 = vector.load %arg9[%c0_93, %c2_94, %c0_95, %c0_96] : memref<2x10x10x8xf32, #tpu.memory_space<vmem>>, vector<2x8x8x8xf32>
    %114 = vector.shape_cast %113 : vector<2x8x8x8xf32> to vector<128x8xf32>
    %115 = vector.extract_strided_slice %76 {offsets = [2, 0, 0, 0], sizes = [1, 1, 8, 16], strides = [1, 1, 1, 1]} : vector<3x3x8x16xf32> to vector<1x1x8x16xf32>
    %116 = vector.shape_cast %115 : vector<1x1x8x16xf32> to vector<8x16xf32>
    %cst_97 = arith.constant dense<0.000000e+00> : vector<128x16xf32>
    %117 = tpu.matmul %114, %116, %cst_97 {dimension_numbers = #tpu.dot_dimension_numbers<[1], [0], [0], [1], [0, 0, 1, 1], [], []>} : vector<128x8xf32>, vector<8x16xf32>, vector<128x16xf32> -> vector<128x16xf32>
    %118 = arith.addf %112, %117 : vector<128x16xf32>
    %c0_98 = arith.constant 0 : index
    %c2_99 = arith.constant 2 : index
    %c1_100 = arith.constant 1 : index
    %c0_101 = arith.constant 0 : index
    %119 = vector.load %arg9[%c0_98, %c2_99, %c1_100, %c0_101] : memref<2x10x10x8xf32, #tpu.memory_space<vmem>>, vector<2x8x8x8xf32>
    %120 = vector.shape_cast %119 : vector<2x8x8x8xf32> to vector<128x8xf32>
    %121 = vector.extract_strided_slice %76 {offsets = [2, 1, 0, 0], sizes = [1, 1, 8, 16], strides = [1, 1, 1, 1]} : vector<3x3x8x16xf32> to vector<1x1x8x16xf32>
    %122 = vector.shape_cast %121 : vector<1x1x8x16xf32> to vector<8x16xf32>
    %cst_102 = arith.constant dense<0.000000e+00> : vector<128x16xf32>
    %123 = tpu.matmul %120, %122, %cst_102 {dimension_numbers = #tpu.dot_dimension_numbers<[1], [0], [0], [1], [0, 0, 1, 1], [], []>} : vector<128x8xf32>, vector<8x16xf32>, vector<128x16xf32> -> vector<128x16xf32>
    %124 = arith.addf %118, %123 : vector<128x16xf32>
    %c0_103 = arith.constant 0 : index
    %c2_104 = arith.constant 2 : index
    %c2_105 = arith.constant 2 : index
    %c0_106 = arith.constant 0 : index
    %125 = vector.load %arg9[%c0_103, %c2_104, %c2_105, %c0_106] : memref<2x10x10x8xf32, #tpu.memory_space<vmem>>, vector<2x8x8x8xf32>
    %126 = vector.shape_cast %125 : vector<2x8x8x8xf32> to vector<128x8xf32>
    %127 = vector.extract_strided_slice %76 {offsets = [2, 2, 0, 0], sizes = [1, 1, 8, 16], strides = [1, 1, 1, 1]} : vector<3x3x8x16xf32> to vector<1x1x8x16xf32>
    %128 = vector.shape_cast %127 : vector<1x1x8x16xf32> to vector<8x16xf32>
    %cst_107 = arith.constant dense<0.000000e+00> : vector<128x16xf32>
    %129 = tpu.matmul %126, %128, %cst_107 {dimension_numbers = #tpu.dot_dimension_numbers<[1], [0], [0], [1], [0, 0, 1, 1], [], []>} : vector<128x8xf32>, vector<8x16xf32>, vector<128x16xf32> -> vector<128x16xf32>
    %130 = arith.addf %124, %129 : vector<128x16xf32>
    %131 = vector.broadcast %77 : vector<1x16xf32> to vector<128x16xf32>
    %132 = arith.addf %130, %131 : vector<128x16xf32>
    %cst_108 = arith.constant 0.000000e+00 : f32
    %133 = vector.broadcast %cst_108 : f32 to vector<128x16xf32>
    %134 = arith.maximumf %132, %133 : vector<128x16xf32>
    %135 = vector.shape_cast %134 : vector<128x16xf32> to vector<2x8x8x16xf32>
    %136 = vector.shape_cast %135 : vector<2x8x8x16xf32> to vector<16x4x2x16xf32>
    %137 = vector.extract_strided_slice %136 {offsets = [0, 0, 0, 0], sizes = [16, 4, 1, 16], strides = [1, 1, 1, 1]} : vector<16x4x2x16xf32> to vector<16x4x1x16xf32>
    %138 = vector.shape_cast %137 : vector<16x4x1x16xf32> to vector<16x4x16xf32>
    %139 = vector.extract_strided_slice %136 {offsets = [0, 0, 1, 0], sizes = [16, 4, 1, 16], strides = [1, 1, 1, 1]} : vector<16x4x2x16xf32> to vector<16x4x1x16xf32>
    %140 = vector.shape_cast %139 : vector<16x4x1x16xf32> to vector<16x4x16xf32>
    %141 = arith.maximumf %138, %140 : vector<16x4x16xf32>
    %142 = vector.shape_cast %141 : vector<16x4x16xf32> to vector<2x4x2x64xf32>
    %143 = vector.extract_strided_slice %142 {offsets = [0, 0, 0, 0], sizes = [2, 4, 1, 64], strides = [1, 1, 1, 1]} : vector<2x4x2x64xf32> to vector<2x4x1x64xf32>
    %144 = vector.shape_cast %143 : vector<2x4x1x64xf32> to vector<2x4x64xf32>
    %145 = vector.extract_strided_slice %142 {offsets = [0, 0, 1, 0], sizes = [2, 4, 1, 64], strides = [1, 1, 1, 1]} : vector<2x4x2x64xf32> to vector<2x4x1x64xf32>
    %146 = vector.shape_cast %145 : vector<2x4x1x64xf32> to vector<2x4x64xf32>
    %147 = arith.maximumf %144, %146 : vector<2x4x64xf32>
    %148 = vector.shape_cast %147 : vector<2x4x64xf32> to vector<2x4x4x16xf32>
    %149 = vector.shape_cast %148 : vector<2x4x4x16xf32> to vector<2x256xf32>
    %c0_109 = arith.constant 0 : index
    %c0_110 = arith.constant 0 : index
    %150 = vector.load %arg6[%c0_109, %c0_110] : memref<256x128xf32, #tpu.memory_space<vmem>>, vector<256x128xf32>
    %cst_111 = arith.constant dense<0.000000e+00> : vector<2x128xf32>
    %151 = tpu.matmul %149, %150, %cst_111 {dimension_numbers = #tpu.dot_dimension_numbers<[1], [0], [0], [1], [0, 0, 1, 1], [], []>} : vector<2x256xf32>, vector<256x128xf32>, vector<2x128xf32> -> vector<2x128xf32>
    %c0_112 = arith.constant 0 : index
    %c0_113 = arith.constant 0 : index
    %152 = vector.load %arg7[%c0_112, %c0_113] : memref<1x128xf32, #tpu.memory_space<vmem>>, vector<1x128xf32>
    %153 = vector.broadcast %152 : vector<1x128xf32> to vector<2x128xf32>
    %154 = arith.addf %151, %153 : vector<2x128xf32>
    %c0_114 = arith.constant 0 : index
    %c0_115 = arith.constant 0 : index
    %155 = vector.load %arg8[%c0_114, %c0_115] : memref<2x128xf32, #tpu.memory_space<vmem>>, vector<2x128xf32>
    tpu.vector_store %arg8[%c0_114, %c0_115], %154 {strides = array<i32>} : memref<2x128xf32, #tpu.memory_space<vmem>>, vector<2x128xf32>,
    return
  }
  func.func @transform_0(%arg0: i32) -> (i32, i32, i32, i32) {
    %c0_i32 = arith.constant 0 : i32
    %c0_i32_0 = arith.constant 0 : i32
    %c0_i32_1 = arith.constant 0 : i32
    %c0_i32_2 = arith.constant 0 : i32
    return %arg0, %c0_i32, %c0_i32_0, %c0_i32_1 : i32, i32, i32, i32
  }
  func.func @transform_1(%arg0: i32) -> (i32, i32, i32, i32) {
    %c0_i32 = arith.constant 0 : i32
    %c0_i32_0 = arith.constant 0 : i32
    %c0_i32_1 = arith.constant 0 : i32
    %c0_i32_2 = arith.constant 0 : i32
    %c0_i32_3 = arith.constant 0 : i32
    return %c0_i32, %c0_i32_0, %c0_i32_1, %c0_i32_2 : i32, i32, i32, i32
  }
  func.func @transform_2(%arg0: i32) -> (i32, i32) {
    %c0_i32 = arith.constant 0 : i32
    %c0_i32_0 = arith.constant 0 : i32
    %c0_i32_1 = arith.constant 0 : i32
    return %c0_i32, %c0_i32_0 : i32, i32
  }
  func.func @transform_3(%arg0: i32) -> (i32, i32, i32, i32) {
    %c0_i32 = arith.constant 0 : i32
    %c0_i32_0 = arith.constant 0 : i32
    %c0_i32_1 = arith.constant 0 : i32
    %c0_i32_2 = arith.constant 0 : i32
    %c0_i32_3 = arith.constant 0 : i32
    return %c0_i32, %c0_i32_0, %c0_i32_1, %c0_i32_2 : i32, i32, i32, i32
  }
  func.func @transform_4(%arg0: i32) -> (i32, i32) {
    %c0_i32 = arith.constant 0 : i32
    %c0_i32_0 = arith.constant 0 : i32
    %c0_i32_1 = arith.constant 0 : i32
    return %c0_i32, %c0_i32_0 : i32, i32
  }
  func.func @transform_5(%arg0: i32) -> (i32, i32) {
    %c0_i32 = arith.constant 0 : i32
    %c0_i32_0 = arith.constant 0 : i32
    %c0_i32_1 = arith.constant 0 : i32
    return %c0_i32, %c0_i32_0 : i32, i32
  }
  func.func @transform_6(%arg0: i32) -> (i32, i32) {
    %c0_i32 = arith.constant 0 : i32
    %c0_i32_0 = arith.constant 0 : i32
    %c0_i32_1 = arith.constant 0 : i32
    return %c0_i32, %c0_i32_0 : i32, i32
  }
  func.func @transform_7(%arg0: i32) -> (i32, i32) {
    %c0_i32 = arith.constant 0 : i32
    %c0_i32_0 = arith.constant 0 : i32
    return %arg0, %c0_i32 : i32, i32
  }
}

</mosaic_0001>

<bundles_post_ra>
// kernel: downstream_forward.1
= control target key start
LH: loop header
LB: loop body
LE: loop exit
PB: predicated region body
PF: predicated region fallthrough
CT: control target
= control target key end

     0   :  { %vm358_vm0 = vcmask 1043456   ;;  %vm165_vm1 = vcmask 31744   ;;  %s29182_s0 = inlined_call_operand.vmem [shape: f32[2,18,18,4], index: 0, kind: input, shape index: {}]   ;;  %s29183_s1 = inlined_call_operand.vmem [shape: f32[3,3,4,8], index: 1, kind: input, shape index: {}]   ;;  %s29184_s2 = inlined_call_operand.vmem [shape: f32[1,8], index: 2, kind: input, shape index: {}]   ;;  %s29185_s3 = inlined_call_operand.vmem [shape: f32[3,3,8,16], index: 3, kind: input, shape index: {}]   ;;  %s29186_s4 = inlined_call_operand.vmem [shape: f32[1,16], index: 4, kind: input, shape index: {}]   ;;  %s29187_s5 = inlined_call_operand.vmem [shape: f32[256,128], index: 5, kind: input, shape index: {}]   ;;  %s29188_s6 = inlined_call_operand.vmem [shape: f32[1,128], index: 6, kind: input, shape index: {}]   ;;  %s29189_s7 = inlined_call_operand.hbm [shape: f32[2,128], index: 7, kind: output, shape index: {}]  }
   0x1   :  { %v28_v0 = vld [vmem:[%s29183_s1 + $0x4] sm:$0xf]  ;;  %v159_v2 = vld [vmem:[%s29182_s0 + $0x2e9] sm:$0xff]  ;;  %v160_v4 = vld [vmem:[%s29182_s0 + $0x2f1] sm:$0xff] }
   0x2   :  { %v101_v1 = vld [vmem:[%s29182_s0 + $0x1] sm:$0xff]  ;;  %18771 = vmatprep.subr.msk.mxu0 %vm358_vm0, %v28_v0  ;;  %19887 = vmatprep.subr.msk.mxu1 %vm358_vm0, %v28_v0  ;;  %v102_v3 = vld [vmem:[%s29182_s0 + $0x9] sm:$0xff]  ;;  %v103_v6 = vld [vmem:[%s29182_s0 + $0x19] sm:$0xff] }
   0x3   :  { %18772 = vmatpush3.msk.msra.mxu0 %vm358_vm0, %v28_v0  ;;  %19888 = vmatpush3.msk.msra.mxu1 %vm358_vm0, %v28_v0  ;;  %v29_v5 = vld [vmem:[%s29183_s1 + $0x8] sm:$0xf]  ;;  %v27_v8 = vld [vmem:[%s29183_s1] sm:$0xf]  ;;  %v105_v11 = vld [vmem:[%s29182_s0 + $0x31] sm:$0xff] }
   0x4   :  { %18773 = vmatprep.mubr.msk.f32.mxu0 %vm165_vm1, %v101_v1  ;;  %18860 = vmatprep.mubr.msk.f32.mxu1 %vm165_vm1, %v159_v2  ;;  %v161_v7 = vld [vmem:[%s29182_s0 + $0x301] sm:$0xff]  ;;  %v162_v10 = vld [vmem:[%s29182_s0 + $0x309] sm:$0xff]  ;;  %v163_v12 = vld [vmem:[%s29182_s0 + $0x319] sm:$0xff] }
   0x5   :  { %18774 = vmatmul.mubr.msk.f32.vlgmr.msra.gmra.mxu0 %vm165_vm1, %v102_v3  ;;  %18861 = vmatmul.mubr.msk.f32.vlgmr.msra.gmra.mxu1 %vm165_vm1, %v160_v4  ;;  %v104_v9 = vld [vmem:[%s29182_s0 + $0x21] sm:$0xff]  ;;  %v106_v13 = vld [vmem:[%s29182_s0 + $0x39] sm:$0xff]  ;;  %v107_v15 = vld [vmem:[%s29182_s0 + $0x49] sm:$0xff] }
   0x6   :  { %18967 = vmatprep.subr.msk.mxu0 %vm358_vm0, %v29_v5  ;;  %18776 = vmatprep.mubr.msk.f32.mxu0 %vm165_vm1, %v103_v6  ;;  %v164_v14 = vld [vmem:[%s29182_s0 + $0x321] sm:$0xff]  ;;  %v108_v17 = vld [vmem:[%s29182_s0 + $0x51] sm:$0xff]  ;;  %v110_v21 = vld [vmem:[%s29182_s0 + $0x69] sm:$0xff] }
   0x7   :  { %18968 = vmatpush3.msk.msra.mxu0 %vm358_vm0, %v29_v5  ;;  %18863 = vmatprep.mubr.msk.f32.mxu1 %vm165_vm1, %v161_v7  ;;  %v37_v16 = vld [vmem:[%s29182_s0] sm:$0xff]  ;;  %v38_v18 = vld [vmem:[%s29182_s0 + $0x8] sm:$0xff]  ;;  %v20082_v20 = vld [vmem:[%s29182_s0 + $0x18] sm:$0xff] }
   0x8   :  { %18869 = vmatprep.subr.msk.mxu1 %vm358_vm0, %v27_v8  ;;  %v109_v19 = vld [vmem:[%s29182_s0 + $0x61] sm:$0xff]  ;;  %v111_v23 = vld [vmem:[%s29182_s0 + $0x79] sm:$0xff]  ;;  %v20103_v24 = vld [vmem:[%s29182_s0 + $0x30] sm:$0xff] }
   0x9   :  { %18777 = vmatmul.mubr.msk.f32.gmra.mxu0 %vm165_vm1, %v104_v9  ;;  %18864 = vmatmul.mubr.msk.f32.gmra.mxu1 %vm165_vm1, %v162_v10  ;;  %v20095_v22 = vld [vmem:[%s29182_s0 + $0x20] sm:$0xff]  ;;  %v20117_v26 = vld [vmem:[%s29182_s0 + $0x38] sm:$0xff]  ;;  %v20125_v28 = vld [vmem:[%s29182_s0 + $0x48] sm:$0xff] }
   0xa   :  { %18779 = vmatprep.mubr.msk.f32.mxu0 %vm165_vm1, %v105_v11  ;;  %18866 = vmatprep.mubr.msk.f32.mxu1 %vm165_vm1, %v163_v12  ;;  %v112_v25 = vld [vmem:[%s29182_s0 + $0x81] sm:$0xff]  ;;  %v113_v27 = vld [vmem:[%s29182_s0 + $0x91] sm:$0xff]  ;;  %v114_v29 = vld [vmem:[%s29182_s0 + $0x99] sm:$0xff] }
   0xb   :  { %18870 = vmatpush3.msk.msra.mxu1 %vm358_vm0, %v27_v8  ;;  %v20139_v30 = vld [vmem:[%s29182_s0 + $0x50] sm:$0xff]  ;;  %v20147_v32 = vld [vmem:[%s29182_s0 + $0x60] sm:$0xff]  ;;  %v20161_v34 = vld [vmem:[%s29182_s0 + $0x68] sm:$0xff] }
   0xc   :  { %v115_v31 = vld [vmem:[%s29182_s0 + $0xa9] sm:$0xff]  ;;  %v116_v33 = vld [vmem:[%s29182_s0 + $0xb1] sm:$0xff]  ;;  %v117_v35 = vld [vmem:[%s29182_s0 + $0xc1] sm:$0xff] }
   0xd   :  { %18780 = vmatmul.mubr.msk.f32.gmra.mxu0 %vm165_vm1, %v106_v13  ;;  %18867 = vmatmul.mubr.msk.f32.gmra.mxu1 %vm165_vm1, %v164_v14  ;;  %v20169_v36 = vld [vmem:[%s29182_s0 + $0x78] sm:$0xff]  ;;  %v118_v37 = vld [vmem:[%s29182_s0 + $0xc9] sm:$0xff]  ;;  %v20183_v38 = vld [vmem:[%s29182_s0 + $0x80] sm:$0xff] }
   0xe   :  { %18782 = vmatprep.mubr.msk.f32.mxu0 %vm165_vm1, %v107_v15  ;;  %18871 = vmatprep.mubr.msk.f32.mxu1 %vm165_vm1, %v37_v16  ;;  %v119_v39 = vld [vmem:[%s29182_s0 + $0xd9] sm:$0xff]  ;;  %v20191_v40 = vld [vmem:[%s29182_s0 + $0x90] sm:$0xff]  ;;  %v120_v41 = vld [vmem:[%s29182_s0 + $0xe1] sm:$0xff] }
   0xf   :  { %v20205_v42 = vld [vmem:[%s29182_s0 + $0x98] sm:$0xff]  ;;  %v20213_v44 = vld [vmem:[%s29182_s0 + $0xa8] sm:$0xff]  ;;  %v20230_v47 = vld [vmem:[%s29182_s0 + $0xb0] sm:$0xff] }
  0x10   :  { %v121_v43 = vld [vmem:[%s29182_s0 + $0xf1] sm:$0xff]  ;;  %v30_v45 = vld [vmem:[%s29183_s1 + $0xc] sm:$0xf]  ;;  %v122_v46 = vld [vmem:[%s29182_s0 + $0xf9] sm:$0xff] }
  0x11   :  { %18783 = vmatmul.mubr.msk.f32.gmra.mxu0 %vm165_vm1, %v108_v17  ;;  %18872 = vmatmul.mubr.msk.f32.vlgmr.msra.gmra.mxu1 %vm165_vm1, %v38_v18  ;;  %v20235_v48 = vld [vmem:[%s29183_s1 + $0x10] sm:$0xf]  ;;  %v20243_v50 = vld [vmem:[%s29182_s0 + $0xc0] sm:$0xff]  ;;  %v20261_v52 = vld [vmem:[%s29182_s0 + $0xc8] sm:$0xff] }
  0x12   :  { %18785 = vmatprep.mubr.msk.f32.mxu0 %vm165_vm1, %v109_v19  ;;  %18874 = vmatprep.mubr.msk.f32.mxu1 %vm165_vm1, %v20082_v20  ;;  %v123_v49 = vld [vmem:[%s29182_s0 + $0x109] sm:$0xff]  ;;  %v124_v51 = vld [vmem:[%s29182_s0 + $0x111] sm:$0xff]  ;;  %v125_v53 = vld [vmem:[%s29182_s0 + $0x121] sm:$0xff] }
  0x13   :  { %19065 = vmatprep.subr.msk.mxu1 %vm358_vm0, %v30_v45  ;;  %19163 = vmatprep.subr.msk.mxu0 %vm358_vm0, %v20235_v48  ;;  %v20269_v54 = vld [vmem:[%s29182_s0 + $0xd8] sm:$0xff]  ;;  %v126_v55 = vld [vmem:[%s29182_s0 + $0x129] sm:$0xff]  ;;  %v20283_v56 = vld [vmem:[%s29182_s0 + $0xe0] sm:$0xff] }
  0x14   :  { %19066 = vmatpush3.msk.msra.mxu1 %vm358_vm0, %v30_v45  ;;  %v127_v57 = vld [vmem:[%s29182_s0 + $0x139] sm:$0xff]  ;;  %v20291_v58 = vld [vmem:[%s29182_s0 + $0xf0] sm:$0xff]  ;;  %v128_v59 = vld [vmem:[%s29182_s0 + $0x141] sm:$0xff] }
  0x15   :  { %18786 = vmatmul.mubr.msk.f32.gmra.mxu0 %vm165_vm1, %v110_v21  ;;  %18875 = vmatmul.mubr.msk.f32.gmra.mxu1 %vm165_vm1, %v20095_v22  ;;  %v20305_v60 = vld [vmem:[%s29182_s0 + $0xf8] sm:$0xff]  ;;  %v20313_v62 = vld [vmem:[%s29182_s0 + $0x108] sm:$0xff] }
  0x16   :  { %18788 = vmatprep.mubr.msk.f32.mxu0 %vm165_vm1, %v111_v23  ;;  %18877 = vmatprep.mubr.msk.f32.mxu1 %vm165_vm1, %v20103_v24  ;;  %v129_v61 = vld [vmem:[%s29182_s0 + $0x151] sm:$0xff] }
  0x19   :  { %18789 = vmatmul.mubr.msk.f32.gmra.mxu0 %vm165_vm1, %v112_v25  ;;  %18878 = vmatmul.mubr.msk.f32.gmra.mxu1 %vm165_vm1, %v20117_v26 }
  0x1a   :  { %18791 = vmatprep.mubr.msk.f32.mxu0 %vm165_vm1, %v113_v27  ;;  %18880 = vmatprep.mubr.msk.f32.mxu1 %vm165_vm1, %v20125_v28 }
  0x1d   :  { %18792 = vmatmul.mubr.msk.f32.gmra.mxu0 %vm165_vm1, %v114_v29  ;;  %18881 = vmatmul.mubr.msk.f32.gmra.mxu1 %vm165_vm1, %v20139_v30 }
  0x1e   :  { %18794 = vmatprep.mubr.msk.f32.mxu0 %vm165_vm1, %v115_v31  ;;  %18883 = vmatprep.mubr.msk.f32.mxu1 %vm165_vm1, %v20147_v32 }
  0x21   :  { %18795 = vmatmul.mubr.msk.f32.gmra.mxu0 %vm165_vm1, %v116_v33  ;;  %18884 = vmatmul.mubr.msk.f32.gmra.mxu1 %vm165_vm1, %v20161_v34 }
  0x22   :  { %18797 = vmatprep.mubr.msk.f32.mxu0 %vm165_vm1, %v117_v35  ;;  %18886 = vmatprep.mubr.msk.f32.mxu1 %vm165_vm1, %v20169_v36 }
  0x25   :  { %18798 = vmatmul.mubr.msk.f32.gmra.mxu0 %vm165_vm1, %v118_v37  ;;  %18887 = vmatmul.mubr.msk.f32.gmra.mxu1 %vm165_vm1, %v20183_v38 }
  0x26   :  { %18800 = vmatprep.mubr.msk.f32.mxu0 %vm165_vm1, %v119_v39  ;;  %18889 = vmatprep.mubr.msk.f32.mxu1 %vm165_vm1, %v20191_v40 }
  0x29   :  { %18801 = vmatmul.mubr.msk.f32.gmra.mxu0 %vm165_vm1, %v120_v41  ;;  %18890 = vmatmul.mubr.msk.f32.gmra.mxu1 %vm165_vm1, %v20205_v42 }
  0x2a   :  { %18803 = vmatprep.mubr.msk.f32.mxu0 %vm165_vm1, %v121_v43  ;;  %18892 = vmatprep.mubr.msk.f32.mxu1 %vm165_vm1, %v20213_v44 }
  0x2d   :  { %18804 = vmatmul.mubr.msk.f32.gmra.mxu0 %vm165_vm1, %v122_v46  ;;  %18893 = vmatmul.mubr.msk.f32.gmra.mxu1 %vm165_vm1, %v20230_v47 }
  0x2e   :  { %18806 = vmatprep.mubr.msk.f32.mxu0 %vm165_vm1, %v123_v49  ;;  %18895 = vmatprep.mubr.msk.f32.mxu1 %vm165_vm1, %v20243_v50 }
  0x31   :  { %18807 = vmatmul.mubr.msk.f32.gmra.mxu0 %vm165_vm1, %v124_v51  ;;  %18896 = vmatmul.mubr.msk.f32.gmra.mxu1 %vm165_vm1, %v20261_v52 }
  0x32   :  { %18809 = vmatprep.mubr.msk.f32.mxu0 %vm165_vm1, %v125_v53  ;;  %18898 = vmatprep.mubr.msk.f32.mxu1 %vm165_vm1, %v20269_v54 }
  0x35   :  { %18810 = vmatmul.mubr.msk.f32.gmra.mxu0 %vm165_vm1, %v126_v55  ;;  %18899 = vmatmul.mubr.msk.f32.gmra.mxu1 %vm165_vm1, %v20283_v56 }
  0x36   :  { %18812 = vmatprep.mubr.msk.f32.mxu0 %vm165_vm1, %v127_v57  ;;  %18901 = vmatprep.mubr.msk.f32.mxu1 %vm165_vm1, %v20291_v58 }
  0x37   :  { %12 = vsyncpa [#allocation4], 0  ;;  %v130_v63 = vld [vmem:[%s29182_s0 + $0x159] sm:$0xff]  ;;  %v20327_v0 = vld [vmem:[%s29182_s0 + $0x110] sm:$0xff]  ;;  %vm9113_vm2 = vcmask 1041409   ;;  %vm9115_vm3 = vcmask 1043459  }
  0x38   :  { %v131_v1 = vld [vmem:[%s29182_s0 + $0x169] sm:$0xff]  ;;  %v20335_v2 = vld [vmem:[%s29182_s0 + $0x120] sm:$0xff]  ;;  %v132_v3 = vld [vmem:[%s29182_s0 + $0x171] sm:$0xff]  ;;  %vm9117_vm4 = vcmask 1045509   ;;  %vm9119_vm5 = vcmask 1047559   ;;  %s19941_s25 = smov 32  }
  0x39   :  { %18813 = vmatmul.mubr.msk.f32.gmra.mxu0 %vm165_vm1, %v128_v59  ;;  %18902 = vmatmul.mubr.msk.f32.gmra.mxu1 %vm165_vm1, %v20305_v60  ;;  %v20349_v4 = vld [vmem:[%s29182_s0 + $0x128] sm:$0xff]  ;;  %v133_v5 = vld [vmem:[%s29182_s0 + $0x1b1] sm:$0xff]  ;;  %v134_v7 = vld [vmem:[%s29182_s0 + $0x1b9] sm:$0xff]  ;;  %s19943_s26 = smov 16   ;;  %s19944_s27 = smov 48   ;;  %vm11946_vm6 = vcmask 64512  }
  0x3a   :  { %18815 = vmatprep.mubr.msk.f32.mxu0 %vm165_vm1, %v129_v61  ;;  %18904 = vmatprep.mubr.msk.f32.mxu1 %vm165_vm1, %v20313_v62  ;;  %v20357_v6 = vld [vmem:[%s29182_s0 + $0x138] sm:$0xff]  ;;  %v20371_v8 = vld [vmem:[%s29182_s0 + $0x140] sm:$0xff]  ;;  %v135_v9 = vld [vmem:[%s29182_s0 + $0x1c9] sm:$0xff]  ;;  %s19945_s28 = smov 56   ;;  %s19946_s29 = smov 24   ;;  %vm11963_vm7 = vcmask 130048  }
  0x3b   :  { %v20379_v10 = vld [vmem:[%s29182_s0 + $0x150] sm:$0xff]  ;;  %v20393_v12 = vld [vmem:[%s29182_s0 + $0x158] sm:$0xff]  ;;  %v137_v13 = vld [vmem:[%s29182_s0 + $0x1e1] sm:$0xff]  ;;  %s19947_s30 = smov 8   ;;  %vm11980_vm8 = vcmask 195584   ;;  %vm11997_vm9 = vcmask 261120  }
  0x3c   :  { %v136_v11 = vld [vmem:[%s29182_s0 + $0x1d1] sm:$0xff]  ;;  %v20401_v14 = vld [vmem:[%s29182_s0 + $0x168] sm:$0xff]  ;;  %v139_v17 = vld [vmem:[%s29182_s0 + $0x1f9] sm:$0xff]  ;;  %vm12014_vm10 = vcmask 326656   ;;  %vm12031_vm11 = vcmask 392192   ;;  %vm12048_vm12 = vcmask 457728  }
  0x3d   :  { %18816 = vmatmul.mubr.msk.f32.gmra.mxu0 %vm165_vm1, %v130_v63  ;;  %18905 = vmatmul.mubr.msk.f32.gmra.mxu1 %vm165_vm1, %v20327_v0  ;;  %v138_v15 = vld [vmem:[%s29182_s0 + $0x1e9] sm:$0xff]  ;;  %v140_v19 = vld [vmem:[%s29182_s0 + $0x201] sm:$0xff]  ;;  %v70_v21 = vld [vmem:[%s29182_s0 + $0x1b8] sm:$0xff]  ;;  %s19949_s14 = smov 120   ;;  %s19950_s15 = smov 96   ;;  %vm12882_vm13 = vcmask 58368  }
  0x3e   :  { %18818 = vmatprep.mubr.msk.f32.mxu0 %vm165_vm1, %v131_v1  ;;  %18907 = vmatprep.mubr.msk.f32.mxu1 %vm165_vm1, %v20335_v2  ;;  %v20415_v16 = vld [vmem:[%s29182_s0 + $0x170] sm:$0xff]  ;;  %v20440_v25 = vld [vmem:[%s29182_s0 + $0x1c8] sm:$0xff]  ;;  %v142_v27 = vld [vmem:[%s29182_s0 + $0x219] sm:$0xff]  ;;  %s19951_s16 = smov 80   ;;  %s19952_s17 = smov 104   ;;  %vm9107_vm14 = vcmask 1042434  }
  0x3f   :  { %v69_v18 = vld [vmem:[%s29182_s0 + $0x1b0] sm:$0xff]  ;;  %v20461_v33 = vld [vmem:[%s29182_s0 + $0x1e0] sm:$0xff]  ;;  %v20475_v37 = vld [vmem:[%s29182_s0 + $0x1e8] sm:$0xff]  ;;  %s19953_s18 = smov 88   ;;  %s19954_s19 = smov 72   ;;  %vm9108_vm15 = vcmask 1044484  }
  0x40   :  { %v141_v23 = vld [vmem:[%s29182_s0 + $0x211] sm:$0xff]  ;;  %v143_v31 = vld [vmem:[%s29182_s0 + $0x229] sm:$0xff]  ;;  %v145_v39 = vld [vmem:[%s29182_s0 + $0x241] sm:$0xff]  ;;  %s19956_s22 = smov [#allocation3]  }
  0x41   :  { %18819 = vmatmul.mubr.msk.f32.gmra.mxu0 %vm165_vm1, %v132_v3  ;;  %18908 = vmatmul.mubr.msk.f32.gmra.mxu1 %vm165_vm1, %v20349_v4  ;;  %v20453_v29 = vld [vmem:[%s29182_s0 + $0x1d0] sm:$0xff]  ;;  %v20483_v41 = vld [vmem:[%s29182_s0 + $0x1f8] sm:$0xff]  ;;  %v20497_v45 = vld [vmem:[%s29182_s0 + $0x200] sm:$0xff]  ;;  %s16554_s23 = sshll.u32 %s19956_s22, 4  ;;  %s16555_s23 = int_to_ptr.vmem [resolvable:$true] %s16554_s23 }
  0x42   :  { %18821 = vmatprep.mubr.msk.f32.mxu0 %vm165_vm1, %v133_v5  ;;  %18910 = vmatprep.mubr.msk.f32.mxu1 %vm165_vm1, %v20357_v6  ;;  %v144_v35 = vld [vmem:[%s29182_s0 + $0x231] sm:$0xff]  ;;  %v146_v43 = vld [vmem:[%s29182_s0 + $0x249] sm:$0xff]  ;;  %v147_v46 = vld [vmem:[%s29182_s0 + $0x259] sm:$0xff]  ;;  %p19921_p1 = scmp.lt.s32.totalorder %s16555_s23, %s16555_s23 }
  0x43   :  { %v20505_v49 = vld [vmem:[%s29182_s0 + $0x210] sm:$0xff]  ;;  %v148_v51 = vld [vmem:[%s29182_s0 + $0x261] sm:$0xff]  ;;  %v20519_v53 = vld [vmem:[%s29182_s0 + $0x218] sm:$0xff] }
  0x44   :  { %v149_v55 = vld [vmem:[%s29182_s0 + $0x271] sm:$0xff]  ;;  %v20527_v57 = vld [vmem:[%s29182_s0 + $0x228] sm:$0xff]  ;;  %v150_v59 = vld [vmem:[%s29182_s0 + $0x279] sm:$0xff] }
  0x45   :  { %18822 = vmatmul.mubr.msk.f32.gmra.mxu0 %vm165_vm1, %v134_v7  ;;  %18911 = vmatmul.mubr.msk.f32.gmra.mxu1 %vm165_vm1, %v20371_v8  ;;  %v20541_v61 = vld [vmem:[%s29182_s0 + $0x230] sm:$0xff]  ;;  %v20549_v1 = vld [vmem:[%s29182_s0 + $0x240] sm:$0xff]  ;;  %v20563_v5 = vld [vmem:[%s29182_s0 + $0x248] sm:$0xff] }
  0x46   :  { %18824 = vmatprep.mubr.msk.f32.mxu0 %vm165_vm1, %v135_v9  ;;  %18913 = vmatprep.mubr.msk.f32.mxu1 %vm165_vm1, %v20379_v10  ;;  %v151_v63 = vld [vmem:[%s29182_s0 + $0x289] sm:$0xff]  ;;  %v152_v3 = vld [vmem:[%s29182_s0 + $0x291] sm:$0xff]  ;;  %v153_v7 = vld [vmem:[%s29182_s0 + $0x2a1] sm:$0xff] }
  0x47   :  { %v20571_v9 = vld [vmem:[%s29182_s0 + $0x258] sm:$0xff] }
  0x49   :  { %18825 = vmatmul.mubr.msk.f32.gmra.mxu0 %vm165_vm1, %v136_v11  ;;  %18914 = vmatmul.mubr.msk.f32.gmra.mxu1 %vm165_vm1, %v20393_v12  ;;  %v154_v11 = vld [vmem:[%s29182_s0 + $0x2a9] sm:$0xff] }
  0x4a   :  { %18827 = vmatprep.mubr.msk.f32.mxu0 %vm165_vm1, %v137_v13  ;;  %18916 = vmatprep.mubr.msk.f32.mxu1 %vm165_vm1, %v20401_v14  ;;  %v20585_v13 = vld [vmem:[%s29182_s0 + $0x260] sm:$0xff] }
  0x4d   :  { %18828 = vmatmul.mubr.msk.f32.gmra.mxu0 %vm165_vm1, %v138_v15  ;;  %18917 = vmatmul.mubr.msk.f32.gmra.mxu1 %vm165_vm1, %v20415_v16  ;;  %v155_v15 = vld [vmem:[%s29182_s0 + $0x2b9] sm:$0xff] }
  0x4e   :  { %18830 = vmatprep.mubr.msk.f32.mxu0 %vm165_vm1, %v139_v17  ;;  %18919 = vmatprep.mubr.msk.f32.mxu1 %vm165_vm1, %v69_v18  ;;  %v20593_v17 = vld [vmem:[%s29182_s0 + $0x270] sm:$0xff]  ;;  %v156_v18 = vld [vmem:[%s29182_s0 + $0x2c1] sm:$0xff] }
  0x51   :  { %18831 = vmatmul.mubr.msk.f32.gmra.mxu0 %vm165_vm1, %v140_v19  ;;  %18920 = vmatmul.mubr.msk.f32.gmra.mxu1 %vm165_vm1, %v70_v21  ;;  %v20607_v19 = vld [vmem:[%s29182_s0 + $0x278] sm:$0xff] }
  0x52   :  { %18833 = vmatprep.mubr.msk.f32.mxu0 %vm165_vm1, %v141_v23  ;;  %18922 = vmatprep.mubr.msk.f32.mxu1 %vm165_vm1, %v20440_v25  ;;  %v157_v21 = vld [vmem:[%s29182_s0 + $0x2d1] sm:$0xff]  ;;  %v20615_v23 = vld [vmem:[%s29182_s0 + $0x288] sm:$0xff] }
  0x55   :  { %18834 = vmatmul.mubr.msk.f32.gmra.mxu0 %vm165_vm1, %v142_v27  ;;  %18923 = vmatmul.mubr.msk.f32.gmra.mxu1 %vm165_vm1, %v20453_v29  ;;  %v158_v27 = vld [vmem:[%s29182_s0 + $0x2d9] sm:$0xff] }
  0x56   :  { %18836 = vmatprep.mubr.msk.f32.mxu0 %vm165_vm1, %v143_v31  ;;  %18925 = vmatprep.mubr.msk.f32.mxu1 %vm165_vm1, %v20461_v33  ;;  %v20629_v31 = vld [vmem:[%s29182_s0 + $0x290] sm:$0xff] }
  0x59   :  { %18837 = vmatmul.mubr.msk.f32.gmra.mxu0 %vm165_vm1, %v144_v35  ;;  %18926 = vmatmul.mubr.msk.f32.gmra.mxu1 %vm165_vm1, %v20475_v37  ;;  %v20634_v35 = vld [vmem:[%s29182_s0 + $0x2a0] sm:$0xff] }
  0x5a   :  { %18839 = vmatprep.mubr.msk.f32.mxu0 %vm165_vm1, %v145_v39  ;;  %18928 = vmatprep.mubr.msk.f32.mxu1 %vm165_vm1, %v20483_v41  ;;  %v1327_v39 = vld [vmem:[%s29182_s0 + $0x2] sm:$0xff] }
  0x5d   :  { %18840 = vmatmul.mubr.msk.f32.gmra.mxu0 %vm165_vm1, %v146_v43  ;;  %18929 = vmatmul.mubr.msk.f32.gmra.mxu1 %vm165_vm1, %v20497_v45  ;;  %v20648_v43 = vld [vmem:[%s29182_s0 + $0x2a8] sm:$0xff] }
  0x5e   :  { %18842 = vmatprep.mubr.msk.f32.mxu0 %vm165_vm1, %v147_v46  ;;  %18931 = vmatprep.mubr.msk.f32.mxu1 %vm165_vm1, %v20505_v49  ;;  %v1328_v46 = vld [vmem:[%s29182_s0 + $0xa] sm:$0xff] }
  0x61   :  { %18843 = vmatmul.mubr.msk.f32.gmra.mxu0 %vm165_vm1, %v148_v51  ;;  %18932 = vmatmul.mubr.msk.f32.gmra.mxu1 %vm165_vm1, %v20519_v53  ;;  %v20656_v51 = vld [vmem:[%s29182_s0 + $0x2b8] sm:$0xff] }
  0x62   :  { %18845 = vmatprep.mubr.msk.f32.mxu0 %vm165_vm1, %v149_v55  ;;  %18934 = vmatprep.mubr.msk.f32.mxu1 %vm165_vm1, %v20527_v57  ;;  %v20661_v55 = vld [vmem:[%s29182_s0 + $0x1a] sm:$0xff] }
  0x63   :  { %29381 = vst [vmem:[#allocation6_spill] sm:$0xff] %v20661_v55 }
  0x65   :  { %18846 = vmatmul.mubr.msk.f32.gmra.mxu0 %vm165_vm1, %v150_v59  ;;  %18935 = vmatmul.mubr.msk.f32.gmra.mxu1 %vm165_vm1, %v20541_v61  ;;  %v32_v59 = vld [vmem:[%s29183_s1 + $0x14] sm:$0xf] }
  0x66   :  { %18848 = vmatprep.mubr.msk.f32.mxu0 %vm165_vm1, %v151_v63  ;;  %18937 = vmatprep.mubr.msk.f32.mxu1 %vm165_vm1, %v20549_v1  ;;  %v20676_v63 = vld [vmem:[%s29182_s0 + $0x2c0] sm:$0xff] }
  0x67   :  { %19261 = vmatprep.subr.msk.mxu1 %vm358_vm0, %v32_v59 }
  0x69   :  { %18849 = vmatmul.mubr.msk.f32.gmra.mxu0 %vm165_vm1, %v152_v3  ;;  %18938 = vmatmul.mubr.msk.f32.gmra.mxu1 %vm165_vm1, %v20563_v5  ;;  %v20681_v3 = vld [vmem:[%s29182_s0 + $0x22] sm:$0xff] }
  0x6a   :  { %18851 = vmatprep.mubr.msk.f32.mxu0 %vm165_vm1, %v153_v7  ;;  %18940 = vmatprep.mubr.msk.f32.mxu1 %vm165_vm1, %v20571_v9  ;;  %29382 = vst [vmem:[#allocation7_spill] sm:$0xff] %v20681_v3  ;;  %v20686_v7 = vld [vmem:[%s29183_s1 + $0x18] sm:$0xf] }
  0x6d   :  { %18852 = vmatmul.mubr.msk.f32.gmra.mxu0 %vm165_vm1, %v154_v11  ;;  %18941 = vmatmul.mubr.msk.f32.gmra.mxu1 %vm165_vm1, %v20585_v13  ;;  %v20698_v11 = vld [vmem:[%s29182_s0 + $0x32] sm:$0xff] }
  0x6e   :  { %18854 = vmatprep.mubr.msk.f32.mxu0 %vm165_vm1, %v155_v15  ;;  %18943 = vmatprep.mubr.msk.f32.mxu1 %vm165_vm1, %v20593_v17  ;;  %29383 = vst [vmem:[#allocation8_spill] sm:$0xff] %v20698_v11  ;;  %v20714_v15 = vld [vmem:[%s29182_s0 + $0x2d8] sm:$0xff] }
  0x71   :  { %18855 = vmatmul.mubr.msk.f32.gmra.mxu0 %vm165_vm1, %v156_v18  ;;  %18944 = vmatmul.mubr.msk.f32.gmra.mxu1 %vm165_vm1, %v20607_v19  ;;  %v20719_v18 = vld [vmem:[%s29182_s0 + $0x3a] sm:$0xff] }
  0x72   :  { %18857 = vmatprep.mubr.msk.f32.mxu0 %vm165_vm1, %v157_v21  ;;  %18946 = vmatprep.mubr.msk.f32.mxu1 %vm165_vm1, %v20615_v23  ;;  %29384 = vst [vmem:[#allocation9_spill] sm:$0xff] %v20719_v18  ;;  %v20724_v21 = vld [vmem:[%s29182_s0 + $0x2e8] sm:$0xff] }
  0x75   :  { %18858 = vmatmul.mubr.msk.f32.gmra.mxu0 %vm165_vm1, %v158_v27  ;;  %18947 = vmatmul.mubr.msk.f32.gmra.mxu1 %vm165_vm1, %v20629_v31  ;;  %v20729_v27 = vld [vmem:[%s29182_s0 + $0x4a] sm:$0xff] }
  0x76   :  { %18949 = vmatprep.mubr.msk.f32.mxu1 %vm165_vm1, %v20634_v35  ;;  %18969 = vmatprep.mubr.msk.f32.mxu0 %vm165_vm1, %v1327_v39  ;;  %29385 = vst [vmem:[#allocation10_spill] sm:$0xff] %v20729_v27  ;;  %v20742_v39 = vld [vmem:[%s29182_s0 + $0x2f0] sm:$0xff] }
  0x79   :  { %18950 = vmatmul.mubr.msk.f32.gmra.mxu1 %vm165_vm1, %v20648_v43  ;;  %18970 = vmatmul.mubr.msk.f32.vlgmr.msra.gmra.mxu0 %vm165_vm1, %v1328_v46  ;;  %v20747_v46 = vld [vmem:[%s29182_s0 + $0x52] sm:$0xff] }
  0x7a   :  { %19164 = vmatpush3.msk.msra.mxu0 %vm358_vm0, %v20235_v48  ;;  %18952 = vmatprep.mubr.msk.f32.mxu1 %vm165_vm1, %v20656_v51  ;;  %v20693_v48 = vld [vmem:[%s29182_s0 + $0x2d0] sm:$0xff]  ;;  %29386 = vst [vmem:[#allocation11_spill] sm:$0xff] %v20747_v46 }
  0x7b   :  { %18972 = vmatprep.mubr.msk.f32.mxu0 %vm165_vm1, %v20661_v55  ;;  %19359 = vmatprep.subr.msk.mxu0 %vm358_vm0, %v20686_v7  ;;  %v20785_v55 = vld [vmem:[%s29182_s0 + $0x7a] sm:$0xff] }
  0x7c   :  { %29391 = vst [vmem:[#allocation16_spill] sm:$0xff] %v20785_v55 }
  0x7d   :  { %18953 = vmatmul.mubr.msk.f32.gmra.mxu1 %vm165_vm1, %v20676_v63  ;;  %18973 = vmatmul.mubr.msk.f32.gmra.mxu0 %vm165_vm1, %v20681_v3  ;;  %v20775_v3 = vld [vmem:[%s29182_s0 + $0x6a] sm:$0xff] }
  0x7e   :  { %18955 = vmatprep.mubr.msk.f32.mxu1 %vm165_vm1, %v20693_v48  ;;  %18975 = vmatprep.mubr.msk.f32.mxu0 %vm165_vm1, %v20698_v11  ;;  %v20757_v11 = vld [vmem:[%s29182_s0 + $0x62] sm:$0xff]  ;;  %29389 = vst [vmem:[#allocation14_spill] sm:$0xff] %v20775_v3 }
  0x7f   :  { %29388 = vst [vmem:[#allocation13_spill] sm:$0xff] %v20757_v11 }
  0x81   :  { %18956 = vmatmul.mubr.msk.f32.gmra.mxu1 %vm165_vm1, %v20714_v15  ;;  %18976 = vmatmul.mubr.msk.f32.gmra.mxu0 %vm165_vm1, %v20719_v18  ;;  %v20752_v18 = vld [vmem:[%s29182_s0 + $0x300] sm:$0xff] }
  0x82   :  { %18958 = vmatprep.mubr.msk.f32.mxu1 %vm165_vm1, %v20724_v21  ;;  %18978 = vmatprep.mubr.msk.f32.mxu0 %vm165_vm1, %v20729_v27  ;;  %29387 = vst [vmem:[#allocation12_spill] sm:$0xff] %v20752_v18  ;;  %v20770_v27 = vld [vmem:[%s29182_s0 + $0x308] sm:$0xff] }
  0x85   :  { %18959 = vmatmul.mubr.msk.f32.gmra.mxu1 %vm165_vm1, %v20742_v39  ;;  %18979 = vmatmul.mubr.msk.f32.gmra.mxu0 %vm165_vm1, %v20747_v46  ;;  %v20780_v46 = vld [vmem:[%s29182_s0 + $0x318] sm:$0xff] }
  0x86   :  { %18961 = vmatprep.mubr.msk.f32.mxu1 %vm165_vm1, %v20752_v18  ;;  %18981 = vmatprep.mubr.msk.f32.mxu0 %vm165_vm1, %v20757_v11  ;;  %29390 = vst [vmem:[#allocation15_spill] sm:$0xff] %v20780_v46  ;;  %v20798_v11 = vld [vmem:[%s29182_s0 + $0x320] sm:$0xff] }
  0x87   :  { %v20803_v18 = vld [vmem:[%s29182_s0 + $0x82] sm:$0xff] }
  0x89   :  { %18962 = vmatmul.mubr.msk.f32.gmra.mxu1 %vm165_vm1, %v20770_v27  ;;  %18982 = vmatmul.mubr.msk.f32.gmra.mxu0 %vm165_vm1, %v20775_v3  ;;  %v20808_v3 = vld [vmem:[%s29182_s0 + $0x92] sm:$0xff] }
  0x8a   :  { %18964 = vmatprep.mubr.msk.f32.mxu1 %vm165_vm1, %v20780_v46  ;;  %18984 = vmatprep.mubr.msk.f32.mxu0 %vm165_vm1, %v20785_v55  ;;  %29392 = vst [vmem:[#allocation17_spill] sm:$0xff] %v20808_v3  ;;  %v20821_v55 = vld [vmem:[%s29182_s0 + $0x9a] sm:$0xff]  ;;  %v20826_v46 = vld [vmem:[%s29182_s0 + $0xaa] sm:$0xff] }
  0x8d   :  { %18965 = vmatmul.mubr.msk.f32.gmra.mxu1 %vm165_vm1, %v20798_v11  ;;  %18985 = vmatmul.mubr.msk.f32.gmra.mxu0 %vm165_vm1, %v20803_v18 }
  0x8e   :  { %18987 = vmatprep.mubr.msk.f32.mxu0 %vm165_vm1, %v20808_v3  ;;  %19067 = vmatprep.mubr.msk.f32.mxu1 %vm165_vm1, %v20082_v20  ;;  %v20839_v20 = vld [vmem:[%s29182_s0 + $0xb2] sm:$0xff]  ;;  %v20844_v3 = vld [vmem:[%s29182_s0 + $0xc2] sm:$0xff] }
  0x91   :  { %18988 = vmatmul.mubr.msk.f32.gmra.mxu0 %vm165_vm1, %v20821_v55  ;;  %19068 = vmatmul.mubr.msk.f32.vlgmr.msra.gmra.mxu1 %vm165_vm1, %v20095_v22  ;;  %v20858_v22 = vld [vmem:[%s29182_s0 + $0xca] sm:$0xff] }
  0x92   :  { %18990 = vmatprep.mubr.msk.f32.mxu0 %vm165_vm1, %v20826_v46  ;;  %19070 = vmatprep.mubr.msk.f32.mxu1 %vm165_vm1, %v20103_v24  ;;  %v20863_v24 = vld [vmem:[%s29182_s0 + $0xda] sm:$0xff] }
  0x93   :  { %19262 = vmatpush3.msk.msra.mxu1 %vm358_vm0, %v32_v59 }
  0x95   :  { %18991 = vmatmul.mubr.msk.f32.gmra.mxu0 %vm165_vm1, %v20839_v20  ;;  %19071 = vmatmul.mubr.msk.f32.gmra.mxu1 %vm165_vm1, %v20117_v26  ;;  %v20876_v26 = vld [vmem:[%s29182_s0 + $0xe2] sm:$0xff] }
  0x96   :  { %18993 = vmatprep.mubr.msk.f32.mxu0 %vm165_vm1, %v20844_v3  ;;  %19073 = vmatprep.mubr.msk.f32.mxu1 %vm165_vm1, %v20125_v28  ;;  %v20881_v28 = vld [vmem:[%s29182_s0 + $0xf2] sm:$0xff] }
  0x99   :  { %18994 = vmatmul.mubr.msk.f32.gmra.mxu0 %vm165_vm1, %v20858_v22  ;;  %19074 = vmatmul.mubr.msk.f32.gmra.mxu1 %vm165_vm1, %v20139_v30  ;;  %v20894_v30 = vld [vmem:[%s29182_s0 + $0xfa] sm:$0xff] }
  0x9a   :  { %18996 = vmatprep.mubr.msk.f32.mxu0 %vm165_vm1, %v20863_v24  ;;  %19076 = vmatprep.mubr.msk.f32.mxu1 %vm165_vm1, %v20147_v32  ;;  %v20899_v32 = vld [vmem:[%s29182_s0 + $0x10a] sm:$0xff] }
  0x9d   :  { %18997 = vmatmul.mubr.msk.f32.gmra.mxu0 %vm165_vm1, %v20876_v26  ;;  %19077 = vmatmul.mubr.msk.f32.gmra.mxu1 %vm165_vm1, %v20161_v34  ;;  %v20912_v34 = vld [vmem:[%s29182_s0 + $0x112] sm:$0xff] }
  0x9e   :  { %18999 = vmatprep.mubr.msk.f32.mxu0 %vm165_vm1, %v20881_v28  ;;  %19079 = vmatprep.mubr.msk.f32.mxu1 %vm165_vm1, %v20169_v36  ;;  %v20917_v36 = vld [vmem:[%s29182_s0 + $0x122] sm:$0xff] }
  0xa1   :  { %19000 = vmatmul.mubr.msk.f32.gmra.mxu0 %vm165_vm1, %v20894_v30  ;;  %19080 = vmatmul.mubr.msk.f32.gmra.mxu1 %vm165_vm1, %v20183_v38  ;;  %v20930_v38 = vld [vmem:[%s29182_s0 + $0x12a] sm:$0xff] }
  0xa2   :  { %19002 = vmatprep.mubr.msk.f32.mxu0 %vm165_vm1, %v20899_v32  ;;  %19082 = vmatprep.mubr.msk.f32.mxu1 %vm165_vm1, %v20191_v40  ;;  %v20935_v40 = vld [vmem:[%s29182_s0 + $0x13a] sm:$0xff] }
  0xa5   :  { %19003 = vmatmul.mubr.msk.f32.gmra.mxu0 %vm165_vm1, %v20912_v34  ;;  %19083 = vmatmul.mubr.msk.f32.gmra.mxu1 %vm165_vm1, %v20205_v42  ;;  %v20948_v42 = vld [vmem:[%s29182_s0 + $0x142] sm:$0xff] }
  0xa6   :  { %19005 = vmatprep.mubr.msk.f32.mxu0 %vm165_vm1, %v20917_v36  ;;  %19085 = vmatprep.mubr.msk.f32.mxu1 %vm165_vm1, %v20213_v44  ;;  %v20953_v44 = vld [vmem:[%s29182_s0 + $0x152] sm:$0xff] }
  0xa9   :  { %19006 = vmatmul.mubr.msk.f32.gmra.mxu0 %vm165_vm1, %v20930_v38  ;;  %19086 = vmatmul.mubr.msk.f32.gmra.mxu1 %vm165_vm1, %v20230_v47  ;;  %v20966_v47 = vld [vmem:[%s29182_s0 + $0x15a] sm:$0xff] }
  0xaa   :  { %19008 = vmatprep.mubr.msk.f32.mxu0 %vm165_vm1, %v20935_v40  ;;  %19088 = vmatprep.mubr.msk.f32.mxu1 %vm165_vm1, %v20243_v50  ;;  %v20971_v50 = vld [vmem:[%s29182_s0 + $0x16a] sm:$0xff] }
  0xad   :  { %19009 = vmatmul.mubr.msk.f32.gmra.mxu0 %vm165_vm1, %v20948_v42  ;;  %19089 = vmatmul.mubr.msk.f32.gmra.mxu1 %vm165_vm1, %v20261_v52  ;;  %v20984_v52 = vld [vmem:[%s29182_s0 + $0x172] sm:$0xff] }
  0xae   :  { %19011 = vmatprep.mubr.msk.f32.mxu0 %vm165_vm1, %v20953_v44  ;;  %19091 = vmatprep.mubr.msk.f32.mxu1 %vm165_vm1, %v20269_v54  ;;  %v1359_v54 = vld [vmem:[%s29182_s0 + $0x1b2] sm:$0xff] }
  0xb1   :  { %19012 = vmatmul.mubr.msk.f32.gmra.mxu0 %vm165_vm1, %v20966_v47  ;;  %19092 = vmatmul.mubr.msk.f32.gmra.mxu1 %vm165_vm1, %v20283_v56  ;;  %v1360_v56 = vld [vmem:[%s29182_s0 + $0x1ba] sm:$0xff] }
  0xb2   :  { %19014 = vmatprep.mubr.msk.f32.mxu0 %vm165_vm1, %v20971_v50  ;;  %19094 = vmatprep.mubr.msk.f32.mxu1 %vm165_vm1, %v20291_v58  ;;  %v1361_v58 = vld [vmem:[%s29182_s0 + $0x1ca] sm:$0xff] }
  0xb5   :  { %19015 = vmatmul.mubr.msk.f32.gmra.mxu0 %vm165_vm1, %v20984_v52  ;;  %19095 = vmatmul.mubr.msk.f32.gmra.mxu1 %vm165_vm1, %v20305_v60  ;;  %v1362_v60 = vld [vmem:[%s29182_s0 + $0x1d2] sm:$0xff] }
  0xb6   :  { %19017 = vmatprep.mubr.msk.f32.mxu0 %vm165_vm1, %v1359_v54  ;;  %19097 = vmatprep.mubr.msk.f32.mxu1 %vm165_vm1, %v20313_v62  ;;  %v1363_v62 = vld [vmem:[%s29182_s0 + $0x1e2] sm:$0xff] }
  0xb9   :  { %19018 = vmatmul.mubr.msk.f32.gmra.mxu0 %vm165_vm1, %v1360_v56  ;;  %19098 = vmatmul.mubr.msk.f32.gmra.mxu1 %vm165_vm1, %v20327_v0  ;;  %v1364_v0 = vld [vmem:[%s29182_s0 + $0x1ea] sm:$0xff] }
  0xba   :  { %19020 = vmatprep.mubr.msk.f32.mxu0 %vm165_vm1, %v1361_v58  ;;  %19100 = vmatprep.mubr.msk.f32.mxu1 %vm165_vm1, %v20335_v2  ;;  %v1365_v2 = vld [vmem:[%s29182_s0 + $0x1fa] sm:$0xff]  ;;  %v1369_v58 = vld [vmem:[%s29182_s0 + $0x22a] sm:$0xff] }
  0xbd   :  { %19021 = vmatmul.mubr.msk.f32.gmra.mxu0 %vm165_vm1, %v1362_v60  ;;  %19101 = vmatmul.mubr.msk.f32.gmra.mxu1 %vm165_vm1, %v20349_v4  ;;  %v1366_v4 = vld [vmem:[%s29182_s0 + $0x202] sm:$0xff] }
  0xbe   :  { %19023 = vmatprep.mubr.msk.f32.mxu0 %vm165_vm1, %v1363_v62  ;;  %19103 = vmatprep.mubr.msk.f32.mxu1 %vm165_vm1, %v20357_v6  ;;  %v1367_v6 = vld [vmem:[%s29182_s0 + $0x212] sm:$0xff] }
  0xc1   :  { %19024 = vmatmul.mubr.msk.f32.gmra.mxu0 %vm165_vm1, %v1364_v0  ;;  %19104 = vmatmul.mubr.msk.f32.gmra.mxu1 %vm165_vm1, %v20371_v8  ;;  %v1368_v8 = vld [vmem:[%s29182_s0 + $0x21a] sm:$0xff]  ;;  %v16788_v0 = vld [vmem:[%s29182_s0 + $0x188] sm:$0xff] }
  0xc2   :  { %19026 = vmatprep.mubr.msk.f32.mxu0 %vm165_vm1, %v1365_v2  ;;  %19106 = vmatprep.mubr.msk.f32.mxu1 %vm165_vm1, %v20379_v10 }
  0xc5   :  { %v18775_v59 = vpop.f32.mrf.mxu0  ;;  %v21038_v54 = vpop.f32.mrf.mxu1  ;;  %19027 = vmatmul.mubr.msk.f32.gmra.mxu0 %vm165_vm1, %v1366_v4  ;;  %19107 = vmatmul.mubr.msk.f32.gmra.mxu1 %vm165_vm1, %v20393_v12  ;;  %v16787_v12 = vld [vmem:[%s29182_s0 + $0x180] sm:$0xff] }
  0xc6   :  { %29393 = vst [vmem:[#allocation18_spill] sm:$0xff] %v21038_v54  ;;  %19029 = vmatprep.mubr.msk.f32.mxu0 %vm165_vm1, %v1367_v6  ;;  %19109 = vmatprep.mubr.msk.f32.mxu1 %vm165_vm1, %v20401_v14  ;;  %v1370_v14 = vld [vmem:[%s29182_s0 + $0x232] sm:$0xff]  ;;  %v1371_v6 = vld [vmem:[%s29182_s0 + $0x242] sm:$0xff] }
  0xc7   :  { %v428_v10 = vpop.f32.mrf.mxu0  ;;  %v21049_v56 = vpop.f32.mrf.mxu1  ;;  %v16892_v54 = vld [vmem:[%s29182_s0 + $0x61] sm:$0xff] }
  0xc8   :  { %29394 = vst [vmem:[#allocation19_spill] sm:$0xff] %v21049_v56 }
  0xc9   :  { %v18778_v60 = vpop.f32.mrf.mxu0  ;;  %v21057_v62 = vpop.f32.mrf.mxu1  ;;  %19030 = vmatmul.mubr.msk.f32.gmra.mxu0 %vm165_vm1, %v1368_v8  ;;  %19110 = vmatmul.mubr.msk.f32.gmra.mxu1 %vm165_vm1, %v20415_v16 }
  0xca   :  { %29395 = vst [vmem:[#allocation20_spill] sm:$0xff] %v21057_v62  ;;  %19032 = vmatprep.mubr.msk.f32.mxu0 %vm165_vm1, %v1369_v58  ;;  %19112 = vmatprep.mubr.msk.f32.mxu1 %vm165_vm1, %v16787_v12  ;;  %v1372_v58 = vld [vmem:[%s29182_s0 + $0x24a] sm:$0xff] }
  0xcb   :  { %v438_v2 = vpop.f32.mrf.mxu0  ;;  %v21070_v4 = vpop.f32.mrf.mxu1 }
  0xcc   :  { %29396 = vst [vmem:[#allocation21_spill] sm:$0xff] %v21070_v4 }
  0xcd   :  { %v18781_v16 = vpop.f32.mrf.mxu0  ;;  %v21075_v8 = vpop.f32.mrf.mxu1  ;;  %19033 = vmatmul.mubr.msk.f32.gmra.mxu0 %vm165_vm1, %v1370_v14  ;;  %19113 = vmatmul.mubr.msk.f32.gmra.mxu1 %vm165_vm1, %v16788_v0 }
  0xce   :  { %29397 = vst [vmem:[#allocation22_spill] sm:$0xff] %v21075_v8  ;;  %19035 = vmatprep.mubr.msk.f32.mxu0 %vm165_vm1, %v1371_v6  ;;  %19115 = vmatprep.mubr.msk.f32.mxu1 %vm165_vm1, %v20440_v25  ;;  %v1373_v8 = vld [vmem:[%s29182_s0 + $0x25a] sm:$0xff]  ;;  %v1374_v25 = vld [vmem:[%s29182_s0 + $0x262] sm:$0xff] }
  0xcf   :  { %v448_v12 = vpop.f32.mrf.mxu0  ;;  %v21085_v4 = vpop.f32.mrf.mxu1 }
  0xd0   :  { %29398 = vst [vmem:[#allocation23_spill] sm:$0xff] %v21085_v4 }
  0xd1   :  { %v18784_v62 = vpop.f32.mrf.mxu0  ;;  %v18873_v14 = vpop.f32.mrf.mxu1  ;;  %19036 = vmatmul.mubr.msk.f32.gmra.mxu0 %vm165_vm1, %v1372_v58  ;;  %19116 = vmatmul.mubr.msk.f32.gmra.mxu1 %vm165_vm1, %v20453_v29  ;;  %v1375_v58 = vld [vmem:[%s29182_s0 + $0x272] sm:$0xff] }
  0xd2   :  { %v21093_v0 = vadd.f32 %v18873_v14, %v18775_v59  ;;  %19038 = vmatprep.mubr.msk.f32.mxu0 %vm165_vm1, %v1373_v8  ;;  %19118 = vmatprep.mubr.msk.f32.mxu1 %vm165_vm1, %v20461_v33  ;;  %v1376_v8 = vld [vmem:[%s29182_s0 + $0x27a] sm:$0xff]  ;;  %v1377_v14 = vld [vmem:[%s29182_s0 + $0x28a] sm:$0xff] }
  0xd3   :  { %v458_v6 = vpop.f32.mrf.mxu0  ;;  %v1008_v4 = vpop.f32.mrf.mxu1 }
  0xd4   :  { %v21104_v56 = vadd.f32 %v1008_v4, %v428_v10 }
  0xd5   :  { %v18787_v29 = vpop.f32.mrf.mxu0  ;;  %v18876_v59 = vpop.f32.mrf.mxu1  ;;  %19039 = vmatmul.mubr.msk.f32.gmra.mxu0 %vm165_vm1, %v1374_v25  ;;  %19119 = vmatmul.mubr.msk.f32.gmra.mxu1 %vm165_vm1, %v20475_v37 }
  0xd6   :  { %v21109_v33 = vadd.f32 %v18876_v59, %v18778_v60  ;;  %19041 = vmatprep.mubr.msk.f32.mxu0 %vm165_vm1, %v1375_v58  ;;  %19121 = vmatprep.mubr.msk.f32.mxu1 %vm165_vm1, %v20483_v41  ;;  %v1378_v58 = vld [vmem:[%s29182_s0 + $0x292] sm:$0xff] }
  0xd7   :  { %v468_v10 = vpop.f32.mrf.mxu0  ;;  %v1018_v4 = vpop.f32.mrf.mxu1 }
  0xd8   :  { %v21120_v25 = vadd.f32 %v1018_v4, %v438_v2 }
  0xd9   :  { %v18790_v37 = vpop.f32.mrf.mxu0  ;;  %v18879_v60 = vpop.f32.mrf.mxu1  ;;  %19042 = vmatmul.mubr.msk.f32.gmra.mxu0 %vm165_vm1, %v1376_v8  ;;  %19122 = vmatmul.mubr.msk.f32.gmra.mxu1 %vm165_vm1, %v20497_v45  ;;  %v1379_v8 = vld [vmem:[%s29182_s0 + $0x2a2] sm:$0xff] }
  0xda   :  { %v21125_v41 = vadd.f32 %v18879_v60, %v18781_v16  ;;  %19044 = vmatprep.mubr.msk.f32.mxu0 %vm165_vm1, %v1377_v14  ;;  %19124 = vmatprep.mubr.msk.f32.mxu1 %vm165_vm1, %v20505_v49  ;;  %v1380_v14 = vld [vmem:[%s29182_s0 + $0x2aa] sm:$0xff] }
  0xdb   :  { %v478_v2 = vpop.f32.mrf.mxu0  ;;  %v1028_v59 = vpop.f32.mrf.mxu1 }
  0xdc   :  { %v21136_v4 = vadd.f32 %v1028_v59, %v448_v12 }
  0xdd   :  { %v18793_v45 = vpop.f32.mrf.mxu0  ;;  %v18882_v16 = vpop.f32.mrf.mxu1  ;;  %19045 = vmatmul.mubr.msk.f32.gmra.mxu0 %vm165_vm1, %v1378_v58  ;;  %19125 = vmatmul.mubr.msk.f32.gmra.mxu1 %vm165_vm1, %v20519_v53  ;;  %v1381_v58 = vld [vmem:[%s29182_s0 + $0x2ba] sm:$0xff] }
  0xde   :  { %v21141_v49 = vadd.f32 %v18882_v16, %v18784_v62  ;;  %19047 = vmatprep.mubr.msk.f32.mxu0 %vm165_vm1, %v1379_v8  ;;  %19127 = vmatprep.mubr.msk.f32.mxu1 %vm165_vm1, %v20527_v57  ;;  %v1382_v8 = vld [vmem:[%s29182_s0 + $0x2c2] sm:$0xff] }
  0xdf   :  { %v488_v12 = vpop.f32.mrf.mxu0  ;;  %v1038_v60 = vpop.f32.mrf.mxu1 }
  0xe0   :  { %v21152_v59 = vadd.f32 %v1038_v60, %v458_v6 }
  0xe1   :  { %v18796_v53 = vpop.f32.mrf.mxu0  ;;  %v18885_v62 = vpop.f32.mrf.mxu1  ;;  %19048 = vmatmul.mubr.msk.f32.gmra.mxu0 %vm165_vm1, %v1380_v14  ;;  %19128 = vmatmul.mubr.msk.f32.gmra.mxu1 %vm165_vm1, %v20541_v61  ;;  %v1383_v14 = vld [vmem:[%s29182_s0 + $0x2d2] sm:$0xff] }
  0xe2   :  { %v21157_v57 = vadd.f32 %v18885_v62, %v18787_v29  ;;  %19050 = vmatprep.mubr.msk.f32.mxu0 %vm165_vm1, %v1381_v58  ;;  %19130 = vmatprep.mubr.msk.f32.mxu1 %vm165_vm1, %v20549_v1  ;;  %v1384_v58 = vld [vmem:[%s29182_s0 + $0x2da] sm:$0xff] }
  0xe3   :  { %v498_v6 = vpop.f32.mrf.mxu0  ;;  %v1048_v16 = vpop.f32.mrf.mxu1 }
  0xe4   :  { %v21168_v60 = vadd.f32 %v1048_v16, %v468_v10 }
  0xe5   :  { %v18799_v61 = vpop.f32.mrf.mxu0  ;;  %v18888_v29 = vpop.f32.mrf.mxu1  ;;  %19051 = vmatmul.mubr.msk.f32.gmra.mxu0 %vm165_vm1, %v1382_v8  ;;  %19131 = vmatmul.mubr.msk.f32.gmra.mxu1 %vm165_vm1, %v20563_v5  ;;  %v1385_v8 = vld [vmem:[%s29182_s0 + $0x2ea] sm:$0xff] }
  0xe6   :  { %v21173_v1 = vadd.f32 %v18888_v29, %v18790_v37  ;;  %19053 = vmatprep.mubr.msk.f32.mxu0 %vm165_vm1, %v1383_v14  ;;  %19133 = vmatprep.mubr.msk.f32.mxu1 %vm165_vm1, %v20571_v9  ;;  %v1386_v14 = vld [vmem:[%s29182_s0 + $0x2f2] sm:$0xff] }
  0xe7   :  { %v508_v10 = vpop.f32.mrf.mxu0  ;;  %v1058_v62 = vpop.f32.mrf.mxu1 }
  0xe8   :  { %v21184_v16 = vadd.f32 %v1058_v62, %v478_v2 }
  0xe9   :  { %v18802_v5 = vpop.f32.mrf.mxu0  ;;  %v18891_v37 = vpop.f32.mrf.mxu1  ;;  %19054 = vmatmul.mubr.msk.f32.gmra.mxu0 %vm165_vm1, %v1384_v58  ;;  %19134 = vmatmul.mubr.msk.f32.gmra.mxu1 %vm165_vm1, %v20585_v13  ;;  %v1387_v58 = vld [vmem:[%s29182_s0 + $0x302] sm:$0xff] }
  0xea   :  { %v21189_v9 = vadd.f32 %v18891_v37, %v18793_v45  ;;  %19056 = vmatprep.mubr.msk.f32.mxu0 %vm165_vm1, %v1385_v8  ;;  %19136 = vmatprep.mubr.msk.f32.mxu1 %vm165_vm1, %v20593_v17  ;;  %v1388_v8 = vld [vmem:[%s29182_s0 + $0x30a] sm:$0xff] }
  0xeb   :  { %v518_v2 = vpop.f32.mrf.mxu0  ;;  %v1068_v29 = vpop.f32.mrf.mxu1 }
  0xec   :  { %v21200_v62 = vadd.f32 %v1068_v29, %v488_v12 }
  0xed   :  { %v18805_v13 = vpop.f32.mrf.mxu0  ;;  %v18894_v45 = vpop.f32.mrf.mxu1  ;;  %19057 = vmatmul.mubr.msk.f32.gmra.mxu0 %vm165_vm1, %v1386_v14  ;;  %19137 = vmatmul.mubr.msk.f32.gmra.mxu1 %vm165_vm1, %v20607_v19  ;;  %v1389_v14 = vld [vmem:[%s29182_s0 + $0x31a] sm:$0xff] }
  0xee   :  { %v21205_v17 = vadd.f32 %v18894_v45, %v18796_v53  ;;  %19059 = vmatprep.mubr.msk.f32.mxu0 %vm165_vm1, %v1387_v58  ;;  %19139 = vmatprep.mubr.msk.f32.mxu1 %vm165_vm1, %v20615_v23  ;;  %v1390_v58 = vld [vmem:[%s29182_s0 + $0x322] sm:$0xff] }
  0xef   :  { %v528_v12 = vpop.f32.mrf.mxu0  ;;  %v1078_v37 = vpop.f32.mrf.mxu1 }
  0xf0   :  { %v21216_v29 = vadd.f32 %v1078_v37, %v498_v6 }
  0xf1   :  { %v18808_v19 = vpop.f32.mrf.mxu0  ;;  %v18897_v53 = vpop.f32.mrf.mxu1  ;;  %19060 = vmatmul.mubr.msk.f32.gmra.mxu0 %vm165_vm1, %v1388_v8  ;;  %19140 = vmatmul.mubr.msk.f32.gmra.mxu1 %vm165_vm1, %v20629_v31  ;;  %v16886_v8 = vld [vmem:[%s29182_s0 + $0x19] sm:$0xff] }
  0xf2   :  { %v21221_v23 = vadd.f32 %v18897_v53, %v18799_v61  ;;  %19062 = vmatprep.mubr.msk.f32.mxu0 %vm165_vm1, %v1389_v14  ;;  %19142 = vmatprep.mubr.msk.f32.mxu1 %vm165_vm1, %v20634_v35  ;;  %v16887_v14 = vld [vmem:[%s29182_s0 + $0x21] sm:$0xff] }
  0xf3   :  { %v538_v6 = vpop.f32.mrf.mxu0  ;;  %v1088_v45 = vpop.f32.mrf.mxu1 }
  0xf4   :  { %v21232_v37 = vadd.f32 %v1088_v45, %v508_v10 }
  0xf5   :  { %v18811_v31 = vpop.f32.mrf.mxu0  ;;  %v18900_v61 = vpop.f32.mrf.mxu1  ;;  %19063 = vmatmul.mubr.msk.f32.gmra.mxu0 %vm165_vm1, %v1390_v58  ;;  %19143 = vmatmul.mubr.msk.f32.gmra.mxu1 %vm165_vm1, %v20648_v43  ;;  %v16888_v58 = vld [vmem:[%s29182_s0 + $0x31] sm:$0xff]  ;;  %v21253_v43 = vld [vmem:[%s29183_s1 + $0x1c] sm:$0xf] }
  0xf6   :  { %v21237_v35 = vadd.f32 %v18900_v61, %v18802_v5  ;;  %19145 = vmatprep.mubr.msk.f32.mxu1 %vm165_vm1, %v20656_v51  ;;  %19165 = vmatprep.mubr.msk.f32.mxu0 %vm165_vm1, %v16886_v8  ;;  %v21270_v61 = vld [vmem:[%s29183_s1 + $0x20] sm:$0xf]  ;;  %s19942_s1 = smov 40  }
  0xf7   :  { %v548_v10 = vpop.f32.mrf.mxu0  ;;  %v1098_v53 = vpop.f32.mrf.mxu1  ;;  %29399 = vst [vmem:[#allocation24_spill] sm:$0xff] %v21270_v61  ;;  %19457 = vmatprep.subr.msk.mxu1 %vm358_vm0, %v21253_v43 }
  0xf8   :  { %v21245_v45 = vadd.f32 %v1098_v53, %v518_v2  ;;  %v16889_v2 = vld [vmem:[%s29182_s0 + $0x39] sm:$0xff] }
  0xf9   :  { %v18814_v51 = vpop.f32.mrf.mxu0  ;;  %v18903_v5 = vpop.f32.mrf.mxu1  ;;  %19146 = vmatmul.mubr.msk.f32.gmra.mxu1 %vm165_vm1, %v20676_v63  ;;  %19166 = vmatmul.mubr.msk.f32.vlgmr.msra.gmra.mxu0 %vm165_vm1, %v16887_v14 }
  0xfa   :  { %v21258_v8 = vadd.f32 %v18903_v5, %v18805_v13  ;;  %19360 = vmatpush3.msk.msra.mxu0 %vm358_vm0, %v20686_v7  ;;  %19148 = vmatprep.mubr.msk.f32.mxu1 %vm165_vm1, %v20693_v48  ;;  %v16890_v7 = vld [vmem:[%s29182_s0 + $0x49] sm:$0xff] }
  0xfb   :  { %v558_v63 = vpop.f32.mrf.mxu0  ;;  %v1108_v53 = vpop.f32.mrf.mxu1  ;;  %19168 = vmatprep.mubr.msk.f32.mxu0 %vm165_vm1, %v16888_v58  ;;  %19555 = vmatprep.subr.msk.mxu0 %vm358_vm0, %v21270_v61  ;;  %v16894_v61 = vld [vmem:[%s29182_s0 + $0x79] sm:$0xff] }
  0xfc   :  { %v21278_v48 = vadd.f32 %v1108_v53, %v528_v12  ;;  %v16891_v12 = vld [vmem:[%s29182_s0 + $0x51] sm:$0xff] }
  0xfd   :  { %v18817_v13 = vpop.f32.mrf.mxu0  ;;  %v18906_v14 = vpop.f32.mrf.mxu1  ;;  %19149 = vmatmul.mubr.msk.f32.gmra.mxu1 %vm165_vm1, %v20714_v15  ;;  %19169 = vmatmul.mubr.msk.f32.gmra.mxu0 %vm165_vm1, %v16889_v2 }
  0xfe   :  { %v21285_v58 = vadd.f32 %v18906_v14, %v18808_v19  ;;  %19151 = vmatprep.mubr.msk.f32.mxu1 %vm165_vm1, %v20724_v21  ;;  %19171 = vmatprep.mubr.msk.f32.mxu0 %vm165_vm1, %v16890_v7  ;;  %v29400_v7 = vld [vmem:[#allocation12_spill] sm:$0xff]  ;;  %v16893_v14 = vld [vmem:[%s29182_s0 + $0x69] sm:$0xff] }
  0xff   :  { %v568_v5 = vpop.f32.mrf.mxu0  ;;  %v1118_v53 = vpop.f32.mrf.mxu1 }
 0x100   :  { %v21296_v15 = vadd.f32 %v1118_v53, %v538_v6 }
 0x101   :  { %v18820_v2 = vpop.f32.mrf.mxu0  ;;  %v18909_v19 = vpop.f32.mrf.mxu1  ;;  %19152 = vmatmul.mubr.msk.f32.gmra.mxu1 %vm165_vm1, %v20742_v39  ;;  %19172 = vmatmul.mubr.msk.f32.gmra.mxu0 %vm165_vm1, %v16891_v12 }
 0x102   :  { %v21301_v21 = vadd.f32 %v18909_v19, %v18811_v31  ;;  %19154 = vmatprep.mubr.msk.f32.mxu1 %vm165_vm1, %v29400_v7  ;;  %19174 = vmatprep.mubr.msk.f32.mxu0 %vm165_vm1, %v16892_v54  ;;  %v29403_v19 = vld [vmem:[#allocation15_spill] sm:$0xff]  ;;  %v16895_v7 = vld [vmem:[%s29182_s0 + $0x81] sm:$0xff] }
 0x103   :  { %v578_v6 = vpop.f32.mrf.mxu0  ;;  %v1128_v53 = vpop.f32.mrf.mxu1 }
 0x104   :  { %v21312_v39 = vadd.f32 %v1128_v53, %v548_v10 }
 0x105   :  { %v18823_v12 = vpop.f32.mrf.mxu0  ;;  %v18912_v31 = vpop.f32.mrf.mxu1  ;;  %19155 = vmatmul.mubr.msk.f32.gmra.mxu1 %vm165_vm1, %v20770_v27  ;;  %19175 = vmatmul.mubr.msk.f32.gmra.mxu0 %vm165_vm1, %v16893_v14  ;;  %v16896_v27 = vld [vmem:[%s29182_s0 + $0x91] sm:$0xff] }
 0x106   :  { %29401 = vst [vmem:[#allocation12_spill] sm:$0xff] %v21312_v39  ;;  %v21317_v54 = vadd.f32 %v18912_v31, %v18814_v51  ;;  %19157 = vmatprep.mubr.msk.f32.mxu1 %vm165_vm1, %v29403_v19  ;;  %19177 = vmatprep.mubr.msk.f32.mxu0 %vm165_vm1, %v16894_v61  ;;  %v16819_v39 = vld [vmem:[%s29182_s0 + $0x330] sm:$0xff]  ;;  %v16820_v19 = vld [vmem:[%s29182_s0 + $0x338] sm:$0xff] }
 0x107   :  { %v588_v10 = vpop.f32.mrf.mxu0  ;;  %v1138_v53 = vpop.f32.mrf.mxu1 }
 0x108   :  { %29402 = vst [vmem:[#allocation25_spill] sm:$0xff] %v21317_v54  ;;  %v21331_v51 = vadd.f32 %v1138_v53, %v558_v63  ;;  %v16897_v63 = vld [vmem:[%s29182_s0 + $0x99] sm:$0xff] }
 0x109   :  { %v18826_v14 = vpop.f32.mrf.mxu0  ;;  %v18915_v31 = vpop.f32.mrf.mxu1  ;;  %19158 = vmatmul.mubr.msk.f32.gmra.mxu1 %vm165_vm1, %v20798_v11  ;;  %19178 = vmatmul.mubr.msk.f32.gmra.mxu0 %vm165_vm1, %v16895_v7  ;;  %v16898_v11 = vld [vmem:[%s29182_s0 + $0xa9] sm:$0xff] }
 0x10a   :  { %29404 = vst [vmem:[#allocation15_spill] sm:$0xff] %v21331_v51  ;;  %v21336_v61 = vadd.f32 %v18915_v31, %v18817_v13  ;;  %19160 = vmatprep.mubr.msk.f32.mxu1 %vm165_vm1, %v16819_v39  ;;  %19180 = vmatprep.mubr.msk.f32.mxu0 %vm165_vm1, %v16896_v27  ;;  %v29407_v31 = vld [vmem:[#allocation6_spill] sm:$0xff] }
 0x10b   :  { %v598_v53 = vpop.f32.mrf.mxu0  ;;  %v1148_v51 = vpop.f32.mrf.mxu1 }
 0x10c   :  { %29405 = vst [vmem:[#allocation26_spill] sm:$0xff] %v21336_v61  ;;  %v21349_v13 = vadd.f32 %v1148_v51, %v568_v5  ;;  %v16899_v61 = vld [vmem:[%s29182_s0 + $0xb1] sm:$0xff]  ;;  %v16900_v51 = vld [vmem:[%s29182_s0 + $0xc1] sm:$0xff] }
 0x10d   :  { %v18829_v7 = vpop.f32.mrf.mxu0  ;;  %v18918_v39 = vpop.f32.mrf.mxu1  ;;  %19161 = vmatmul.mubr.msk.f32.gmra.mxu1 %vm165_vm1, %v16820_v19  ;;  %19181 = vmatmul.mubr.msk.f32.gmra.mxu0 %vm165_vm1, %v16897_v63 }
 0x10e   :  { %v21353_v27 = vadd.f32 %v18918_v39, %v18820_v2  ;;  %19183 = vmatprep.mubr.msk.f32.mxu0 %vm165_vm1, %v16898_v11  ;;  %19263 = vmatprep.mubr.msk.f32.mxu1 %vm165_vm1, %v29407_v31  ;;  %v29408_v11 = vld [vmem:[#allocation7_spill] sm:$0xff]  ;;  %v29410_v31 = vld [vmem:[#allocation8_spill] sm:$0xff] }
 0x10f   :  { %v608_v54 = vpop.f32.mrf.mxu0  ;;  %v1158_v5 = vpop.f32.mrf.mxu1 }
 0x110   :  { %29406 = vst [vmem:[#allocation27_spill] sm:$0xff] %v21353_v27  ;;  %v21364_v19 = vadd.f32 %v1158_v5, %v578_v6  ;;  %v16901_v27 = vld [vmem:[%s29182_s0 + $0xc9] sm:$0xff] }
 0x111   :  { %v18832_v63 = vpop.f32.mrf.mxu0  ;;  %v18921_v2 = vpop.f32.mrf.mxu1  ;;  %19184 = vmatmul.mubr.msk.f32.gmra.mxu0 %vm165_vm1, %v16899_v61  ;;  %19264 = vmatmul.mubr.msk.f32.vlgmr.msra.gmra.mxu1 %vm165_vm1, %v29408_v11  ;;  %v16902_v61 = vld [vmem:[%s29182_s0 + $0xd9] sm:$0xff] }
 0x112   :  { %v21369_v39 = vadd.f32 %v18921_v2, %v18823_v12  ;;  %19186 = vmatprep.mubr.msk.f32.mxu0 %vm165_vm1, %v16900_v51  ;;  %19266 = vmatprep.mubr.msk.f32.mxu1 %vm165_vm1, %v29410_v31  ;;  %v29412_v11 = vld [vmem:[#allocation9_spill] sm:$0xff] }
 0x113   :  { %v618_v6 = vpop.f32.mrf.mxu0  ;;  %v1168_v5 = vpop.f32.mrf.mxu1  ;;  %19458 = vmatpush3.msk.msra.mxu1 %vm358_vm0, %v21253_v43  ;;  %v16903_v43 = vld [vmem:[%s29182_s0 + $0xe1] sm:$0xff] }
 0x114   :  { %29409 = vst [vmem:[#allocation6_spill] sm:$0xff] %v21369_v39  ;;  %v21382_v12 = vadd.f32 %v1168_v5, %v588_v10  ;;  %v29414_v39 = vld [vmem:[#allocation10_spill] sm:$0xff] }
 0x115   :  { %v18835_v2 = vpop.f32.mrf.mxu0  ;;  %v18924_v51 = vpop.f32.mrf.mxu1  ;;  %19187 = vmatmul.mubr.msk.f32.gmra.mxu0 %vm165_vm1, %v16901_v27  ;;  %19267 = vmatmul.mubr.msk.f32.gmra.mxu1 %vm165_vm1, %v29412_v11  ;;  %v16904_v27 = vld [vmem:[%s29182_s0 + $0xf1] sm:$0xff] }
 0x116   :  { %29411 = vst [vmem:[#allocation7_spill] sm:$0xff] %v21382_v12  ;;  %v21387_v31 = vadd.f32 %v18924_v51, %v18826_v14  ;;  %19189 = vmatprep.mubr.msk.f32.mxu0 %vm165_vm1, %v16902_v61  ;;  %19269 = vmatprep.mubr.msk.f32.mxu1 %vm165_vm1, %v29414_v39  ;;  %v29416_v61 = vld [vmem:[#allocation11_spill] sm:$0xff]  ;;  %v29418_v51 = vld [vmem:[#allocation13_spill] sm:$0xff] }
 0x117   :  { %v628_v10 = vpop.f32.mrf.mxu0  ;;  %v1178_v5 = vpop.f32.mrf.mxu1 }
 0x118   :  { %29413 = vst [vmem:[#allocation8_spill] sm:$0xff] %v21387_v31  ;;  %v21398_v12 = vadd.f32 %v1178_v5, %v598_v53  ;;  %v16905_v31 = vld [vmem:[%s29182_s0 + $0xf9] sm:$0xff] }
 0x119   :  { %v18838_v11 = vpop.f32.mrf.mxu0  ;;  %v18927_v14 = vpop.f32.mrf.mxu1  ;;  %19190 = vmatmul.mubr.msk.f32.gmra.mxu0 %vm165_vm1, %v16903_v43  ;;  %19270 = vmatmul.mubr.msk.f32.gmra.mxu1 %vm165_vm1, %v29416_v61  ;;  %v16906_v43 = vld [vmem:[%s29182_s0 + $0x109] sm:$0xff] }
 0x11a   :  { %29415 = vst [vmem:[#allocation9_spill] sm:$0xff] %v21398_v12  ;;  %v21403_v39 = vadd.f32 %v18927_v14, %v18829_v7  ;;  %19192 = vmatprep.mubr.msk.f32.mxu0 %vm165_vm1, %v16904_v27  ;;  %19272 = vmatprep.mubr.msk.f32.mxu1 %vm165_vm1, %v29418_v51  ;;  %v29420_v27 = vld [vmem:[#allocation14_spill] sm:$0xff]  ;;  %v29421_v51 = vld [vmem:[#allocation16_spill] sm:$0xff] }
 0x11b   :  { %v638_v53 = vpop.f32.mrf.mxu0  ;;  %v1188_v5 = vpop.f32.mrf.mxu1 }
 0x11c   :  { %29417 = vst [vmem:[#allocation10_spill] sm:$0xff] %v21403_v39  ;;  %v21414_v12 = vadd.f32 %v1188_v5, %v608_v54  ;;  %v16907_v39 = vld [vmem:[%s29182_s0 + $0x111] sm:$0xff] }
 0x11d   :  { %v18841_v61 = vpop.f32.mrf.mxu0  ;;  %v18930_v7 = vpop.f32.mrf.mxu1  ;;  %19193 = vmatmul.mubr.msk.f32.gmra.mxu0 %vm165_vm1, %v16905_v31  ;;  %19273 = vmatmul.mubr.msk.f32.gmra.mxu1 %vm165_vm1, %v29420_v27  ;;  %v16908_v31 = vld [vmem:[%s29182_s0 + $0x121] sm:$0xff] }
 0x11e   :  { %29419 = vst [vmem:[#allocation11_spill] sm:$0xff] %v21414_v12  ;;  %v21419_v14 = vadd.f32 %v18930_v7, %v18832_v63  ;;  %19195 = vmatprep.mubr.msk.f32.mxu0 %vm165_vm1, %v16906_v43  ;;  %19275 = vmatprep.mubr.msk.f32.mxu1 %vm165_vm1, %v29421_v51  ;;  %v29423_v7 = vld [vmem:[#allocation17_spill] sm:$0xff]  ;;  %v16909_v51 = vld [vmem:[%s29182_s0 + $0x129] sm:$0xff] }
 0x11f   :  { %v648_v54 = vpop.f32.mrf.mxu0  ;;  %v1198_v5 = vpop.f32.mrf.mxu1 }
 0x120   :  { %v21430_v12 = vadd.f32 %v1198_v5, %v618_v6 }
 0x121   :  { %v18844_v27 = vpop.f32.mrf.mxu0  ;;  %v18933_v63 = vpop.f32.mrf.mxu1  ;;  %19196 = vmatmul.mubr.msk.f32.gmra.mxu0 %vm165_vm1, %v16907_v39  ;;  %19276 = vmatmul.mubr.msk.f32.gmra.mxu1 %vm165_vm1, %v20803_v18  ;;  %v16910_v39 = vld [vmem:[%s29182_s0 + $0x139] sm:$0xff] }
 0x122   :  { %29422 = vst [vmem:[#allocation13_spill] sm:$0xff] %v21430_v12  ;;  %v21435_v43 = vadd.f32 %v18933_v63, %v18835_v2  ;;  %19198 = vmatprep.mubr.msk.f32.mxu0 %vm165_vm1, %v16908_v31  ;;  %19278 = vmatprep.mubr.msk.f32.mxu1 %vm165_vm1, %v29423_v7  ;;  %v16911_v63 = vld [vmem:[%s29182_s0 + $0x141] sm:$0xff] }
 0x123   :  { %v658_v6 = vpop.f32.mrf.mxu0  ;;  %v1208_v5 = vpop.f32.mrf.mxu1 }
 0x124   :  { %v21446_v12 = vadd.f32 %v1208_v5, %v628_v10 }
 0x125   :  { %v18847_v18 = vpop.f32.mrf.mxu0  ;;  %v18936_v2 = vpop.f32.mrf.mxu1  ;;  %19199 = vmatmul.mubr.msk.f32.gmra.mxu0 %vm165_vm1, %v16909_v51  ;;  %19279 = vmatmul.mubr.msk.f32.gmra.mxu1 %vm165_vm1, %v20821_v55  ;;  %v16912_v51 = vld [vmem:[%s29182_s0 + $0x151] sm:$0xff] }
 0x126   :  { %v21451_v31 = vadd.f32 %v18936_v2, %v18838_v11  ;;  %19201 = vmatprep.mubr.msk.f32.mxu0 %vm165_vm1, %v16910_v39  ;;  %19281 = vmatprep.mubr.msk.f32.mxu1 %vm165_vm1, %v20826_v46  ;;  %v16913_v39 = vld [vmem:[%s29182_s0 + $0x159] sm:$0xff] }
 0x127   :  { %v668_v10 = vpop.f32.mrf.mxu0  ;;  %v1218_v7 = vpop.f32.mrf.mxu1 }
 0x128   :  { %v21462_v5 = vadd.f32 %v1218_v7, %v638_v53 }
 0x129   :  { %v18850_v55 = vpop.f32.mrf.mxu0  ;;  %v18939_v11 = vpop.f32.mrf.mxu1  ;;  %19202 = vmatmul.mubr.msk.f32.gmra.mxu0 %vm165_vm1, %v16911_v63  ;;  %19282 = vmatmul.mubr.msk.f32.gmra.mxu1 %vm165_vm1, %v20839_v20  ;;  %v16914_v63 = vld [vmem:[%s29182_s0 + $0x169] sm:$0xff] }
 0x12a   :  { %v21467_v46 = vadd.f32 %v18939_v11, %v18841_v61  ;;  %19204 = vmatprep.mubr.msk.f32.mxu0 %vm165_vm1, %v16912_v51  ;;  %19284 = vmatprep.mubr.msk.f32.mxu1 %vm165_vm1, %v20844_v3  ;;  %v16915_v51 = vld [vmem:[%s29182_s0 + $0x171] sm:$0xff] }
 0x12b   :  { %v678_v53 = vpop.f32.mrf.mxu0  ;;  %v1228_v2 = vpop.f32.mrf.mxu1 }
 0x12c   :  { %v21478_v7 = vadd.f32 %v1228_v2, %v648_v54 }
 0x12d   :  { %v18853_v20 = vpop.f32.mrf.mxu0  ;;  %v18942_v61 = vpop.f32.mrf.mxu1  ;;  %19205 = vmatmul.mubr.msk.f32.gmra.mxu0 %vm165_vm1, %v16913_v39  ;;  %19285 = vmatmul.mubr.msk.f32.gmra.mxu1 %vm165_vm1, %v20858_v22  ;;  %v16916_v39 = vld [vmem:[%s29182_s0 + $0x181] sm:$0xff] }
 0x12e   :  { %v21483_v3 = vadd.f32 %v18942_v61, %v18844_v27  ;;  %19207 = vmatprep.mubr.msk.f32.mxu0 %vm165_vm1, %v16914_v63  ;;  %19287 = vmatprep.mubr.msk.f32.mxu1 %vm165_vm1, %v20863_v24  ;;  %v16917_v63 = vld [vmem:[%s29182_s0 + $0x189] sm:$0xff] }
 0x12f   :  { %v688_v54 = vpop.f32.mrf.mxu0  ;;  %v1238_v11 = vpop.f32.mrf.mxu1 }
 0x130   :  { %v21494_v2 = vadd.f32 %v1238_v11, %v658_v6 }
 0x131   :  { %v18856_v22 = vpop.f32.mrf.mxu0  ;;  %v18945_v27 = vpop.f32.mrf.mxu1  ;;  %19208 = vmatmul.mubr.msk.f32.gmra.mxu0 %vm165_vm1, %v16915_v51  ;;  %19288 = vmatmul.mubr.msk.f32.gmra.mxu1 %vm165_vm1, %v20876_v26  ;;  %v16918_v51 = vld [vmem:[%s29182_s0 + $0x1c9] sm:$0xff] }
 0x132   :  { %v21499_v24 = vadd.f32 %v18945_v27, %v18847_v18  ;;  %19210 = vmatprep.mubr.msk.f32.mxu0 %vm165_vm1, %v16916_v39  ;;  %19290 = vmatprep.mubr.msk.f32.mxu1 %vm165_vm1, %v20881_v28  ;;  %v16919_v39 = vld [vmem:[%s29182_s0 + $0x1d1] sm:$0xff] }
 0x133   :  { %v698_v6 = vpop.f32.mrf.mxu0  ;;  %v1248_v61 = vpop.f32.mrf.mxu1 }
 0x134   :  { %v21510_v11 = vadd.f32 %v1248_v61, %v668_v10 }
 0x135   :  { %v18859_v26 = vpop.f32.mrf.mxu0  ;;  %v18948_v18 = vpop.f32.mrf.mxu1  ;;  %19211 = vmatmul.mubr.msk.f32.gmra.mxu0 %vm165_vm1, %v16917_v63  ;;  %19291 = vmatmul.mubr.msk.f32.gmra.mxu1 %vm165_vm1, %v20894_v30  ;;  %v16920_v63 = vld [vmem:[%s29182_s0 + $0x1e1] sm:$0xff] }
 0x136   :  { %v21515_v28 = vadd.f32 %v18948_v18, %v18850_v55  ;;  %19213 = vmatprep.mubr.msk.f32.mxu0 %vm165_vm1, %v16918_v51  ;;  %19293 = vmatprep.mubr.msk.f32.mxu1 %vm165_vm1, %v20899_v32 }
 0x137   :  { %v708_v10 = vpop.f32.mrf.mxu0  ;;  %v1258_v27 = vpop.f32.mrf.mxu1 }
 0x138   :  { %v21526_v61 = vadd.f32 %v1258_v27, %v678_v53  ;;  %v16921_v53 = vld [vmem:[%s29182_s0 + $0x1e9] sm:$0xff] }
 0x139   :  { %v18951_v30 = vpop.f32.mrf.mxu1  ;;  %v18971_v55 = vpop.f32.mrf.mxu0  ;;  %19214 = vmatmul.mubr.msk.f32.gmra.mxu0 %vm165_vm1, %v16919_v39  ;;  %19294 = vmatmul.mubr.msk.f32.gmra.mxu1 %vm165_vm1, %v20912_v34  ;;  %v16922_v34 = vld [vmem:[%s29182_s0 + $0x1f9] sm:$0xff] }
 0x13a   :  { %v21531_v32 = vadd.f32 %v18951_v30, %v18853_v20  ;;  %v21534_v51 = vadd.f32 %v18971_v55, %v21093_v0  ;;  %19216 = vmatprep.mubr.msk.f32.mxu0 %vm165_vm1, %v16920_v63  ;;  %19296 = vmatprep.mubr.msk.f32.mxu1 %vm165_vm1, %v20917_v36 }
 0x13b   :  { %v1268_v18 = vpop.f32.mrf.mxu1  ;;  %v1652_v27 = vpop.f32.mrf.mxu0 }
 0x13c   :  { %v21545_v20 = vadd.f32 %v1268_v18, %v688_v54  ;;  %v21548_v0 = vadd.f32 %v1652_v27, %v21104_v56  ;;  %v16923_v56 = vld [vmem:[%s29182_s0 + $0x201] sm:$0xff] }
 0x13d   :  { %v18954_v39 = vpop.f32.mrf.mxu1  ;;  %v18974_v63 = vpop.f32.mrf.mxu0  ;;  %19217 = vmatmul.mubr.msk.f32.gmra.mxu0 %vm165_vm1, %v16921_v53  ;;  %19297 = vmatmul.mubr.msk.f32.gmra.mxu1 %vm165_vm1, %v20930_v38  ;;  %v16924_v38 = vld [vmem:[%s29182_s0 + $0x211] sm:$0xff] }
 0x13e   :  { %v21553_v36 = vadd.f32 %v18954_v39, %v18856_v22  ;;  %v21556_v30 = vadd.f32 %v18974_v63, %v21109_v33  ;;  %19219 = vmatprep.mubr.msk.f32.mxu0 %vm165_vm1, %v16922_v34  ;;  %19299 = vmatprep.mubr.msk.f32.mxu1 %vm165_vm1, %v20935_v40 }
 0x13f   :  { %v1278_v54 = vpop.f32.mrf.mxu1  ;;  %v1662_v55 = vpop.f32.mrf.mxu0 }
 0x140   :  { %v21567_v22 = vadd.f32 %v1278_v54, %v698_v6  ;;  %v21570_v33 = vadd.f32 %v1662_v55, %v21120_v25  ;;  %v16925_v25 = vld [vmem:[%s29182_s0 + $0x219] sm:$0xff]  ;;  %v16928_v54 = vld [vmem:[%s29182_s0 + $0x241] sm:$0xff] }
 0x141   :  { %v18957_v53 = vpop.f32.mrf.mxu1  ;;  %v18977_v18 = vpop.f32.mrf.mxu0  ;;  %19220 = vmatmul.mubr.msk.f32.gmra.mxu0 %vm165_vm1, %v16923_v56  ;;  %19300 = vmatmul.mubr.msk.f32.gmra.mxu1 %vm165_vm1, %v20948_v42  ;;  %v16926_v42 = vld [vmem:[%s29182_s0 + $0x229] sm:$0xff] }
 0x142   :  { %v21575_v40 = vadd.f32 %v18957_v53, %v18859_v26  ;;  %v21578_v27 = vadd.f32 %v18977_v18, %v21125_v41  ;;  %19222 = vmatprep.mubr.msk.f32.mxu0 %vm165_vm1, %v16924_v38  ;;  %19302 = vmatprep.mubr.msk.f32.mxu1 %vm165_vm1, %v20953_v44  ;;  %v17046_v53 = vld [vmem:[%s29182_s0 + $0x18a] sm:$0xff] }
 0x143   :  { %v1288_v6 = vpop.f32.mrf.mxu1  ;;  %v1672_v34 = vpop.f32.mrf.mxu0 }
 0x144   :  { %v21589_v26 = vadd.f32 %v1288_v6, %v708_v10  ;;  %v21592_v41 = vadd.f32 %v1672_v34, %v21136_v4  ;;  %v16927_v4 = vld [vmem:[%s29182_s0 + $0x231] sm:$0xff] }
 0x145   :  { %v21594_v39 = vpop.f32.mrf.mxu1  ;;  %v18980_v63 = vpop.f32.mrf.mxu0  ;;  %19223 = vmatmul.mubr.msk.f32.gmra.mxu0 %vm165_vm1, %v16925_v25  ;;  %19303 = vmatmul.mubr.msk.f32.gmra.mxu1 %vm165_vm1, %v20966_v47  ;;  %v17045_v47 = vld [vmem:[%s29182_s0 + $0x182] sm:$0xff] }
 0x146   :  { %v21600_v44 = vadd.f32 %v18980_v63, %v21141_v49  ;;  %19225 = vmatprep.mubr.msk.f32.mxu0 %vm165_vm1, %v16926_v42  ;;  %19305 = vmatprep.mubr.msk.f32.mxu1 %vm165_vm1, %v20971_v50 }
 0x147   :  { %v21608_v10 = vpop.f32.mrf.mxu1  ;;  %v1682_v56 = vpop.f32.mrf.mxu0 }
 0x148   :  { %v21617_v49 = vadd.f32 %v1682_v56, %v21152_v59  ;;  %v16929_v59 = vld [vmem:[%s29182_s0 + $0x249] sm:$0xff] }
 0x149   :  { %v21619_v55 = vpop.f32.mrf.mxu1  ;;  %v18983_v50 = vpop.f32.mrf.mxu0  ;;  %19226 = vmatmul.mubr.msk.f32.gmra.mxu0 %vm165_vm1, %v16927_v4  ;;  %19306 = vmatmul.mubr.msk.f32.gmra.mxu1 %vm165_vm1, %v20984_v52  ;;  %v16930_v52 = vld [vmem:[%s29182_s0 + $0x259] sm:$0xff]  ;;  %v16931_v4 = vld [vmem:[%s29182_s0 + $0x261] sm:$0xff] }
 0x14a   :  { %v21625_v38 = vadd.f32 %v18983_v50, %v21157_v57  ;;  %19228 = vmatprep.mubr.msk.f32.mxu0 %vm165_vm1, %v16928_v54  ;;  %19308 = vmatprep.mubr.msk.f32.mxu1 %vm165_vm1, %v17045_v47  ;;  %v17047_v57 = vld [vmem:[%s29182_s0 + $0x1ca] sm:$0xff]  ;;  %v17049_v47 = vld [vmem:[%s29182_s0 + $0x1e2] sm:$0xff] }
 0x14b   :  { %v21635_v18 = vpop.f32.mrf.mxu1  ;;  %v1692_v25 = vpop.f32.mrf.mxu0 }
 0x14c   :  { %v21644_v6 = vadd.f32 %v1692_v25, %v21168_v60  ;;  %v17048_v60 = vld [vmem:[%s29182_s0 + $0x1d2] sm:$0xff] }
 0x14d   :  { %v21646_v34 = vpop.f32.mrf.mxu1  ;;  %v18986_v42 = vpop.f32.mrf.mxu0  ;;  %19229 = vmatmul.mubr.msk.f32.gmra.mxu0 %vm165_vm1, %v16929_v59  ;;  %19309 = vmatmul.mubr.msk.f32.gmra.mxu1 %vm165_vm1, %v17046_v53 }
 0x14e   :  { %v21651_v63 = vadd.f32 %v18986_v42, %v21173_v1  ;;  %19231 = vmatprep.mubr.msk.f32.mxu0 %vm165_vm1, %v16930_v52  ;;  %19311 = vmatprep.mubr.msk.f32.mxu1 %vm165_vm1, %v17047_v57  ;;  %v16932_v1 = vld [vmem:[%s29182_s0 + $0x271] sm:$0xff] }
 0x14f   :  { %v21661_v56 = vpop.f32.mrf.mxu1  ;;  %v1702_v54 = vpop.f32.mrf.mxu0  ;;  %v17050_v57 = vld [vmem:[%s29182_s0 + $0x1ea] sm:$0xff] }
 0x150   :  { %v21670_v50 = vadd.f32 %v1702_v54, %v21184_v16  ;;  %v16933_v16 = vld [vmem:[%s29182_s0 + $0x279] sm:$0xff] }
 0x151   :  { %v18989_v59 = vpop.f32.mrf.mxu0  ;;  %v19069_v53 = vpop.f32.mrf.mxu1  ;;  %19232 = vmatmul.mubr.msk.f32.gmra.mxu0 %vm165_vm1, %v16931_v4  ;;  %19312 = vmatmul.mubr.msk.f32.gmra.mxu1 %vm165_vm1, %v17048_v60 }
 0x152   :  { %v21675_v25 = vadd.f32 %v18989_v59, %v21189_v9  ;;  %v21678_v52 = vadd.f32 %v19069_v53, %v21534_v51  ;;  %19234 = vmatprep.mubr.msk.f32.mxu0 %vm165_vm1, %v16932_v1  ;;  %19314 = vmatprep.mubr.msk.f32.mxu1 %vm165_vm1, %v17049_v47  ;;  %v16934_v9 = vld [vmem:[%s29182_s0 + $0x289] sm:$0xff]  ;;  %v17051_v51 = vld [vmem:[%s29182_s0 + $0x1fa] sm:$0xff] }
 0x153   :  { %v1712_v42 = vpop.f32.mrf.mxu0  ;;  %v2361_v4 = vpop.f32.mrf.mxu1 }
 0x154   :  { %v21695_v60 = vadd.f32 %v1712_v42, %v21200_v62  ;;  %v21698_v54 = vadd.f32 %v2361_v4, %v21548_v0  ;;  %v16935_v62 = vld [vmem:[%s29182_s0 + $0x291] sm:$0xff]  ;;  %v17052_v0 = vld [vmem:[%s29182_s0 + $0x202] sm:$0xff] }
 0x155   :  { %v18992_v1 = vpop.f32.mrf.mxu0  ;;  %v19072_v47 = vpop.f32.mrf.mxu1  ;;  %19235 = vmatmul.mubr.msk.f32.gmra.mxu0 %vm165_vm1, %v16933_v16  ;;  %19315 = vmatmul.mubr.msk.f32.gmra.mxu1 %vm165_vm1, %v17050_v57 }
 0x156   :  { %v21703_v59 = vadd.f32 %v18992_v1, %v21205_v17  ;;  %v21706_v53 = vadd.f32 %v19072_v47, %v21556_v30  ;;  %19237 = vmatprep.mubr.msk.f32.mxu0 %vm165_vm1, %v16934_v9  ;;  %19317 = vmatprep.mubr.msk.f32.mxu1 %vm165_vm1, %v17051_v51  ;;  %v16936_v17 = vld [vmem:[%s29182_s0 + $0x2a1] sm:$0xff]  ;;  %v17053_v30 = vld [vmem:[%s29182_s0 + $0x212] sm:$0xff] }
 0x157   :  { %v1722_v16 = vpop.f32.mrf.mxu0  ;;  %v2371_v57 = vpop.f32.mrf.mxu1 }
 0x158   :  { %v21723_v42 = vadd.f32 %v1722_v16, %v21216_v29  ;;  %v21726_v4 = vadd.f32 %v2371_v57, %v21570_v33  ;;  %v16937_v29 = vld [vmem:[%s29182_s0 + $0x2a9] sm:$0xff]  ;;  %v17054_v33 = vld [vmem:[%s29182_s0 + $0x21a] sm:$0xff] }
 0x159   :  { %v18995_v9 = vpop.f32.mrf.mxu0  ;;  %v19075_v51 = vpop.f32.mrf.mxu1  ;;  %19238 = vmatmul.mubr.msk.f32.gmra.mxu0 %vm165_vm1, %v16935_v62  ;;  %19318 = vmatmul.mubr.msk.f32.gmra.mxu1 %vm165_vm1, %v17052_v0 }
 0x15a   :  { %v21731_v1 = vadd.f32 %v18995_v9, %v21221_v23  ;;  %v21734_v47 = vadd.f32 %v19075_v51, %v21578_v27  ;;  %19240 = vmatprep.mubr.msk.f32.mxu0 %vm165_vm1, %v16936_v17  ;;  %19320 = vmatprep.mubr.msk.f32.mxu1 %vm165_vm1, %v17053_v30  ;;  %v16938_v23 = vld [vmem:[%s29182_s0 + $0x2b9] sm:$0xff]  ;;  %v17055_v27 = vld [vmem:[%s29182_s0 + $0x22a] sm:$0xff] }
 0x15b   :  { %v1732_v62 = vpop.f32.mrf.mxu0  ;;  %v2381_v0 = vpop.f32.mrf.mxu1 }
 0x15c   :  { %v21751_v16 = vadd.f32 %v1732_v62, %v21232_v37  ;;  %v21754_v57 = vadd.f32 %v2381_v0, %v21592_v41  ;;  %v16939_v37 = vld [vmem:[%s29182_s0 + $0x2c1] sm:$0xff]  ;;  %v17056_v41 = vld [vmem:[%s29182_s0 + $0x232] sm:$0xff] }
 0x15d   :  { %v18998_v17 = vpop.f32.mrf.mxu0  ;;  %v19078_v30 = vpop.f32.mrf.mxu1  ;;  %19241 = vmatmul.mubr.msk.f32.gmra.mxu0 %vm165_vm1, %v16937_v29  ;;  %19321 = vmatmul.mubr.msk.f32.gmra.mxu1 %vm165_vm1, %v17054_v33 }
 0x15e   :  { %v21759_v9 = vadd.f32 %v18998_v17, %v21237_v35  ;;  %v21762_v51 = vadd.f32 %v19078_v30, %v21600_v44  ;;  %19243 = vmatprep.mubr.msk.f32.mxu0 %vm165_vm1, %v16938_v23  ;;  %19323 = vmatprep.mubr.msk.f32.mxu1 %vm165_vm1, %v17055_v27  ;;  %v16940_v35 = vld [vmem:[%s29182_s0 + $0x2d1] sm:$0xff]  ;;  %v17057_v44 = vld [vmem:[%s29182_s0 + $0x242] sm:$0xff] }
 0x15f   :  { %v1742_v29 = vpop.f32.mrf.mxu0  ;;  %v2391_v33 = vpop.f32.mrf.mxu1 }
 0x160   :  { %v21779_v62 = vadd.f32 %v1742_v29, %v21245_v45  ;;  %v21782_v0 = vadd.f32 %v2391_v33, %v21617_v49  ;;  %v16941_v45 = vld [vmem:[%s29182_s0 + $0x2d9] sm:$0xff]  ;;  %v17058_v49 = vld [vmem:[%s29182_s0 + $0x24a] sm:$0xff] }
 0x161   :  { %v19001_v23 = vpop.f32.mrf.mxu0  ;;  %v19081_v27 = vpop.f32.mrf.mxu1  ;;  %19244 = vmatmul.mubr.msk.f32.gmra.mxu0 %vm165_vm1, %v16939_v37  ;;  %19324 = vmatmul.mubr.msk.f32.gmra.mxu1 %vm165_vm1, %v17056_v41 }
 0x162   :  { %v21787_v17 = vadd.f32 %v19001_v23, %v21258_v8  ;;  %v21790_v30 = vadd.f32 %v19081_v27, %v21625_v38  ;;  %19246 = vmatprep.mubr.msk.f32.mxu0 %vm165_vm1, %v16940_v35  ;;  %19326 = vmatprep.mubr.msk.f32.mxu1 %vm165_vm1, %v17057_v44  ;;  %v16942_v8 = vld [vmem:[%s29182_s0 + $0x2e9] sm:$0xff]  ;;  %v17059_v38 = vld [vmem:[%s29182_s0 + $0x25a] sm:$0xff] }
 0x163   :  { %v1752_v37 = vpop.f32.mrf.mxu0  ;;  %v2401_v41 = vpop.f32.mrf.mxu1 }
 0x164   :  { %v21807_v29 = vadd.f32 %v1752_v37, %v21278_v48  ;;  %v21810_v33 = vadd.f32 %v2401_v41, %v21644_v6  ;;  %v16943_v48 = vld [vmem:[%s29182_s0 + $0x2f1] sm:$0xff]  ;;  %v17060_v6 = vld [vmem:[%s29182_s0 + $0x262] sm:$0xff] }
 0x165   :  { %v19004_v35 = vpop.f32.mrf.mxu0  ;;  %v19084_v44 = vpop.f32.mrf.mxu1  ;;  %19247 = vmatmul.mubr.msk.f32.gmra.mxu0 %vm165_vm1, %v16941_v45  ;;  %19327 = vmatmul.mubr.msk.f32.gmra.mxu1 %vm165_vm1, %v17058_v49 }
 0x166   :  { %v21815_v23 = vadd.f32 %v19004_v35, %v21285_v58  ;;  %v21818_v27 = vadd.f32 %v19084_v44, %v21651_v63  ;;  %19249 = vmatprep.mubr.msk.f32.mxu0 %vm165_vm1, %v16942_v8  ;;  %19329 = vmatprep.mubr.msk.f32.mxu1 %vm165_vm1, %v17059_v38  ;;  %v16944_v58 = vld [vmem:[%s29182_s0 + $0x301] sm:$0xff]  ;;  %v17061_v63 = vld [vmem:[%s29182_s0 + $0x272] sm:$0xff] }
 0x167   :  { %v1762_v45 = vpop.f32.mrf.mxu0  ;;  %v2411_v49 = vpop.f32.mrf.mxu1 }
 0x168   :  { %v21835_v37 = vadd.f32 %v1762_v45, %v21296_v15  ;;  %v21838_v41 = vadd.f32 %v2411_v49, %v21670_v50  ;;  %v16945_v15 = vld [vmem:[%s29182_s0 + $0x309] sm:$0xff]  ;;  %v17062_v50 = vld [vmem:[%s29182_s0 + $0x27a] sm:$0xff]  ;;  %v29426_v45 = vld [vmem:[#allocation12_spill] sm:$0xff] }
 0x169   :  { %v19007_v8 = vpop.f32.mrf.mxu0  ;;  %v19087_v38 = vpop.f32.mrf.mxu1  ;;  %19250 = vmatmul.mubr.msk.f32.gmra.mxu0 %vm165_vm1, %v16943_v48  ;;  %19330 = vmatmul.mubr.msk.f32.gmra.mxu1 %vm165_vm1, %v17060_v6 }
 0x16a   :  { %29424 = vst [vmem:[#allocation14_spill] sm:$0xff] %v21838_v41  ;;  %v21843_v35 = vadd.f32 %v19007_v8, %v21301_v21  ;;  %v21846_v44 = vadd.f32 %v19087_v38, %v21675_v25  ;;  %19252 = vmatprep.mubr.msk.f32.mxu0 %vm165_vm1, %v16944_v58  ;;  %19332 = vmatprep.mubr.msk.f32.mxu1 %vm165_vm1, %v17061_v63  ;;  %v16946_v21 = vld [vmem:[%s29182_s0 + $0x319] sm:$0xff]  ;;  %v17063_v25 = vld [vmem:[%s29182_s0 + $0x28a] sm:$0xff] }
 0x16b   :  { %v1772_v48 = vpop.f32.mrf.mxu0  ;;  %v2421_v6 = vpop.f32.mrf.mxu1  ;;  %v29428_v38 = vld [vmem:[#allocation25_spill] sm:$0xff] }
 0x16c   :  { %29425 = vst [vmem:[#allocation16_spill] sm:$0xff] %v21846_v44  ;;  %v21863_v49 = vadd.f32 %v1772_v48, %v29426_v45  ;;  %v21866_v58 = vadd.f32 %v2421_v6, %v21695_v60  ;;  %v16947_v60 = vld [vmem:[%s29182_s0 + $0x321] sm:$0xff]  ;;  %v16948_v6 = vld [vmem:[%s29182_s0 + $0x331] sm:$0xff] }
 0x16d   :  { %v19010_v63 = vpop.f32.mrf.mxu0  ;;  %v19090_v8 = vpop.f32.mrf.mxu1  ;;  %19253 = vmatmul.mubr.msk.f32.gmra.mxu0 %vm165_vm1, %v16945_v15  ;;  %19333 = vmatmul.mubr.msk.f32.gmra.mxu1 %vm165_vm1, %v17062_v50  ;;  %v17064_v15 = vld [vmem:[%s29182_s0 + $0x292] sm:$0xff] }
 0x16e   :  { %29427 = vst [vmem:[#allocation17_spill] sm:$0xff] %v21866_v58  ;;  %v21871_v44 = vadd.f32 %v19010_v63, %v29428_v38  ;;  %v21874_v41 = vadd.f32 %v19090_v8, %v21703_v59  ;;  %19255 = vmatprep.mubr.msk.f32.mxu0 %vm165_vm1, %v16946_v21  ;;  %19335 = vmatprep.mubr.msk.f32.mxu1 %vm165_vm1, %v17063_v25  ;;  %v17065_v59 = vld [vmem:[%s29182_s0 + $0x2a2] sm:$0xff]  ;;  %v29430_v21 = vld [vmem:[#allocation15_spill] sm:$0xff] }
 0x16f   :  { %v1782_v48 = vpop.f32.mrf.mxu0  ;;  %v2431_v50 = vpop.f32.mrf.mxu1  ;;  %v29431_v38 = vld [vmem:[#allocation26_spill] sm:$0xff] }
 0x170   :  { %29429 = vst [vmem:[#allocation12_spill] sm:$0xff] %v21874_v41  ;;  %v21891_v25 = vadd.f32 %v1782_v48, %v29430_v21  ;;  %v21894_v45 = vadd.f32 %v2431_v50, %v21723_v42  ;;  %v16949_v42 = vld [vmem:[%s29182_s0 + $0x339] sm:$0xff] }
 0x171   :  { %v19013_v63 = vpop.f32.mrf.mxu0  ;;  %v19093_v8 = vpop.f32.mrf.mxu1  ;;  %19256 = vmatmul.mubr.msk.f32.gmra.mxu0 %vm165_vm1, %v16947_v60  ;;  %19336 = vmatmul.mubr.msk.f32.gmra.mxu1 %vm165_vm1, %v17064_v15  ;;  %v17066_v60 = vld [vmem:[%s29182_s0 + $0x2aa] sm:$0xff]  ;;  %v17067_v50 = vld [vmem:[%s29182_s0 + $0x2ba] sm:$0xff] }
 0x172   :  { %v21899_v41 = vadd.f32 %v19013_v63, %v29431_v38  ;;  %v21902_v58 = vadd.f32 %v19093_v8, %v21731_v1  ;;  %19258 = vmatprep.mubr.msk.f32.mxu0 %vm165_vm1, %v16948_v6  ;;  %19338 = vmatprep.mubr.msk.f32.mxu1 %vm165_vm1, %v17065_v59  ;;  %v17144_v1 = vld [vmem:[%s29182_s0 + $0x30] sm:$0xff] }
 0x173   :  { %v1792_v48 = vpop.f32.mrf.mxu0  ;;  %v2441_v15 = vpop.f32.mrf.mxu1  ;;  %v29433_v8 = vld [vmem:[#allocation27_spill] sm:$0xff] }
 0x174   :  { %29432 = vst [vmem:[#allocation25_spill] sm:$0xff] %v21902_v58  ;;  %v21919_v6 = vadd.f32 %v1792_v48, %v21349_v13  ;;  %v21922_v59 = vadd.f32 %v2441_v15, %v21751_v16  ;;  %v17068_v13 = vld [vmem:[%s29182_s0 + $0x2c2] sm:$0xff]  ;;  %v17145_v16 = vld [vmem:[%s29182_s0 + $0x38] sm:$0xff] }
 0x175   :  { %v19016_v21 = vpop.f32.mrf.mxu0  ;;  %v19096_v63 = vpop.f32.mrf.mxu1  ;;  %19259 = vmatmul.mubr.msk.f32.gmra.mxu0 %vm165_vm1, %v16949_v42  ;;  %19339 = vmatmul.mubr.msk.f32.gmra.mxu1 %vm165_vm1, %v17066_v60  ;;  %v17069_v48 = vld [vmem:[%s29182_s0 + $0x2d2] sm:$0xff] }
 0x176   :  { %v21927_v38 = vadd.f32 %v19016_v21, %v29433_v8  ;;  %v21930_v58 = vadd.f32 %v19096_v63, %v21759_v9  ;;  %19341 = vmatprep.mubr.msk.f32.mxu1 %vm165_vm1, %v17067_v50  ;;  %19361 = vmatprep.mubr.msk.f32.mxu0 %vm165_vm1, %v17144_v1  ;;  %v17146_v50 = vld [vmem:[%s29182_s0 + $0x48] sm:$0xff] }
 0x177   :  { %v1802_v42 = vpop.f32.mrf.mxu0  ;;  %v2451_v60 = vpop.f32.mrf.mxu1  ;;  %v29436_v63 = vld [vmem:[#allocation6_spill] sm:$0xff] }
 0x178   :  { %29434 = vst [vmem:[#allocation15_spill] sm:$0xff] %v21930_v58  ;;  %v21944_v9 = vadd.f32 %v1802_v42, %v21364_v19  ;;  %v21947_v15 = vadd.f32 %v2451_v60, %v21779_v62  ;;  %v29438_v19 = vld [vmem:[#allocation24_spill] sm:$0xff]  ;;  %v17070_v62 = vld [vmem:[%s29182_s0 + $0x2da] sm:$0xff] }
 0x179   :  { %v19019_v1 = vpop.f32.mrf.mxu0  ;;  %v19099_v21 = vpop.f32.mrf.mxu1  ;;  %19342 = vmatmul.mubr.msk.f32.gmra.mxu1 %vm165_vm1, %v17068_v13  ;;  %19362 = vmatmul.mubr.msk.f32.vlgmr.msra.gmra.mxu0 %vm165_vm1, %v17145_v16  ;;  %v17147_v13 = vld [vmem:[%s29182_s0 + $0x50] sm:$0xff]  ;;  %v17148_v60 = vld [vmem:[%s29182_s0 + $0x60] sm:$0xff] }
 0x17a   :  { %29435 = vst [vmem:[#allocation26_spill] sm:$0xff] %v21947_v15  ;;  %v21955_v8 = vadd.f32 %v19019_v1, %v29436_v63  ;;  %v21958_v58 = vadd.f32 %v19099_v21, %v21787_v17  ;;  %19556 = vmatpush3.msk.msra.mxu0 %vm358_vm0, %v29438_v19  ;;  %19344 = vmatprep.mubr.msk.f32.mxu1 %vm165_vm1, %v17069_v48  ;;  %v17071_v17 = vld [vmem:[%s29182_s0 + $0x2ea] sm:$0xff]  ;;  %vm9110_vm0 = vcmask 1046534  }
 0x17b   :  { %v1812_v16 = vpop.f32.mrf.mxu0  ;;  %v2461_v42 = vpop.f32.mrf.mxu1  ;;  %19364 = vmatprep.mubr.msk.f32.mxu0 %vm165_vm1, %v17146_v50  ;;  %v29439_v48 = vld [vmem:[#allocation7_spill] sm:$0xff]  ;;  %v29441_v50 = vld [vmem:[#allocation8_spill] sm:$0xff] }
 0x17c   :  { %29437 = vst [vmem:[#allocation27_spill] sm:$0xff] %v21958_v58  ;;  %v21977_v1 = vadd.f32 %v1812_v16, %v29439_v48  ;;  %v21980_v21 = vadd.f32 %v2461_v42, %v21807_v29  ;;  %v17072_v29 = vld [vmem:[%s29182_s0 + $0x2f2] sm:$0xff]  ;;  %v17073_v42 = vld [vmem:[%s29182_s0 + $0x302] sm:$0xff] }
 0x17d   :  { %v19022_v63 = vpop.f32.mrf.mxu0  ;;  %v19102_v19 = vpop.f32.mrf.mxu1  ;;  %19345 = vmatmul.mubr.msk.f32.gmra.mxu1 %vm165_vm1, %v17070_v62  ;;  %19365 = vmatmul.mubr.msk.f32.gmra.mxu0 %vm165_vm1, %v17147_v13  ;;  %v17149_v62 = vld [vmem:[%s29182_s0 + $0x68] sm:$0xff] }
 0x17e   :  { %29440 = vst [vmem:[#allocation6_spill] sm:$0xff] %v21980_v21  ;;  %v21985_v58 = vadd.f32 %v19022_v63, %v29441_v50  ;;  %v21988_v15 = vadd.f32 %v19102_v19, %v21815_v23  ;;  %19347 = vmatprep.mubr.msk.f32.mxu1 %vm165_vm1, %v17071_v17  ;;  %19367 = vmatprep.mubr.msk.f32.mxu0 %vm165_vm1, %v17148_v60  ;;  %v17150_v23 = vld [vmem:[%s29182_s0 + $0x78] sm:$0xff]  ;;  %v29444_v50 = vld [vmem:[#allocation10_spill] sm:$0xff] }
 0x17f   :  { %v1822_v16 = vpop.f32.mrf.mxu0  ;;  %v2471_v13 = vpop.f32.mrf.mxu1  ;;  %v29443_v17 = vld [vmem:[#allocation9_spill] sm:$0xff] }
 0x180   :  { %29442 = vst [vmem:[#allocation24_spill] sm:$0xff] %v21988_v15  ;;  %v22005_v60 = vadd.f32 %v1822_v16, %v29443_v17  ;;  %v22008_v48 = vadd.f32 %v2471_v13, %v21835_v37  ;;  %v17074_v37 = vld [vmem:[%s29182_s0 + $0x30a] sm:$0xff]  ;;  %v17075_v13 = vld [vmem:[%s29182_s0 + $0x31a] sm:$0xff] }
 0x181   :  { %v19025_v63 = vpop.f32.mrf.mxu0  ;;  %v19105_v19 = vpop.f32.mrf.mxu1  ;;  %19348 = vmatmul.mubr.msk.f32.gmra.mxu1 %vm165_vm1, %v17072_v29  ;;  %19368 = vmatmul.mubr.msk.f32.gmra.mxu0 %vm165_vm1, %v17149_v62  ;;  %v17151_v29 = vld [vmem:[%s29182_s0 + $0x80] sm:$0xff] }
 0x182   :  { %v22013_v15 = vadd.f32 %v19025_v63, %v29444_v50  ;;  %v22016_v21 = vadd.f32 %v19105_v19, %v21843_v35  ;;  %19350 = vmatprep.mubr.msk.f32.mxu1 %vm165_vm1, %v17073_v42  ;;  %19370 = vmatprep.mubr.msk.f32.mxu0 %vm165_vm1, %v17150_v23  ;;  %v17152_v35 = vld [vmem:[%s29182_s0 + $0x90] sm:$0xff] }
 0x183   :  { %v1832_v16 = vpop.f32.mrf.mxu0  ;;  %v2481_v62 = vpop.f32.mrf.mxu1  ;;  %v29446_v42 = vld [vmem:[#allocation11_spill] sm:$0xff] }
 0x184   :  { %29445 = vst [vmem:[#allocation7_spill] sm:$0xff] %v22016_v21  ;;  %v22033_v23 = vadd.f32 %v1832_v16, %v29446_v42  ;;  %v22036_v17 = vadd.f32 %v2481_v62, %v21863_v49  ;;  %v17076_v49 = vld [vmem:[%s29182_s0 + $0x322] sm:$0xff]  ;;  %v29448_v62 = vld [vmem:[#allocation13_spill] sm:$0xff] }
 0x185   :  { %v19028_v63 = vpop.f32.mrf.mxu0  ;;  %v19108_v19 = vpop.f32.mrf.mxu1  ;;  %19351 = vmatmul.mubr.msk.f32.gmra.mxu1 %vm165_vm1, %v17074_v37  ;;  %19371 = vmatmul.mubr.msk.f32.gmra.mxu0 %vm165_vm1, %v17151_v29  ;;  %v17153_v37 = vld [vmem:[%s29182_s0 + $0x98] sm:$0xff] }
 0x186   :  { %v22041_v50 = vadd.f32 %v19028_v63, %v21419_v14  ;;  %v22044_v21 = vadd.f32 %v19108_v19, %v21871_v44  ;;  %19353 = vmatprep.mubr.msk.f32.mxu1 %vm165_vm1, %v17075_v13  ;;  %19373 = vmatprep.mubr.msk.f32.mxu0 %vm165_vm1, %v17152_v35  ;;  %v17077_v14 = vld [vmem:[%s29182_s0 + $0x332] sm:$0xff]  ;;  %v17154_v44 = vld [vmem:[%s29182_s0 + $0xa8] sm:$0xff] }
 0x187   :  { %v1842_v16 = vpop.f32.mrf.mxu0  ;;  %v2491_v29 = vpop.f32.mrf.mxu1 }
 0x188   :  { %29447 = vst [vmem:[#allocation8_spill] sm:$0xff] %v22044_v21  ;;  %v22061_v13 = vadd.f32 %v1842_v16, %v29448_v62  ;;  %v22064_v35 = vadd.f32 %v2491_v29, %v21891_v25  ;;  %v17078_v25 = vld [vmem:[%s29182_s0 + $0x33a] sm:$0xff] }
 0x189   :  { %v19031_v42 = vpop.f32.mrf.mxu0  ;;  %v19111_v63 = vpop.f32.mrf.mxu1  ;;  %19354 = vmatmul.mubr.msk.f32.gmra.mxu1 %vm165_vm1, %v17076_v49  ;;  %19374 = vmatmul.mubr.msk.f32.gmra.mxu0 %vm165_vm1, %v17153_v37  ;;  %v17155_v49 = vld [vmem:[%s29182_s0 + $0xb0] sm:$0xff] }
 0x18a   :  { %v22069_v19 = vadd.f32 %v19031_v42, %v21435_v43  ;;  %v22072_v21 = vadd.f32 %v19111_v63, %v21899_v41  ;;  %19356 = vmatprep.mubr.msk.f32.mxu1 %vm165_vm1, %v17077_v14  ;;  %19376 = vmatprep.mubr.msk.f32.mxu0 %vm165_vm1, %v17154_v44  ;;  %v17156_v43 = vld [vmem:[%s29182_s0 + $0xc0] sm:$0xff]  ;;  %v17273_v41 = vld [vmem:[%s29182_s0 + $0x31] sm:$0xff] }
 0x18b   :  { %v1852_v16 = vpop.f32.mrf.mxu0  ;;  %v2501_v37 = vpop.f32.mrf.mxu1 }
 0x18c   :  { %v22089_v29 = vadd.f32 %v1852_v16, %v21446_v12  ;;  %v22092_v14 = vadd.f32 %v2501_v37, %v21919_v6  ;;  %v17157_v12 = vld [vmem:[%s29182_s0 + $0xc8] sm:$0xff]  ;;  %v17274_v6 = vld [vmem:[%s29182_s0 + $0x39] sm:$0xff] }
 0x18d   :  { %v19034_v44 = vpop.f32.mrf.mxu0  ;;  %v19114_v62 = vpop.f32.mrf.mxu1  ;;  %19357 = vmatmul.mubr.msk.f32.gmra.mxu1 %vm165_vm1, %v17078_v25  ;;  %19377 = vmatmul.mubr.msk.f32.gmra.mxu0 %vm165_vm1, %v17155_v49 }
 0x18e   :  { %v22097_v42 = vadd.f32 %v19034_v44, %v21451_v31  ;;  %v22100_v63 = vadd.f32 %v19114_v62, %v21927_v38  ;;  %19379 = vmatprep.mubr.msk.f32.mxu0 %vm165_vm1, %v17156_v43  ;;  %19459 = vmatprep.mubr.msk.f32.mxu1 %vm165_vm1, %v17273_v41  ;;  %v17158_v31 = vld [vmem:[%s29182_s0 + $0xd8] sm:$0xff]  ;;  %v17275_v38 = vld [vmem:[%s29182_s0 + $0x49] sm:$0xff] }
 0x18f   :  { %v1862_v25 = vpop.f32.mrf.mxu0  ;;  %v2511_v49 = vpop.f32.mrf.mxu1 }
 0x190   :  { %v22117_v16 = vadd.f32 %v1862_v25, %v21462_v5  ;;  %v22120_v37 = vadd.f32 %v2511_v49, %v21944_v9  ;;  %v17159_v5 = vld [vmem:[%s29182_s0 + $0xe0] sm:$0xff]  ;;  %v17276_v9 = vld [vmem:[%s29182_s0 + $0x51] sm:$0xff] }
 0x191   :  { %v19037_v43 = vpop.f32.mrf.mxu0  ;;  %v19117_v41 = vpop.f32.mrf.mxu1  ;;  %19380 = vmatmul.mubr.msk.f32.gmra.mxu0 %vm165_vm1, %v17157_v12  ;;  %19460 = vmatmul.mubr.msk.f32.vlgmr.msra.gmra.mxu1 %vm165_vm1, %v17274_v6 }
 0x192   :  { %v22125_v44 = vadd.f32 %v19037_v43, %v21467_v46  ;;  %v22128_v62 = vadd.f32 %v19117_v41, %v21955_v8  ;;  %19382 = vmatprep.mubr.msk.f32.mxu0 %vm165_vm1, %v17158_v31  ;;  %19462 = vmatprep.mubr.msk.f32.mxu1 %vm165_vm1, %v17275_v38  ;;  %v17160_v46 = vld [vmem:[%s29182_s0 + $0xf0] sm:$0xff]  ;;  %v17277_v8 = vld [vmem:[%s29182_s0 + $0x61] sm:$0xff] }
 0x193   :  { %v1872_v12 = vpop.f32.mrf.mxu0  ;;  %v2521_v6 = vpop.f32.mrf.mxu1 }
 0x194   :  { %v22145_v25 = vadd.f32 %v1872_v12, %v21478_v7  ;;  %v22148_v49 = vadd.f32 %v2521_v6, %v21977_v1  ;;  %v17161_v7 = vld [vmem:[%s29182_s0 + $0xf8] sm:$0xff]  ;;  %v17278_v1 = vld [vmem:[%s29182_s0 + $0x69] sm:$0xff] }
 0x195   :  { %v19040_v31 = vpop.f32.mrf.mxu0  ;;  %v19120_v38 = vpop.f32.mrf.mxu1  ;;  %19383 = vmatmul.mubr.msk.f32.gmra.mxu0 %vm165_vm1, %v17159_v5  ;;  %19463 = vmatmul.mubr.msk.f32.gmra.mxu1 %vm165_vm1, %v17276_v9 }
 0x196   :  { %v22153_v43 = vadd.f32 %v19040_v31, %v21483_v3  ;;  %v22156_v41 = vadd.f32 %v19120_v38, %v21985_v58  ;;  %19385 = vmatprep.mubr.msk.f32.mxu0 %vm165_vm1, %v17160_v46  ;;  %19465 = vmatprep.mubr.msk.f32.mxu1 %vm165_vm1, %v17277_v8  ;;  %v17162_v3 = vld [vmem:[%s29182_s0 + $0x108] sm:$0xff]  ;;  %v17279_v58 = vld [vmem:[%s29182_s0 + $0x79] sm:$0xff] }
 0x197   :  { %v1882_v5 = vpop.f32.mrf.mxu0  ;;  %v2531_v9 = vpop.f32.mrf.mxu1 }
 0x198   :  { %v22173_v12 = vadd.f32 %v1882_v5, %v21494_v2  ;;  %v22176_v6 = vadd.f32 %v2531_v9, %v22005_v60  ;;  %v17163_v2 = vld [vmem:[%s29182_s0 + $0x110] sm:$0xff]  ;;  %v17280_v60 = vld [vmem:[%s29182_s0 + $0x81] sm:$0xff] }
 0x199   :  { %v19043_v46 = vpop.f32.mrf.mxu0  ;;  %v19123_v8 = vpop.f32.mrf.mxu1  ;;  %19386 = vmatmul.mubr.msk.f32.gmra.mxu0 %vm165_vm1, %v17161_v7  ;;  %19466 = vmatmul.mubr.msk.f32.gmra.mxu1 %vm165_vm1, %v17278_v1 }
 0x19a   :  { %v22181_v31 = vadd.f32 %v19043_v46, %v21499_v24  ;;  %v22184_v38 = vadd.f32 %v19123_v8, %v22013_v15  ;;  %19388 = vmatprep.mubr.msk.f32.mxu0 %vm165_vm1, %v17162_v3  ;;  %19468 = vmatprep.mubr.msk.f32.mxu1 %vm165_vm1, %v17279_v58  ;;  %v17164_v24 = vld [vmem:[%s29182_s0 + $0x120] sm:$0xff]  ;;  %v17281_v15 = vld [vmem:[%s29182_s0 + $0x91] sm:$0xff] }
 0x19b   :  { %v1892_v7 = vpop.f32.mrf.mxu0  ;;  %v2541_v1 = vpop.f32.mrf.mxu1 }
 0x19c   :  { %v22201_v5 = vadd.f32 %v1892_v7, %v21510_v11  ;;  %v22204_v9 = vadd.f32 %v2541_v1, %v22033_v23  ;;  %v17165_v11 = vld [vmem:[%s29182_s0 + $0x128] sm:$0xff]  ;;  %v17282_v23 = vld [vmem:[%s29182_s0 + $0x99] sm:$0xff] }
 0x19d   :  { %v19046_v3 = vpop.f32.mrf.mxu0  ;;  %v19126_v58 = vpop.f32.mrf.mxu1  ;;  %19389 = vmatmul.mubr.msk.f32.gmra.mxu0 %vm165_vm1, %v17163_v2  ;;  %19469 = vmatmul.mubr.msk.f32.gmra.mxu1 %vm165_vm1, %v17280_v60 }
 0x19e   :  { %v22209_v46 = vadd.f32 %v19046_v3, %v21515_v28  ;;  %v22212_v8 = vadd.f32 %v19126_v58, %v22041_v50  ;;  %19391 = vmatprep.mubr.msk.f32.mxu0 %vm165_vm1, %v17164_v24  ;;  %19471 = vmatprep.mubr.msk.f32.mxu1 %vm165_vm1, %v17281_v15  ;;  %v17166_v28 = vld [vmem:[%s29182_s0 + $0x138] sm:$0xff]  ;;  %v17283_v50 = vld [vmem:[%s29182_s0 + $0xa9] sm:$0xff] }
 0x19f   :  { %v1902_v2 = vpop.f32.mrf.mxu0  ;;  %v2551_v60 = vpop.f32.mrf.mxu1 }
 0x1a0   :  { %v22229_v7 = vadd.f32 %v1902_v2, %v21526_v61  ;;  %v22232_v1 = vadd.f32 %v2551_v60, %v22061_v13  ;;  %v17167_v61 = vld [vmem:[%s29182_s0 + $0x140] sm:$0xff]  ;;  %v17284_v13 = vld [vmem:[%s29182_s0 + $0xb1] sm:$0xff] }
 0x1a1   :  { %v19049_v24 = vpop.f32.mrf.mxu0  ;;  %v19129_v15 = vpop.f32.mrf.mxu1  ;;  %19392 = vmatmul.mubr.msk.f32.gmra.mxu0 %vm165_vm1, %v17165_v11  ;;  %19472 = vmatmul.mubr.msk.f32.gmra.mxu1 %vm165_vm1, %v17282_v23 }
 0x1a2   :  { %v22237_v3 = vadd.f32 %v19049_v24, %v21531_v32  ;;  %v22240_v58 = vadd.f32 %v19129_v15, %v22069_v19  ;;  %19394 = vmatprep.mubr.msk.f32.mxu0 %vm165_vm1, %v17166_v28  ;;  %19474 = vmatprep.mubr.msk.f32.mxu1 %vm165_vm1, %v17283_v50  ;;  %v17168_v32 = vld [vmem:[%s29182_s0 + $0x150] sm:$0xff]  ;;  %v17285_v19 = vld [vmem:[%s29182_s0 + $0xc1] sm:$0xff] }
 0x1a3   :  { %v1912_v11 = vpop.f32.mrf.mxu0  ;;  %v2561_v23 = vpop.f32.mrf.mxu1 }
 0x1a4   :  { %v22257_v2 = vadd.f32 %v1912_v11, %v21545_v20  ;;  %v22260_v60 = vadd.f32 %v2561_v23, %v22089_v29  ;;  %v17169_v20 = vld [vmem:[%s29182_s0 + $0x158] sm:$0xff]  ;;  %v17286_v29 = vld [vmem:[%s29182_s0 + $0xc9] sm:$0xff] }
 0x1a5   :  { %v19052_v28 = vpop.f32.mrf.mxu0  ;;  %v19132_v50 = vpop.f32.mrf.mxu1  ;;  %19395 = vmatmul.mubr.msk.f32.gmra.mxu0 %vm165_vm1, %v17167_v61  ;;  %19475 = vmatmul.mubr.msk.f32.gmra.mxu1 %vm165_vm1, %v17284_v13 }
 0x1a6   :  { %29449 = vst [vmem:[#allocation9_spill] sm:$0xff] %v22260_v60  ;;  %v22265_v24 = vadd.f32 %v19052_v28, %v21553_v36  ;;  %v22268_v15 = vadd.f32 %v19132_v50, %v22097_v42  ;;  %19397 = vmatprep.mubr.msk.f32.mxu0 %vm165_vm1, %v17168_v32  ;;  %19477 = vmatprep.mubr.msk.f32.mxu1 %vm165_vm1, %v17285_v19  ;;  %v17170_v36 = vld [vmem:[%s29182_s0 + $0x168] sm:$0xff]  ;;  %v17287_v42 = vld [vmem:[%s29182_s0 + $0xd9] sm:$0xff] }
 0x1a7   :  { %v1922_v61 = vpop.f32.mrf.mxu0  ;;  %v2571_v13 = vpop.f32.mrf.mxu1 }
 0x1a8   :  { %29450 = vst [vmem:[#allocation10_spill] sm:$0xff] %v22268_v15  ;;  %v22285_v11 = vadd.f32 %v1922_v61, %v21567_v22  ;;  %v22288_v23 = vadd.f32 %v2571_v13, %v22117_v16  ;;  %v17171_v22 = vld [vmem:[%s29182_s0 + $0x170] sm:$0xff]  ;;  %v17288_v16 = vld [vmem:[%s29182_s0 + $0xe1] sm:$0xff] }
 0x1a9   :  { %v19055_v32 = vpop.f32.mrf.mxu0  ;;  %v19135_v19 = vpop.f32.mrf.mxu1  ;;  %19398 = vmatmul.mubr.msk.f32.gmra.mxu0 %vm165_vm1, %v17169_v20  ;;  %19478 = vmatmul.mubr.msk.f32.gmra.mxu1 %vm165_vm1, %v17286_v29  ;;  %v29453_v61 = vld [vmem:[#allocation18_spill] sm:$0xff] }
 0x1aa   :  { %29451 = vst [vmem:[#allocation11_spill] sm:$0xff] %v22288_v23  ;;  %v22293_v28 = vadd.f32 %v19055_v32, %v21575_v40  ;;  %v22296_v50 = vadd.f32 %v19135_v19, %v22125_v44  ;;  %19400 = vmatprep.mubr.msk.f32.mxu0 %vm165_vm1, %v17170_v36  ;;  %19480 = vmatprep.mubr.msk.f32.mxu1 %vm165_vm1, %v17287_v42  ;;  %v17172_v40 = vld [vmem:[%s29182_s0 + $0x180] sm:$0xff]  ;;  %v17289_v44 = vld [vmem:[%s29182_s0 + $0xf1] sm:$0xff] }
 0x1ab   :  { %v1932_v20 = vpop.f32.mrf.mxu0  ;;  %v2581_v29 = vpop.f32.mrf.mxu1  ;;  %v1304_v13 = vadd.f32 %v21594_v39, %v29453_v61  ;;  %v17290_v39 = vld [vmem:[%s29182_s0 + $0xf9] sm:$0xff] }
 0x1ac   :  { %29452 = vst [vmem:[#allocation13_spill] sm:$0xff] %v22296_v50  ;;  %v22315_v36 = vadd.f32 %v1932_v20, %v21589_v26  ;;  %v22318_v42 = vadd.f32 %v2581_v29, %v22145_v25  ;;  %v29454_v50 = vld [vmem:[#allocation19_spill] sm:$0xff]  ;;  %v29456_v61 = vld [vmem:[#allocation21_spill] sm:$0xff] }
 0x1ad   :  { %v19058_v32 = vpop.f32.mrf.mxu0  ;;  %v19138_v19 = vpop.f32.mrf.mxu1  ;;  %19401 = vmatmul.mubr.msk.f32.gmra.mxu0 %vm165_vm1, %v17171_v22  ;;  %19481 = vmatmul.mubr.msk.f32.gmra.mxu1 %vm165_vm1, %v17288_v16  ;;  %v1299_v23 = vadd.f32 %v21608_v10, %v29454_v50  ;;  %v17173_v26 = vld [vmem:[%s29182_s0 + $0x188] sm:$0xff]  ;;  %v17174_v10 = vld [vmem:[%s29182_s0 + $0x198] sm:$0xff] }
 0x1ae   :  { %v22324_v15 = vadd.f32 %v19058_v32, %v1304_v13  ;;  %v22327_v60 = vadd.f32 %v19138_v19, %v22153_v43  ;;  %19403 = vmatprep.mubr.msk.f32.mxu0 %vm165_vm1, %v17172_v40  ;;  %19483 = vmatprep.mubr.msk.f32.mxu1 %vm165_vm1, %v17289_v44  ;;  %v17291_v43 = vld [vmem:[%s29182_s0 + $0x109] sm:$0xff]  ;;  %v29455_v50 = vld [vmem:[#allocation20_spill] sm:$0xff]  ;;  %v1309_v13 = vadd.f32 %v21635_v18, %v29456_v61  ;;  %v17176_v18 = vld [vmem:[%s29182_s0 + $0x1e0] sm:$0xff] }
 0x1af   :  { %v1942_v25 = vpop.f32.mrf.mxu0  ;;  %v2591_v22 = vpop.f32.mrf.mxu1  ;;  %v1314_v16 = vadd.f32 %v21619_v55, %v29455_v50  ;;  %v17175_v55 = vld [vmem:[%s29182_s0 + $0x1a0] sm:$0xff] }
 0x1b0   :  { %v22345_v20 = vadd.f32 %v1942_v25, %v1299_v23  ;;  %v22348_v29 = vadd.f32 %v2591_v22, %v22173_v12  ;;  %v17292_v12 = vld [vmem:[%s29182_s0 + $0x111] sm:$0xff] }
 0x1b1   :  { %v19061_v40 = vpop.f32.mrf.mxu0  ;;  %v19141_v44 = vpop.f32.mrf.mxu1  ;;  %19404 = vmatmul.mubr.msk.f32.gmra.mxu0 %vm165_vm1, %v17173_v26  ;;  %19484 = vmatmul.mubr.msk.f32.gmra.mxu1 %vm165_vm1, %v17290_v39  ;;  %v29457_v39 = vld [vmem:[#allocation22_spill] sm:$0xff] }
 0x1b2   :  { %v22354_v32 = vadd.f32 %v19061_v40, %v1314_v16  ;;  %v22357_v19 = vadd.f32 %v19141_v44, %v22181_v31  ;;  %19406 = vmatprep.mubr.msk.f32.mxu0 %vm165_vm1, %v17174_v10  ;;  %19486 = vmatprep.mubr.msk.f32.mxu1 %vm165_vm1, %v17291_v43  ;;  %v17293_v31 = vld [vmem:[%s29182_s0 + $0x121] sm:$0xff]  ;;  %v1324_v25 = vadd.f32 %v21646_v34, %v29457_v39  ;;  %v29458_v16 = vld [vmem:[#allocation23_spill] sm:$0xff] }
 0x1b3   :  { %v1952_v23 = vpop.f32.mrf.mxu0  ;;  %v2601_v26 = vpop.f32.mrf.mxu1  ;;  %v1319_v40 = vadd.f32 %v21661_v56, %v29458_v16  ;;  %v17177_v34 = vld [vmem:[%s29182_s0 + $0x1e8] sm:$0xff]  ;;  %v17178_v56 = vld [vmem:[%s29182_s0 + $0x1f8] sm:$0xff] }
 0x1b4   :  { %v22375_v22 = vadd.f32 %v1952_v23, %v1309_v13  ;;  %v22378_v10 = vadd.f32 %v2601_v26, %v22201_v5  ;;  %v17294_v5 = vld [vmem:[%s29182_s0 + $0x129] sm:$0xff] }
 0x1b5   :  { %v19064_v43 = vpop.f32.mrf.mxu0  ;;  %v19144_v50 = vpop.f32.mrf.mxu1  ;;  %19407 = vmatmul.mubr.msk.f32.gmra.mxu0 %vm165_vm1, %v17175_v55  ;;  %19487 = vmatmul.mubr.msk.f32.gmra.mxu1 %vm165_vm1, %v17292_v12 }
 0x1b6   :  { %v22384_v44 = vadd.f32 %v19064_v43, %v1324_v25  ;;  %v22387_v61 = vadd.f32 %v19144_v50, %v22209_v46  ;;  %19409 = vmatprep.mubr.msk.f32.mxu0 %vm165_vm1, %v17176_v18  ;;  %19489 = vmatprep.mubr.msk.f32.mxu1 %vm165_vm1, %v17293_v31  ;;  %v17295_v46 = vld [vmem:[%s29182_s0 + $0x139] sm:$0xff]  ;;  %v17296_v25 = vld [vmem:[%s29182_s0 + $0x141] sm:$0xff] }
 0x1b7   :  { %v1962_v13 = vpop.f32.mrf.mxu0  ;;  %v2611_v55 = vpop.f32.mrf.mxu1 }
 0x1b8   :  { %v22403_v12 = vadd.f32 %v1962_v13, %v1319_v40  ;;  %v22406_v23 = vadd.f32 %v2611_v55, %v22229_v7  ;;  %v17179_v7 = vld [vmem:[%s29182_s0 + $0x200] sm:$0xff] }
 0x1b9   :  { %v19147_v26 = vpop.f32.mrf.mxu1  ;;  %v19167_v18 = vpop.f32.mrf.mxu0  ;;  %19410 = vmatmul.mubr.msk.f32.gmra.mxu0 %vm165_vm1, %v17177_v34  ;;  %19490 = vmatmul.mubr.msk.f32.gmra.mxu1 %vm165_vm1, %v17294_v5 }
 0x1ba   :  { %v22411_v31 = vadd.f32 %v19147_v26, %v22237_v3  ;;  %v22414_v39 = vadd.f32 %v19167_v18, %v21678_v52  ;;  %19412 = vmatprep.mubr.msk.f32.mxu0 %vm165_vm1, %v17178_v56  ;;  %19492 = vmatprep.mubr.msk.f32.mxu1 %vm165_vm1, %v17295_v46  ;;  %v17180_v3 = vld [vmem:[%s29182_s0 + $0x210] sm:$0xff] }
 0x1bb   :  { %v2621_v43 = vpop.f32.mrf.mxu1  ;;  %v3069_v50 = vpop.f32.mrf.mxu0  ;;  %v17297_v52 = vld [vmem:[%s29182_s0 + $0x151] sm:$0xff] }
 0x1bc   :  { %v22431_v16 = vadd.f32 %v2621_v43, %v22257_v2  ;;  %v22434_v40 = vadd.f32 %v3069_v50, %v21698_v54  ;;  %v17181_v54 = vld [vmem:[%s29182_s0 + $0x218] sm:$0xff] }
 0x1bd   :  { %v19150_v34 = vpop.f32.mrf.mxu1  ;;  %v19170_v5 = vpop.f32.mrf.mxu0  ;;  %19413 = vmatmul.mubr.msk.f32.gmra.mxu0 %vm165_vm1, %v17179_v7  ;;  %19493 = vmatmul.mubr.msk.f32.gmra.mxu1 %vm165_vm1, %v17296_v25  ;;  %v17298_v2 = vld [vmem:[%s29182_s0 + $0x159] sm:$0xff] }
 0x1be   :  { %v22439_v13 = vadd.f32 %v19150_v34, %v22265_v24  ;;  %v22442_v55 = vadd.f32 %v19170_v5, %v21706_v53  ;;  %19415 = vmatprep.mubr.msk.f32.mxu0 %vm165_vm1, %v17180_v3  ;;  %19495 = vmatprep.mubr.msk.f32.mxu1 %vm165_vm1, %v17297_v52  ;;  %v17182_v24 = vld [vmem:[%s29182_s0 + $0x228] sm:$0xff] }
 0x1bf   :  { %v2631_v56 = vpop.f32.mrf.mxu1  ;;  %v3079_v46 = vpop.f32.mrf.mxu0  ;;  %v17299_v53 = vld [vmem:[%s29182_s0 + $0x169] sm:$0xff] }
 0x1c0   :  { %v22459_v26 = vadd.f32 %v2631_v56, %v22285_v11  ;;  %v22462_v18 = vadd.f32 %v3079_v46, %v21726_v4  ;;  %v17183_v4 = vld [vmem:[%s29182_s0 + $0x230] sm:$0xff] }
 0x1c1   :  { %v19153_v7 = vpop.f32.mrf.mxu1  ;;  %v19173_v25 = vpop.f32.mrf.mxu0  ;;  %19416 = vmatmul.mubr.msk.f32.gmra.mxu0 %vm165_vm1, %v17181_v54  ;;  %19496 = vmatmul.mubr.msk.f32.gmra.mxu1 %vm165_vm1, %v17298_v2  ;;  %v17300_v11 = vld [vmem:[%s29182_s0 + $0x171] sm:$0xff] }
 0x1c2   :  { %v22467_v43 = vadd.f32 %v19153_v7, %v22293_v28  ;;  %v22470_v50 = vadd.f32 %v19173_v25, %v21734_v47  ;;  %19418 = vmatprep.mubr.msk.f32.mxu0 %vm165_vm1, %v17182_v24  ;;  %19498 = vmatprep.mubr.msk.f32.mxu1 %vm165_vm1, %v17299_v53  ;;  %v17184_v28 = vld [vmem:[%s29182_s0 + $0x240] sm:$0xff] }
 0x1c3   :  { %v2641_v3 = vpop.f32.mrf.mxu1  ;;  %v3089_v52 = vpop.f32.mrf.mxu0  ;;  %v17301_v47 = vld [vmem:[%s29182_s0 + $0x181] sm:$0xff] }
 0x1c4   :  { %v22487_v34 = vadd.f32 %v2641_v3, %v22315_v36  ;;  %v22490_v5 = vadd.f32 %v3089_v52, %v21754_v57  ;;  %v17185_v57 = vld [vmem:[%s29182_s0 + $0x248] sm:$0xff] }
 0x1c5   :  { %v19156_v54 = vpop.f32.mrf.mxu1  ;;  %v19176_v2 = vpop.f32.mrf.mxu0  ;;  %19419 = vmatmul.mubr.msk.f32.gmra.mxu0 %vm165_vm1, %v17183_v4  ;;  %19499 = vmatmul.mubr.msk.f32.gmra.mxu1 %vm165_vm1, %v17300_v11  ;;  %v17302_v36 = vld [vmem:[%s29182_s0 + $0x189] sm:$0xff] }
 0x1c6   :  { %v22495_v56 = vadd.f32 %v19156_v54, %v22324_v15  ;;  %v22498_v46 = vadd.f32 %v19176_v2, %v21762_v51  ;;  %19421 = vmatprep.mubr.msk.f32.mxu0 %vm165_vm1, %v17184_v28  ;;  %19501 = vmatprep.mubr.msk.f32.mxu1 %vm165_vm1, %v17301_v47  ;;  %v17186_v15 = vld [vmem:[%s29182_s0 + $0x258] sm:$0xff] }
 0x1c7   :  { %v2651_v24 = vpop.f32.mrf.mxu1  ;;  %v3099_v53 = vpop.f32.mrf.mxu0  ;;  %v17303_v51 = vld [vmem:[%s29182_s0 + $0x199] sm:$0xff] }
 0x1c8   :  { %v22515_v7 = vadd.f32 %v2651_v24, %v22345_v20  ;;  %v22518_v25 = vadd.f32 %v3099_v53, %v21782_v0  ;;  %v17187_v0 = vld [vmem:[%s29182_s0 + $0x260] sm:$0xff] }
 0x1c9   :  { %v19159_v4 = vpop.f32.mrf.mxu1  ;;  %v19179_v11 = vpop.f32.mrf.mxu0  ;;  %19422 = vmatmul.mubr.msk.f32.gmra.mxu0 %vm165_vm1, %v17185_v57  ;;  %19502 = vmatmul.mubr.msk.f32.gmra.mxu1 %vm165_vm1, %v17302_v36  ;;  %v17304_v20 = vld [vmem:[%s29182_s0 + $0x1a1] sm:$0xff] }
 0x1ca   :  { %v22523_v3 = vadd.f32 %v19159_v4, %v22354_v32  ;;  %v22526_v52 = vadd.f32 %v19179_v11, %v21790_v30  ;;  %19424 = vmatprep.mubr.msk.f32.mxu0 %vm165_vm1, %v17186_v15  ;;  %19504 = vmatprep.mubr.msk.f32.mxu1 %vm165_vm1, %v17303_v51  ;;  %v17188_v32 = vld [vmem:[%s29182_s0 + $0x270] sm:$0xff]  ;;  %v17305_v30 = vld [vmem:[%s29182_s0 + $0x1e1] sm:$0xff] }
 0x1cb   :  { %v2661_v28 = vpop.f32.mrf.mxu1  ;;  %v3109_v47 = vpop.f32.mrf.mxu0  ;;  %v29459_v11 = vld [vmem:[#allocation14_spill] sm:$0xff] }
 0x1cc   :  { %v22543_v54 = vadd.f32 %v2661_v28, %v22375_v22  ;;  %v22546_v2 = vadd.f32 %v3109_v47, %v21810_v33  ;;  %v17189_v33 = vld [vmem:[%s29182_s0 + $0x278] sm:$0xff]  ;;  %v17306_v22 = vld [vmem:[%s29182_s0 + $0x1e9] sm:$0xff] }
 0x1cd   :  { %v19162_v57 = vpop.f32.mrf.mxu1  ;;  %v19182_v36 = vpop.f32.mrf.mxu0  ;;  %19425 = vmatmul.mubr.msk.f32.gmra.mxu0 %vm165_vm1, %v17187_v0  ;;  %19505 = vmatmul.mubr.msk.f32.gmra.mxu1 %vm165_vm1, %v17304_v20  ;;  %v29460_v47 = vld [vmem:[#allocation16_spill] sm:$0xff] }
 0x1ce   :  { %v22551_v24 = vadd.f32 %v19162_v57, %v22384_v44  ;;  %v22554_v53 = vadd.f32 %v19182_v36, %v21818_v27  ;;  %19427 = vmatprep.mubr.msk.f32.mxu0 %vm165_vm1, %v17188_v32  ;;  %19507 = vmatprep.mubr.msk.f32.mxu1 %vm165_vm1, %v17305_v30  ;;  %v17190_v44 = vld [vmem:[%s29182_s0 + $0x288] sm:$0xff]  ;;  %v17307_v27 = vld [vmem:[%s29182_s0 + $0x1f9] sm:$0xff] }
 0x1cf   :  { %v2671_v15 = vpop.f32.mrf.mxu1  ;;  %v3119_v51 = vpop.f32.mrf.mxu0  ;;  %v17308_v57 = vld [vmem:[%s29182_s0 + $0x201] sm:$0xff] }
 0x1d0   :  { %v22571_v4 = vadd.f32 %v2671_v15, %v22403_v12  ;;  %v22574_v0 = vadd.f32 %v3119_v51, %v29459_v11  ;;  %v17191_v12 = vld [vmem:[%s29182_s0 + $0x290] sm:$0xff]  ;;  %v29461_v15 = vld [vmem:[#allocation17_spill] sm:$0xff] }
 0x1d1   :  { %v19185_v20 = vpop.f32.mrf.mxu0  ;;  %v19265_v28 = vpop.f32.mrf.mxu1  ;;  %19428 = vmatmul.mubr.msk.f32.gmra.mxu0 %vm165_vm1, %v17189_v33  ;;  %19508 = vmatmul.mubr.msk.f32.gmra.mxu1 %vm165_vm1, %v17306_v22  ;;  %v17192_v22 = vld [vmem:[%s29182_s0 + $0x2a0] sm:$0xff] }
 0x1d2   :  { %v22579_v32 = vadd.f32 %v19185_v20, %v29460_v47  ;;  %v22582_v30 = vadd.f32 %v19265_v28, %v22414_v39  ;;  %19430 = vmatprep.mubr.msk.f32.mxu0 %vm165_vm1, %v17190_v44  ;;  %19510 = vmatprep.mubr.msk.f32.mxu1 %vm165_vm1, %v17307_v27  ;;  %v17309_v39 = vld [vmem:[%s29182_s0 + $0x211] sm:$0xff] }
 0x1d3   :  { %v3129_v36 = vpop.f32.mrf.mxu0  ;;  %v3777_v33 = vpop.f32.mrf.mxu1  ;;  %v29462_v20 = vld [vmem:[#allocation12_spill] sm:$0xff] }
 0x1d4   :  { %v22599_v51 = vadd.f32 %v3129_v36, %v29461_v15  ;;  %v22602_v44 = vadd.f32 %v3777_v33, %v22434_v40  ;;  %v17193_v40 = vld [vmem:[%s29182_s0 + $0x2a8] sm:$0xff]  ;;  %v17194_v33 = vld [vmem:[%s29182_s0 + $0x2b8] sm:$0xff] }
 0x1d5   :  { %v19188_v27 = vpop.f32.mrf.mxu0  ;;  %v19268_v11 = vpop.f32.mrf.mxu1  ;;  %19431 = vmatmul.mubr.msk.f32.gmra.mxu0 %vm165_vm1, %v17191_v12  ;;  %19511 = vmatmul.mubr.msk.f32.gmra.mxu1 %vm165_vm1, %v17308_v57  ;;  %v17310_v12 = vld [vmem:[%s29182_s0 + $0x219] sm:$0xff] }
 0x1d6   :  { %v22607_v28 = vadd.f32 %v19188_v27, %v29462_v20  ;;  %v22610_v47 = vadd.f32 %v19268_v11, %v22442_v55  ;;  %19433 = vmatprep.mubr.msk.f32.mxu0 %vm165_vm1, %v17192_v22  ;;  %19513 = vmatprep.mubr.msk.f32.mxu1 %vm165_vm1, %v17309_v39  ;;  %v17311_v55 = vld [vmem:[%s29182_s0 + $0x229] sm:$0xff]  ;;  %v29464_v11 = vld [vmem:[#allocation25_spill] sm:$0xff] }
 0x1d7   :  { %v3139_v36 = vpop.f32.mrf.mxu0  ;;  %v3787_v57 = vpop.f32.mrf.mxu1 }
 0x1d8   :  { %29463 = vst [vmem:[#allocation18_spill] sm:$0xff] %v22610_v47  ;;  %v22627_v22 = vadd.f32 %v3139_v36, %v21894_v45  ;;  %v22630_v39 = vadd.f32 %v3787_v57, %v22462_v18  ;;  %v17195_v45 = vld [vmem:[%s29182_s0 + $0x2c0] sm:$0xff]  ;;  %v17312_v18 = vld [vmem:[%s29182_s0 + $0x231] sm:$0xff] }
 0x1d9   :  { %v19191_v15 = vpop.f32.mrf.mxu0  ;;  %v19271_v27 = vpop.f32.mrf.mxu1  ;;  %19434 = vmatmul.mubr.msk.f32.gmra.mxu0 %vm165_vm1, %v17193_v40  ;;  %19514 = vmatmul.mubr.msk.f32.gmra.mxu1 %vm165_vm1, %v17310_v12  ;;  %v17196_v36 = vld [vmem:[%s29182_s0 + $0x2d0] sm:$0xff] }
 0x1da   :  { %v22635_v20 = vadd.f32 %v19191_v15, %v29464_v11  ;;  %v22638_v47 = vadd.f32 %v19271_v27, %v22470_v50  ;;  %19436 = vmatprep.mubr.msk.f32.mxu0 %vm165_vm1, %v17194_v33  ;;  %19516 = vmatprep.mubr.msk.f32.mxu1 %vm165_vm1, %v17311_v55  ;;  %v17313_v50 = vld [vmem:[%s29182_s0 + $0x241] sm:$0xff]  ;;  %v29467_v27 = vld [vmem:[#allocation15_spill] sm:$0xff] }
 0x1db   :  { %v3149_v40 = vpop.f32.mrf.mxu0  ;;  %v3797_v12 = vpop.f32.mrf.mxu1 }
 0x1dc   :  { %29465 = vst [vmem:[#allocation19_spill] sm:$0xff] %v22638_v47  ;;  %v22655_v57 = vadd.f32 %v3149_v40, %v21922_v59  ;;  %v22658_v33 = vadd.f32 %v3797_v12, %v22490_v5  ;;  %v17197_v59 = vld [vmem:[%s29182_s0 + $0x2d8] sm:$0xff]  ;;  %v17314_v5 = vld [vmem:[%s29182_s0 + $0x249] sm:$0xff] }
 0x1dd   :  { %v19194_v55 = vpop.f32.mrf.mxu0  ;;  %v19274_v15 = vpop.f32.mrf.mxu1  ;;  %19437 = vmatmul.mubr.msk.f32.gmra.mxu0 %vm165_vm1, %v17195_v45  ;;  %19517 = vmatmul.mubr.msk.f32.gmra.mxu1 %vm165_vm1, %v17312_v18  ;;  %v17198_v40 = vld [vmem:[%s29182_s0 + $0x2e8] sm:$0xff] }
 0x1de   :  { %29466 = vst [vmem:[#allocation20_spill] sm:$0xff] %v22655_v57  ;;  %v22663_v11 = vadd.f32 %v19194_v55, %v29467_v27  ;;  %v22666_v47 = vadd.f32 %v19274_v15, %v22498_v46  ;;  %19439 = vmatprep.mubr.msk.f32.mxu0 %vm165_vm1, %v17196_v36  ;;  %19519 = vmatprep.mubr.msk.f32.mxu1 %vm165_vm1, %v17313_v50  ;;  %v17315_v46 = vld [vmem:[%s29182_s0 + $0x259] sm:$0xff]  ;;  %v29469_v12 = vld [vmem:[#allocation26_spill] sm:$0xff]  ;;  %v29471_v27 = vld [vmem:[#allocation27_spill] sm:$0xff] }
 0x1df   :  { %v3159_v45 = vpop.f32.mrf.mxu0  ;;  %v3807_v18 = vpop.f32.mrf.mxu1 }
 0x1e0   :  { %29468 = vst [vmem:[#allocation21_spill] sm:$0xff] %v22666_v47  ;;  %v22683_v36 = vadd.f32 %v3159_v45, %v29469_v12  ;;  %v22686_v50 = vadd.f32 %v3807_v18, %v22518_v25  ;;  %v17199_v25 = vld [vmem:[%s29182_s0 + $0x2f0] sm:$0xff]  ;;  %v17200_v18 = vld [vmem:[%s29182_s0 + $0x300] sm:$0xff] }
 0x1e1   :  { %v19197_v55 = vpop.f32.mrf.mxu0  ;;  %v19277_v15 = vpop.f32.mrf.mxu1  ;;  %19440 = vmatmul.mubr.msk.f32.gmra.mxu0 %vm165_vm1, %v17197_v59  ;;  %19520 = vmatmul.mubr.msk.f32.gmra.mxu1 %vm165_vm1, %v17314_v5  ;;  %v17316_v59 = vld [vmem:[%s29182_s0 + $0x261] sm:$0xff] }
 0x1e2   :  { %29470 = vst [vmem:[#allocation22_spill] sm:$0xff] %v22683_v36  ;;  %v22691_v57 = vadd.f32 %v19197_v55, %v29471_v27  ;;  %v22694_v47 = vadd.f32 %v19277_v15, %v22526_v52  ;;  %19442 = vmatprep.mubr.msk.f32.mxu0 %vm165_vm1, %v17198_v40  ;;  %19522 = vmatprep.mubr.msk.f32.mxu1 %vm165_vm1, %v17315_v46  ;;  %v17317_v52 = vld [vmem:[%s29182_s0 + $0x271] sm:$0xff]  ;;  %v29473_v40 = vld [vmem:[#allocation6_spill] sm:$0xff] }
 0x1e3   :  { %v3169_v45 = vpop.f32.mrf.mxu0  ;;  %v3817_v5 = vpop.f32.mrf.mxu1  ;;  %v29475_v27 = vld [vmem:[#allocation24_spill] sm:$0xff] }
 0x1e4   :  { %29472 = vst [vmem:[#allocation23_spill] sm:$0xff] %v22694_v47  ;;  %v22711_v46 = vadd.f32 %v3169_v45, %v29473_v40  ;;  %v22714_v12 = vadd.f32 %v3817_v5, %v22546_v2  ;;  %v17201_v2 = vld [vmem:[%s29182_s0 + $0x308] sm:$0xff]  ;;  %v17202_v5 = vld [vmem:[%s29182_s0 + $0x318] sm:$0xff] }
 0x1e5   :  { %v19200_v55 = vpop.f32.mrf.mxu0  ;;  %v19280_v15 = vpop.f32.mrf.mxu1  ;;  %19443 = vmatmul.mubr.msk.f32.gmra.mxu0 %vm165_vm1, %v17199_v25  ;;  %19523 = vmatmul.mubr.msk.f32.gmra.mxu1 %vm165_vm1, %v17316_v59  ;;  %v17318_v25 = vld [vmem:[%s29182_s0 + $0x279] sm:$0xff] }
 0x1e6   :  { %29474 = vst [vmem:[#allocation14_spill] sm:$0xff] %v22711_v46  ;;  %v22719_v36 = vadd.f32 %v19200_v55, %v29475_v27  ;;  %v22722_v47 = vadd.f32 %v19280_v15, %v22554_v53  ;;  %19445 = vmatprep.mubr.msk.f32.mxu0 %vm165_vm1, %v17200_v18  ;;  %19525 = vmatprep.mubr.msk.f32.mxu1 %vm165_vm1, %v17317_v52  ;;  %v17319_v53 = vld [vmem:[%s29182_s0 + $0x289] sm:$0xff] }
 0x1e7   :  { %v3179_v45 = vpop.f32.mrf.mxu0  ;;  %v3827_v59 = vpop.f32.mrf.mxu1  ;;  %v29477_v15 = vld [vmem:[#allocation7_spill] sm:$0xff] }
 0x1e8   :  { %v22739_v18 = vadd.f32 %v3179_v45, %v22008_v48  ;;  %v22742_v52 = vadd.f32 %v3827_v59, %v22574_v0  ;;  %v17203_v48 = vld [vmem:[%s29182_s0 + $0x320] sm:$0xff]  ;;  %v17320_v0 = vld [vmem:[%s29182_s0 + $0x291] sm:$0xff] }
 0x1e9   :  { %v19203_v40 = vpop.f32.mrf.mxu0  ;;  %v19283_v55 = vpop.f32.mrf.mxu1  ;;  %19446 = vmatmul.mubr.msk.f32.gmra.mxu0 %vm165_vm1, %v17201_v2  ;;  %19526 = vmatmul.mubr.msk.f32.gmra.mxu1 %vm165_vm1, %v17318_v25  ;;  %v17204_v45 = vld [vmem:[%s29182_s0 + $0x330] sm:$0xff] }
 0x1ea   :  { %29476 = vst [vmem:[#allocation16_spill] sm:$0xff] %v22739_v18  ;;  %v22747_v27 = vadd.f32 %v19203_v40, %v29477_v15  ;;  %v22750_v46 = vadd.f32 %v19283_v55, %v22579_v32  ;;  %19448 = vmatprep.mubr.msk.f32.mxu0 %vm165_vm1, %v17202_v5  ;;  %19528 = vmatprep.mubr.msk.f32.mxu1 %vm165_vm1, %v17319_v53  ;;  %v17321_v32 = vld [vmem:[%s29182_s0 + $0x2a1] sm:$0xff]  ;;  %v29478_v55 = vld [vmem:[#allocation8_spill] sm:$0xff] }
 0x1eb   :  { %v3189_v2 = vpop.f32.mrf.mxu0  ;;  %v3837_v25 = vpop.f32.mrf.mxu1 }
 0x1ec   :  { %v22767_v59 = vadd.f32 %v3189_v2, %v22036_v17  ;;  %v22770_v5 = vadd.f32 %v3837_v25, %v22599_v51  ;;  %v17205_v17 = vld [vmem:[%s29182_s0 + $0x338] sm:$0xff]  ;;  %v17322_v51 = vld [vmem:[%s29182_s0 + $0x2a9] sm:$0xff] }
 0x1ed   :  { %v19206_v53 = vpop.f32.mrf.mxu0  ;;  %v19286_v40 = vpop.f32.mrf.mxu1  ;;  %19449 = vmatmul.mubr.msk.f32.gmra.mxu0 %vm165_vm1, %v17203_v48  ;;  %19529 = vmatmul.mubr.msk.f32.gmra.mxu1 %vm165_vm1, %v17320_v0  ;;  %v17206_v2 = vld [vmem:[%s29182_s0 + $0x348] sm:$0xff] }
 0x1ee   :  { %v22775_v15 = vadd.f32 %v19206_v53, %v29478_v55  ;;  %v22778_v18 = vadd.f32 %v19286_v40, %v22607_v28  ;;  %19451 = vmatprep.mubr.msk.f32.mxu0 %vm165_vm1, %v17204_v45  ;;  %19531 = vmatprep.mubr.msk.f32.mxu1 %vm165_vm1, %v17321_v32  ;;  %v17323_v28 = vld [vmem:[%s29182_s0 + $0x2b9] sm:$0xff] }
 0x1ef   :  { %v3199_v48 = vpop.f32.mrf.mxu0  ;;  %v3847_v0 = vpop.f32.mrf.mxu1 }
 0x1f0   :  { %v22795_v25 = vadd.f32 %v3199_v48, %v22064_v35  ;;  %v22798_v45 = vadd.f32 %v3847_v0, %v22627_v22  ;;  %v17207_v35 = vld [vmem:[%s29182_s0 + $0x350] sm:$0xff]  ;;  %v17324_v22 = vld [vmem:[%s29182_s0 + $0x2c1] sm:$0xff] }
 0x1f1   :  { %v19209_v32 = vpop.f32.mrf.mxu0  ;;  %v19289_v53 = vpop.f32.mrf.mxu1  ;;  %19452 = vmatmul.mubr.msk.f32.gmra.mxu0 %vm165_vm1, %v17205_v17  ;;  %19532 = vmatmul.mubr.msk.f32.gmra.mxu1 %vm165_vm1, %v17322_v51 }
 0x1f2   :  { %29479 = vst [vmem:[#allocation17_spill] sm:$0xff] %v22795_v25  ;;  %v22803_v40 = vadd.f32 %v19209_v32, %v22072_v21  ;;  %v22806_v55 = vadd.f32 %v19289_v53, %v22635_v20  ;;  %19454 = vmatprep.mubr.msk.f32.mxu0 %vm165_vm1, %v17206_v2  ;;  %19534 = vmatprep.mubr.msk.f32.mxu1 %vm165_vm1, %v17323_v28  ;;  %v17325_v21 = vld [vmem:[%s29182_s0 + $0x2d1] sm:$0xff]  ;;  %v17403_v53 = vld [vmem:[%s29182_s0 + $0x3a] sm:$0xff] }
 0x1f3   :  { %v3209_v17 = vpop.f32.mrf.mxu0  ;;  %v22816_v51 = vpop.f32.mrf.mxu1  ;;  %v17402_v20 = vld [vmem:[%s29182_s0 + $0x32] sm:$0xff] }
 0x1f4   :  { %v22825_v48 = vadd.f32 %v3209_v17, %v22092_v14  ;;  %v17326_v14 = vld [vmem:[%s29182_s0 + $0x2d9] sm:$0xff] }
 0x1f5   :  { %v19212_v0 = vpop.f32.mrf.mxu0  ;;  %v19292_v2 = vpop.f32.mrf.mxu1  ;;  %19455 = vmatmul.mubr.msk.f32.gmra.mxu0 %vm165_vm1, %v17207_v35  ;;  %19535 = vmatmul.mubr.msk.f32.gmra.mxu1 %vm165_vm1, %v17324_v22 }
 0x1f6   :  { %29480 = vst [vmem:[#allocation12_spill] sm:$0xff] %v22825_v48  ;;  %v22830_v28 = vadd.f32 %v19212_v0, %v22100_v63  ;;  %v22833_v32 = vadd.f32 %v19292_v2, %v22663_v11  ;;  %19537 = vmatprep.mubr.msk.f32.mxu1 %vm165_vm1, %v17325_v21  ;;  %19557 = vmatprep.mubr.msk.f32.mxu0 %vm165_vm1, %v17402_v20  ;;  %v17327_v63 = vld [vmem:[%s29182_s0 + $0x2e9] sm:$0xff] }
 0x1f7   :  { %v3219_v35 = vpop.f32.mrf.mxu0  ;;  %v22843_v22 = vpop.f32.mrf.mxu1  ;;  %v17404_v11 = vld [vmem:[%s29182_s0 + $0x4a] sm:$0xff] }
 0x1f8   :  { %v22852_v17 = vadd.f32 %v3219_v35, %v22120_v37  ;;  %v17328_v37 = vld [vmem:[%s29182_s0 + $0x2f1] sm:$0xff] }
 0x1f9   :  { %v19215_v21 = vpop.f32.mrf.mxu0  ;;  %v19295_v20 = vpop.f32.mrf.mxu1  ;;  %19538 = vmatmul.mubr.msk.f32.gmra.mxu1 %vm165_vm1, %v17326_v14  ;;  %19558 = vmatmul.mubr.msk.f32.vlgmr.msra.gmra.mxu0 %vm165_vm1, %v17403_v53  ;;  %v17405_v14 = vld [vmem:[%s29182_s0 + $0x52] sm:$0xff] }
 0x1fa   :  { %29481 = vst [vmem:[#allocation25_spill] sm:$0xff] %v22852_v17  ;;  %v22857_v0 = vadd.f32 %v19215_v21, %v22128_v62  ;;  %v22860_v2 = vadd.f32 %v19295_v20, %v22691_v57  ;;  %19540 = vmatprep.mubr.msk.f32.mxu1 %vm165_vm1, %v17327_v63  ;;  %19560 = vmatprep.mubr.msk.f32.mxu0 %vm165_vm1, %v17404_v11  ;;  %v17329_v62 = vld [vmem:[%s29182_s0 + $0x301] sm:$0xff] }
 0x1fb   :  { %v3229_v35 = vpop.f32.mrf.mxu0  ;;  %v22870_v53 = vpop.f32.mrf.mxu1  ;;  %v17406_v57 = vld [vmem:[%s29182_s0 + $0x62] sm:$0xff] }
 0x1fc   :  { %v22879_v63 = vadd.f32 %v3229_v35, %v22148_v49  ;;  %v17330_v49 = vld [vmem:[%s29182_s0 + $0x309] sm:$0xff] }
 0x1fd   :  { %v19218_v11 = vpop.f32.mrf.mxu0  ;;  %v19298_v21 = vpop.f32.mrf.mxu1  ;;  %19541 = vmatmul.mubr.msk.f32.gmra.mxu1 %vm165_vm1, %v17328_v37  ;;  %19561 = vmatmul.mubr.msk.f32.gmra.mxu0 %vm165_vm1, %v17405_v14  ;;  %v17407_v37 = vld [vmem:[%s29182_s0 + $0x6a] sm:$0xff] }
 0x1fe   :  { %29482 = vst [vmem:[#allocation15_spill] sm:$0xff] %v22879_v63  ;;  %v22884_v20 = vadd.f32 %v19218_v11, %v22156_v41  ;;  %v22887_v17 = vadd.f32 %v19298_v21, %v22719_v36  ;;  %19543 = vmatprep.mubr.msk.f32.mxu1 %vm165_vm1, %v17329_v62  ;;  %19563 = vmatprep.mubr.msk.f32.mxu0 %vm165_vm1, %v17406_v57  ;;  %v17331_v41 = vld [vmem:[%s29182_s0 + $0x319] sm:$0xff] }
 0x1ff   :  { %v3239_v35 = vpop.f32.mrf.mxu0  ;;  %v22897_v14 = vpop.f32.mrf.mxu1  ;;  %v17408_v36 = vld [vmem:[%s29182_s0 + $0x7a] sm:$0xff] }
 0x200   :  { %v22906_v62 = vadd.f32 %v3239_v35, %v22176_v6  ;;  %v17332_v6 = vld [vmem:[%s29182_s0 + $0x321] sm:$0xff] }
 0x201   :  { %v19221_v57 = vpop.f32.mrf.mxu0  ;;  %v19301_v11 = vpop.f32.mrf.mxu1  ;;  %19544 = vmatmul.mubr.msk.f32.gmra.mxu1 %vm165_vm1, %v17330_v49  ;;  %19564 = vmatmul.mubr.msk.f32.gmra.mxu0 %vm165_vm1, %v17407_v37  ;;  %v17409_v49 = vld [vmem:[%s29182_s0 + $0x82] sm:$0xff] }
 0x202   :  { %29483 = vst [vmem:[#allocation26_spill] sm:$0xff] %v22906_v62  ;;  %v22911_v21 = vadd.f32 %v19221_v57, %v22184_v38  ;;  %v22914_v63 = vadd.f32 %v19301_v11, %v22747_v27  ;;  %19546 = vmatprep.mubr.msk.f32.mxu1 %vm165_vm1, %v17331_v41  ;;  %19566 = vmatprep.mubr.msk.f32.mxu0 %vm165_vm1, %v17408_v36  ;;  %v17333_v38 = vld [vmem:[%s29182_s0 + $0x331] sm:$0xff] }
 0x203   :  { %v3249_v35 = vpop.f32.mrf.mxu0  ;;  %v22924_v37 = vpop.f32.mrf.mxu1  ;;  %v17410_v27 = vld [vmem:[%s29182_s0 + $0x92] sm:$0xff] }
 0x204   :  { %v22933_v41 = vadd.f32 %v3249_v35, %v22204_v9  ;;  %v17334_v9 = vld [vmem:[%s29182_s0 + $0x339] sm:$0xff] }
 0x205   :  { %v19224_v36 = vpop.f32.mrf.mxu0  ;;  %v19304_v57 = vpop.f32.mrf.mxu1  ;;  %19547 = vmatmul.mubr.msk.f32.gmra.mxu1 %vm165_vm1, %v17332_v6  ;;  %19567 = vmatmul.mubr.msk.f32.gmra.mxu0 %vm165_vm1, %v17409_v49  ;;  %v17411_v6 = vld [vmem:[%s29182_s0 + $0x9a] sm:$0xff] }
 0x206   :  { %29484 = vst [vmem:[#allocation27_spill] sm:$0xff] %v22933_v41  ;;  %v22938_v11 = vadd.f32 %v19224_v36, %v22212_v8  ;;  %v22941_v62 = vadd.f32 %v19304_v57, %v22775_v15  ;;  %19549 = vmatprep.mubr.msk.f32.mxu1 %vm165_vm1, %v17333_v38  ;;  %19569 = vmatprep.mubr.msk.f32.mxu0 %vm165_vm1, %v17410_v27  ;;  %v17335_v8 = vld [vmem:[%s29182_s0 + $0x349] sm:$0xff] }
 0x207   :  { %v3259_v35 = vpop.f32.mrf.mxu0  ;;  %v22951_v49 = vpop.f32.mrf.mxu1  ;;  %v17412_v15 = vld [vmem:[%s29182_s0 + $0xaa] sm:$0xff] }
 0x208   :  { %29485 = vst [vmem:[#allocation6_spill] sm:$0xff] %v22951_v49  ;;  %v22960_v38 = vadd.f32 %v3259_v35, %v22232_v1  ;;  %v17336_v1 = vld [vmem:[%s29182_s0 + $0x351] sm:$0xff] }
 0x209   :  { %v19227_v27 = vpop.f32.mrf.mxu0  ;;  %v19307_v36 = vpop.f32.mrf.mxu1  ;;  %19550 = vmatmul.mubr.msk.f32.gmra.mxu1 %vm165_vm1, %v17334_v9  ;;  %19570 = vmatmul.mubr.msk.f32.gmra.mxu0 %vm165_vm1, %v17411_v6  ;;  %v17413_v9 = vld [vmem:[%s29182_s0 + $0xb2] sm:$0xff] }
 0x20a   :  { %29486 = vst [vmem:[#allocation24_spill] sm:$0xff] %v22960_v38  ;;  %v22965_v57 = vadd.f32 %v19227_v27, %v22240_v58  ;;  %v22968_v41 = vadd.f32 %v19307_v36, %v22803_v40  ;;  %19552 = vmatprep.mubr.msk.f32.mxu1 %vm165_vm1, %v17335_v8  ;;  %19572 = vmatprep.mubr.msk.f32.mxu0 %vm165_vm1, %v17412_v15  ;;  %v17414_v58 = vld [vmem:[%s29182_s0 + $0xc2] sm:$0xff]  ;;  %v29488_v40 = vld [vmem:[#allocation9_spill] sm:$0xff] }
 0x20b   :  { %v3269_v35 = vpop.f32.mrf.mxu0  ;;  %v22978_v6 = vpop.f32.mrf.mxu1  ;;  %v29490_v36 = vld [vmem:[#allocation10_spill] sm:$0xff] }
 0x20c   :  { %29487 = vst [vmem:[#allocation7_spill] sm:$0xff] %v22978_v6  ;;  %v22984_v27 = vadd.f32 %v3269_v35, %v29488_v40  ;;  %v17415_v6 = vld [vmem:[%s29182_s0 + $0xca] sm:$0xff] }
 0x20d   :  { %v19230_v8 = vpop.f32.mrf.mxu0  ;;  %v19310_v15 = vpop.f32.mrf.mxu1  ;;  %19553 = vmatmul.mubr.msk.f32.gmra.mxu1 %vm165_vm1, %v17336_v1  ;;  %19573 = vmatmul.mubr.msk.f32.gmra.mxu0 %vm165_vm1, %v17413_v9  ;;  %v17416_v1 = vld [vmem:[%s29182_s0 + $0xda] sm:$0xff]  ;;  %v29492_v9 = vld [vmem:[#allocation11_spill] sm:$0xff] }
 0x20e   :  { %29489 = vst [vmem:[#allocation8_spill] sm:$0xff] %v22984_v27  ;;  %v22989_v38 = vadd.f32 %v19230_v8, %v29490_v36  ;;  %v22992_v48 = vadd.f32 %v19310_v15, %v22830_v28  ;;  %19575 = vmatprep.mubr.msk.f32.mxu0 %vm165_vm1, %v17414_v58  ;;  %v29494_v28 = vld [vmem:[#allocation13_spill] sm:$0xff] }
 0x20f   :  { %v3279_v35 = vpop.f32.mrf.mxu0  ;;  %v22998_v40 = vpop.f32.mrf.mxu1 }
 0x210   :  { %29491 = vst [vmem:[#allocation9_spill] sm:$0xff] %v22998_v40  ;;  %v23004_v27 = vadd.f32 %v3279_v35, %v29492_v9  ;;  %v17417_v40 = vld [vmem:[%s29182_s0 + $0xe2] sm:$0xff]  ;;  %v17418_v35 = vld [vmem:[%s29182_s0 + $0xf2] sm:$0xff] }
 0x211   :  { %v19233_v8 = vpop.f32.mrf.mxu0  ;;  %v19313_v36 = vpop.f32.mrf.mxu1  ;;  %19576 = vmatmul.mubr.msk.f32.gmra.mxu0 %vm165_vm1, %v17415_v6 }
 0x212   :  { %29493 = vst [vmem:[#allocation10_spill] sm:$0xff] %v23004_v27  ;;  %v23008_v58 = vadd.f32 %v19233_v8, %v29494_v28  ;;  %v23011_v15 = vadd.f32 %v19313_v36, %v22857_v0  ;;  %19578 = vmatprep.mubr.msk.f32.mxu0 %vm165_vm1, %v17416_v1  ;;  %v17419_v36 = vld [vmem:[%s29182_s0 + $0xfa] sm:$0xff] }
 0x213   :  { %v3289_v49 = vpop.f32.mrf.mxu0  ;;  %v23017_v25 = vpop.f32.mrf.mxu1 }
 0x214   :  { %v23023_v6 = vadd.f32 %v3289_v49, %v22318_v42  ;;  %v17420_v42 = vld [vmem:[%s29182_s0 + $0x10a] sm:$0xff] }
 0x215   :  { %v19236_v9 = vpop.f32.mrf.mxu0  ;;  %v19316_v8 = vpop.f32.mrf.mxu1  ;;  %19579 = vmatmul.mubr.msk.f32.gmra.mxu0 %vm165_vm1, %v17417_v40 }
 0x216   :  { %29495 = vst [vmem:[#allocation11_spill] sm:$0xff] %v23023_v6  ;;  %v23027_v0 = vadd.f32 %v19236_v9, %v22327_v60  ;;  %v23030_v1 = vadd.f32 %v19316_v8, %v22884_v20  ;;  %19581 = vmatprep.mubr.msk.f32.mxu0 %vm165_vm1, %v17418_v35  ;;  %v17421_v9 = vld [vmem:[%s29182_s0 + $0x112] sm:$0xff] }
 0x217   :  { %v3299_v28 = vpop.f32.mrf.mxu0  ;;  %v23036_v27 = vpop.f32.mrf.mxu1 }
 0x218   :  { %v23042_v49 = vadd.f32 %v3299_v28, %v22348_v29  ;;  %v17422_v29 = vld [vmem:[%s29182_s0 + $0x122] sm:$0xff] }
 0x219   :  { %v19239_v60 = vpop.f32.mrf.mxu0  ;;  %v19319_v40 = vpop.f32.mrf.mxu1  ;;  %19582 = vmatmul.mubr.msk.f32.gmra.mxu0 %vm165_vm1, %v17419_v36 }
 0x21a   :  { %29496 = vst [vmem:[#allocation13_spill] sm:$0xff] %v23042_v49  ;;  %v23046_v20 = vadd.f32 %v19239_v60, %v22357_v19  ;;  %v23049_v35 = vadd.f32 %v19319_v40, %v22911_v21  ;;  %19584 = vmatprep.mubr.msk.f32.mxu0 %vm165_vm1, %v17420_v42  ;;  %v17423_v60 = vld [vmem:[%s29182_s0 + $0x12a] sm:$0xff] }
 0x21b   :  { %v3309_v8 = vpop.f32.mrf.mxu0  ;;  %v23055_v6 = vpop.f32.mrf.mxu1 }
 0x21c   :  { %v23061_v36 = vadd.f32 %v3309_v8, %v22378_v10  ;;  %v17424_v10 = vld [vmem:[%s29182_s0 + $0x13a] sm:$0xff] }
 0x21d   :  { %v19242_v19 = vpop.f32.mrf.mxu0  ;;  %v19322_v28 = vpop.f32.mrf.mxu1  ;;  %19585 = vmatmul.mubr.msk.f32.gmra.mxu0 %vm165_vm1, %v17421_v9 }
 0x21e   :  { %29497 = vst [vmem:[#allocation28_spill] sm:$0xff] %v23061_v36  ;;  %v23065_v21 = vadd.f32 %v19242_v19, %v22387_v61  ;;  %v23068_v42 = vadd.f32 %v19322_v28, %v22938_v11  ;;  %19587 = vmatprep.mubr.msk.f32.mxu0 %vm165_vm1, %v17422_v29  ;;  %v17425_v19 = vld [vmem:[%s29182_s0 + $0x142] sm:$0xff] }
 0x21f   :  { %v3319_v40 = vpop.f32.mrf.mxu0  ;;  %v23074_v49 = vpop.f32.mrf.mxu1 }
 0x220   :  { %v23080_v9 = vadd.f32 %v3319_v40, %v22406_v23  ;;  %v17426_v23 = vld [vmem:[%s29182_s0 + $0x152] sm:$0xff] }
 0x221   :  { %v19245_v61 = vpop.f32.mrf.mxu0  ;;  %v19325_v8 = vpop.f32.mrf.mxu1  ;;  %19588 = vmatmul.mubr.msk.f32.gmra.mxu0 %vm165_vm1, %v17423_v60 }
 0x222   :  { %29498 = vst [vmem:[#allocation29_spill] sm:$0xff] %v23080_v9  ;;  %v23084_v11 = vadd.f32 %v19245_v61, %v22411_v31  ;;  %v23087_v29 = vadd.f32 %v19325_v8, %v22965_v57  ;;  %19590 = vmatprep.mubr.msk.f32.mxu0 %vm165_vm1, %v17424_v10  ;;  %v17427_v61 = vld [vmem:[%s29182_s0 + $0x15a] sm:$0xff] }
 0x223   :  { %v3329_v28 = vpop.f32.mrf.mxu0  ;;  %v23093_v36 = vpop.f32.mrf.mxu1 }
 0x224   :  { %v23099_v60 = vadd.f32 %v3329_v28, %v22431_v16  ;;  %v17428_v16 = vld [vmem:[%s29182_s0 + $0x16a] sm:$0xff] }
 0x225   :  { %v19248_v31 = vpop.f32.mrf.mxu0  ;;  %v19328_v40 = vpop.f32.mrf.mxu1  ;;  %19591 = vmatmul.mubr.msk.f32.gmra.mxu0 %vm165_vm1, %v17425_v19 }
 0x226   :  { %29499 = vst [vmem:[#allocation30_spill] sm:$0xff] %v23099_v60  ;;  %v23103_v57 = vadd.f32 %v19248_v31, %v22439_v13  ;;  %v23106_v10 = vadd.f32 %v19328_v40, %v22989_v38  ;;  %19593 = vmatprep.mubr.msk.f32.mxu0 %vm165_vm1, %v17426_v23  ;;  %v17429_v31 = vld [vmem:[%s29182_s0 + $0x172] sm:$0xff] }
 0x227   :  { %v3339_v8 = vpop.f32.mrf.mxu0  ;;  %v23112_v9 = vpop.f32.mrf.mxu1 }
 0x228   :  { %v23118_v19 = vadd.f32 %v3339_v8, %v22459_v26  ;;  %v17430_v26 = vld [vmem:[%s29182_s0 + $0x182] sm:$0xff] }
 0x229   :  { %v19251_v13 = vpop.f32.mrf.mxu0  ;;  %v19331_v28 = vpop.f32.mrf.mxu1  ;;  %19594 = vmatmul.mubr.msk.f32.gmra.mxu0 %vm165_vm1, %v17427_v61 }
 0x22a   :  { %29500 = vst [vmem:[#allocation31_spill] sm:$0xff] %v23118_v19  ;;  %v23122_v38 = vadd.f32 %v19251_v13, %v22467_v43  ;;  %v23125_v23 = vadd.f32 %v19331_v28, %v23008_v58  ;;  %19596 = vmatprep.mubr.msk.f32.mxu0 %vm165_vm1, %v17428_v16  ;;  %v17431_v13 = vld [vmem:[%s29182_s0 + $0x18a] sm:$0xff] }
 0x22b   :  { %v3349_v40 = vpop.f32.mrf.mxu0  ;;  %v23131_v60 = vpop.f32.mrf.mxu1 }
 0x22c   :  { %v23137_v61 = vadd.f32 %v3349_v40, %v22487_v34  ;;  %v17432_v34 = vld [vmem:[%s29182_s0 + $0x19a] sm:$0xff] }
 0x22d   :  { %v19254_v43 = vpop.f32.mrf.mxu0  ;;  %v19334_v8 = vpop.f32.mrf.mxu1  ;;  %19597 = vmatmul.mubr.msk.f32.gmra.mxu0 %vm165_vm1, %v17429_v31 }
 0x22e   :  { %29501 = vst [vmem:[#allocation32_spill] sm:$0xff] %v23137_v61  ;;  %v23141_v58 = vadd.f32 %v19254_v43, %v22495_v56  ;;  %v23144_v16 = vadd.f32 %v19334_v8, %v23027_v0  ;;  %19599 = vmatprep.mubr.msk.f32.mxu0 %vm165_vm1, %v17430_v26  ;;  %v17433_v43 = vld [vmem:[%s29182_s0 + $0x1a2] sm:$0xff] }
 0x22f   :  { %v3359_v28 = vpop.f32.mrf.mxu0  ;;  %v23150_v19 = vpop.f32.mrf.mxu1 }
 0x230   :  { %v23156_v31 = vadd.f32 %v3359_v28, %v22515_v7  ;;  %v17434_v7 = vld [vmem:[%s29182_s0 + $0x1e2] sm:$0xff] }
 0x231   :  { %v19257_v56 = vpop.f32.mrf.mxu0  ;;  %v19337_v40 = vpop.f32.mrf.mxu1  ;;  %19600 = vmatmul.mubr.msk.f32.gmra.mxu0 %vm165_vm1, %v17431_v13 }
 0x232   :  { %29502 = vst [vmem:[#allocation33_spill] sm:$0xff] %v23156_v31  ;;  %v23160_v0 = vadd.f32 %v19257_v56, %v22523_v3  ;;  %v23163_v26 = vadd.f32 %v19337_v40, %v23046_v20  ;;  %19602 = vmatprep.mubr.msk.f32.mxu0 %vm165_vm1, %v17432_v34  ;;  %v17435_v56 = vld [vmem:[%s29182_s0 + $0x1ea] sm:$0xff] }
 0x233   :  { %v3369_v8 = vpop.f32.mrf.mxu0  ;;  %v23169_v61 = vpop.f32.mrf.mxu1 }
 0x234   :  { %v23175_v13 = vadd.f32 %v3369_v8, %v22543_v54  ;;  %v17436_v54 = vld [vmem:[%s29182_s0 + $0x1fa] sm:$0xff] }
 0x235   :  { %v19260_v3 = vpop.f32.mrf.mxu0  ;;  %v19340_v28 = vpop.f32.mrf.mxu1  ;;  %19603 = vmatmul.mubr.msk.f32.gmra.mxu0 %vm165_vm1, %v17433_v43 }
 0x236   :  { %v23179_v20 = vadd.f32 %v19260_v3, %v22551_v24  ;;  %v23182_v34 = vadd.f32 %v19340_v28, %v23065_v21  ;;  %19605 = vmatprep.mubr.msk.f32.mxu0 %vm165_vm1, %v17434_v7  ;;  %v17437_v3 = vld [vmem:[%s29182_s0 + $0x202] sm:$0xff] }
 0x237   :  { %v3379_v40 = vpop.f32.mrf.mxu0  ;;  %v23188_v31 = vpop.f32.mrf.mxu1 }
 0x238   :  { %v23194_v43 = vadd.f32 %v3379_v40, %v22571_v4  ;;  %v17438_v40 = vld [vmem:[%s29182_s0 + $0x212] sm:$0xff] }
 0x239   :  { %v19343_v24 = vpop.f32.mrf.mxu1  ;;  %v19363_v8 = vpop.f32.mrf.mxu0  ;;  %19606 = vmatmul.mubr.msk.f32.gmra.mxu0 %vm165_vm1, %v17435_v56 }
 0x23a   :  { %29503 = vst [vmem:[#allocation34_spill] sm:$0xff] %v23194_v43  ;;  %v23198_v21 = vadd.f32 %v19343_v24, %v23084_v11  ;;  %v23201_v7 = vadd.f32 %v19363_v8, %v22582_v30  ;;  %19608 = vmatprep.mubr.msk.f32.mxu0 %vm165_vm1, %v17436_v54  ;;  %v29506_v54 = vld [vmem:[#allocation18_spill] sm:$0xff] }
 0x23b   :  { %v23207_v28 = vpop.f32.mrf.mxu1  ;;  %v4486_v4 = vpop.f32.mrf.mxu0 }
 0x23c   :  { %29504 = vst [vmem:[#allocation35_spill] sm:$0xff] %v23201_v7  ;;  %v23213_v56 = vadd.f32 %v4486_v4, %v22602_v44  ;;  %v17439_v7 = vld [vmem:[%s29182_s0 + $0x21a] sm:$0xff]  ;;  %v17440_v4 = vld [vmem:[%s29182_s0 + $0x22a] sm:$0xff] }
 0x23d   :  { %v19346_v11 = vpop.f32.mrf.mxu1  ;;  %v19366_v24 = vpop.f32.mrf.mxu0  ;;  %19609 = vmatmul.mubr.msk.f32.gmra.mxu0 %vm165_vm1, %v17437_v3 }
 0x23e   :  { %29505 = vst [vmem:[#allocation36_spill] sm:$0xff] %v23213_v56  ;;  %v23217_v30 = vadd.f32 %v19346_v11, %v23103_v57  ;;  %v23220_v8 = vadd.f32 %v19366_v24, %v29506_v54  ;;  %19611 = vmatprep.mubr.msk.f32.mxu0 %vm165_vm1, %v17438_v40  ;;  %v29509_v24 = vld [vmem:[#allocation19_spill] sm:$0xff] }
 0x23f   :  { %v23226_v43 = vpop.f32.mrf.mxu1  ;;  %v4496_v44 = vpop.f32.mrf.mxu0 }
 0x240   :  { %29507 = vst [vmem:[#allocation18_spill] sm:$0xff] %v23220_v8  ;;  %v23232_v3 = vadd.f32 %v4496_v44, %v22630_v39  ;;  %v17441_v8 = vld [vmem:[%s29182_s0 + $0x232] sm:$0xff]  ;;  %v17442_v44 = vld [vmem:[%s29182_s0 + $0x242] sm:$0xff] }
 0x241   :  { %v19349_v57 = vpop.f32.mrf.mxu1  ;;  %v19369_v11 = vpop.f32.mrf.mxu0  ;;  %19612 = vmatmul.mubr.msk.f32.gmra.mxu0 %vm165_vm1, %v17439_v7 }
 0x242   :  { %29508 = vst [vmem:[#allocation37_spill] sm:$0xff] %v23232_v3  ;;  %v23236_v40 = vadd.f32 %v19349_v57, %v23122_v38  ;;  %v23239_v54 = vadd.f32 %v19369_v11, %v29509_v24  ;;  %19614 = vmatprep.mubr.msk.f32.mxu0 %vm165_vm1, %v17440_v4  ;;  %v29512_v11 = vld [vmem:[#allocation21_spill] sm:$0xff] }
 0x243   :  { %v23245_v56 = vpop.f32.mrf.mxu1  ;;  %v4506_v39 = vpop.f32.mrf.mxu0 }
 0x244   :  { %29510 = vst [vmem:[#allocation19_spill] sm:$0xff] %v23239_v54  ;;  %v23251_v7 = vadd.f32 %v4506_v39, %v22658_v33  ;;  %v17443_v54 = vld [vmem:[%s29182_s0 + $0x24a] sm:$0xff]  ;;  %v17444_v39 = vld [vmem:[%s29182_s0 + $0x25a] sm:$0xff] }
 0x245   :  { %v19352_v38 = vpop.f32.mrf.mxu1  ;;  %v19372_v57 = vpop.f32.mrf.mxu0  ;;  %19615 = vmatmul.mubr.msk.f32.gmra.mxu0 %vm165_vm1, %v17441_v8 }
 0x246   :  { %29511 = vst [vmem:[#allocation38_spill] sm:$0xff] %v23251_v7  ;;  %v23255_v4 = vadd.f32 %v19352_v38, %v23141_v58  ;;  %v23258_v24 = vadd.f32 %v19372_v57, %v29512_v11  ;;  %19617 = vmatprep.mubr.msk.f32.mxu0 %vm165_vm1, %v17442_v44  ;;  %v29515_v57 = vld [vmem:[#allocation23_spill] sm:$0xff] }
 0x247   :  { %v23264_v3 = vpop.f32.mrf.mxu1  ;;  %v4516_v33 = vpop.f32.mrf.mxu0 }
 0x248   :  { %29513 = vst [vmem:[#allocation21_spill] sm:$0xff] %v23258_v24  ;;  %v23270_v8 = vadd.f32 %v4516_v33, %v22686_v50  ;;  %v17445_v24 = vld [vmem:[%s29182_s0 + $0x262] sm:$0xff]  ;;  %v17446_v33 = vld [vmem:[%s29182_s0 + $0x272] sm:$0xff] }
 0x249   :  { %v19355_v58 = vpop.f32.mrf.mxu1  ;;  %v19375_v38 = vpop.f32.mrf.mxu0  ;;  %19618 = vmatmul.mubr.msk.f32.gmra.mxu0 %vm165_vm1, %v17443_v54 }
 0x24a   :  { %29514 = vst [vmem:[#allocation39_spill] sm:$0xff] %v23270_v8  ;;  %v23274_v44 = vadd.f32 %v19355_v58, %v23160_v0  ;;  %v23277_v11 = vadd.f32 %v19375_v38, %v29515_v57  ;;  %19620 = vmatprep.mubr.msk.f32.mxu0 %vm165_vm1, %v17444_v39  ;;  %v17447_v57 = vld [vmem:[%s29182_s0 + $0x27a] sm:$0xff] }
 0x24b   :  { %v23283_v7 = vpop.f32.mrf.mxu1  ;;  %v4526_v50 = vpop.f32.mrf.mxu0 }
 0x24c   :  { %29516 = vst [vmem:[#allocation23_spill] sm:$0xff] %v23277_v11  ;;  %v23289_v54 = vadd.f32 %v4526_v50, %v22714_v12  ;;  %v17448_v50 = vld [vmem:[%s29182_s0 + $0x28a] sm:$0xff] }
 0x24d   :  { %v19358_v0 = vpop.f32.mrf.mxu1  ;;  %v19378_v58 = vpop.f32.mrf.mxu0  ;;  %19621 = vmatmul.mubr.msk.f32.gmra.mxu0 %vm165_vm1, %v17445_v24 }
 0x24e   :  { %29517 = vst [vmem:[#allocation40_spill] sm:$0xff] %v23289_v54  ;;  %v23293_v39 = vadd.f32 %v19358_v0, %v23179_v20  ;;  %v23296_v38 = vadd.f32 %v19378_v58, %v22722_v47  ;;  %19623 = vmatprep.mubr.msk.f32.mxu0 %vm165_vm1, %v17446_v33  ;;  %v17449_v33 = vld [vmem:[%s29182_s0 + $0x292] sm:$0xff] }
 0x24f   :  { %v23302_v11 = vpop.f32.mrf.mxu1  ;;  %v4536_v12 = vpop.f32.mrf.mxu0 }
 0x250   :  { %29518 = vst [vmem:[#allocation41_spill] sm:$0xff] %v23296_v38  ;;  %v23308_v24 = vadd.f32 %v4536_v12, %v22742_v52  ;;  %v17450_v52 = vld [vmem:[%s29182_s0 + $0x2a2] sm:$0xff] }
 0x251   :  { %v19381_v20 = vpop.f32.mrf.mxu0  ;;  %v23310_v0 = vpop.f32.mrf.mxu1  ;;  %19624 = vmatmul.mubr.msk.f32.gmra.mxu0 %vm165_vm1, %v17447_v57 }
 0x252   :  { %29519 = vst [vmem:[#allocation42_spill] sm:$0xff] %v23308_v24  ;;  %v23314_v47 = vadd.f32 %v19381_v20, %v22750_v46  ;;  %19626 = vmatprep.mubr.msk.f32.mxu0 %vm165_vm1, %v17448_v50  ;;  %v17451_v50 = vld [vmem:[%s29182_s0 + $0x2aa] sm:$0xff] }
 0x253   :  { %v4546_v58 = vpop.f32.mrf.mxu0  ;;  %v23320_v38 = vpop.f32.mrf.mxu1 }
 0x254   :  { %29520 = vst [vmem:[#allocation43_spill] sm:$0xff] %v23314_v47  ;;  %v23326_v12 = vadd.f32 %v4546_v58, %v22770_v5  ;;  %v17452_v5 = vld [vmem:[%s29182_s0 + $0x2ba] sm:$0xff] }
 0x255   :  { %v19384_v57 = vpop.f32.mrf.mxu0  ;;  %v23328_v24 = vpop.f32.mrf.mxu1  ;;  %19627 = vmatmul.mubr.msk.f32.gmra.mxu0 %vm165_vm1, %v17449_v33 }
 0x256   :  { %29521 = vst [vmem:[#allocation44_spill] sm:$0xff] %v23326_v12  ;;  %v23332_v46 = vadd.f32 %v19384_v57, %v22778_v18  ;;  %19629 = vmatprep.mubr.msk.f32.mxu0 %vm165_vm1, %v17450_v52  ;;  %v17453_v52 = vld [vmem:[%s29182_s0 + $0x2c2] sm:$0xff] }
 0x257   :  { %v4556_v20 = vpop.f32.mrf.mxu0  ;;  %v23338_v47 = vpop.f32.mrf.mxu1 }
 0x258   :  { %29522 = vst [vmem:[#allocation45_spill] sm:$0xff] %v23332_v46  ;;  %v23344_v58 = vadd.f32 %v4556_v20, %v22798_v45  ;;  %v17454_v45 = vld [vmem:[%s29182_s0 + $0x2d2] sm:$0xff] }
 0x259   :  { %v19387_v33 = vpop.f32.mrf.mxu0  ;;  %v23346_v12 = vpop.f32.mrf.mxu1  ;;  %19630 = vmatmul.mubr.msk.f32.gmra.mxu0 %vm165_vm1, %v17451_v50  ;;  %v17455_v50 = vld [vmem:[%s29182_s0 + $0x2da] sm:$0xff] }
 0x25a   :  { %29523 = vst [vmem:[#allocation46_spill] sm:$0xff] %v23344_v58  ;;  %v23350_v18 = vadd.f32 %v19387_v33, %v22806_v55  ;;  %19632 = vmatprep.mubr.msk.f32.mxu0 %vm165_vm1, %v17452_v5 }
 0x25b   :  { %v23356_v57 = vpop.f32.mrf.mxu0  ;;  %v23358_v46 = vpop.f32.mrf.mxu1 }
 0x25c   :  { %29524 = vst [vmem:[#allocation47_spill] sm:$0xff] %v23350_v18  ;;  %v17456_v18 = vld [vmem:[%s29182_s0 + $0x2ea] sm:$0xff] }
 0x25d   :  { %v19390_v20 = vpop.f32.mrf.mxu0  ;;  %v23363_v58 = vpop.f32.mrf.mxu1  ;;  %19633 = vmatmul.mubr.msk.f32.gmra.mxu0 %vm165_vm1, %v17453_v52  ;;  %v17457_v52 = vld [vmem:[%s29182_s0 + $0x2f2] sm:$0xff] }
 0x25e   :  { %v23367_v55 = vadd.f32 %v19390_v20, %v22833_v32  ;;  %19635 = vmatprep.mubr.msk.f32.mxu0 %vm165_vm1, %v17454_v45 }
 0x25f   :  { %v23373_v5 = vpop.f32.mrf.mxu0  ;;  %v23375_v33 = vpop.f32.mrf.mxu1 }
 0x260   :  { %29525 = vst [vmem:[#allocation48_spill] sm:$0xff] %v23367_v55  ;;  %29526 = vst [vmem:[#allocation49_spill] sm:$0xff] %v23375_v33  ;;  %v17458_v55 = vld [vmem:[%s29182_s0 + $0x302] sm:$0xff] }
 0x261   :  { %v19393_v54 = vpop.f32.mrf.mxu0  ;;  %v23380_v8 = vpop.f32.mrf.mxu1  ;;  %19636 = vmatmul.mubr.msk.f32.gmra.mxu0 %vm165_vm1, %v17455_v50 }
 0x262   :  { %29527 = vst [vmem:[#allocation50_spill] sm:$0xff] %v23380_v8  ;;  %v23384_v32 = vadd.f32 %v19393_v54, %v22860_v2  ;;  %19638 = vmatprep.mubr.msk.f32.mxu0 %vm165_vm1, %v17456_v18  ;;  %v17459_v54 = vld [vmem:[%s29182_s0 + $0x30a] sm:$0xff] }
 0x263   :  { %v23390_v45 = vpop.f32.mrf.mxu0  ;;  %v23392_v20 = vpop.f32.mrf.mxu1 }
 0x264   :  { %29528 = vst [vmem:[#allocation51_spill] sm:$0xff] %v23384_v32  ;;  %29529 = vst [vmem:[#allocation52_spill] sm:$0xff] %v23392_v20  ;;  %v17460_v32 = vld [vmem:[%s29182_s0 + $0x31a] sm:$0xff] }
 0x265   :  { %v19396_v8 = vpop.f32.mrf.mxu0  ;;  %v23397_v33 = vpop.f32.mrf.mxu1  ;;  %19639 = vmatmul.mubr.msk.f32.gmra.mxu0 %vm165_vm1, %v17457_v52 }
 0x266   :  { %29530 = vst [vmem:[#allocation53_spill] sm:$0xff] %v23397_v33  ;;  %v23401_v2 = vadd.f32 %v19396_v8, %v22887_v17  ;;  %19641 = vmatprep.mubr.msk.f32.mxu0 %vm165_vm1, %v17458_v55  ;;  %v17461_v8 = vld [vmem:[%s29182_s0 + $0x322] sm:$0xff] }
 0x267   :  { %v23407_v18 = vpop.f32.mrf.mxu0  ;;  %v23409_v50 = vpop.f32.mrf.mxu1 }
 0x268   :  { %29531 = vst [vmem:[#allocation54_spill] sm:$0xff] %v23401_v2  ;;  %29532 = vst [vmem:[#allocation55_spill] sm:$0xff] %v23409_v50  ;;  %v17462_v2 = vld [vmem:[%s29182_s0 + $0x332] sm:$0xff] }
 0x269   :  { %v19399_v33 = vpop.f32.mrf.mxu0  ;;  %v23414_v20 = vpop.f32.mrf.mxu1  ;;  %19642 = vmatmul.mubr.msk.f32.gmra.mxu0 %vm165_vm1, %v17459_v54 }
 0x26a   :  { %29533 = vst [vmem:[#allocation56_spill] sm:$0xff] %v23414_v20  ;;  %v23418_v17 = vadd.f32 %v19399_v33, %v22914_v63  ;;  %19644 = vmatprep.mubr.msk.f32.mxu0 %vm165_vm1, %v17460_v32  ;;  %v17463_v33 = vld [vmem:[%s29182_s0 + $0x33a] sm:$0xff] }
 0x26b   :  { %v23424_v55 = vpop.f32.mrf.mxu0  ;;  %v23426_v52 = vpop.f32.mrf.mxu1 }
 0x26c   :  { %29534 = vst [vmem:[#allocation57_spill] sm:$0xff] %v23418_v17  ;;  %29535 = vst [vmem:[#allocation58_spill] sm:$0xff] %v23426_v52  ;;  %v17464_v17 = vld [vmem:[%s29182_s0 + $0x34a] sm:$0xff] }
 0x26d   :  { %v19402_v20 = vpop.f32.mrf.mxu0  ;;  %v23431_v50 = vpop.f32.mrf.mxu1  ;;  %19645 = vmatmul.mubr.msk.f32.gmra.mxu0 %vm165_vm1, %v17461_v8 }
 0x26e   :  { %29536 = vst [vmem:[#allocation59_spill] sm:$0xff] %v23431_v50  ;;  %v23435_v63 = vadd.f32 %v19402_v20, %v22941_v62  ;;  %19647 = vmatprep.mubr.msk.f32.mxu0 %vm165_vm1, %v17462_v2  ;;  %v17465_v20 = vld [vmem:[%s29182_s0 + $0x352] sm:$0xff]  ;;  %s19916_s0 = scalar_lea.vmem %s16555_s23, 32 }
 0x26f   :  { %v23441_v32 = vpop.f32.mrf.mxu0  ;;  %v23443_v54 = vpop.f32.mrf.mxu1  ;;  %p19917_p0 = scmp.ne.s32.totalorder %s16555_s23, %s19916_s0  ;;  %p19922_p2 = scmp.lt.s32.totalorder %s19916_s0, %s19916_s0 }
 0x270   :  { %29537 = vst [vmem:[#allocation60_spill] sm:$0xff] %v23435_v63  ;;  %29538 = vst [vmem:[#allocation61_spill] sm:$0xff] %v23441_v32 }
 0x271   :  { %29539 = vst [vmem:[#allocation62_spill] sm:$0xff] %v23443_v54  ;;  %v19405_v50 = vpop.f32.mrf.mxu0  ;;  %v23448_v52 = vpop.f32.mrf.mxu1  ;;  %19648 = vmatmul.mubr.msk.f32.gmra.mxu0 %vm165_vm1, %v17463_v33  ;;  %p19923_p3 = por %p19922_p2, %p19921_p1 }
 0x272   :  { %29540 = vst [vmem:[#allocation63_spill] sm:$0xff] %v23448_v52  ;;  %v23452_v62 = vadd.f32 %v19405_v50, %v22968_v41  ;;  %19650 = vmatprep.mubr.msk.f32.mxu0 %vm165_vm1, %v17464_v17 }
 0x273   :  { %v23458_v2 = vpop.f32.mrf.mxu0  ;;  %v23460_v8 = vpop.f32.mrf.mxu1  ;;  %p19924_p4 = pnand %p19923_p3, %p19917_p0 }
 0x274   :  { %29541 = vst [vmem:[#allocation64_spill] sm:$0xff] %v23452_v62  ;;  %29542 = vst [vmem:[#allocation65_spill] sm:$0xff] %v23458_v2 }
 0x275   :  { %29543 = vst [vmem:[#allocation66_spill] sm:$0xff] %v23460_v8  ;;  %v19408_v63 = vpop.f32.mrf.mxu0  ;;  %v23462_v54 = vpop.f32.mrf.mxu1  ;;  %19651 = vmatmul.mubr.msk.f32.gmra.mxu0 %vm165_vm1, %v17465_v20  ;;  %vm16435_vm1 = vcmask 523264  }
 0x276   :  { %29544 = vst [vmem:[#allocation67_spill] sm:$0xff] %v23462_v54  ;;  %v23466_v33 = vadd.f32 %v19408_v63, %v22992_v48 }
 0x277   :  { %v23468_v41 = vpop.f32.mrf.mxu0  ;;  %v23470_v50 = vpop.f32.mrf.mxu1 }
 0x278   :  { %29545 = vst [vmem:[#allocation68_spill] sm:$0xff] %v23466_v33  ;;  %29546 = vst [vmem:[#allocation69_spill] sm:$0xff] %v23470_v50 }
 0x279   :  { %v19411_v17 = vpop.f32.mrf.mxu0  ;;  %v23472_v62 = vpop.f32.mrf.mxu1 }
 0x27a   :  { %v23475_v52 = vadd.f32 %v19411_v17, %v23011_v15 }
 0x27b   :  { %v23477_v2 = vpop.f32.mrf.mxu0  ;;  %v23479_v8 = vpop.f32.mrf.mxu1 }
 0x27c   :  { %29547 = vst [vmem:[#allocation70_spill] sm:$0xff] %v23475_v52  ;;  %29548 = vst [vmem:[#allocation71_spill] sm:$0xff] %v23477_v2 }
 0x27d   :  { %29549 = vst [vmem:[#allocation72_spill] sm:$0xff] %v23479_v8  ;;  %v19414_v54 = vpop.f32.mrf.mxu0  ;;  %v23481_v32 = vpop.f32.mrf.mxu1 }
 0x27e   :  { %v23484_v48 = vadd.f32 %v19414_v54, %v23030_v1 }
 0x27f   :  { %v23486_v63 = vpop.f32.mrf.mxu0  ;;  %v23488_v20 = vpop.f32.mrf.mxu1 }
 0x280   :  { %29550 = vst [vmem:[#allocation73_spill] sm:$0xff] %v23484_v48  ;;  %29551 = vst [vmem:[#allocation74_spill] sm:$0xff] %v23486_v63 }
 0x281   :  { %29552 = vst [vmem:[#allocation75_spill] sm:$0xff] %v23488_v20  ;;  %v19417_v33 = vpop.f32.mrf.mxu0  ;;  %v23490_v50 = vpop.f32.mrf.mxu1 }
 0x282   :  { %v23493_v15 = vadd.f32 %v19417_v33, %v23049_v35 }
 0x283   :  { %v23495_v17 = vpop.f32.mrf.mxu0  ;;  %v23497_v52 = vpop.f32.mrf.mxu1 }
 0x284   :  { %29553 = vst [vmem:[#allocation76_spill] sm:$0xff] %v23493_v15  ;;  %29554 = vst [vmem:[#allocation77_spill] sm:$0xff] %v23495_v17 }
 0x285   :  { %29555 = vst [vmem:[#allocation78_spill] sm:$0xff] %v23497_v52  ;;  %v19420_v8 = vpop.f32.mrf.mxu0  ;;  %v23499_v2 = vpop.f32.mrf.mxu1 }
 0x286   :  { %v23502_v1 = vadd.f32 %v19420_v8, %v23068_v42 }
 0x287   :  { %v23504_v54 = vpop.f32.mrf.mxu0  ;;  %v23506_v48 = vpop.f32.mrf.mxu1 }
 0x288   :  { %29556 = vst [vmem:[#allocation79_spill] sm:$0xff] %v23502_v1  ;;  %29557 = vst [vmem:[#allocation80_spill] sm:$0xff] %v23504_v54 }
 0x289   :  { %29558 = vst [vmem:[#allocation81_spill] sm:$0xff] %v23506_v48  ;;  %v19423_v20 = vpop.f32.mrf.mxu0  ;;  %v23508_v63 = vpop.f32.mrf.mxu1 }
 0x28a   :  { %v23511_v35 = vadd.f32 %v19423_v20, %v23087_v29 }
 0x28b   :  { %v23513_v33 = vpop.f32.mrf.mxu0  ;;  %v23515_v15 = vpop.f32.mrf.mxu1 }
 0x28c   :  { %29559 = vst [vmem:[#allocation82_spill] sm:$0xff] %v23511_v35  ;;  %29560 = vst [vmem:[#allocation83_spill] sm:$0xff] %v23513_v33 }
 0x28d   :  { %29561 = vst [vmem:[#allocation84_spill] sm:$0xff] %v23515_v15  ;;  %v19426_v52 = vpop.f32.mrf.mxu0  ;;  %v23517_v17 = vpop.f32.mrf.mxu1 }
 0x28e   :  { %v23520_v42 = vadd.f32 %v19426_v52, %v23106_v10 }
 0x28f   :  { %v23522_v8 = vpop.f32.mrf.mxu0  ;;  %v23524_v1 = vpop.f32.mrf.mxu1 }
 0x290   :  { %29562 = vst [vmem:[#allocation85_spill] sm:$0xff] %v23520_v42  ;;  %29563 = vst [vmem:[#allocation86_spill] sm:$0xff] %v23522_v8 }
 0x291   :  { %29564 = vst [vmem:[#allocation87_spill] sm:$0xff] %v23524_v1  ;;  %v19429_v48 = vpop.f32.mrf.mxu0  ;;  %v23526_v54 = vpop.f32.mrf.mxu1 }
 0x292   :  { %v23529_v29 = vadd.f32 %v19429_v48, %v23125_v23 }
 0x293   :  { %v23531_v20 = vpop.f32.mrf.mxu0  ;;  %v23533_v35 = vpop.f32.mrf.mxu1 }
 0x294   :  { %29565 = vst [vmem:[#allocation88_spill] sm:$0xff] %v23529_v29  ;;  %29566 = vst [vmem:[#allocation89_spill] sm:$0xff] %v23531_v20 }
 0x295   :  { %29567 = vst [vmem:[#allocation90_spill] sm:$0xff] %v23533_v35  ;;  %v19432_v15 = vpop.f32.mrf.mxu0  ;;  %v23535_v33 = vpop.f32.mrf.mxu1 }
 0x296   :  { %v23538_v10 = vadd.f32 %v19432_v15, %v23144_v16 }
 0x297   :  { %v23540_v52 = vpop.f32.mrf.mxu0  ;;  %v23542_v42 = vpop.f32.mrf.mxu1 }
 0x298   :  { %29568 = vst [vmem:[#allocation91_spill] sm:$0xff] %v23538_v10  ;;  %29569 = vst [vmem:[#allocation92_spill] sm:$0xff] %v23540_v52 }
 0x299   :  { %29570 = vst [vmem:[#allocation93_spill] sm:$0xff] %v23542_v42  ;;  %v19435_v1 = vpop.f32.mrf.mxu0  ;;  %v23544_v8 = vpop.f32.mrf.mxu1 }
 0x29a   :  { %29571 = vst [vmem:[#allocation94_spill] sm:$0xff] %v23544_v8  ;;  %v23547_v23 = vadd.f32 %v19435_v1, %v23163_v26 }
 0x29b   :  { %v23549_v48 = vpop.f32.mrf.mxu0  ;;  %v23551_v29 = vpop.f32.mrf.mxu1 }
 0x29c   :  { %29572 = vst [vmem:[#allocation95_spill] sm:$0xff] %v23547_v23  ;;  %29573 = vst [vmem:[#allocation96_spill] sm:$0xff] %v23549_v48 }
 0x29d   :  { %29574 = vst [vmem:[#allocation97_spill] sm:$0xff] %v23551_v29  ;;  %v19438_v35 = vpop.f32.mrf.mxu0  ;;  %v23553_v20 = vpop.f32.mrf.mxu1 }
 0x29e   :  { %29575 = vst [vmem:[#allocation98_spill] sm:$0xff] %v23553_v20  ;;  %v23556_v16 = vadd.f32 %v19438_v35, %v23182_v34 }
 0x29f   :  { %v23558_v15 = vpop.f32.mrf.mxu0  ;;  %v23560_v10 = vpop.f32.mrf.mxu1 }
 0x2a0   :  { %29576 = vst [vmem:[#allocation99_spill] sm:$0xff] %v23556_v16  ;;  %29577 = vst [vmem:[#allocation100_spill] sm:$0xff] %v23558_v15 }
 0x2a1   :  { %29578 = vst [vmem:[#allocation101_spill] sm:$0xff] %v23560_v10  ;;  %v19441_v42 = vpop.f32.mrf.mxu0  ;;  %v23562_v52 = vpop.f32.mrf.mxu1 }
 0x2a2   :  { %29579 = vst [vmem:[#allocation102_spill] sm:$0xff] %v23562_v52  ;;  %v23565_v26 = vadd.f32 %v19441_v42, %v23198_v21 }
 0x2a3   :  { %v23567_v1 = vpop.f32.mrf.mxu0  ;;  %v23569_v23 = vpop.f32.mrf.mxu1 }
 0x2a4   :  { %29580 = vst [vmem:[#allocation103_spill] sm:$0xff] %v23565_v26  ;;  %29581 = vst [vmem:[#allocation104_spill] sm:$0xff] %v23567_v1 }
 0x2a5   :  { %29582 = vst [vmem:[#allocation105_spill] sm:$0xff] %v23569_v23  ;;  %v19444_v29 = vpop.f32.mrf.mxu0  ;;  %v23571_v48 = vpop.f32.mrf.mxu1  ;;  %v19938_v23 = vmov 1983009808  }
 0x2a6   :  { %29583 = vst [vmem:[#allocation106_spill] sm:$0xff] %v23571_v48  ;;  %v23574_v34 = vadd.f32 %v19444_v29, %v23217_v30  ;;  %v6485_v1 = vunpack.c.l.s4 %v19938_v23  ;;  %v6487_v48 = vlaneseq  ;;  %v29592_v29 = vld [vmem:[#allocation20_spill] sm:$0xff]  ;;  %v4120_v23 = vadd.f32 %v22924_v37, %v22767_v59  ;;  %v29605_v59 = vld [vmem:[#allocation26_spill] sm:$0xff] }
 0x2a7   :  { %v23576_v35 = vpop.f32.mrf.mxu0  ;;  %v23578_v16 = vpop.f32.mrf.mxu1  ;;  %v23620_v37 = vadd.f32 %v23036_v27, %v29605_v59  ;;  %v29610_v27 = vld [vmem:[#allocation11_spill] sm:$0xff] }
 0x2a8   :  { %29584 = vst [vmem:[#allocation107_spill] sm:$0xff] %v23574_v34  ;;  %29585 = vst [vmem:[#allocation108_spill] sm:$0xff] %v23576_v35  ;;  %v4112_v34 = vadd.f32 %v22816_v51, %v29592_v29  ;;  %v6486_v51 = vunpack.c.0.s8 %v6485_v1  ;;  %v23608_v29 = vshrl.u32 %v6487_v48, 7  ;;  %v29607_v1 = vld [vmem:[#allocation24_spill] sm:$0xff] }
 0x2a9   :  { %29586 = vst [vmem:[#allocation109_spill] sm:$0xff] %v23578_v16  ;;  %v19447_v10 = vpop.f32.mrf.mxu0  ;;  %v23580_v15 = vpop.f32.mrf.mxu1  ;;  %v29593_v16 = vld [vmem:[#allocation22_spill] sm:$0xff] }
 0x2aa   :  { %29587 = vst [vmem:[#allocation110_spill] sm:$0xff] %v23580_v15  ;;  %v23583_v21 = vadd.f32 %v19447_v10, %v23236_v40  ;;  %v4114_v35 = vadd.f32 %v22843_v22, %v29593_v16  ;;  %v29594_v15 = vld [vmem:[#allocation14_spill] sm:$0xff]  ;;  %v29598_v22 = vld [vmem:[#allocation17_spill] sm:$0xff] }
 0x2ab   :  { %v23585_v42 = vpop.f32.mrf.mxu0  ;;  %v23587_v26 = vpop.f32.mrf.mxu1  ;;  %v4116_v40 = vadd.f32 %v22870_v53, %v29594_v15  ;;  %v29599_v16 = vld [vmem:[#allocation6_spill] sm:$0xff]  ;;  %v29600_v53 = vld [vmem:[#allocation12_spill] sm:$0xff]  ;;  %v29601_v15 = vld [vmem:[#allocation7_spill] sm:$0xff] }
 0x2ac   :  { %29588 = vst [vmem:[#allocation111_spill] sm:$0xff] %v23583_v21  ;;  %29589 = vst [vmem:[#allocation112_spill] sm:$0xff] %v23585_v42  ;;  %v29596_v21 = vld [vmem:[#allocation16_spill] sm:$0xff]  ;;  %v4122_v20 = vadd.f32 %v29599_v16, %v29598_v22  ;;  %v23628_v22 = vadd.f32 %v23074_v49, %v29607_v1  ;;  %v29614_v1 = vld [vmem:[#allocation29_spill] sm:$0xff] }
 0x2ad   :  { %29590 = vst [vmem:[#allocation113_spill] sm:$0xff] %v23587_v26  ;;  %v19450_v52 = vpop.f32.mrf.mxu0  ;;  %v23589_v30 = vpop.f32.mrf.mxu1  ;;  %v4118_v26 = vadd.f32 %v22897_v14, %v29596_v21  ;;  %v29604_v14 = vld [vmem:[#allocation15_spill] sm:$0xff]  ;;  %v29608_v16 = vld [vmem:[#allocation8_spill] sm:$0xff] }
 0x2ae   :  { %29591 = vst [vmem:[#allocation114_spill] sm:$0xff] %v23589_v30  ;;  %v23598_v10 = vadd.f32 %v19450_v52, %v23255_v4  ;;  %v4124_v4 = vadd.f32 %v29601_v15, %v29600_v53  ;;  %v29602_v52 = vld [vmem:[#allocation25_spill] sm:$0xff]  ;;  %v4128_v21 = vadd.f32 %v23017_v25, %v29604_v14  ;;  %v23632_v53 = vadd.f32 %v23093_v36, %v29608_v16  ;;  %v29609_v25 = vld [vmem:[#allocation10_spill] sm:$0xff]  ;;  %v29613_v36 = vld [vmem:[#allocation28_spill] sm:$0xff] }
 0x2af   :  { %v23604_v42 = vpop.f32.mrf.mxu0  ;;  %v23606_v30 = vpop.f32.mrf.mxu1  ;;  %v23642_v14 = vadd.f32 %v23131_v60, %v29610_v27  ;;  %v23653_v59 = vadd.f32 %v23169_v61, %v29613_v36  ;;  %v23657_v16 = vadd.f32 %v23188_v31, %v29614_v1  ;;  %v29617_v27 = vld [vmem:[#allocation31_spill] sm:$0xff] }
 0x2b0   :  { %29595 = vst [vmem:[#allocation20_spill] sm:$0xff] %v23598_v10  ;;  %29597 = vst [vmem:[#allocation22_spill] sm:$0xff] %v23606_v30  ;;  %v29603_v10 = vld [vmem:[#allocation9_spill] sm:$0xff]  ;;  %v29606_v30 = vld [vmem:[#allocation27_spill] sm:$0xff] }
 0x2b1   :  { %v4126_v8 = vadd.f32 %v29603_v10, %v29602_v52  ;;  %v23624_v48 = vadd.f32 %v23055_v6, %v29606_v30  ;;  %v19453_v10 = vpop.f32.mrf.mxu0  ;;  %v23634_v15 = vpop.f32.mrf.mxu1  ;;  %v23638_v52 = vadd.f32 %v23112_v9, %v29609_v25  ;;  %v29611_v6 = vld [vmem:[#allocation13_spill] sm:$0xff]  ;;  %v29615_v9 = vld [vmem:[#allocation30_spill] sm:$0xff] }
 0x2b2   :  { %v23646_v30 = vadd.f32 %v23150_v19, %v29611_v6  ;;  %v23649_v49 = vadd.f32 %v19453_v10, %v23274_v44  ;;  %v23661_v25 = vadd.f32 %v23207_v28, %v29615_v9  ;;  %v23666_v19 = vsub.s32 %v6486_v51, %v23608_v29  ;;  %v29618_v10 = vld [vmem:[#allocation32_spill] sm:$0xff]  ;;  %v29619_v6 = vld [vmem:[#allocation33_spill] sm:$0xff]  ;;  %v29621_v51 = vld [vmem:[#allocation34_spill] sm:$0xff] }
 0x2b3   :  { %v23663_v60 = vpop.f32.mrf.mxu0  ;;  %v23670_v44 = vadd.f32 %v23226_v43, %v29617_v27  ;;  %v23674_v61 = vadd.f32 %v23245_v56, %v29618_v10  ;;  %v23678_v31 = vadd.f32 %v23264_v3, %v29619_v6  ;;  %v23682_v28 = vadd.f32 %v23283_v7, %v23175_v13  ;;  %v23684_v36 = vpop.f32.mrf.mxu1  ;;  %v29622_v43 = vld [vmem:[#allocation35_spill] sm:$0xff]  ;;  %v29623_v27 = vld [vmem:[#allocation36_spill] sm:$0xff]  ;;  %v29624_v10 = vld [vmem:[#allocation18_spill] sm:$0xff] }
 0x2b4   :  { %29612 = vst [vmem:[#allocation14_spill] sm:$0xff] %v23649_v49  ;;  %29616 = vst [vmem:[#allocation16_spill] sm:$0xff] %v23666_v19  ;;  %v23688_v1 = vadd.f32 %v23302_v11, %v29621_v51  ;;  %v5514_v9 = vadd.f32 %v23310_v0, %v29622_v43  ;;  %v5513_v56 = vadd.f32 %v23320_v38, %v29623_v27  ;;  %v29625_v49 = vld [vmem:[#allocation37_spill] sm:$0xff]  ;;  %v29626_v7 = vld [vmem:[#allocation19_spill] sm:$0xff] }
 0x2b5   :  { %29620 = vst [vmem:[#allocation17_spill] sm:$0xff] %v23684_v36  ;;  %v5516_v3 = vadd.f32 %v23328_v24, %v29624_v10  ;;  %v19456_v6 = vpop.f32.mrf.mxu0  ;;  %v23698_v13 = vadd.f32 %v23338_v47, %v29625_v49  ;;  %v23702_v36 = vadd.f32 %v23346_v12, %v29626_v7  ;;  %v4821_v11 = vadd.f32 %v23356_v57, %v4112_v34  ;;  %v29628_v0 = vld [vmem:[#allocation38_spill] sm:$0xff]  ;;  %v29630_v43 = vld [vmem:[#allocation21_spill] sm:$0xff]  ;;  %v29632_v49 = vld [vmem:[#allocation39_spill] sm:$0xff] }
 0x2b6   :  { %v23706_v51 = vadd.f32 %v19456_v6, %v23293_v39  ;;  %v23710_v38 = vadd.f32 %v23358_v46, %v29628_v0  ;;  %v23714_v24 = vadd.f32 %v23363_v58, %v29630_v43  ;;  %v4823_v47 = vadd.f32 %v23373_v5, %v4114_v35  ;;  %v29633_v27 = vld [vmem:[#allocation49_spill] sm:$0xff]  ;;  %v29635_v57 = vld [vmem:[#allocation23_spill] sm:$0xff]  ;;  %v29636_v34 = vld [vmem:[#allocation50_spill] sm:$0xff]  ;;  %v23736_v5 = vpop.f32.mrf.mxu1 }
 0x2b7   :  { %v23719_v10 = vadd.f32 %v29633_v27, %v29632_v49  ;;  %v23721_v12 = vpop.f32.mrf.mxu0  ;;  %v23725_v39 = vadd.f32 %v29636_v34, %v29635_v57  ;;  %v4825_v6 = vadd.f32 %v23390_v45, %v4116_v40  ;;  %v29638_v46 = vld [vmem:[#allocation40_spill] sm:$0xff]  ;;  %v29641_v58 = vld [vmem:[#allocation41_spill] sm:$0xff]  ;;  %v4827_v35 = vadd.f32 %v23407_v18, %v4118_v26  ;;  %v29644_v49 = vld [vmem:[#allocation42_spill] sm:$0xff] }
 0x2b8   :  { %29627 = vst [vmem:[#allocation6_spill] sm:$0xff] %v23706_v51  ;;  %29629 = vst [vmem:[#allocation12_spill] sm:$0xff] %v23710_v38  ;;  %v29639_v7 = vld [vmem:[#allocation52_spill] sm:$0xff]  ;;  %v29642_v43 = vld [vmem:[#allocation53_spill] sm:$0xff]  ;;  %v4829_v40 = vadd.f32 %v23424_v55, %v4120_v23 }
 0x2b9   :  { %29631 = vst [vmem:[#allocation7_spill] sm:$0xff] %v23714_v24  ;;  %29634 = vst [vmem:[#allocation25_spill] sm:$0xff] %v23719_v10  ;;  %v23730_v0 = vadd.f32 %v29639_v7, %v29638_v46  ;;  %v23734_v51 = vadd.f32 %v29642_v43, %v29641_v58  ;;  %v29645_v27 = vld [vmem:[#allocation55_spill] sm:$0xff]  ;;  %v29648_v34 = vld [vmem:[#allocation56_spill] sm:$0xff]  ;;  %v19559_v45 = vpop.f32.mrf.mxu0 }
 0x2ba   :  { %29637 = vst [vmem:[#allocation9_spill] sm:$0xff] %v23725_v39  ;;  %v23741_v10 = vadd.f32 %v29645_v27, %v29644_v49  ;;  %v29647_v57 = vld [vmem:[#allocation43_spill] sm:$0xff]  ;;  %v29650_v46 = vld [vmem:[#allocation44_spill] sm:$0xff]  ;;  %v29651_v7 = vld [vmem:[#allocation58_spill] sm:$0xff]  ;;  %v6222_v23 = vadd.f32 %v19559_v45, %v5514_v9 }
 0x2bb   :  { %29640 = vst [vmem:[#allocation15_spill] sm:$0xff] %v23730_v0  ;;  %29643 = vst [vmem:[#allocation26_spill] sm:$0xff] %v23734_v51  ;;  %v23745_v39 = vadd.f32 %v29648_v34, %v29647_v57  ;;  %v23750_v0 = vadd.f32 %v29651_v7, %v29650_v46  ;;  %v29653_v58 = vld [vmem:[#allocation45_spill] sm:$0xff]  ;;  %v29654_v43 = vld [vmem:[#allocation59_spill] sm:$0xff]  ;;  %v5902_v38 = vpop.f32.mrf.mxu0 }
 0x2bc   :  { %29646 = vst [vmem:[#allocation27_spill] sm:$0xff] %v23741_v10  ;;  %v23754_v51 = vadd.f32 %v29654_v43, %v29653_v58  ;;  %v29655_v18 = vld [vmem:[#allocation61_spill] sm:$0xff]  ;;  %v29656_v24 = vld [vmem:[#allocation46_spill] sm:$0xff]  ;;  %v29658_v10 = vld [vmem:[#allocation47_spill] sm:$0xff] }
 0x2bd   :  { %29649 = vst [vmem:[#allocation24_spill] sm:$0xff] %v23745_v39  ;;  %29652 = vst [vmem:[#allocation8_spill] sm:$0xff] %v23750_v0  ;;  %v4831_v26 = vadd.f32 %v29655_v18, %v4122_v20  ;;  %v29657_v49 = vld [vmem:[#allocation62_spill] sm:$0xff]  ;;  %v29659_v57 = vld [vmem:[#allocation63_spill] sm:$0xff]  ;;  %v4835_v20 = vadd.f32 %v23468_v41, %v4126_v8  ;;  %v23774_v18 = vpop.f32.mrf.mxu1  ;;  %v19562_v41 = vpop.f32.mrf.mxu0 }
 0x2be   :  { %v23759_v27 = vadd.f32 %v29657_v49, %v29656_v24  ;;  %v23763_v34 = vadd.f32 %v29659_v57, %v29658_v10  ;;  %v29660_v39 = vld [vmem:[#allocation65_spill] sm:$0xff]  ;;  %v29661_v46 = vld [vmem:[#allocation66_spill] sm:$0xff]  ;;  %v29663_v0 = vld [vmem:[#allocation48_spill] sm:$0xff]  ;;  %v19939_v10 = vmov 1934713408   ;;  %v6221_v57 = vadd.f32 %v5902_v38, %v5513_v56 }
 0x2bf   :  { %v4833_v55 = vadd.f32 %v29660_v39, %v4124_v4  ;;  %v23767_v7 = vadd.f32 %v29661_v46, %v4821_v11  ;;  %v29664_v58 = vld [vmem:[#allocation67_spill] sm:$0xff]  ;;  %v23779_v24 = vld [vmem:[%s29184_s2] ss:$0 sm:$0xff]  ;;  %v10140_v4 = vunpack.c.l.s4 %v19939_v10  ;;  %v29670_v8 = vld [vmem:[#allocation72_spill] sm:$0xff] }
 0x2c0   :  { %v23771_v43 = vadd.f32 %v29664_v58, %v29663_v0  ;;  %v29666_v9 = vld [vmem:[#allocation69_spill] sm:$0xff]  ;;  %v29668_v11 = vld [vmem:[#allocation51_spill] sm:$0xff]  ;;  %v23790_v46 = vadd.f32 %v29670_v8, %v4825_v6  ;;  %v29671_v58 = vld [vmem:[#allocation54_spill] sm:$0xff]  ;;  %v6292_v38 = vadd.f32 %v23779_v24, %v6222_v23  ;;  %v6224_v6 = vadd.f32 %v19562_v41, %v5516_v3 }
 0x2c1   :  { %29662 = vst [vmem:[#allocation10_spill] sm:$0xff] %v23767_v7  ;;  %v23782_v39 = vadd.f32 %v29666_v9, %v4823_v47  ;;  %v23786_v45 = vadd.f32 %v23472_v62, %v29668_v11  ;;  %v29669_v0 = vld [vmem:[#allocation71_spill] sm:$0xff]  ;;  %v29672_v10 = vld [vmem:[#allocation74_spill] sm:$0xff]  ;;  %v6291_v41 = vadd.f32 %v23779_v24, %v6221_v57 }
 0x2c2   :  { %29665 = vst [vmem:[#allocation11_spill] sm:$0xff] %v23771_v43  ;;  %v4837_v49 = vadd.f32 %v29669_v0, %v4128_v21  ;;  %v23794_v43 = vadd.f32 %v23481_v32, %v29671_v58  ;;  %v4839_v7 = vadd.f32 %v29672_v10, %v23620_v37  ;;  %v29673_v47 = vld [vmem:[#allocation75_spill] sm:$0xff]  ;;  %v29677_v21 = vld [vmem:[#allocation77_spill] sm:$0xff]  ;;  %v29678_v11 = vld [vmem:[#allocation78_spill] sm:$0xff]  ;;  %v23817_v58 = vpop.f32.mrf.mxu1  ;;  %v6294_v57 = vadd.f32 %v23779_v24, %v6224_v6 }
 0x2c3   :  { %29667 = vst [vmem:[#allocation13_spill] sm:$0xff] %v23782_v39  ;;  %v23799_v9 = vadd.f32 %v29673_v47, %v4827_v35  ;;  %v29675_v39 = vld [vmem:[#allocation57_spill] sm:$0xff]  ;;  %v4841_v56 = vadd.f32 %v29677_v21, %v23624_v48  ;;  %v23809_v0 = vadd.f32 %v29678_v11, %v4829_v40  ;;  %v29680_v32 = vld [vmem:[#allocation60_spill] sm:$0xff]  ;;  %v29687_v3 = vld [vmem:[#allocation83_spill] sm:$0xff] }
 0x2c4   :  { %v23803_v62 = vadd.f32 %v23490_v50, %v29675_v39  ;;  %v23813_v8 = vadd.f32 %v23499_v2, %v29680_v32  ;;  %v29682_v37 = vld [vmem:[#allocation80_spill] sm:$0xff]  ;;  %v10141_v50 = vunpack.c.0.s8 %v10140_v4  ;;  %v29683_v39 = vld [vmem:[#allocation81_spill] sm:$0xff]  ;;  %v4845_v40 = vadd.f32 %v29687_v3, %v23632_v53  ;;  %v29692_v4 = vld [vmem:[#allocation86_spill] sm:$0xff] }
 0x2c5   :  { %29674 = vst [vmem:[#allocation28_spill] sm:$0xff] %v23799_v9  ;;  %29679 = vst [vmem:[#allocation30_spill] sm:$0xff] %v23809_v0  ;;  %v4843_v35 = vadd.f32 %v29682_v37, %v23628_v22  ;;  %v23820_v10 = vadd.f32 %v29683_v39, %v4831_v26  ;;  %v29685_v48 = vld [vmem:[#allocation64_spill] sm:$0xff]  ;;  %v4847_v26 = vadd.f32 %v29692_v4, %v23638_v52  ;;  %v29693_v11 = vld [vmem:[#allocation87_spill] sm:$0xff]  ;;  %v6356_v53 = vmax.f32 %v6292_v38, 0.0  ;;  %v5454_v52 = vpop.f32.mrf.mxu1 }
 0x2c6   :  { %29676 = vst [vmem:[#allocation29_spill] sm:$0xff] %v23803_v62  ;;  %29681 = vst [vmem:[#allocation31_spill] sm:$0xff] %v23813_v8  ;;  %v23824_v23 = vadd.f32 %v23508_v63, %v29685_v48  ;;  %v29688_v2 = vld [vmem:[#allocation84_spill] sm:$0xff]  ;;  %v23839_v32 = vadd.f32 %v29693_v11, %v4835_v20  ;;  %v29695_v63 = vld [vmem:[#allocation70_spill] sm:$0xff]  ;;  %v23856_v20 = vsub.s32 %v10141_v50, %v23608_v29 }
 0x2c7   :  { %29684 = vst [vmem:[#allocation32_spill] sm:$0xff] %v23820_v10  ;;  %v23830_v47 = vadd.f32 %v29688_v2, %v4833_v55  ;;  %v29690_v21 = vld [vmem:[#allocation68_spill] sm:$0xff]  ;;  %v23843_v37 = vadd.f32 %v23526_v54, %v29695_v63  ;;  %v29697_v55 = vld [vmem:[#allocation89_spill] sm:$0xff]  ;;  %v29698_v48 = vld [vmem:[#allocation90_spill] sm:$0xff]  ;;  %v5912_v63 = vpop.f32.mrf.mxu0 }
 0x2c8   :  { %29686 = vst [vmem:[#allocation33_spill] sm:$0xff] %v23824_v23  ;;  %v23834_v22 = vadd.f32 %v23517_v17, %v29690_v21  ;;  %29694 = vst [vmem:[#allocation36_spill] sm:$0xff] %v23839_v32  ;;  %v4849_v39 = vadd.f32 %v29697_v55, %v23642_v14  ;;  %v23849_v3 = vadd.f32 %v29698_v48, %v4837_v49  ;;  %v29700_v17 = vld [vmem:[#allocation73_spill] sm:$0xff]  ;;  %v29703_v54 = vld [vmem:[#allocation92_spill] sm:$0xff]  ;;  %v6355_v49 = vmax.f32 %v6291_v41, 0.0 }
 0x2c9   :  { %29689 = vst [vmem:[#allocation34_spill] sm:$0xff] %v23830_v47  ;;  %29696 = vst [vmem:[#allocation18_spill] sm:$0xff] %v23843_v37  ;;  %v23853_v2 = vadd.f32 %v23535_v33, %v29700_v17  ;;  %v4851_v21 = vadd.f32 %v29703_v54, %v23646_v30  ;;  %v29704_v38 = vld [vmem:[#allocation93_spill] sm:$0xff]  ;;  %v29706_v6 = vld [vmem:[#allocation76_spill] sm:$0xff] }
 0x2ca   :  { %29691 = vst [vmem:[#allocation35_spill] sm:$0xff] %v23834_v22  ;;  %29699 = vst [vmem:[#allocation37_spill] sm:$0xff] %v23849_v3  ;;  %v23861_v4 = vadd.f32 %v29704_v38, %v4839_v7  ;;  %v29707_v11 = vld [vmem:[#allocation94_spill] sm:$0xff]  ;;  %v29709_v55 = vld [vmem:[#allocation96_spill] sm:$0xff] }
 0x2cb   :  { %29701 = vst [vmem:[#allocation19_spill] sm:$0xff] %v23853_v2  ;;  %29702 = vst [vmem:[#allocation38_spill] sm:$0xff] %v23856_v20  ;;  %v23865_v14 = vadd.f32 %v29707_v11, %v29706_v6  ;;  %v4853_v33 = vadd.f32 %v29709_v55, %v23653_v59  ;;  %v29710_v48 = vld [vmem:[#allocation97_spill] sm:$0xff]  ;;  %v29712_v29 = vld [vmem:[#allocation79_spill] sm:$0xff] }
 0x2cc   :  { %29705 = vst [vmem:[#allocation21_spill] sm:$0xff] %v23861_v4  ;;  %v23870_v17 = vadd.f32 %v29710_v48, %v4841_v56  ;;  %v29713_v50 = vld [vmem:[#allocation98_spill] sm:$0xff]  ;;  %v29715_v30 = vld [vmem:[#allocation100_spill] sm:$0xff]  ;;  %v29716_v54 = vld [vmem:[#allocation101_spill] sm:$0xff]  ;;  %v6358_v4 = vmax.f32 %v6294_v57, 0.0  ;;  %v6507_v57 = vrot.slane %v6356_v53, %v23666_v19 }
 0x2cd   :  { %29708 = vst [vmem:[#allocation39_spill] sm:$0xff] %v23865_v14  ;;  %v23874_v2 = vadd.f32 %v29713_v50, %v29712_v29  ;;  %v4855_v7 = vadd.f32 %v29715_v30, %v23657_v16  ;;  %v23879_v38 = vadd.f32 %v29716_v54, %v4843_v35  ;;  %v29718_v6 = vld [vmem:[#allocation82_spill] sm:$0xff]  ;;  %v6500_v14 = vcombine.high %v6356_v53, %v6356_v53  ;;  %v29721_v59 = vld [vmem:[#allocation104_spill] sm:$0xff]  ;;  %v29722_v55 = vld [vmem:[#allocation105_spill] sm:$0xff]  ;;  %v19542_v16 = vpop.f32.mrf.mxu1 }
 0x2ce   :  { %29711 = vst [vmem:[#allocation49_spill] sm:$0xff] %v23870_v17  ;;  %v29719_v11 = vld [vmem:[#allocation102_spill] sm:$0xff]  ;;  %v4857_v56 = vadd.f32 %v29721_v59, %v23661_v25  ;;  %v23888_v48 = vadd.f32 %v29722_v55, %v4845_v40  ;;  %v29724_v29 = vld [vmem:[#allocation85_spill] sm:$0xff]  ;;  %v6223_v35 = vadd.f32 %v5912_v63, %v23698_v13  ;;  %v29727_v30 = vld [vmem:[#allocation108_spill] sm:$0xff]  ;;  %v6490_v25 = vrot.slane %v6355_v49, %v23666_v19  ;;  %v19565_v59 = vpop.f32.mrf.mxu0 }
 0x2cf   :  { %29714 = vst [vmem:[#allocation23_spill] sm:$0xff] %v23874_v2  ;;  %29717 = vst [vmem:[#allocation50_spill] sm:$0xff] %v23879_v38  ;;  %v23883_v41 = vadd.f32 %v29719_v11, %v29718_v6  ;;  %v29725_v50 = vld [vmem:[#allocation106_spill] sm:$0xff]  ;;  %v4859_v54 = vadd.f32 %v29727_v30, %v23670_v44  ;;  %v29728_v6 = vld [vmem:[#allocation109_spill] sm:$0xff]  ;;  %v6483_v44 = vcombine.high %v6355_v49, %v6355_v49 }
 0x2d0   :  { %29723 = vst [vmem:[#allocation52_spill] sm:$0xff] %v23888_v48  ;;  %v23892_v2 = vadd.f32 %v29725_v50, %v29724_v29  ;;  %v23898_v11 = vadd.f32 %v29728_v6, %v4847_v26  ;;  %v29730_v40 = vld [vmem:[#allocation88_spill] sm:$0xff]  ;;  %v29731_v55 = vld [vmem:[#allocation110_spill] sm:$0xff]  ;;  %v29734_v13 = vld [vmem:[#allocation113_spill] sm:$0xff]  ;;  %v23919_v53 = vadd.f32 %v23604_v42, %v23678_v31  ;;  %v6293_v49 = vadd.f32 %v23779_v24, %v6223_v35 }
 0x2d1   :  { %29720 = vst [vmem:[#allocation40_spill] sm:$0xff] %v23883_v41  ;;  %v23904_v48 = vadd.f32 %v29731_v55, %v29730_v40  ;;  %v29733_v29 = vld [vmem:[#allocation112_spill] sm:$0xff]  ;;  %v23911_v63 = vadd.f32 %v29734_v13, %v4849_v39  ;;  %v29736_v30 = vld [vmem:[#allocation91_spill] sm:$0xff]  ;;  %v29737_v26 = vld [vmem:[#allocation114_spill] sm:$0xff]  ;;  %v6534_v40 = vcombine.high %v6358_v4, %v6358_v4  ;;  %v5464_v39 = vpop.f32.mrf.mxu1  ;;  %v6226_v13 = vadd.f32 %v19565_v59, %v23702_v36  ;;  %v5922_v59 = vpop.f32.mrf.mxu0 }
 0x2d2   :  { %29726 = vst [vmem:[#allocation41_spill] sm:$0xff] %v23892_v2  ;;  %29729 = vst [vmem:[#allocation53_spill] sm:$0xff] %v23898_v11  ;;  %v23908_v50 = vadd.f32 %v29733_v29, %v23674_v61  ;;  %v23915_v6 = vadd.f32 %v29737_v26, %v29736_v30  ;;  %v6514_v11 = vrot.slane %v6500_v14, %v23666_v19  ;;  %v29739_v55 = vld [vmem:[#allocation22_spill] sm:$0xff]  ;;  %v29741_v61 = vld [vmem:[#allocation95_spill] sm:$0xff] }
 0x2d3   :  { %29732 = vst [vmem:[#allocation42_spill] sm:$0xff] %v23904_v48  ;;  %29735 = vst [vmem:[#allocation55_spill] sm:$0xff] %v23911_v63  ;;  %v23923_v48 = vadd.f32 %v29739_v55, %v4851_v21  ;;  %v23927_v29 = vadd.f32 %v23634_v15, %v29741_v61  ;;  %v23933_v30 = vadd.f32 %v23663_v60, %v23682_v28  ;;  %v29743_v42 = vld [vmem:[#allocation17_spill] sm:$0xff]  ;;  %v29745_v21 = vld [vmem:[#allocation99_spill] sm:$0xff] }
 0x2d4   :  { %29738 = vst [vmem:[#allocation43_spill] sm:$0xff] %v23915_v6  ;;  %v23936_v31 = vadd.f32 %v29743_v42, %v4853_v33  ;;  %v6515_v14 = vcombine.high %v6507_v57, %v6507_v57  ;;  %v6498_v26 = vcombine.high %v6490_v25, %v6490_v25  ;;  %v23940_v55 = vadd.f32 %v23736_v5, %v29745_v21  ;;  %v29748_v28 = vld [vmem:[#allocation103_spill] sm:$0xff]  ;;  %v29762_v47 = vld [vmem:[#allocation9_spill] sm:$0xff] }
 0x2d5   :  { %29740 = vst [vmem:[#allocation56_spill] sm:$0xff] %v23923_v48  ;;  %29742 = vst [vmem:[#allocation44_spill] sm:$0xff] %v23927_v29  ;;  %v23944_v15 = vadd.f32 %v23721_v12, %v23688_v1  ;;  %v6497_v35 = vrot.slane %v6483_v44, %v23666_v19  ;;  %v6541_v36 = vrot.slane %v6358_v4, %v23666_v19  ;;  %v17536_v42 = vrot.slane %v6507_v57, 9  ;;  %v19545_v12 = vpop.f32.mrf.mxu1 }
 0x2d6   :  { %29744 = vst [vmem:[#allocation58_spill] sm:$0xff] %v23936_v31  ;;  %29746 = vst [vmem:[#allocation45_spill] sm:$0xff] %v23940_v55  ;;  %v23949_v60 = vadd.f32 %v23774_v18, %v4855_v7  ;;  %v23953_v33 = vadd.f32 %v23817_v58, %v29748_v28  ;;  %v6516_v61 = vcombine.high %v6514_v11, %v6514_v11  ;;  %v6357_v1 = vmax.f32 %v6293_v49, 0.0  ;;  %v29751_v31 = vld [vmem:[#allocation107_spill] sm:$0xff]  ;;  %v29753_v18 = vld [vmem:[#allocation12_spill] sm:$0xff] }
 0x2d7   :  { %v6548_v5 = vrot.slane %v6534_v40, %v23666_v19  ;;  %v23956_v21 = vadd.f32 %v5454_v52, %v4857_v56  ;;  %v6296_v44 = vadd.f32 %v23779_v24, %v6226_v13  ;;  %v17537_v55 = vrot.slane %v6515_v14, 9  ;;  %v19568_v40 = vpop.f32.mrf.mxu0  ;;  %v29755_v49 = vld [vmem:[#allocation111_spill] sm:$0xff] }
 0x2d8   :  { %29747 = vst [vmem:[#allocation59_spill] sm:$0xff] %v23949_v60  ;;  %29749 = vst [vmem:[#allocation61_spill] sm:$0xff] %v23953_v33  ;;  %v17533_v4 = vrot.slane %v6498_v26, 9  ;;  %v23960_v29 = vadd.f32 %v19542_v16, %v29751_v31  ;;  %v6225_v7 = vadd.f32 %v5922_v59, %v29753_v18  ;;  %v17538_v60 = vrot.slane %v6514_v11, 9 }
 0x2d9   :  { %29750 = vst [vmem:[#allocation46_spill] sm:$0xff] %v23956_v21  ;;  %v6499_v58 = vcombine.high %v6497_v35, %v6497_v35  ;;  %v6549_v28 = vcombine.high %v6541_v36, %v6541_v36  ;;  %v23963_v33 = vadd.f32 %v5464_v39, %v4859_v54  ;;  %v17539_v48 = vrot.slane %v6516_v61, 9  ;;  %v29757_v39 = vld [vmem:[#allocation7_spill] sm:$0xff]  ;;  %v5932_v41 = vpop.f32.mrf.mxu0 }
 0x2da   :  { %29752 = vst [vmem:[#allocation62_spill] sm:$0xff] %v23960_v29  ;;  %v17532_v52 = vrot.slane %v6490_v25, 9  ;;  %v6550_v56 = vcombine.high %v6548_v5, %v6548_v5  ;;  %v23966_v21 = vadd.f32 %v19545_v12, %v29755_v49  ;;  %v23968_v13 = vmax.f32 %v6507_v57, %v17536_v42 }
 0x2db   :  { %29754 = vst [vmem:[#allocation47_spill] sm:$0xff] %v23963_v33  ;;  %v6517_v6 = vcombine.high %v6357_v1, %v6357_v1  ;;  %v23971_v16 = vrot.slane %v6357_v1, %v23666_v19  ;;  %v6360_v31 = vmax.f32 %v6296_v44, 0.0  ;;  %v8600_v59 = vmax.f32 %v6515_v14, %v17537_v55  ;;  %v5474_v44 = vpop.f32.mrf.mxu1 }
 0x2dc   :  { %29756 = vst [vmem:[#allocation63_spill] sm:$0xff] %v23966_v21  ;;  %v8596_v18 = vmax.f32 %v6498_v26, %v17533_v4  ;;  %v6295_v54 = vadd.f32 %v23779_v24, %v6225_v7  ;;  %v6228_v33 = vadd.f32 %v19568_v40, %v29757_v39  ;;  %v23975_v29 = vmax.f32 %v6514_v11, %v17538_v60  ;;  %v29758_v40 = vld [vmem:[#allocation25_spill] sm:$0xff] }
 0x2dd   :  { %v17534_v63 = vrot.slane %v6497_v35, 9  ;;  %v17535_v2 = vrot.slane %v6499_v58, 9  ;;  %v17545_v12 = vrot.slane %v6549_v28, 9  ;;  %v8602_v49 = vmax.f32 %v6516_v61, %v17539_v48  ;;  %v19548_v37 = vpop.f32.mrf.mxu1 }
 0x2de   :  { %v8595_v57 = vmax.f32 %v6490_v25, %v17532_v52  ;;  %v17544_v42 = vrot.slane %v6541_v36, 9  ;;  %v17547_v21 = vrot.slane %v6550_v56, 9  ;;  %v6531_v1 = vrot.slane %v6517_v6, %v23666_v19 }
 0x2df   :  { %v6532_v14 = vcombine.high %v23971_v16, %v23971_v16  ;;  %v6568_v26 = vcombine.high %v6360_v31, %v6360_v31  ;;  %v6575_v55 = vrot.slane %v6360_v31, %v23666_v19  ;;  %v23981_v4 = vrot.slane %v8596_v18, 7 }
 0x2e0   :  { %v17546_v11 = vrot.slane %v6548_v5, 9  ;;  %v6359_v60 = vmax.f32 %v6295_v54, 0.0  ;;  %v6298_v7 = vadd.f32 %v23779_v24, %v6228_v33  ;;  %v23984_v48 = vrot.slane %v8600_v59, 7  ;;  %v19571_v33 = vpop.f32.mrf.mxu0 }
 0x2e1   :  { %v8598_v25 = vmax.f32 %v6499_v58, %v17535_v2  ;;  %v8608_v61 = vmax.f32 %v6549_v28, %v17545_v12  ;;  %v6227_v52 = vadd.f32 %v5932_v41, %v29758_v40  ;;  %v23987_v6 = vrot.slane %v8602_v49, 7 }
 0x2e2   :  { %v23989_v39 = vmax.f32 %v6497_v35, %v17534_v63  ;;  %v23991_v38 = vmax.f32 %v6541_v36, %v17544_v42  ;;  %v8610_v31 = vmax.f32 %v6550_v56, %v17547_v21  ;;  %v6533_v17 = vcombine.high %v6531_v1, %v6531_v1 }
 0x2e3   :  { %v17541_v18 = vrot.slane %v6532_v14, 9  ;;  %v6582_v3 = vrot.slane %v6568_v26, %v23666_v19  ;;  %v6583_v54 = vcombine.high %v6575_v55, %v6575_v55  ;;  %v23996_v2 = vsel %vm9113_vm2, %v23981_v4, %v8595_v57 }
 0x2e4   :  { %v23998_v58 = vmax.f32 %v6548_v5, %v17546_v11  ;;  %v6558_v41 = vrot.slane %v6359_v60, %v23666_v19  ;;  %v6362_v63 = vmax.f32 %v6298_v7, 0.0  ;;  %v24001_v35 = vrot.slane %v8598_v25, 7  ;;  %v5484_v11 = vpop.f32.mrf.mxu1  ;;  %v5942_v7 = vpop.f32.mrf.mxu0 }
 0x2e5   :  { %v24003_v36 = vrot.slane %v8608_v61, 7  ;;  %v6551_v21 = vcombine.high %v6359_v60, %v6359_v60  ;;  %v6297_v28 = vadd.f32 %v23779_v24, %v6227_v52  ;;  %v24006_v56 = vrot.slane %v8610_v31, 7  ;;  %v29760_v61 = vld [vmem:[#allocation20_spill] sm:$0xff] }
 0x2e6   :  { %v17540_v59 = vrot.slane %v23971_v16, 9  ;;  %v17542_v12 = vrot.slane %v6531_v1, 9  ;;  %v24010_v49 = vadd.f32 %v5474_v44, %v23908_v50  ;;  %v17543_v5 = vrot.slane %v6533_v17, 9  ;;  %v19574_v10 = vpop.f32.mrf.mxu0 }
 0x2e7   :  { %v8604_v57 = vmax.f32 %v6532_v14, %v17541_v18  ;;  %v6584_v42 = vcombine.high %v6582_v3, %v6582_v3  ;;  %v17553_v26 = vrot.slane %v6583_v54, 9  ;;  %v6566_v25 = vcombine.high %v6558_v41, %v6558_v41 }
 0x2e8   :  { %29759 = vst [vmem:[#allocation65_spill] sm:$0xff] %v24010_v49  ;;  %v24013_v40 = vadd.f32 %v19548_v37, %v29760_v61  ;;  %v6602_v60 = vcombine.high %v6362_v63, %v6362_v63  ;;  %v6609_v52 = vrot.slane %v6362_v63, %v23666_v19  ;;  %v17552_v31 = vrot.slane %v6575_v55, 9  ;;  %v29764_v49 = vld [vmem:[#allocation15_spill] sm:$0xff] }
 0x2e9   :  { %v6565_v32 = vrot.slane %v6551_v21, %v23666_v19  ;;  %v6361_v22 = vmax.f32 %v6297_v28, 0.0  ;;  %v6230_v50 = vadd.f32 %v19571_v33, %v29762_v47  ;;  %v8603_v44 = vmax.f32 %v23971_v16, %v17540_v59 }
 0x2ea   :  { %29761 = vst [vmem:[#allocation66_spill] sm:$0xff] %v24013_v40  ;;  %v24019_v14 = vmax.f32 %v6531_v1, %v17542_v12  ;;  %v24022_v18 = vadd.f32 %v5484_v11, %v23919_v53  ;;  %v6229_v23 = vadd.f32 %v5942_v7, %v29764_v49  ;;  %v8606_v37 = vmax.f32 %v6533_v17, %v17543_v5  ;;  %v29765_v49 = vld [vmem:[#allocation26_spill] sm:$0xff] }
 0x2eb   :  { %v24025_v61 = vrot.slane %v8604_v57, 7  ;;  %v17555_v40 = vrot.slane %v6584_v42, 9  ;;  %v8616_v63 = vmax.f32 %v6583_v54, %v17553_v26  ;;  %v17554_v8 = vrot.slane %v6582_v3, 9 }
 0x2ec   :  { %29763 = vst [vmem:[#allocation48_spill] sm:$0xff] %v24022_v18  ;;  %v17549_v21 = vrot.slane %v6566_v25, 9  ;;  %v6616_v28 = vrot.slane %v6602_v60, %v23666_v19  ;;  %v6617_v47 = vcombine.high %v6609_v52, %v6609_v52  ;;  %v8615_v33 = vmax.f32 %v6575_v55, %v17552_v31 }
 0x2ed   :  { %v6567_v16 = vcombine.high %v6565_v32, %v6565_v32  ;;  %v6585_v1 = vcombine.high %v6361_v22, %v6361_v22  ;;  %v6300_v59 = vadd.f32 %v23779_v24, %v6230_v50  ;;  %v17548_v53 = vrot.slane %v6558_v41, 9 }
 0x2ee   :  { %v24030_v12 = vrot.slane %v6361_v22, %v23666_v19  ;;  %v6299_v17 = vadd.f32 %v23779_v24, %v6229_v23  ;;  %v6232_v5 = vadd.f32 %v19574_v10, %v29765_v49  ;;  %v24036_v54 = vsel %vm9113_vm2, %v24025_v61, %v8603_v44  ;;  %v5952_v22 = vpop.f32.mrf.mxu0 }
 0x2ef   :  { %v24038_v57 = vrot.slane %v8606_v37, 7  ;;  %v8618_v26 = vmax.f32 %v6584_v42, %v17555_v40  ;;  %v24040_v55 = vrot.slane %v8616_v63, 7  ;;  %v24042_v11 = vmax.f32 %v6582_v3, %v17554_v8  ;;  %v19551_v37 = vpop.f32.mrf.mxu1  ;;  %v29769_v40 = vld [vmem:[#allocation27_spill] sm:$0xff] }
 0x2f0   :  { %v8612_v7 = vmax.f32 %v6566_v25, %v17549_v21  ;;  %v6618_v60 = vcombine.high %v6616_v28, %v6616_v28  ;;  %v17561_v31 = vrot.slane %v6617_v47, 9  ;;  %v17550_v50 = vrot.slane %v6565_v32, 9 }
 0x2f1   :  { %29766 = vst [vmem:[#allocation67_spill] sm:$0xff] %v24040_v55  ;;  %29767 = vst [vmem:[#allocation69_spill] sm:$0xff] %v24042_v11  ;;  %v17551_v18 = vrot.slane %v6567_v16, 9  ;;  %v6599_v23 = vrot.slane %v6585_v1, %v23666_v19  ;;  %v6364_v10 = vmax.f32 %v6300_v59, 0.0  ;;  %v8611_v49 = vmax.f32 %v6558_v41, %v17548_v53  ;;  %v5494_v9 = vpop.f32.mrf.mxu1 }
 0x2f2   :  { %v6600_v44 = vcombine.high %v24030_v12, %v24030_v12  ;;  %v6363_v0 = vmax.f32 %v6299_v17, 0.0  ;;  %v6302_v42 = vadd.f32 %v23779_v24, %v6232_v5  ;;  %v24050_v8 = vsel %vm9113_vm2, %v24040_v55, %v8615_v33 }
 0x2f3   :  { %v24052_v3 = vrot.slane %v8618_v26, 7  ;;  %v17560_v25 = vrot.slane %v6609_v52, 9  ;;  %v6231_v63 = vadd.f32 %v5952_v22, %v29769_v40  ;;  %v24055_v21 = vrot.slane %v8612_v7, 7  ;;  %v29772_v7 = vld [vmem:[#allocation14_spill] sm:$0xff] }
 0x2f4   :  { %v17562_v1 = vrot.slane %v6616_v28, 9  ;;  %v17563_v41 = vrot.slane %v6618_v60, 9  ;;  %v8624_v59 = vmax.f32 %v6617_v47, %v17561_v31  ;;  %v8614_v53 = vmax.f32 %v6567_v16, %v17551_v18  ;;  %v19577_v47 = vpop.f32.mrf.mxu0 }
 0x2f5   :  { %29768 = vst [vmem:[#allocation51_spill] sm:$0xff] %v24052_v3  ;;  %29770 = vst [vmem:[#allocation71_spill] sm:$0xff] %v24055_v21  ;;  %v6601_v62 = vcombine.high %v6599_v23, %v6599_v23  ;;  %v6636_v11 = vcombine.high %v6364_v10, %v6364_v10  ;;  %v24058_v17 = vrot.slane %v6364_v10, %v23666_v19  ;;  %v17557_v33 = vrot.slane %v6600_v44, 9 }
 0x2f6   :  { %v24060_v5 = vmax.f32 %v6565_v32, %v17550_v50  ;;  %v24063_v26 = vrot.slane %v6363_v0, %v23666_v19  ;;  %v6366_v3 = vmax.f32 %v6302_v42, 0.0  ;;  %v8623_v22 = vmax.f32 %v6609_v52, %v17560_v25 }
 0x2f7   :  { %v24066_v40 = vadd.f32 %v19551_v37, %v29772_v7  ;;  %v6619_v55 = vcombine.high %v6363_v0, %v6363_v0  ;;  %v6301_v18 = vadd.f32 %v23779_v24, %v6231_v63  ;;  %v24071_v16 = vsel %vm9113_vm2, %v24055_v21, %v8611_v49  ;;  %v19554_v63 = vpop.f32.mrf.mxu1  ;;  %v29777_v7 = vld [vmem:[#allocation24_spill] sm:$0xff] }
 0x2f8   :  { %29771 = vst [vmem:[#allocation72_spill] sm:$0xff] %v24060_v5  ;;  %29774 = vst [vmem:[#allocation74_spill] sm:$0xff] %v24071_v16  ;;  %v24073_v32 = vmax.f32 %v6616_v28, %v17562_v1  ;;  %v8626_v31 = vmax.f32 %v6618_v60, %v17563_v41  ;;  %v24075_v50 = vrot.slane %v8624_v59, 7  ;;  %v24077_v10 = vrot.slane %v8614_v53, 7  ;;  %v5962_v16 = vpop.f32.mrf.mxu0 }
 0x2f9   :  { %29773 = vst [vmem:[#allocation54_spill] sm:$0xff] %v24066_v40  ;;  %v17559_v42 = vrot.slane %v6601_v62, 9  ;;  %v6650_v52 = vrot.slane %v6636_v11, %v23666_v19  ;;  %v6651_v0 = vcombine.high %v24058_v17, %v24058_v17  ;;  %v8620_v37 = vmax.f32 %v6600_v44, %v17557_v33  ;;  %v5504_v21 = vpop.f32.mrf.mxu1 }
 0x2fa   :  { %29775 = vst [vmem:[#allocation75_spill] sm:$0xff] %v24073_v32  ;;  %29776 = vst [vmem:[#allocation57_spill] sm:$0xff] %v24077_v10  ;;  %v6634_v25 = vcombine.high %v24063_v26, %v24063_v26  ;;  %v6670_v49 = vcombine.high %v6366_v3, %v6366_v3  ;;  %v6234_v28 = vadd.f32 %v19577_v47, %v29777_v7  ;;  %v17556_v60 = vrot.slane %v24030_v12, 9  ;;  %v29780_v10 = vld [vmem:[#allocation6_spill] sm:$0xff] }
 0x2fb   :  { %v17558_v1 = vrot.slane %v6599_v23, 9  ;;  %v6633_v41 = vrot.slane %v6619_v55, %v23666_v19  ;;  %v6365_v59 = vmax.f32 %v6301_v18, 0.0  ;;  %v24089_v11 = vsel %vm9113_vm2, %v24075_v50, %v8623_v22 }
 0x2fc   :  { %v24091_v53 = vrot.slane %v8626_v31, 7  ;;  %v24094_v44 = vadd.f32 %v5494_v9, %v23933_v30  ;;  %v24097_v33 = vrot.slane %v6366_v3, %v23666_v19  ;;  %v8622_v40 = vmax.f32 %v6601_v62, %v17559_v42 }
 0x2fd   :  { %v6652_v47 = vcombine.high %v6650_v52, %v6650_v52  ;;  %v17569_v7 = vrot.slane %v6651_v0, 9  ;;  %v24100_v5 = vadd.f32 %v19554_v63, %v29780_v10  ;;  %v24102_v55 = vrot.slane %v8620_v37, 7 }
 0x2fe   :  { %29778 = vst [vmem:[#allocation77_spill] sm:$0xff] %v24091_v53  ;;  %29779 = vst [vmem:[#allocation78_spill] sm:$0xff] %v24094_v44  ;;  %v17565_v18 = vrot.slane %v6634_v25, 9  ;;  %v6684_v22 = vrot.slane %v6670_v49, %v23666_v19  ;;  %v6304_v31 = vadd.f32 %v23779_v24, %v6234_v28  ;;  %v8619_v9 = vmax.f32 %v24030_v12, %v17556_v60 }
 0x2ff   :  { %29781 = vst [vmem:[#allocation60_spill] sm:$0xff] %v24100_v5  ;;  %29782 = vst [vmem:[#allocation80_spill] sm:$0xff] %v24102_v55  ;;  %v24107_v30 = vmax.f32 %v6599_v23, %v17558_v1  ;;  %v6635_v3 = vcombine.high %v6633_v41, %v6633_v41  ;;  %v6653_v62 = vcombine.high %v6365_v59, %v6365_v59  ;;  %v17568_v42 = vrot.slane %v24058_v17, 9 }
 0x300   :  { %v17570_v44 = vrot.slane %v6650_v52, 9  ;;  %v6685_v10 = vcombine.high %v24097_v33, %v24097_v33  ;;  %v24113_v37 = vrot.slane %v6365_v59, %v23666_v19  ;;  %v24115_v63 = vrot.slane %v8622_v40, 7  ;;  %v29786_v40 = vld [vmem:[#allocation8_spill] sm:$0xff] }
 0x301   :  { %29783 = vst [vmem:[#allocation81_spill] sm:$0xff] %v24107_v30  ;;  %v17571_v49 = vrot.slane %v6652_v47, 9  ;;  %v8632_v28 = vmax.f32 %v6651_v0, %v17569_v7  ;;  %v24118_v5 = vadd.f32 %v5504_v21, %v23944_v15  ;;  %v24122_v12 = vsel %vm9113_vm2, %v24102_v55, %v8619_v9  ;;  %v19580_v30 = vpop.f32.mrf.mxu0 }
 0x302   :  { %29784 = vst [vmem:[#allocation64_spill] sm:$0xff] %v24115_v63  ;;  %v8628_v23 = vmax.f32 %v6634_v25, %v17565_v18  ;;  %v6686_v60 = vcombine.high %v6684_v22, %v6684_v22  ;;  %v6368_v1 = vmax.f32 %v6304_v31, 0.0  ;;  %v17564_v53 = vrot.slane %v24063_v26, 9 }
 0x303   :  { %29785 = vst [vmem:[#allocation83_spill] sm:$0xff] %v24118_v5  ;;  %v17567_v32 = vrot.slane %v6635_v3, 9  ;;  %v6667_v59 = vrot.slane %v6653_v62, %v23666_v19  ;;  %v6233_v63 = vadd.f32 %v5962_v16, %v29786_v40  ;;  %v8631_v0 = vmax.f32 %v24058_v17, %v17568_v42 }
 0x304   :  { %v24128_v7 = vmax.f32 %v6650_v52, %v17570_v44  ;;  %v17577_v15 = vrot.slane %v6685_v10, 9  ;;  %v6668_v21 = vcombine.high %v24113_v37, %v24113_v37  ;;  %v8634_v9 = vmax.f32 %v6652_v47, %v17571_v49 }
 0x305   :  { %v24132_v25 = vrot.slane %v8632_v28, 7  ;;  %v17566_v18 = vrot.slane %v6633_v41, 9  ;;  %v6236_v31 = vadd.f32 %v19580_v30, %v23754_v51  ;;  %v24135_v5 = vrot.slane %v8628_v23, 7  ;;  %v5972_v51 = vpop.f32.mrf.mxu0 }
 0x306   :  { %v17579_v62 = vrot.slane %v6686_v60, 9  ;;  %v6704_v55 = vcombine.high %v6368_v1, %v6368_v1  ;;  %v6711_v16 = vrot.slane %v6368_v1, %v23666_v19  ;;  %v8627_v17 = vmax.f32 %v24063_v26, %v17564_v53 }
 0x307   :  { %29787 = vst [vmem:[#allocation84_spill] sm:$0xff] %v24135_v5  ;;  %v8630_v52 = vmax.f32 %v6635_v3, %v17567_v32  ;;  %v6669_v44 = vcombine.high %v6667_v59, %v6667_v59  ;;  %v6303_v42 = vadd.f32 %v23779_v24, %v6233_v63  ;;  %v17576_v47 = vrot.slane %v24097_v33, 9 }
 0x308   :  { %v17578_v49 = vrot.slane %v6684_v22, 9  ;;  %v8640_v28 = vmax.f32 %v6685_v10, %v17577_v15  ;;  %v17573_v40 = vrot.slane %v6668_v21, 9  ;;  %v24143_v30 = vsel %vm9113_vm2, %v24132_v25, %v8631_v0 }
 0x309   :  { %v24145_v23 = vrot.slane %v8634_v9, 7  ;;  %v24147_v1 = vmax.f32 %v6633_v41, %v17566_v18  ;;  %v6306_v26 = vadd.f32 %v23779_v24, %v6236_v31  ;;  %v24152_v32 = vsel %vm9113_vm2, %v24135_v5, %v8627_v17 }
 0x30a   :  { %29789 = vst [vmem:[#allocation86_spill] sm:$0xff] %v24152_v32  ;;  %v8642_v53 = vmax.f32 %v6686_v60, %v17579_v62  ;;  %v6718_v3 = vrot.slane %v6704_v55, %v23666_v19  ;;  %v6719_v10 = vcombine.high %v6711_v16, %v6711_v16  ;;  %v24155_v63 = vrot.slane %v8630_v52, 7 }
 0x30b   :  { %29788 = vst [vmem:[#allocation68_spill] sm:$0xff] %v24147_v1  ;;  %v17575_v15 = vrot.slane %v6669_v44, 9  ;;  %v6367_v0 = vmax.f32 %v6303_v42, 0.0  ;;  %v6235_v9 = vadd.f32 %v5972_v51, %v23759_v27  ;;  %v8639_v41 = vmax.f32 %v24097_v33, %v17576_v47 }
 0x30c   :  { %29790 = vst [vmem:[#allocation87_spill] sm:$0xff] %v24155_v63  ;;  %v24159_v18 = vmax.f32 %v6684_v22, %v17578_v49  ;;  %v24161_v31 = vrot.slane %v8640_v28, 7  ;;  %v8636_v1 = vmax.f32 %v6668_v21, %v17573_v40  ;;  %v17572_v17 = vrot.slane %v24113_v37, 9  ;;  %v19583_v63 = vpop.f32.mrf.mxu0 }
 0x30d   :  { %v17574_v60 = vrot.slane %v6667_v59, 9  ;;  %v6370_v62 = vmax.f32 %v6306_v26, 0.0  ;;  %v9131_v55 = vsel %vm9113_vm2, %v23984_v48, %v23968_v13  ;;  %v24167_v52 = vrot.slane %v8642_v53, 7 }
 0x30e   :  { %v6720_v42 = vcombine.high %v6718_v3, %v6718_v3  ;;  %v17584_v5 = vrot.slane %v6711_v16, 9  ;;  %v17585_v27 = vrot.slane %v6719_v10, 9  ;;  %v8638_v51 = vmax.f32 %v6669_v44, %v17575_v15 }
 0x30f   :  { %v17586_v33 = vrot.slane %v6718_v3, 9  ;;  %v24170_v22 = vrot.slane %v6367_v0, %v23666_v19  ;;  %v6305_v21 = vadd.f32 %v23779_v24, %v6235_v9  ;;  %v24173_v47 = vrot.slane %v8636_v1, 7 }
 0x310   :  { %v6687_v49 = vcombine.high %v6367_v0, %v6367_v0  ;;  %v9132_v28 = vsel %vm9115_vm3, %v23984_v48, %v9131_v55  ;;  %v9159_v13 = vsel %vm9113_vm2, %v24003_v36, %v23991_v38  ;;  %v24182_v40 = vsel %vm9113_vm2, %v24161_v31, %v8639_v41 }
 0x311   :  { %29791 = vst [vmem:[#allocation70_spill] sm:$0xff] %v24173_v47  ;;  %v8635_v44 = vmax.f32 %v24113_v37, %v17572_v17  ;;  %v24185_v26 = vmax.f32 %v6667_v59, %v17574_v60  ;;  %v6738_v53 = vcombine.high %v6370_v62, %v6370_v62  ;;  %v17587_v15 = vrot.slane %v6720_v42, 9 }
 0x312   :  { %v8647_v1 = vmax.f32 %v6711_v16, %v17584_v5  ;;  %v9133_v0 = vsel %vm9117_vm4, %v23984_v48, %v9132_v28  ;;  %v9160_v9 = vsel %vm9115_vm3, %v24003_v36, %v9159_v13  ;;  %v8648_v55 = vmax.f32 %v6719_v10, %v17585_v27  ;;  %v5982_v13 = vpop.f32.mrf.mxu0 }
 0x313   :  { %v8649_v32 = vmax.f32 %v6718_v3, %v17586_v33  ;;  %v6702_v38 = vcombine.high %v24170_v22, %v24170_v22  ;;  %v6369_v41 = vmax.f32 %v6305_v21, 0.0  ;;  %v24195_v37 = vsel %vm9113_vm2, %v24173_v47, %v8635_v44 }
 0x314   :  { %29792 = vst [vmem:[#allocation89_spill] sm:$0xff] %v24195_v37  ;;  %v24197_v59 = vrot.slane %v8638_v51, 7  ;;  %v6701_v5 = vrot.slane %v6687_v49, %v23666_v19  ;;  %v9161_v16 = vsel %vm9117_vm4, %v24003_v36, %v9160_v9  ;;  %v24203_v17 = vrot.slane %v6370_v62, %v23666_v19 }
 0x315   :  { %v24206_v3 = vrot.slane %v6738_v53, %v23666_v19  ;;  %v9134_v10 = vsel %vm9119_vm5, %v23984_v48, %v9133_v0  ;;  %v9162_v60 = vsel %vm9119_vm5, %v24003_v36, %v9161_v16  ;;  %v8650_v27 = vmax.f32 %v6720_v42, %v17587_v15 }
 0x316   :  { %v10156_v51 = vcombine.low %v9134_v10, %v9162_v60  ;;  %v6238_v33 = vadd.f32 %v19583_v63, %v23763_v34  ;;  %v9124_v21 = vsel %vm9113_vm2, %v24001_v35, %v23989_v39  ;;  %v24216_v49 = vrot.slane %v8648_v55, 7 }
 0x317   :  { %v17581_v62 = vrot.slane %v6702_v38, 9  ;;  %v24219_v28 = vrot.slane %v6369_v41, %v23666_v19  ;;  %v9152_v48 = vsel %vm9113_vm2, %v24038_v57, %v24019_v14  ;;  %v17580_v36 = vrot.slane %v24170_v22, 9 }
 0x318   :  { %29793 = vst [vmem:[#allocation90_spill] sm:$0xff] %v24216_v49  ;;  %v6721_v42 = vcombine.high %v6369_v41, %v6369_v41  ;;  %v10163_v34 = vrot.slane %v10156_v51, %v23856_v20  ;;  %v9125_v63 = vsel %vm9115_vm3, %v24001_v35, %v9124_v21  ;;  %v6703_v39 = vcombine.high %v6701_v5, %v6701_v5  ;;  %v29794_v41 = vld [vmem:[#allocation10_spill] sm:$0xff] }
 0x319   :  { %v6753_v44 = vcombine.high %v24203_v17, %v24203_v17  ;;  %v6754_v53 = vcombine.high %v24206_v3, %v24206_v3  ;;  %v9153_v15 = vsel %vm9115_vm3, %v24038_v57, %v9152_v48  ;;  %v29218_v0 = vmov 0.0  }
 0x31a   :  { %v11264_v14 = vrot.slane %v10163_v34, %v23666_v19  ;;  %v10164_v9 = vcombine.high %v10163_v34, %v29218_v0  ;;  %v6308_v55 = vadd.f32 %v23779_v24, %v6238_v33  ;;  %v6237_v16 = vadd.f32 %v5982_v13, %v29794_v41  ;;  %v19586_v41 = vpop.f32.mrf.mxu0 }
 0x31b   :  { %v8644_v10 = vmax.f32 %v6702_v38, %v17581_v62  ;;  %v6736_v60 = vcombine.high %v24219_v28, %v24219_v28  ;;  %v9126_v51 = vsel %vm9117_vm4, %v24001_v35, %v9125_v63  ;;  %v9154_v21 = vsel %vm9117_vm4, %v24038_v57, %v9153_v15 }
 0x31c   :  { %v24246_v48 = vsel %vm9113_vm2, %v24216_v49, %v8647_v1  ;;  %v24248_v47 = vrot.slane %v8650_v27, 7  ;;  %v17582_v34 = vrot.slane %v6701_v5, 9  ;;  %v6735_v33 = vrot.slane %v6721_v42, %v23666_v19  ;;  %11370 = vrot.lane.b32.xlu1 %v11264_v14, %s19941_s25 }
 0x31d   :  { %29795 = vst [vmem:[#allocation73_spill] sm:$0xff] %v24246_v48  ;;  %v17583_v38 = vrot.slane %v6703_v39, 9  ;;  %v17593_v62 = vrot.slane %v6753_v44, 9  ;;  %v17595_v13 = vrot.slane %v6754_v53, 9  ;;  %v9155_v63 = vsel %vm9119_vm5, %v24038_v57, %v9154_v21 }
 0x31e   :  { %v6372_v15 = vmax.f32 %v6308_v55, 0.0  ;;  %v6307_v0 = vadd.f32 %v23779_v24, %v6237_v16  ;;  %v11440_v1 = vrot.slane %v10164_v9, %v23666_v19  ;;  %v9127_v27 = vsel %vm9119_vm5, %v24001_v35, %v9126_v51  ;;  %v29797_v9 = vld [vmem:[#allocation11_spill] sm:$0xff] }
 0x31f   :  { %v8643_v42 = vmax.f32 %v24170_v22, %v17580_v36  ;;  %v24259_v49 = vrot.slane %v8644_v10, 7  ;;  %v17589_v14 = vrot.slane %v6736_v60, 9  ;;  %v10147_v48 = vcombine.low %v9127_v27, %v9155_v63  ;;  %v5992_v10 = vpop.f32.mrf.mxu0 }
 0x320   :  { %v24263_v37 = vsel %vm9113_vm2, %v24248_v47, %v8649_v32  ;;  %v24265_v57 = vmax.f32 %v6701_v5, %v17582_v34  ;;  %v6737_v55 = vcombine.high %v6735_v33, %v6735_v33  ;;  %11546 = vrot.lane.b32.xlu1 %v11440_v1, %s19942_s1  ;;  %v6240_v16 = vadd.f32 %v19586_v41, %v29797_v9 }
 0x321   :  { %29796 = vst [vmem:[#allocation92_spill] sm:$0xff] %v24259_v49  ;;  %v8646_v21 = vmax.f32 %v6703_v39, %v17583_v38  ;;  %v17592_v35 = vrot.slane %v24203_v17, 9  ;;  %v17594_v22 = vrot.slane %v24206_v3, 9  ;;  %v8656_v36 = vmax.f32 %v6753_v44, %v17593_v62  ;;  %v29799_v62 = vld [vmem:[#allocation13_spill] sm:$0xff] }
 0x322   :  { %v8658_v51 = vmax.f32 %v6754_v53, %v17595_v13  ;;  %v6772_v63 = vcombine.high %v6372_v15, %v6372_v15  ;;  %v6371_v27 = vmax.f32 %v6307_v0, 0.0  ;;  %v24272_v32 = vrot.slane %v10147_v48, %v23856_v20 }
 0x323   :  { %v24276_v5 = vsel %vm9113_vm2, %v24259_v49, %v8643_v42  ;;  %v17588_v34 = vrot.slane %v24219_v28, 9  ;;  %v8652_v41 = vmax.f32 %v6736_v60, %v17589_v14  ;;  %v6779_v39 = vrot.slane %v6372_v15, %v23666_v19 }
 0x324   :  { %29798 = vst [vmem:[#allocation93_spill] sm:$0xff] %v24276_v5  ;;  %v17591_v38 = vrot.slane %v6737_v55, 9  ;;  %v10912_v44 = vrot.slane %v24272_v32, %v23666_v19  ;;  %v6310_v53 = vadd.f32 %v23779_v24, %v6240_v16  ;;  %v6239_v0 = vadd.f32 %v5992_v10, %v29799_v62 }
 0x325   :  { %v24284_v13 = vrot.slane %v8646_v21, 7  ;;  %v8655_v48 = vmax.f32 %v24203_v17, %v17592_v35  ;;  %v24287_v1 = vrot.slane %v8656_v36, 7  ;;  %v17590_v42 = vrot.slane %v6735_v33, 9 }
 0x326   :  { %v24289_v9 = vrot.slane %v8658_v51, 7  ;;  %v6786_v60 = vrot.slane %v6772_v63, %v23666_v19  ;;  %v24293_v15 = vrot.slane %v6371_v27, %v23666_v19  ;;  %11018 = vrot.lane.b32.xlu0 %v10912_v44, %s19943_s26  ;;  %v9138_v14 = vsel %vm9113_vm2, %v23987_v6, %v23975_v29 }
 0x327   :  { %v8657_v16 = vmax.f32 %v24206_v3, %v17594_v22  ;;  %v8651_v17 = vmax.f32 %v24219_v28, %v17588_v34  ;;  %v24301_v21 = vrot.slane %v8652_v41, 7  ;;  %v6787_v35 = vcombine.high %v6779_v39, %v6779_v39 }
 0x328   :  { %29800 = vst [vmem:[#allocation76_spill] sm:$0xff] %v24289_v9  ;;  %v8654_v36 = vmax.f32 %v6737_v55, %v17591_v38  ;;  %v6755_v10 = vcombine.high %v6371_v27, %v6371_v27  ;;  %v6374_v51 = vmax.f32 %v6310_v53, 0.0  ;;  %v6309_v63 = vadd.f32 %v23779_v24, %v6239_v0 }
 0x329   :  { %29801 = vst [vmem:[#allocation94_spill] sm:$0xff] %v24301_v21  ;;  %v24304_v62 = vmax.f32 %v6735_v33, %v17590_v42  ;;  %v17600_v49 = vrot.slane %v6779_v39, 9  ;;  %v9139_v44 = vsel %vm9115_vm3, %v23987_v6, %v9138_v14  ;;  %v9166_v29 = vsel %vm9113_vm2, %v24006_v56, %v23998_v58 }
 0x32a   :  { %v24313_v3 = vsel %vm9113_vm2, %v24287_v1, %v8655_v48  ;;  %v24317_v28 = vsel %vm9113_vm2, %v24289_v9, %v8657_v16  ;;  %v6788_v55 = vcombine.high %v6786_v60, %v6786_v60  ;;  %v6770_v33 = vcombine.high %v24293_v15, %v24293_v15  ;;  %v19589_v48 = vpop.f32.mrf.mxu0 }
 0x32b   :  { %29802 = vst [vmem:[#allocation96_spill] sm:$0xff] %v24317_v28  ;;  %v24323_v22 = vsel %vm9113_vm2, %v24301_v21, %v8651_v17  ;;  %v17601_v27 = vrot.slane %v6787_v35, 9  ;;  %v9140_v58 = vsel %vm9117_vm4, %v23987_v6, %v9139_v44  ;;  %v9167_v34 = vsel %vm9115_vm3, %v24006_v56, %v9166_v29 }
 0x32c   :  { %29803 = vst [vmem:[#allocation97_spill] sm:$0xff] %v24323_v22  ;;  %v24329_v41 = vrot.slane %v8654_v36, 7  ;;  %v6769_v38 = vrot.slane %v6755_v10, %v23666_v19  ;;  %v6806_v53 = vcombine.high %v6374_v51, %v6374_v51  ;;  %v6373_v0 = vmax.f32 %v6309_v63, 0.0  ;;  %v6002_v9 = vpop.f32.mrf.mxu0 }
 0x32d   :  { %v17602_v42 = vrot.slane %v6786_v60, 9  ;;  %v8663_v14 = vmax.f32 %v6779_v39, %v17600_v49  ;;  %v17596_v16 = vrot.slane %v24293_v15, 9  ;;  %v9168_v17 = vsel %vm9117_vm4, %v24006_v56, %v9167_v34 }
 0x32e   :  { %v17603_v5 = vrot.slane %v6788_v55, 9  ;;  %v17597_v21 = vrot.slane %v6770_v33, 9  ;;  %v9141_v44 = vsel %vm9119_vm5, %v23987_v6, %v9140_v58  ;;  %v9169_v36 = vsel %vm9119_vm5, %v24006_v56, %v9168_v17 }
 0x32f   :  { %v8664_v29 = vmax.f32 %v6787_v35, %v17601_v27  ;;  %v6813_v10 = vrot.slane %v6374_v51, %v23666_v19  ;;  %v10165_v63 = vcombine.low %v9141_v44, %v9169_v36  ;;  %v9116_v49 = vsel %vm9115_vm3, %v23981_v4, %v23996_v2 }
 0x330   :  { %v6771_v39 = vcombine.high %v6769_v38, %v6769_v38  ;;  %v24344_v22 = vrot.slane %v6806_v53, %v23666_v19  ;;  %v24347_v34 = vrot.slane %v6373_v0, %v23666_v19  ;;  %v9146_v6 = vsel %vm9115_vm3, %v24025_v61, %v24036_v54 }
 0x331   :  { %v24352_v56 = vmax.f32 %v6786_v60, %v17602_v42  ;;  %v17598_v35 = vrot.slane %v6769_v38, 9  ;;  %v10172_v51 = vrot.slane %v10165_v63, %v23856_v20  ;;  %v6242_v27 = vadd.f32 %v19589_v48, %v23786_v45 }
 0x332   :  { %v8660_v2 = vmax.f32 %v6770_v33, %v17597_v21  ;;  %v6789_v58 = vcombine.high %v6373_v0, %v6373_v0  ;;  %v9118_v53 = vsel %vm9117_vm4, %v23981_v4, %v9116_v49  ;;  %v9147_v17 = vsel %vm9117_vm4, %v24025_v61, %v9146_v6 }
 0x333   :  { %v6821_v44 = vcombine.high %v6813_v10, %v6813_v10  ;;  %v11616_v36 = vrot.slane %v10172_v51, %v23666_v19  ;;  %v29804_v28 = vmov 0.0   ;;  %v6241_v60 = vadd.f32 %v6002_v9, %v23790_v46 }
 0x334   :  { %v10173_v54 = vcombine.high %v10172_v51, %v29804_v28  ;;  %v17599_v42 = vrot.slane %v6771_v39, 9  ;;  %v6822_v63 = vcombine.high %v24344_v22, %v24344_v22  ;;  %v6804_v45 = vcombine.high %v24347_v34, %v24347_v34  ;;  %12881 = vst.msk [vmem:[#allocation2] sm:$0xff] %vm11946_vm6, %v29804_v28  ;;  %12884 = vst.msk [vmem:[#allocation2 + $0x10] sm:$0xff] %vm11946_vm6, %v29804_v28 }
 0x335   :  { %v9148_v21 = vsel %vm9119_vm5, %v24025_v61, %v9147_v17  ;;  %v10155_v33 = vcombine.high %v24272_v32, %v29804_v28  ;;  %11722 = vrot.lane.b32.xlu1 %v11616_v36, %s19944_s27  ;;  %v6312_v46 = vadd.f32 %v23779_v24, %v6242_v27  ;;  %v9120_v9 = vsel %vm9119_vm5, %v23981_v4, %v9118_v53 }
 0x336   :  { %v11792_v0 = vrot.slane %v10173_v54, %v23666_v19  ;;  %v8666_v48 = vmax.f32 %v6788_v55, %v17603_v5  ;;  %v24376_v49 = vrot.slane %v8664_v29, 7  ;;  %v24379_v6 = vrot.slane %v6789_v58, %v23666_v19  ;;  %v19592_v55 = vpop.f32.mrf.mxu0  ;;  %12886 = vst.msk [vmem:[#allocation2 + $0x20] sm:$0xff] %vm11946_vm6, %v29804_v28  ;;  %12888 = vst.msk [vmem:[#allocation2 + $0x30] sm:$0xff] %vm11946_vm6, %v29804_v28 }
 0x337   :  { %v10138_v61 = vcombine.low %v9120_v9, %v9148_v21  ;;  %v8659_v51 = vmax.f32 %v24293_v15, %v17596_v16  ;;  %v24382_v32 = vrot.slane %v8660_v2, 7  ;;  %v17609_v17 = vrot.slane %v6821_v44, 9  ;;  %12890 = vst.msk [vmem:[#allocation2 + $0x40] sm:$0xff] %vm11946_vm6, %v29804_v28  ;;  %12892 = vst.msk [vmem:[#allocation2 + $0x50] sm:$0xff] %vm11946_vm6, %v29804_v28 }
 0x338   :  { %29805 = vst [vmem:[#allocation79_spill] sm:$0xff] %v24376_v49  ;;  %11898 = vrot.lane.b32.xlu0 %v11792_v0, %s19945_s28  ;;  %v6311_v27 = vadd.f32 %v23779_v24, %v6241_v60  ;;  %v8662_v36 = vmax.f32 %v6771_v39, %v17599_v42  ;;  %v17608_v54 = vrot.slane %v6813_v10, 9  ;;  %v17611_v4 = vrot.slane %v6822_v63, 9  ;;  %12894 = vst.msk [vmem:[#allocation2 + $0x60] sm:$0xff] %vm11946_vm6, %v29804_v28 }
 0x339   :  { %29806 = vst [vmem:[#allocation98_spill] sm:$0xff] %v24382_v32  ;;  %v17605_v5 = vrot.slane %v6804_v45, 9  ;;  %v24386_v29 = vmax.f32 %v6769_v38, %v17598_v35  ;;  %v6376_v58 = vmax.f32 %v6312_v46, 0.0  ;;  %v24389_v53 = vrot.slane %v10138_v61, %v23856_v20  ;;  %v6012_v46 = vpop.f32.mrf.mxu0  ;;  %12896 = vst.msk [vmem:[#allocation2 + $0x70] sm:$0xff] %vm11946_vm6, %v29804_v28 }
 0x33a   :  { %v11088_v15 = vrot.slane %v10155_v33, %v23666_v19  ;;  %v24394_v16 = vsel %vm9113_vm2, %v24376_v49, %v8663_v14  ;;  %v24396_v2 = vrot.slane %v8666_v48, 7  ;;  %v17610_v24 = vrot.slane %v24344_v22, 9  ;;  %12898 = vst.msk [vmem:[#allocation2 + $0x80] sm:$0xff] %vm11946_vm6, %v29804_v28  ;;  %12900 = vst.msk [vmem:[#allocation2 + $0x90] sm:$0xff] %vm11946_vm6, %v29804_v28 }
 0x33b   :  { %29807 = vst [vmem:[#allocation100_spill] sm:$0xff] %v24386_v29  ;;  %29808 = vst [vmem:[#allocation101_spill] sm:$0xff] %v24389_v53  ;;  %v6805_v39 = vcombine.high %v24379_v6, %v24379_v6  ;;  %v24403_v38 = vsel %vm9113_vm2, %v24382_v32, %v8659_v51  ;;  %v8672_v35 = vmax.f32 %v6821_v44, %v17609_v17  ;;  %v6375_v60 = vmax.f32 %v6311_v27, 0.0  ;;  %v29812_v44 = vld [vmem:[#allocation67_spill] sm:$0xff] }
 0x33c   :  { %29809 = vst [vmem:[#allocation82_spill] sm:$0xff] %v24394_v16  ;;  %29810 = vst [vmem:[#allocation102_spill] sm:$0xff] %v24403_v38  ;;  %v10146_v42 = vcombine.high %v24389_v53, %v29804_v28  ;;  %11194 = vrot.lane.b32.xlu0 %v11088_v15, %s19946_s29  ;;  %v24408_v14 = vrot.slane %v8662_v36, 7  ;;  %v8671_v21 = vmax.f32 %v6813_v10, %v17608_v54  ;;  %v17604_v27 = vrot.slane %v24347_v34, 9 }
 0x33d   :  { %v8674_v33 = vmax.f32 %v6822_v63, %v17611_v4  ;;  %v8668_v0 = vmax.f32 %v6804_v45, %v17605_v5  ;;  %v6840_v9 = vcombine.high %v6376_v58, %v6376_v58  ;;  %v6244_v61 = vadd.f32 %v19592_v55, %v23794_v43  ;;  %v29814_v43 = vld [vmem:[#allocation28_spill] sm:$0xff]  ;;  %12902 = vst.msk [vmem:[#allocation2 + $0xa0] sm:$0xff] %vm11946_vm6, %v29804_v28 }
 0x33e   :  { %29811 = vst [vmem:[#allocation104_spill] sm:$0xff] %v24408_v14  ;;  %v10736_v48 = vrot.slane %v10146_v42, %v23666_v19  ;;  %v9188_v51 = vsel %vm9115_vm3, %v29812_v44, %v24050_v8  ;;  %v24416_v17 = vmax.f32 %v24344_v22, %v17610_v24  ;;  %v17607_v36 = vrot.slane %v6805_v39, 9  ;;  %v24445_v24 = vld [vmem:[%s29184_s2] ss:$0 sm:$0xff]  ;;  %12904 = vst.msk [vmem:[#allocation2 + $0xb0] sm:$0xff] %vm11946_vm6, %v29804_v28 }
 0x33f   :  { %v24420_v10 = vrot.slane %v6376_v58, %v23666_v19  ;;  %v24422_v63 = vrot.slane %v8672_v35, 7  ;;  %v6823_v45 = vcombine.high %v6375_v60, %v6375_v60  ;;  %v6243_v54 = vadd.f32 %v6012_v46, %v29814_v43  ;;  %v29818_v46 = vld [vmem:[#allocation51_spill] sm:$0xff]  ;;  %12906 = vst.msk [vmem:[#allocation2 + $0xc0] sm:$0xff] %vm11946_vm6, %v29804_v28  ;;  %12908 = vst.msk [vmem:[#allocation2 + $0xd0] sm:$0xff] %vm11946_vm6, %v29804_v28 }
 0x340   :  { %10842 = vrot.lane.b32.xlu1 %v10736_v48, %s19947_s30  ;;  %v9216_v8 = vsel %vm9115_vm3, %v24075_v50, %v24089_v11  ;;  %v24429_v22 = vrot.slane %v8674_v33, 7  ;;  %v17606_v4 = vrot.slane %v24379_v6, 9  ;;  %v24433_v5 = vrot.slane %v6375_v60, %v23666_v19  ;;  %12910 = vst.msk [vmem:[#allocation2 + $0xe0] sm:$0xff] %vm11946_vm6, %v29804_v28  ;;  %12912 = vst.msk [vmem:[#allocation2 + $0xf0] sm:$0xff] %vm11946_vm6, %v29804_v28 }
 0x341   :  { %29813 = vst [vmem:[#allocation105_spill] sm:$0xff] %v24422_v63  ;;  %v9189_v55 = vsel %vm9117_vm4, %v29812_v44, %v9188_v51  ;;  %v24437_v58 = vrot.slane %v8668_v0, 7  ;;  %v24440_v15 = vrot.slane %v6840_v9, %v23666_v19  ;;  %v6314_v11 = vadd.f32 %v24445_v24, %v6244_v61  ;;  %v29817_v0 = vld [vmem:[#allocation69_spill] sm:$0xff]  ;;  %12914 = vst.msk [vmem:[#allocation2 + $0x100] sm:$0xff] %vm11946_vm6, %v29804_v28 }
 0x342   :  { %29815 = vst [vmem:[#allocation85_spill] sm:$0xff] %v24429_v22  ;;  %v9217_v35 = vsel %vm9117_vm4, %v24075_v50, %v9216_v8  ;;  %v8667_v60 = vmax.f32 %v24347_v34, %v17604_v27  ;;  %v8670_v42 = vmax.f32 %v6805_v39, %v17607_v36  ;;  %v6855_v33 = vcombine.high %v24420_v10, %v24420_v10  ;;  %v29828_v22 = vld [vmem:[#allocation80_spill] sm:$0xff] }
 0x343   :  { %29816 = vst [vmem:[#allocation106_spill] sm:$0xff] %v24437_v58  ;;  %v9194_v9 = vsel %vm9113_vm2, %v29818_v46, %v29817_v0  ;;  %v24457_v48 = vrot.slane %v6823_v45, %v23666_v19  ;;  %v6313_v51 = vadd.f32 %v24445_v24, %v6243_v54  ;;  %v9190_v61 = vsel %vm9119_vm5, %v29812_v44, %v9189_v55 }
 0x344   :  { %v9218_v43 = vsel %vm9119_vm5, %v24075_v50, %v9217_v35  ;;  %v24466_v34 = vsel %vm9113_vm2, %v24422_v63, %v8671_v21  ;;  %v24469_v39 = vmax.f32 %v24379_v6, %v17606_v4  ;;  %v6838_v27 = vcombine.high %v24433_v5, %v24433_v5  ;;  %12916 = vst.msk [vmem:[#allocation2 + $0x110] sm:$0xff] %vm11946_vm6, %v29804_v28 }
 0x345   :  { %29819 = vst [vmem:[#allocation108_spill] sm:$0xff] %v24466_v34  ;;  %v10192_v36 = vcombine.low %v9190_v61, %v9218_v43  ;;  %v24475_v45 = vsel %vm9113_vm2, %v24437_v58, %v8667_v60  ;;  %v6856_v44 = vcombine.high %v24440_v15, %v24440_v15  ;;  %v6378_v54 = vmax.f32 %v6314_v11, 0.0  ;;  %v29824_v43 = vld [vmem:[#allocation77_spill] sm:$0xff]  ;;  %v29825_v34 = vld [vmem:[#allocation74_spill] sm:$0xff]  ;;  %12918 = vst.msk [vmem:[#allocation2 + $0x120] sm:$0xff] %vm11946_vm6, %v29804_v28 }
 0x346   :  { %29820 = vst [vmem:[#allocation109_spill] sm:$0xff] %v24469_v39  ;;  %29821 = vst [vmem:[#allocation88_spill] sm:$0xff] %v24475_v45  ;;  %v9195_v50 = vsel %vm9115_vm3, %v29818_v46, %v9194_v9  ;;  %v24481_v21 = vrot.slane %v8670_v42, 7  ;;  %v17616_v6 = vrot.slane %v24420_v10, 9  ;;  %v17612_v8 = vrot.slane %v24433_v5, 9  ;;  %v29823_v9 = vld [vmem:[#allocation75_spill] sm:$0xff] }
 0x347   :  { %v10199_v4 = vrot.slane %v10192_v36, %v23856_v20  ;;  %v17617_v55 = vrot.slane %v6855_v33, 9  ;;  %v17618_v35 = vrot.slane %v24440_v15, 9  ;;  %v6839_v60 = vcombine.high %v24457_v48, %v24457_v48  ;;  %12920 = vst.msk [vmem:[#allocation2 + $0x130] sm:$0xff] %vm11946_vm6, %v29804_v28 }
 0x348   :  { %29822 = vst [vmem:[#allocation110_spill] sm:$0xff] %v24481_v21  ;;  %v6377_v0 = vmax.f32 %v6313_v51, 0.0  ;;  %v17613_v61 = vrot.slane %v6838_v27, 9  ;;  %v9196_v42 = vsel %vm9117_vm4, %v29818_v46, %v9195_v50  ;;  %v9222_v53 = vsel %vm9113_vm2, %v29824_v43, %v29823_v9  ;;  %v19595_v21 = vpop.f32.mrf.mxu0  ;;  %v29826_v9 = vld [vmem:[#allocation71_spill] sm:$0xff]  ;;  %12885 = vst.msk [vmem:[#allocation2 + $0x18] sm:$0x3] %vm12882_vm13, %v29804_v28 }
 0x349   :  { %v11271_v11 = vrot.slane %v10199_v4, %v23666_v19  ;;  %v17619_v39 = vrot.slane %v6856_v44, 9  ;;  %v17614_v36 = vrot.slane %v24457_v48, 9  ;;  %v24497_v14 = vrot.slane %v6378_v54, %v23666_v19  ;;  %12887 = vst.msk [vmem:[#allocation2 + $0x28] sm:$0x3] %vm12882_vm13, %v29804_v28  ;;  %12889 = vst.msk [vmem:[#allocation2 + $0x38] sm:$0x3] %vm12882_vm13, %v29804_v28 }
 0x34a   :  { %v9223_v51 = vsel %vm9115_vm3, %v29824_v43, %v9222_v53  ;;  %v6874_v29 = vcombine.high %v6378_v54, %v6378_v54  ;;  %v10200_v63 = vcombine.high %v10199_v4, %v29804_v28  ;;  %v9174_v49 = vsel %vm9115_vm3, %v29826_v9, %v29825_v34  ;;  %v6022_v32 = vpop.f32.mrf.mxu0  ;;  %v29827_v34 = vld [vmem:[#allocation29_spill] sm:$0xff]  ;;  %12891 = vst.msk [vmem:[#allocation2 + $0x48] sm:$0x3] %vm12882_vm13, %v29804_v28 }
 0x34b   :  { %11372 = vrot.lane.b32.xlu1 %v11271_v11, %s19941_s25  ;;  %v9224_v50 = vsel %vm9117_vm4, %v29824_v43, %v9223_v51  ;;  %v8680_v16 = vmax.f32 %v6855_v33, %v17617_v55  ;;  %v24509_v58 = vrot.slane %v6377_v0, %v23666_v19  ;;  %v9197_v45 = vsel %vm9119_vm5, %v29818_v46, %v9196_v42 }
 0x34c   :  { %v9225_v53 = vsel %vm9119_vm5, %v29824_v43, %v9224_v50  ;;  %v6857_v54 = vcombine.high %v6377_v0, %v6377_v0  ;;  %v11447_v51 = vrot.slane %v10200_v63, %v23666_v19  ;;  %v9175_v4 = vsel %vm9117_vm4, %v29826_v9, %v9174_v49  ;;  %v29829_v43 = vld [vmem:[#allocation30_spill] sm:$0xff]  ;;  %12893 = vst.msk [vmem:[#allocation2 + $0x58] sm:$0x3] %vm12882_vm13, %v29804_v28 }
 0x34d   :  { %v10201_v11 = vcombine.low %v9197_v45, %v9225_v53  ;;  %v17615_v38 = vrot.slane %v6839_v60, 9  ;;  %v6889_v33 = vcombine.high %v24497_v14, %v24497_v14  ;;  %v6246_v55 = vadd.f32 %v19595_v21, %v29827_v34  ;;  %12895 = vst.msk [vmem:[#allocation2 + $0x68] sm:$0x3] %vm12882_vm13, %v29804_v28  ;;  %12897 = vst.msk [vmem:[#allocation2 + $0x78] sm:$0x3] %vm12882_vm13, %v29804_v28 }
 0x34e   :  { %v9202_v46 = vsel %vm9115_vm3, %v29828_v22, %v24122_v12  ;;  %v8676_v42 = vmax.f32 %v6838_v27, %v17613_v61  ;;  %v6888_v0 = vrot.slane %v6874_v29, %v23666_v19  ;;  %v6872_v63 = vcombine.high %v24509_v58, %v24509_v58  ;;  %12899 = vst.msk [vmem:[#allocation2 + $0x88] sm:$0x3] %vm12882_vm13, %v29804_v28 }
 0x34f   :  { %v24526_v45 = vrot.slane %v10201_v11, %v23856_v20  ;;  %11548 = vrot.lane.b32.xlu1 %v11447_v51, %s19942_s1  ;;  %v9203_v49 = vsel %vm9117_vm4, %v29828_v22, %v9202_v46  ;;  %v6245_v21 = vadd.f32 %v6022_v32, %v29829_v43  ;;  %v9176_v50 = vsel %vm9119_vm5, %v29826_v9, %v9175_v4  ;;  %v19598_v11 = vpop.f32.mrf.mxu0 }
 0x350   :  { %v9204_v12 = vsel %vm9119_vm5, %v29828_v22, %v9203_v49  ;;  %v24538_v29 = vrot.slane %v8680_v16, 7  ;;  %v6871_v27 = vrot.slane %v6857_v54, %v23666_v19  ;;  %v8679_v51 = vmax.f32 %v24420_v10, %v17616_v6  ;;  %12883 = vst.msk [vmem:[#allocation2 + $0x8] sm:$0x3] %vm12882_vm13, %v29804_v28  ;;  %12901 = vst.msk [vmem:[#allocation2 + $0x98] sm:$0x3] %vm12882_vm13, %v29804_v28 }
 0x351   :  { %v11623_v61 = vrot.slane %v24526_v45, %v23666_v19  ;;  %v10174_v53 = vcombine.low %v9176_v50, %v9204_v12  ;;  %v8675_v34 = vmax.f32 %v24433_v5, %v17612_v8  ;;  %v17625_v32 = vrot.slane %v6889_v33, 9  ;;  %v6032_v8 = vpop.f32.mrf.mxu0  ;;  %12903 = vst.msk [vmem:[#allocation2 + $0xa8] sm:$0x3] %vm12882_vm13, %v29804_v28  ;;  %12905 = vst.msk [vmem:[#allocation2 + $0xb8] sm:$0x3] %vm12882_vm13, %v29804_v28 }
 0x352   :  { %v6316_v46 = vadd.f32 %v24445_v24, %v6246_v55  ;;  %v24547_v9 = vmax.f32 %v24440_v15, %v17618_v35  ;;  %v8682_v22 = vmax.f32 %v6856_v44, %v17619_v39  ;;  %v6890_v16 = vcombine.high %v6888_v0, %v6888_v0  ;;  %12907 = vst.msk [vmem:[#allocation2 + $0xc8] sm:$0x3] %vm12882_vm13, %v29804_v28 }
 0x353   :  { %11724 = vrot.lane.b32.xlu0 %v11623_v61, %s19944_s27  ;;  %v24551_v54 = vrot.slane %v10174_v53, %v23856_v20  ;;  %v24554_v4 = vmax.f32 %v24457_v48, %v17614_v36  ;;  %v8678_v49 = vmax.f32 %v6839_v60, %v17615_v38  ;;  %v17621_v10 = vrot.slane %v6872_v63, 9  ;;  %v29834_v36 = vld [vmem:[#allocation31_spill] sm:$0xff]  ;;  %v29836_v53 = vld [vmem:[#allocation32_spill] sm:$0xff]  ;;  %12909 = vst.msk [vmem:[#allocation2 + $0xd8] sm:$0x3] %vm12882_vm13, %v29804_v28 }
 0x354   :  { %29830 = vst [vmem:[#allocation112_spill] sm:$0xff] %v24547_v9  ;;  %v6315_v5 = vadd.f32 %v24445_v24, %v6245_v21  ;;  %v24559_v6 = vsel %vm9113_vm2, %v24538_v29, %v8679_v51  ;;  %v24561_v15 = vrot.slane %v8676_v42, 7  ;;  %v17624_v39 = vrot.slane %v24497_v14, 9  ;;  %12911 = vst.msk [vmem:[#allocation2 + $0xe8] sm:$0x3] %vm12882_vm13, %v29804_v28 }
 0x355   :  { %29831 = vst [vmem:[#allocation113_spill] sm:$0xff] %v24551_v54  ;;  %29832 = vst [vmem:[#allocation91_spill] sm:$0xff] %v24554_v4  ;;  %v6873_v44 = vcombine.high %v6871_v27, %v6871_v27  ;;  %v8688_v35 = vmax.f32 %v6889_v33, %v17625_v32  ;;  %v6380_v55 = vmax.f32 %v6316_v46, 0.0  ;;  %v10182_v48 = vcombine.high %v24551_v54, %v29804_v28 }
 0x356   :  { %29833 = vst [vmem:[#allocation114_spill] sm:$0xff] %v24561_v15  ;;  %v6248_v38 = vadd.f32 %v19598_v11, %v29834_v36  ;;  %v24567_v60 = vrot.slane %v8682_v22, 7  ;;  %v17626_v43 = vrot.slane %v6888_v0, 9  ;;  %v17627_v21 = vrot.slane %v6890_v16, 9  ;;  %12913 = vst.msk [vmem:[#allocation2 + $0xf8] sm:$0x3] %vm12882_vm13, %v29804_v28 }
 0x357   :  { %v17620_v50 = vrot.slane %v24509_v58, 9  ;;  %v8684_v12 = vmax.f32 %v6872_v63, %v17621_v10  ;;  %v6379_v42 = vmax.f32 %v6315_v5, 0.0  ;;  %v10743_v61 = vrot.slane %v10182_v48, %v23666_v19  ;;  %12915 = vst.msk [vmem:[#allocation2 + $0x108] sm:$0x3] %vm12882_vm13, %v29804_v28  ;;  %12917 = vst.msk [vmem:[#allocation2 + $0x118] sm:$0x3] %vm12882_vm13, %v29804_v28 }
 0x358   :  { %29835 = vst [vmem:[#allocation22_spill] sm:$0xff] %v24567_v60  ;;  %v6247_v51 = vadd.f32 %v6032_v8, %v29836_v53  ;;  %v24574_v33 = vsel %vm9113_vm2, %v24561_v15, %v8675_v34  ;;  %v24576_v32 = vrot.slane %v8678_v49, 7  ;;  %v8687_v11 = vmax.f32 %v24497_v14, %v17624_v39  ;;  %v29841_v39 = vld [vmem:[#allocation72_spill] sm:$0xff]  ;;  %12919 = vst.msk [vmem:[#allocation2 + $0x128] sm:$0x3] %vm12882_vm13, %v29804_v28 }
 0x359   :  { %29837 = vst [vmem:[#allocation95_spill] sm:$0xff] %v24574_v33  ;;  %v17623_v46 = vrot.slane %v6873_v44, 9  ;;  %v24579_v22 = vrot.slane %v8688_v35, 7  ;;  %v17622_v36 = vrot.slane %v6871_v27, 9  ;;  %v6908_v54 = vcombine.high %v6380_v55, %v6380_v55  ;;  %10844 = vrot.lane.b32.xlu0 %v10743_v61, %s19947_s30  ;;  %v29842_v35 = vld [vmem:[#allocation57_spill] sm:$0xff] }
 0x35a   :  { %29838 = vst [vmem:[#allocation17_spill] sm:$0xff] %v24576_v32  ;;  %v6318_v63 = vadd.f32 %v24445_v24, %v6248_v38  ;;  %v24583_v10 = vmax.f32 %v6888_v0, %v17626_v43  ;;  %v8690_v5 = vmax.f32 %v6890_v16, %v17627_v21  ;;  %v8683_v8 = vmax.f32 %v24509_v58, %v17620_v50  ;;  %v29843_v16 = vld [vmem:[#allocation81_spill] sm:$0xff]  ;;  %v29844_v58 = vld [vmem:[#allocation64_spill] sm:$0xff] }
 0x35b   :  { %v6915_v34 = vrot.slane %v6380_v55, %v23666_v19  ;;  %v24587_v49 = vrot.slane %v8684_v12, 7  ;;  %v6891_v48 = vcombine.high %v6379_v42, %v6379_v42  ;;  %v6317_v14 = vadd.f32 %v24445_v24, %v6247_v51  ;;  %12921 = vst.msk [vmem:[#allocation2 + $0x138] sm:$0x3] %vm12882_vm13, %v29804_v28 }
 0x35c   :  { %29839 = vst [vmem:[#allocation99_spill] sm:$0xff] %v24583_v10  ;;  %v9180_v53 = vsel %vm9113_vm2, %v29842_v35, %v29841_v39  ;;  %v8686_v15 = vmax.f32 %v6873_v44, %v17623_v46  ;;  %v24594_v61 = vrot.slane %v6379_v42, %v23666_v19  ;;  %v9208_v55 = vsel %vm9113_vm2, %v29844_v58, %v29843_v16  ;;  %v29849_v10 = vld [vmem:[#allocation33_spill] sm:$0xff] }
 0x35d   :  { %29840 = vst [vmem:[#allocation103_spill] sm:$0xff] %v24587_v49  ;;  %v9181_v0 = vsel %vm9115_vm3, %v29842_v35, %v9180_v53  ;;  %v24603_v38 = vsel %vm9113_vm2, %v24579_v22, %v8687_v11  ;;  %v24605_v43 = vmax.f32 %v6871_v27, %v17622_v36  ;;  %v24608_v21 = vrot.slane %v6908_v54, %v23666_v19  ;;  %v19601_v36 = vpop.f32.mrf.mxu0 }
 0x35e   :  { %v6382_v44 = vmax.f32 %v6318_v63, 0.0  ;;  %v24610_v50 = vrot.slane %v8690_v5, 7  ;;  %v6923_v12 = vcombine.high %v6915_v34, %v6915_v34  ;;  %v9209_v42 = vsel %vm9115_vm3, %v29844_v58, %v9208_v55 }
 0x35f   :  { %29845 = vst [vmem:[#allocation107_spill] sm:$0xff] %v24605_v43  ;;  %v10209_v51 = vcombine.high %v24526_v45, %v29804_v28  ;;  %v24618_v46 = vsel %vm9113_vm2, %v24587_v49, %v8683_v8  ;;  %v6905_v27 = vrot.slane %v6891_v48, %v23666_v19  ;;  %v6381_v11 = vmax.f32 %v6317_v14, 0.0  ;;  %v6042_v33 = vpop.f32.mrf.mxu0 }
 0x360   :  { %29846 = vst [vmem:[#allocation12_spill] sm:$0xff] %v24610_v50  ;;  %29847 = vst [vmem:[#allocation111_spill] sm:$0xff] %v24618_v46  ;;  %v9182_v54 = vsel %vm9117_vm4, %v29842_v35, %v9181_v0  ;;  %v24623_v63 = vrot.slane %v8686_v15, 7  ;;  %v6906_v5 = vcombine.high %v24594_v61, %v24594_v61  ;;  %v9210_v39 = vsel %vm9117_vm4, %v29844_v58, %v9209_v42 }
 0x361   :  { %v11799_v45 = vrot.slane %v10209_v51, %v23666_v19  ;;  %v6924_v8 = vcombine.high %v24608_v21, %v24608_v21  ;;  %v17632_v53 = vrot.slane %v6915_v34, 9  ;;  %v17628_v48 = vrot.slane %v24594_v61, 9 }
 0x362   :  { %29848 = vst [vmem:[#allocation7_spill] sm:$0xff] %v24623_v63  ;;  %v6942_v14 = vcombine.high %v6382_v44, %v6382_v44  ;;  %v17633_v16 = vrot.slane %v6923_v12, 9  ;;  %v24634_v0 = vrot.slane %v6382_v44, %v23666_v19  ;;  %v9183_v15 = vsel %vm9119_vm5, %v29842_v35, %v9182_v54 }
 0x363   :  { %v9211_v55 = vsel %vm9119_vm5, %v29844_v58, %v9210_v39  ;;  %11900 = vrot.lane.b32.xlu0 %v11799_v45, %s19945_s28  ;;  %v17634_v42 = vrot.slane %v24608_v21, 9  ;;  %v6907_v51 = vcombine.high %v6905_v27, %v6905_v27  ;;  %v6925_v49 = vcombine.high %v6381_v11, %v6381_v11 }
 0x364   :  { %v10183_v46 = vcombine.low %v9183_v15, %v9211_v55  ;;  %v17629_v50 = vrot.slane %v6906_v5, 9  ;;  %v6250_v60 = vadd.f32 %v19601_v36, %v29849_v10  ;;  %v9244_v44 = vsel %vm9115_vm3, %v24132_v25, %v24143_v30  ;;  %v29850_v36 = vld [vmem:[#allocation34_spill] sm:$0xff] }
 0x365   :  { %v9272_v35 = vsel %vm9115_vm3, %v24161_v31, %v24182_v40  ;;  %v8695_v58 = vmax.f32 %v6915_v34, %v17632_v53  ;;  %v6956_v54 = vrot.slane %v6942_v14, %v23666_v19  ;;  %v24651_v39 = vrot.slane %v6381_v11, %v23666_v19 }
 0x366   :  { %v10190_v45 = vrot.slane %v10183_v46, %v23856_v20  ;;  %v17635_v15 = vrot.slane %v6924_v8, 9  ;;  %v8696_v55 = vmax.f32 %v6923_v12, %v17633_v16  ;;  %v6957_v10 = vcombine.high %v24634_v0, %v24634_v0 }
 0x367   :  { %v6249_v9 = vadd.f32 %v6042_v33, %v29850_v36  ;;  %v24658_v30 = vrot.slane %v6925_v49, %v23666_v19  ;;  %v9245_v34 = vsel %vm9117_vm4, %v24132_v25, %v9244_v44  ;;  %v9273_v11 = vsel %vm9117_vm4, %v24161_v31, %v9272_v35 }
 0x368   :  { %v10919_v40 = vrot.slane %v10190_v45, %v23666_v19  ;;  %v17630_v53 = vrot.slane %v6905_v27, 9  ;;  %v17631_v46 = vrot.slane %v6907_v51, 9  ;;  %v8692_v14 = vmax.f32 %v6906_v5, %v17629_v50 }
 0x369   :  { %v6320_v12 = vadd.f32 %v24445_v24, %v6250_v60  ;;  %v6958_v16 = vcombine.high %v6956_v54, %v6956_v54  ;;  %v6940_v33 = vcombine.high %v24651_v39, %v24651_v39  ;;  %v9274_v49 = vsel %vm9119_vm5, %v24161_v31, %v9273_v11 }
 0x36a   :  { %11020 = vrot.lane.b32.xlu1 %v10919_v40, %s19943_s26  ;;  %v10191_v36 = vcombine.high %v10190_v45, %v29804_v28  ;;  %v24672_v44 = vrot.slane %v8696_v55, 7  ;;  %v17641_v63 = vrot.slane %v6957_v10, 9  ;;  %v6319_v35 = vadd.f32 %v24445_v24, %v6249_v9 }
 0x36b   :  { %v9246_v50 = vsel %vm9119_vm5, %v24132_v25, %v9245_v34  ;;  %v8698_v60 = vmax.f32 %v6924_v8, %v17635_v15  ;;  %v8691_v5 = vmax.f32 %v24594_v61, %v17628_v48  ;;  %v6941_v43 = vcombine.high %v24658_v30, %v24658_v30  ;;  %v19604_v8 = vpop.f32.mrf.mxu0 }
 0x36c   :  { %29851 = vst [vmem:[#allocation25_spill] sm:$0xff] %v24672_v44  ;;  %v10228_v40 = vcombine.low %v9246_v50, %v9274_v49  ;;  %v8694_v32 = vmax.f32 %v6907_v51, %v17631_v46  ;;  %v24680_v4 = vrot.slane %v8692_v14, 7  ;;  %v6384_v31 = vmax.f32 %v6320_v12, 0.0 }
 0x36d   :  { %v11095_v45 = vrot.slane %v10191_v36, %v23666_v19  ;;  %v24684_v55 = vmax.f32 %v24608_v21, %v17634_v42  ;;  %v24686_v9 = vmax.f32 %v6905_v27, %v17630_v53  ;;  %v17643_v11 = vrot.slane %v6958_v16, 9  ;;  %v6052_v49 = vpop.f32.mrf.mxu0 }
 0x36e   :  { %29852 = vst [vmem:[#allocation20_spill] sm:$0xff] %v24680_v4  ;;  %v17637_v25 = vrot.slane %v6940_v33, 9  ;;  %v24690_v61 = vsel %vm9113_vm2, %v24672_v44, %v8695_v58  ;;  %v8704_v48 = vmax.f32 %v6957_v10, %v17641_v63  ;;  %v6383_v15 = vmax.f32 %v6319_v35, 0.0 }
 0x36f   :  { %29853 = vst [vmem:[#allocation9_spill] sm:$0xff] %v24684_v55  ;;  %29854 = vst [vmem:[#allocation15_spill] sm:$0xff] %v24686_v9  ;;  %v10235_v51 = vrot.slane %v10228_v40, %v23856_v20  ;;  %11196 = vrot.lane.b32.xlu0 %v11095_v45, %s19946_s29  ;;  %v24694_v34 = vrot.slane %v8698_v60, 7  ;;  %v17640_v21 = vrot.slane %v24634_v0, 9  ;;  %v17642_v42 = vrot.slane %v6956_v54, 9 }
 0x370   :  { %v17639_v27 = vrot.slane %v6941_v43, 9  ;;  %v24699_v53 = vsel %vm9113_vm2, %v24680_v4, %v8691_v5  ;;  %v24701_v46 = vrot.slane %v8694_v32, 7  ;;  %v6983_v58 = vrot.slane %v6384_v31, %v23666_v19 }
 0x371   :  { %29855 = vst [vmem:[#allocation26_spill] sm:$0xff] %v24694_v34  ;;  %29856 = vst [vmem:[#allocation27_spill] sm:$0xff] %v24699_v53  ;;  %v10236_v63 = vcombine.high %v10235_v51, %v29804_v28  ;;  %v8706_v10 = vmax.f32 %v6958_v16, %v17643_v11  ;;  %v8700_v14 = vmax.f32 %v6940_v33, %v17637_v25  ;;  %v24708_v35 = vrot.slane %v8704_v48, 7 }
 0x372   :  { %29857 = vst [vmem:[#allocation14_spill] sm:$0xff] %v24701_v46  ;;  %v6976_v12 = vcombine.high %v6384_v31, %v6384_v31  ;;  %v9250_v36 = vsel %vm9113_vm2, %v24145_v23, %v24128_v7  ;;  %v17636_v50 = vrot.slane %v24651_v39, 9  ;;  %v24712_v60 = vrot.slane %v6383_v15, %v23666_v19  ;;  %v29860_v7 = vld [vmem:[#allocation35_spill] sm:$0xff] }
 0x373   :  { %29858 = vst [vmem:[#allocation24_spill] sm:$0xff] %v24708_v35  ;;  %v11454_v32 = vrot.slane %v10236_v63, %v23666_v19  ;;  %v8703_v5 = vmax.f32 %v24634_v0, %v17640_v21  ;;  %v24716_v40 = vmax.f32 %v6956_v54, %v17642_v42  ;;  %v17638_v16 = vrot.slane %v24658_v30, 9 }
 0x374   :  { %v8702_v33 = vmax.f32 %v6941_v43, %v17639_v27  ;;  %v6991_v31 = vcombine.high %v6983_v58, %v6983_v58  ;;  %v6959_v45 = vcombine.high %v6383_v15, %v6383_v15  ;;  %v6252_v11 = vadd.f32 %v19604_v8, %v29860_v7  ;;  %v19607_v43 = vpop.f32.mrf.mxu0 }
 0x375   :  { %29859 = vst [vmem:[#allocation6_spill] sm:$0xff] %v24716_v40  ;;  %11550 = vrot.lane.b32.xlu1 %v11454_v32, %s19942_s1  ;;  %v9251_v25 = vsel %vm9115_vm3, %v24145_v23, %v9250_v36  ;;  %v24723_v48 = vrot.slane %v8700_v14, 7  ;;  %v6990_v63 = vrot.slane %v6976_v12, %v23666_v19  ;;  %v9278_v0 = vsel %vm9113_vm2, %v24167_v52, %v24159_v18 }
 0x376   :  { %v11278_v54 = vrot.slane %v10235_v51, %v23666_v19  ;;  %v24732_v15 = vsel %vm9113_vm2, %v24708_v35, %v8703_v5  ;;  %v24734_v21 = vrot.slane %v8706_v10, 7  ;;  %v8699_v8 = vmax.f32 %v24651_v39, %v17636_v50  ;;  %v29867_v5 = vld [vmem:[#allocation36_spill] sm:$0xff]  ;;  %v6062_v7 = vpop.f32.mrf.mxu0 }
 0x377   :  { %29861 = vst [vmem:[#allocation8_spill] sm:$0xff] %v24723_v48  ;;  %29862 = vst [vmem:[#allocation10_spill] sm:$0xff] %v24732_v15  ;;  %v6974_v42 = vcombine.high %v24712_v60, %v24712_v60  ;;  %v24740_v27 = vmax.f32 %v24658_v30, %v17638_v16  ;;  %v17648_v14 = vrot.slane %v6983_v58, 9  ;;  %v9252_v18 = vsel %vm9117_vm4, %v24145_v23, %v9251_v25 }
 0x378   :  { %29863 = vst [vmem:[#allocation11_spill] sm:$0xff] %v24734_v21  ;;  %v9279_v51 = vsel %vm9115_vm3, %v24167_v52, %v9278_v0  ;;  %11374 = vrot.lane.b32.xlu0 %v11278_v54, %s19941_s25  ;;  %v17649_v12 = vrot.slane %v6991_v31, 9  ;;  %v6973_v10 = vrot.slane %v6959_v45, %v23666_v19  ;;  %v6322_v39 = vadd.f32 %v24445_v24, %v6252_v11  ;;  %v29868_v11 = vld [vmem:[#allocation18_spill] sm:$0xff]  ;;  %v29869_v21 = vld [vmem:[#allocation37_spill] sm:$0xff] }
 0x379   :  { %29864 = vst [vmem:[#allocation13_spill] sm:$0xff] %v24740_v27  ;;  %v9280_v36 = vsel %vm9117_vm4, %v24167_v52, %v9279_v51  ;;  %v24753_v30 = vsel %vm9113_vm2, %v24723_v48, %v8699_v8  ;;  %v24755_v50 = vrot.slane %v8702_v33, 7  ;;  %v6992_v32 = vcombine.high %v6990_v63, %v6990_v63 }
 0x37a   :  { %29865 = vst [vmem:[#allocation67_spill] sm:$0xff] %v24753_v30  ;;  %v6251_v16 = vadd.f32 %v6052_v49, %v29867_v5  ;;  %v17645_v25 = vrot.slane %v6974_v42, 9  ;;  %v9253_v0 = vsel %vm9119_vm5, %v24145_v23, %v9252_v18  ;;  %v9281_v45 = vsel %vm9119_vm5, %v24167_v52, %v9280_v36  ;;  %v29870_v18 = vld [vmem:[#allocation68_spill] sm:$0xff]  ;;  %v29871_v52 = vld [vmem:[#allocation87_spill] sm:$0xff] }
 0x37b   :  { %29866 = vst [vmem:[#allocation28_spill] sm:$0xff] %v24755_v50  ;;  %v6254_v54 = vadd.f32 %v19607_v43, %v29868_v11  ;;  %v17650_v51 = vrot.slane %v6990_v63, 9  ;;  %v8711_v27 = vmax.f32 %v6983_v58, %v17648_v14  ;;  %v17644_v8 = vrot.slane %v24712_v60, 9 }
 0x37c   :  { %v10237_v46 = vcombine.low %v9253_v0, %v9281_v45  ;;  %v8712_v33 = vmax.f32 %v6991_v31, %v17649_v12  ;;  %v6975_v50 = vcombine.high %v6973_v10, %v6973_v10  ;;  %v6386_v9 = vmax.f32 %v6322_v39, 0.0 }
 0x37d   :  { %v6253_v49 = vadd.f32 %v6062_v7, %v29869_v21  ;;  %v17651_v5 = vrot.slane %v6992_v32, 9  ;;  %v6321_v40 = vadd.f32 %v24445_v24, %v6251_v16  ;;  %v9236_v43 = vsel %vm9113_vm2, %v29871_v52, %v29870_v18 }
 0x37e   :  { %v24767_v23 = vrot.slane %v10237_v46, %v23856_v20  ;;  %v17646_v36 = vrot.slane %v6973_v10, 9  ;;  %v8708_v58 = vmax.f32 %v6974_v42, %v17645_v25  ;;  %v6324_v14 = vadd.f32 %v24445_v24, %v6254_v54 }
 0x37f   :  { %v9264_v31 = vsel %vm9113_vm2, %v24197_v59, %v24185_v26  ;;  %v24776_v12 = vmax.f32 %v6990_v63, %v17650_v51  ;;  %v6323_v46 = vadd.f32 %v24445_v24, %v6253_v49  ;;  %v9237_v39 = vsel %vm9115_vm3, %v29871_v52, %v9236_v43 }
 0x380   :  { %v11630_v21 = vrot.slane %v24767_v23, %v23666_v19  ;;  %v24783_v16 = vrot.slane %v8712_v33, 7  ;;  %v17647_v7 = vrot.slane %v6975_v50, 9  ;;  %v7010_v42 = vcombine.high %v6386_v9, %v6386_v9 }
 0x381   :  { %29872 = vst [vmem:[#allocation69_spill] sm:$0xff] %v24776_v12  ;;  %v7017_v25 = vrot.slane %v6386_v9, %v23666_v19  ;;  %v8714_v0 = vmax.f32 %v6992_v32, %v17651_v5  ;;  %v8707_v45 = vmax.f32 %v24712_v60, %v17644_v8  ;;  %v6385_v26 = vmax.f32 %v6321_v40, 0.0  ;;  %v29876_v32 = vld [vmem:[#allocation86_spill] sm:$0xff]  ;;  %v29877_v60 = vld [vmem:[#allocation84_spill] sm:$0xff]  ;;  %v29878_v8 = vld [vmem:[#allocation89_spill] sm:$0xff] }
 0x382   :  { %29873 = vst [vmem:[#allocation51_spill] sm:$0xff] %v24783_v16  ;;  %11726 = vrot.lane.b32.xlu1 %v11630_v21, %s19944_s27  ;;  %v9265_v63 = vsel %vm9115_vm3, %v24197_v59, %v9264_v31  ;;  %v24790_v11 = vmax.f32 %v6973_v10, %v17646_v36  ;;  %v24792_v54 = vrot.slane %v8708_v58, 7  ;;  %v6388_v51 = vmax.f32 %v6324_v14, 0.0  ;;  %v29879_v5 = vld [vmem:[#allocation70_spill] sm:$0xff] }
 0x383   :  { %v9238_v33 = vsel %vm9117_vm4, %v29871_v52, %v9237_v39  ;;  %v6387_v49 = vmax.f32 %v6323_v46, 0.0  ;;  %v9266_v9 = vsel %vm9117_vm4, %v24197_v59, %v9265_v63  ;;  %v9230_v40 = vsel %vm9115_vm3, %v29877_v60, %v29876_v32 }
 0x384   :  { %29874 = vst [vmem:[#allocation75_spill] sm:$0xff] %v24790_v11  ;;  %29875 = vst [vmem:[#allocation77_spill] sm:$0xff] %v24792_v54  ;;  %v9258_v18 = vsel %vm9115_vm3, %v29879_v5, %v29878_v8  ;;  %v24806_v10 = vsel %vm9113_vm2, %v24783_v16, %v8711_v27  ;;  %v8710_v43 = vmax.f32 %v6975_v50, %v17647_v7  ;;  %v24821_v7 = vrot.slane %v8714_v0, 7 }
 0x385   :  { %29880 = vst [vmem:[#allocation74_spill] sm:$0xff] %v24806_v10  ;;  %v7024_v36 = vrot.slane %v7010_v42, %v23666_v19  ;;  %v7025_v58 = vcombine.high %v7017_v25, %v7017_v25  ;;  %v6993_v14 = vcombine.high %v6385_v26, %v6385_v26  ;;  %v7000_v31 = vrot.slane %v6385_v26, %v23666_v19 }
 0x386   :  { %v9239_v21 = vsel %vm9119_vm5, %v29871_v52, %v9238_v33  ;;  %v9267_v46 = vsel %vm9119_vm5, %v24197_v59, %v9266_v9  ;;  %v24815_v39 = vrot.slane %v6388_v51, %v23666_v19  ;;  %v9231_v27 = vsel %vm9117_vm4, %v29877_v60, %v9230_v40  ;;  %29881 = vst [vmem:[#allocation71_spill] sm:$0xff] %v24821_v7  ;;  %v19610_v40 = vpop.f32.mrf.mxu0 }
 0x387   :  { %v10219_v63 = vcombine.low %v9239_v21, %v9267_v46  ;;  %v9259_v50 = vsel %vm9117_vm4, %v29879_v5, %v9258_v18  ;;  %v24825_v42 = vsel %vm9113_vm2, %v24792_v54, %v8707_v45  ;;  %v7044_v52 = vcombine.high %v6388_v51, %v6388_v51 }
 0x388   :  { %29882 = vst [vmem:[#allocation29_spill] sm:$0xff] %v24825_v42  ;;  %v7027_v26 = vcombine.high %v6387_v49, %v6387_v49  ;;  %v24827_v33 = vrot.slane %v8710_v43, 7  ;;  %v17657_v59 = vrot.slane %v7025_v58, 9  ;;  %v24830_v9 = vrot.slane %v6387_v49, %v23666_v19  ;;  %v6072_v10 = vpop.f32.mrf.mxu0 }
 0x389   :  { %v10226_v32 = vrot.slane %v10219_v63, %v23856_v20  ;;  %v7007_v8 = vrot.slane %v6993_v14, %v23666_v19  ;;  %v7008_v18 = vcombine.high %v7000_v31, %v7000_v31  ;;  %v9232_v0 = vsel %vm9119_vm5, %v29877_v60, %v9231_v27  ;;  %v29885_v27 = vld [vmem:[#allocation19_spill] sm:$0xff] }
 0x38a   :  { %29883 = vst [vmem:[#allocation80_spill] sm:$0xff] %v24827_v33  ;;  %v9260_v45 = vsel %vm9119_vm5, %v29879_v5, %v9259_v50  ;;  %v7026_v51 = vcombine.high %v7024_v36, %v7024_v36  ;;  %v7059_v43 = vcombine.high %v24815_v39, %v24815_v39  ;;  %v17656_v46 = vrot.slane %v7017_v25, 9 }
 0x38b   :  { %v10926_v21 = vrot.slane %v10226_v32, %v23666_v19  ;;  %v10210_v49 = vcombine.low %v9232_v0, %v9260_v45  ;;  %v17658_v16 = vrot.slane %v7024_v36, 9  ;;  %v24842_v63 = vrot.slane %v7044_v52, %v23666_v19 }
 0x38c   :  { %v24845_v14 = vrot.slane %v7027_v26, %v23666_v19  ;;  %v7042_v60 = vcombine.high %v24830_v9, %v24830_v9  ;;  %v6256_v50 = vadd.f32 %v19610_v40, %v29885_v27  ;;  %v10245_v0 = vcombine.high %v24767_v23, %v29804_v28 }
 0x38d   :  { %11022 = vrot.lane.b32.xlu1 %v10926_v21, %s19943_s26  ;;  %v24851_v5 = vrot.slane %v10210_v49, %v23856_v20  ;;  %v8720_v45 = vmax.f32 %v7025_v58, %v17657_v59  ;;  %v7009_v52 = vcombine.high %v7007_v8, %v7007_v8  ;;  %v17652_v33 = vrot.slane %v7000_v31, 9 }
 0x38e   :  { %v17653_v11 = vrot.slane %v7008_v18, 9  ;;  %v17659_v26 = vrot.slane %v7026_v51, 9  ;;  %v17665_v54 = vrot.slane %v7059_v43, 9  ;;  %v11806_v21 = vrot.slane %v10245_v0, %v23666_v19  ;;  %v29886_v0 = vld [vmem:[#allocation21_spill] sm:$0xff] }
 0x38f   :  { %29884 = vst [vmem:[#allocation30_spill] sm:$0xff] %v24851_v5  ;;  %v10218_v42 = vcombine.high %v24851_v5, %v29804_v28  ;;  %v8719_v7 = vmax.f32 %v7017_v25, %v17656_v46  ;;  %v17654_v49 = vrot.slane %v7007_v8, 9  ;;  %v7060_v40 = vcombine.high %v24842_v63, %v24842_v63  ;;  %v19613_v5 = vpop.f32.mrf.mxu0 }
 0x390   :  { %v7043_v27 = vcombine.high %v24845_v14, %v24845_v14  ;;  %v17661_v23 = vrot.slane %v7042_v60, 9  ;;  %v6326_v59 = vadd.f32 %v24445_v24, %v6256_v50  ;;  %v10227_v12 = vcombine.high %v10226_v32, %v29804_v28  ;;  %v29887_v32 = vld [vmem:[#allocation39_spill] sm:$0xff] }
 0x391   :  { %v10750_v58 = vrot.slane %v10218_v42, %v23666_v19  ;;  %11902 = vrot.lane.b32.xlu1 %v11806_v21, %s19945_s28  ;;  %v24867_v34 = vrot.slane %v8720_v45, 7  ;;  %v17655_v25 = vrot.slane %v7009_v52, 9  ;;  %v8716_v46 = vmax.f32 %v7008_v18, %v17653_v11 }
 0x392   :  { %v6255_v55 = vadd.f32 %v6072_v10, %v29886_v0  ;;  %v24870_v48 = vmax.f32 %v7024_v36, %v17658_v16  ;;  %v8722_v30 = vmax.f32 %v7026_v51, %v17659_v26  ;;  %v8715_v4 = vmax.f32 %v7000_v31, %v17652_v33 }
 0x393   :  { %v8728_v53 = vmax.f32 %v7059_v43, %v17665_v54  ;;  %10846 = vrot.lane.b32.xlu0 %v10750_v58, %s19947_s30  ;;  %v24873_v42 = vmax.f32 %v7007_v8, %v17654_v49  ;;  %v17664_v50 = vrot.slane %v24815_v39, 9  ;;  %v17667_v21 = vrot.slane %v7060_v40, 9 }
 0x394   :  { %v6258_v35 = vadd.f32 %v19613_v5, %v29887_v32  ;;  %v17663_v45 = vrot.slane %v7043_v27, 9  ;;  %v8724_v15 = vmax.f32 %v7042_v60, %v17661_v23  ;;  %v6390_v44 = vmax.f32 %v6326_v59, 0.0  ;;  %v29893_v32 = vld [vmem:[#allocation73_spill] sm:$0xff] }
 0x395   :  { %v11102_v11 = vrot.slane %v10227_v12, %v23666_v19  ;;  %v24880_v16 = vsel %vm9113_vm2, %v24867_v34, %v8719_v7  ;;  %v8718_v10 = vmax.f32 %v7009_v52, %v17655_v25  ;;  %v24882_v54 = vrot.slane %v8716_v46, 7  ;;  %v6082_v52 = vpop.f32.mrf.mxu0 }
 0x396   :  { %v6325_v36 = vadd.f32 %v24445_v24, %v6255_v55  ;;  %v17666_v31 = vrot.slane %v24842_v63, 9  ;;  %v24886_v33 = vrot.slane %v8728_v53, 7  ;;  %v17660_v8 = vrot.slane %v24830_v9, 9 }
 0x397   :  { %v17662_v18 = vrot.slane %v24845_v14, 9  ;;  %11198 = vrot.lane.b32.xlu0 %v11102_v11, %s19946_s29  ;;  %v24891_v12 = vrot.slane %v8722_v30, 7  ;;  %v8727_v7 = vmax.f32 %v24815_v39, %v17664_v50  ;;  %v8730_v51 = vmax.f32 %v7060_v40, %v17667_v21 }
 0x398   :  { %v6328_v43 = vadd.f32 %v24445_v24, %v6258_v35  ;;  %v8726_v60 = vmax.f32 %v7043_v27, %v17663_v45  ;;  %v24895_v5 = vrot.slane %v8724_v15, 7  ;;  %v7078_v55 = vcombine.high %v6390_v44, %v6390_v44  ;;  %v29894_v45 = vld [vmem:[#allocation90_spill] sm:$0xff] }
 0x399   :  { %v9292_v53 = vsel %vm9113_vm2, %v24284_v13, %v24265_v57  ;;  %v24902_v26 = vsel %vm9113_vm2, %v24882_v54, %v8715_v4  ;;  %v24904_v30 = vrot.slane %v8718_v10, 7  ;;  %v7085_v39 = vrot.slane %v6390_v44, %v23666_v19  ;;  %v29890_v4 = vld [vmem:[#allocation49_spill] sm:$0xff] }
 0x39a   :  { %29888 = vst [vmem:[#allocation31_spill] sm:$0xff] %v24895_v5  ;;  %v6389_v49 = vmax.f32 %v6325_v36, 0.0  ;;  %v24908_v35 = vmax.f32 %v24842_v63, %v17666_v31  ;;  %v24912_v15 = vsel %vm9113_vm2, %v24886_v33, %v8727_v7  ;;  %v8723_v40 = vmax.f32 %v24830_v9, %v17660_v8  ;;  %v19616_v36 = vpop.f32.mrf.mxu0 }
 0x39b   :  { %v24916_v57 = vmax.f32 %v24845_v14, %v17662_v18  ;;  %v6392_v27 = vmax.f32 %v6328_v43, 0.0  ;;  %v6257_v23 = vadd.f32 %v6082_v52, %v29890_v4  ;;  %v9293_v58 = vsel %vm9115_vm3, %v24284_v13, %v9292_v53 }
 0x39c   :  { %29889 = vst [vmem:[#allocation32_spill] sm:$0xff] %v24908_v35  ;;  %v9320_v44 = vsel %vm9113_vm2, %v24329_v41, %v24304_v62  ;;  %v24924_v63 = vrot.slane %v8730_v51, 7  ;;  %v24928_v59 = vsel %vm9113_vm2, %v24895_v5, %v8723_v40  ;;  %v24930_v9 = vrot.slane %v8726_v60, 7 }
 0x39d   :  { %29892 = vst [vmem:[#allocation57_spill] sm:$0xff] %v24928_v59  ;;  %v7092_v14 = vrot.slane %v7078_v55, %v23666_v19  ;;  %v7093_v25 = vcombine.high %v7085_v39, %v7085_v39  ;;  %v17672_v46 = vrot.slane %v7085_v39, 9  ;;  %v7061_v0 = vcombine.high %v6389_v49, %v6389_v49 }
 0x39e   :  { %29891 = vst [vmem:[#allocation72_spill] sm:$0xff] %v24924_v63  ;;  %v7068_v50 = vrot.slane %v6389_v49, %v23666_v19  ;;  %v9294_v21 = vsel %vm9117_vm4, %v24284_v13, %v9293_v58  ;;  %v9321_v62 = vsel %vm9115_vm3, %v24329_v41, %v9320_v44  ;;  %v9300_v11 = vsel %vm9115_vm3, %v29894_v45, %v29893_v32  ;;  %v29895_v49 = vld [vmem:[#allocation23_spill] sm:$0xff] }
 0x39f   :  { %v9328_v10 = vsel %vm9115_vm3, %v24287_v1, %v24313_v3  ;;  %v7112_v31 = vcombine.high %v6392_v27, %v6392_v27  ;;  %v24945_v8 = vrot.slane %v6392_v27, %v23666_v19  ;;  %v6327_v18 = vadd.f32 %v24445_v24, %v6257_v23 }
 0x3a0   :  { %v9322_v7 = vsel %vm9117_vm4, %v24329_v41, %v9321_v62  ;;  %v7094_v51 = vcombine.high %v7092_v14, %v7092_v14  ;;  %v9301_v60 = vsel %vm9117_vm4, %v29894_v45, %v9300_v11  ;;  %v9329_v3 = vsel %vm9117_vm4, %v24287_v1, %v9328_v10  ;;  %v6092_v11 = vpop.f32.mrf.mxu0 }
 0x3a1   :  { %v9323_v43 = vsel %vm9119_vm5, %v24329_v41, %v9322_v7  ;;  %v17673_v55 = vrot.slane %v7093_v25, 9  ;;  %v17674_v52 = vrot.slane %v7092_v14, 9  ;;  %v9295_v53 = vsel %vm9119_vm5, %v24284_v13, %v9294_v21 }
 0x3a2   :  { %v6260_v40 = vadd.f32 %v19616_v36, %v29895_v49  ;;  %v8735_v27 = vmax.f32 %v7085_v39, %v17672_v46  ;;  %v10255_v4 = vcombine.low %v9295_v53, %v9323_v43  ;;  %v9302_v23 = vsel %vm9119_vm5, %v29894_v45, %v9301_v60 }
 0x3a3   :  { %v9330_v41 = vsel %vm9119_vm5, %v24287_v1, %v9329_v3  ;;  %v7075_v58 = vrot.slane %v7061_v0, %v23666_v19  ;;  %v7076_v44 = vcombine.high %v7068_v50, %v7068_v50  ;;  %v6391_v62 = vmax.f32 %v6327_v18, 0.0  ;;  %v29897_v18 = vld [vmem:[#allocation50_spill] sm:$0xff] }
 0x3a4   :  { %v10264_v32 = vcombine.low %v9302_v23, %v9330_v41  ;;  %v17675_v10 = vrot.slane %v7094_v51, 9  ;;  %v17668_v7 = vrot.slane %v7068_v50, 9  ;;  %v7126_v13 = vrot.slane %v7112_v31, %v23666_v19  ;;  %v29899_v23 = vld [vmem:[#allocation76_spill] sm:$0xff] }
 0x3a5   :  { %v24966_v21 = vrot.slane %v10255_v4, %v23856_v20  ;;  %v8736_v39 = vmax.f32 %v7093_v25, %v17673_v55  ;;  %v24968_v46 = vmax.f32 %v7092_v14, %v17674_v52  ;;  %v6330_v1 = vadd.f32 %v24445_v24, %v6260_v40 }
 0x3a6   :  { %v10271_v45 = vrot.slane %v10264_v32, %v23856_v20  ;;  %v7127_v0 = vcombine.high %v24945_v8, %v24945_v8  ;;  %v6259_v43 = vadd.f32 %v6092_v11, %v29897_v18  ;;  %v9307_v31 = vsel %vm9115_vm3, %v24248_v47, %v24263_v37  ;;  %v29898_v37 = vld [vmem:[#allocation96_spill] sm:$0xff]  ;;  %v19619_v18 = vpop.f32.mrf.mxu0 }
 0x3a7   :  { %29896 = vst [vmem:[#allocation81_spill] sm:$0xff] %v24968_v46  ;;  %v10933_v36 = vrot.slane %v24966_v21, %v23666_v19  ;;  %v7077_v60 = vcombine.high %v7075_v58, %v7075_v58  ;;  %v7095_v25 = vcombine.high %v6391_v62, %v6391_v62  ;;  %v24981_v14 = vrot.slane %v6391_v62, %v23666_v19 }
 0x3a8   :  { %v11285_v3 = vrot.slane %v10271_v45, %v23666_v19  ;;  %v8738_v55 = vmax.f32 %v7094_v51, %v17675_v10  ;;  %v17669_v52 = vrot.slane %v7076_v44, 9  ;;  %v17670_v53 = vrot.slane %v7075_v58, 9 }
 0x3a9   :  { %v8731_v49 = vmax.f32 %v7068_v50, %v17668_v7  ;;  %11024 = vrot.lane.b32.xlu1 %v10933_v36, %s19943_s26  ;;  %v6394_v40 = vmax.f32 %v6330_v1, 0.0  ;;  %v9308_v4 = vsel %vm9117_vm4, %v24248_v47, %v9307_v31  ;;  %v9335_v41 = vsel %vm9115_vm3, %v29899_v23, %v29898_v37 }
 0x3aa   :  { %11376 = vrot.lane.b32.xlu0 %v11285_v3, %s19941_s25  ;;  %v10272_v62 = vcombine.high %v10271_v45, %v29804_v28  ;;  %v24992_v32 = vrot.slane %v8736_v39, 7  ;;  %v7128_v51 = vcombine.high %v7126_v13, %v7126_v13  ;;  %v17680_v11 = vrot.slane %v24945_v8, 9 }
 0x3ab   :  { %v6329_v50 = vadd.f32 %v24445_v24, %v6259_v43  ;;  %v24997_v10 = vrot.slane %v7095_v25, %v23666_v19  ;;  %v7110_v7 = vcombine.high %v24981_v14, %v24981_v14  ;;  %v9336_v1 = vsel %vm9117_vm4, %v29899_v23, %v9335_v41 }
 0x3ac   :  { %v11461_v36 = vrot.slane %v10272_v62, %v23666_v19  ;;  %v17671_v45 = vrot.slane %v7077_v60, 9  ;;  %v17681_v39 = vrot.slane %v7127_v0, 9  ;;  %v9309_v31 = vsel %vm9119_vm5, %v24248_v47, %v9308_v4 }
 0x3ad   :  { %v9337_v43 = vsel %vm9119_vm5, %v29899_v23, %v9336_v1  ;;  %v8732_v3 = vmax.f32 %v7076_v44, %v17669_v52  ;;  %v7146_v25 = vcombine.high %v6394_v40, %v6394_v40  ;;  %v25009_v37 = vrot.slane %v6394_v40, %v23666_v19  ;;  %v29900_v52 = vld [vmem:[#allocation40_spill] sm:$0xff]  ;;  %v6102_v40 = vpop.f32.mrf.mxu0 }
 0x3ae   :  { %v10273_v5 = vcombine.low %v9309_v31, %v9337_v43  ;;  %11552 = vrot.lane.b32.xlu0 %v11461_v36, %s19942_s1  ;;  %v25014_v41 = vsel %vm9113_vm2, %v24992_v32, %v8735_v27  ;;  %v25016_v62 = vmax.f32 %v7075_v58, %v17670_v53  ;;  %v17682_v59 = vrot.slane %v7126_v13, 9 }
 0x3af   :  { %v6393_v46 = vmax.f32 %v6329_v50, 0.0  ;;  %v17683_v47 = vrot.slane %v7128_v51, 9  ;;  %v7111_v4 = vcombine.high %v24997_v10, %v24997_v10  ;;  %v17677_v44 = vrot.slane %v7110_v7, 9 }
 0x3b0   :  { %v6262_v23 = vadd.f32 %v19619_v18, %v29900_v52  ;;  %v25021_v1 = vrot.slane %v8738_v55, 7  ;;  %v8734_v31 = vmax.f32 %v7077_v60, %v17671_v45  ;;  %v8744_v36 = vmax.f32 %v7127_v0, %v17681_v39  ;;  %v29903_v55 = vld [vmem:[#allocation52_spill] sm:$0xff] }
 0x3b1   :  { %v10280_v43 = vrot.slane %v10273_v5, %v23856_v20  ;;  %v25024_v27 = vrot.slane %v8732_v3, 7  ;;  %v8743_v58 = vmax.f32 %v24945_v8, %v17680_v11  ;;  %v7160_v53 = vrot.slane %v7146_v25, %v23666_v19 }
 0x3b2   :  { %v7161_v50 = vcombine.high %v25009_v37, %v25009_v37  ;;  %v25030_v63 = vmax.f32 %v7126_v13, %v17682_v59  ;;  %v7129_v35 = vcombine.high %v6393_v46, %v6393_v46  ;;  %v6261_v52 = vadd.f32 %v6102_v40, %v29903_v55 }
 0x3b3   :  { %29901 = vst [vmem:[#allocation64_spill] sm:$0xff] %v25024_v27  ;;  %v10281_v18 = vcombine.high %v10280_v43, %v29804_v28  ;;  %v8746_v60 = vmax.f32 %v7128_v51, %v17683_v47  ;;  %v17679_v0 = vrot.slane %v7111_v4, 9  ;;  %v8740_v45 = vmax.f32 %v7110_v7, %v17677_v44 }
 0x3b4   :  { %29902 = vst [vmem:[#allocation33_spill] sm:$0xff] %v25030_v63  ;;  %v6332_v5 = vadd.f32 %v24445_v24, %v6262_v23  ;;  %v25035_v39 = vrot.slane %v8744_v36, 7  ;;  %v7136_v8 = vrot.slane %v6393_v46, %v23666_v19  ;;  %v10263_v59 = vcombine.high %v24966_v21, %v29804_v28 }
 0x3b5   :  { %v11813_v11 = vrot.slane %v10281_v18, %v23666_v19  ;;  %v25043_v13 = vsel %vm9113_vm2, %v25024_v27, %v8731_v49  ;;  %v17676_v3 = vrot.slane %v24981_v14, 9  ;;  %v7162_v51 = vcombine.high %v7160_v53, %v7160_v53 }
 0x3b6   :  { %29904 = vst [vmem:[#allocation34_spill] sm:$0xff] %v25035_v39  ;;  %v17689_v25 = vrot.slane %v7161_v50, 9  ;;  %v25046_v7 = vrot.slane %v8734_v31, 7  ;;  %v17678_v47 = vrot.slane %v24997_v10, 9  ;;  %v25050_v44 = vrot.slane %v7129_v35, %v23666_v19 }
 0x3b7   :  { %11904 = vrot.lane.b32.xlu1 %v11813_v11, %s19945_s28  ;;  %v6331_v46 = vadd.f32 %v24445_v24, %v6261_v52  ;;  %v25054_v21 = vrot.slane %v8746_v60, 7  ;;  %v8742_v23 = vmax.f32 %v7111_v4, %v17679_v0  ;;  %v25056_v49 = vrot.slane %v8740_v45, 7 }
 0x3b8   :  { %v6396_v40 = vmax.f32 %v6332_v5, 0.0  ;;  %v25060_v36 = vsel %vm9113_vm2, %v25035_v39, %v8743_v58  ;;  %v17688_v31 = vrot.slane %v25009_v37, 9  ;;  %v7144_v18 = vcombine.high %v7136_v8, %v7136_v8  ;;  %v29949_v39 = vld [vmem:[#allocation104_spill] sm:$0xff] }
 0x3b9   :  { %29905 = vst [vmem:[#allocation35_spill] sm:$0xff] %v25054_v21  ;;  %29906 = vst [vmem:[#allocation36_spill] sm:$0xff] %v25056_v49  ;;  %v11109_v35 = vrot.slane %v10263_v59, %v23666_v19  ;;  %v8739_v55 = vmax.f32 %v24981_v14, %v17676_v3  ;;  %v17690_v11 = vrot.slane %v7160_v53, 9  ;;  %v17691_v63 = vrot.slane %v7162_v51, 9 }
 0x3ba   :  { %29907 = vst [vmem:[#allocation18_spill] sm:$0xff] %v25060_v36  ;;  %v8752_v24 = vmax.f32 %v7161_v50, %v17689_v25  ;;  %v25066_v52 = vmax.f32 %v24997_v10, %v17678_v47  ;;  %v7145_v4 = vcombine.high %v25050_v44, %v25050_v44  ;;  %v6395_v60 = vmax.f32 %v6331_v46, 0.0 }
 0x3bb   :  { %11200 = vrot.lane.b32.xlu1 %v11109_v35, %s19946_s29  ;;  %v11637_v58 = vrot.slane %v10280_v43, %v23666_v19  ;;  %v25074_v0 = vsel %vm9113_vm2, %v25056_v49, %v8739_v55  ;;  %v25076_v45 = vrot.slane %v8742_v23, 7  ;;  %v7180_v14 = vcombine.high %v6396_v40, %v6396_v40  ;;  %v19622_v23 = vpop.f32.mrf.mxu0 }
 0x3bc   :  { %29908 = vst [vmem:[#allocation37_spill] sm:$0xff] %v25066_v52  ;;  %29909 = vst [vmem:[#allocation68_spill] sm:$0xff] %v25074_v0  ;;  %v9362_v10 = vsel %vm9113_vm2, %v24396_v2, %v24352_v56  ;;  %v8751_v50 = vmax.f32 %v25009_v37, %v17688_v31  ;;  %v17685_v5 = vrot.slane %v7144_v18, 9  ;;  %v7187_v59 = vrot.slane %v6396_v40, %v23666_v19  ;;  %v29913_v40 = vld [vmem:[#allocation85_spill] sm:$0xff]  ;;  %v29917_v52 = vld [vmem:[#allocation92_spill] sm:$0xff] }
 0x3bd   :  { %29910 = vst [vmem:[#allocation87_spill] sm:$0xff] %v25076_v45  ;;  %11728 = vrot.lane.b32.xlu0 %v11637_v58, %s19944_s27  ;;  %v9363_v43 = vsel %vm9115_vm3, %v24396_v2, %v9362_v10  ;;  %v25086_v3 = vmax.f32 %v7160_v53, %v17690_v11  ;;  %v8754_v25 = vmax.f32 %v7162_v51, %v17691_v63  ;;  %v25088_v47 = vrot.slane %v8752_v24, 7  ;;  %v29914_v51 = vld [vmem:[#allocation97_spill] sm:$0xff]  ;;  %v29915_v11 = vld [vmem:[#allocation94_spill] sm:$0xff] }
 0x3be   :  { %v17684_v46 = vrot.slane %v7136_v8, 9  ;;  %v17687_v35 = vrot.slane %v7145_v4, 9  ;;  %v25091_v56 = vrot.slane %v6395_v60, %v23666_v19  ;;  %v9364_v37 = vsel %vm9117_vm4, %v24396_v2, %v9363_v43  ;;  %v29916_v43 = vld [vmem:[#allocation93_spill] sm:$0xff] }
 0x3bf   :  { %29911 = vst [vmem:[#allocation86_spill] sm:$0xff] %v25086_v3  ;;  %29912 = vst [vmem:[#allocation84_spill] sm:$0xff] %v25088_v47  ;;  %v9390_v31 = vsel %vm9113_vm2, %v29913_v40, %v24416_v17  ;;  %v7194_v55 = vrot.slane %v7180_v14, %v23666_v19  ;;  %v7163_v53 = vcombine.high %v6395_v60, %v6395_v60  ;;  %v29918_v17 = vld [vmem:[#allocation41_spill] sm:$0xff]  ;;  %v6112_v14 = vpop.f32.mrf.mxu0 }
 0x3c0   :  { %v9391_v63 = vsel %vm9115_vm3, %v29913_v40, %v9390_v31  ;;  %v9314_v24 = vsel %vm9115_vm3, %v29915_v11, %v29914_v51  ;;  %v8748_v58 = vmax.f32 %v7144_v18, %v17685_v5  ;;  %v7195_v10 = vcombine.high %v7187_v59, %v7187_v59 }
 0x3c1   :  { %v9392_v45 = vsel %vm9117_vm4, %v29913_v40, %v9391_v63  ;;  %v9286_v49 = vsel %vm9115_vm3, %v29917_v52, %v29916_v43  ;;  %v6264_v0 = vadd.f32 %v19622_v23, %v29918_v17  ;;  %v9365_v60 = vsel %vm9119_vm5, %v24396_v2, %v9364_v37 }
 0x3c2   :  { %v9393_v31 = vsel %vm9119_vm5, %v29913_v40, %v9392_v45  ;;  %v9315_v18 = vsel %vm9117_vm4, %v29915_v11, %v9314_v24  ;;  %v17686_v5 = vrot.slane %v25050_v44, 9  ;;  %v8747_v51 = vmax.f32 %v7136_v8, %v17684_v46  ;;  %v29921_v24 = vld [vmem:[#allocation53_spill] sm:$0xff] }
 0x3c3   :  { %v7178_v63 = vcombine.high %v25091_v56, %v25091_v56  ;;  %v10309_v3 = vcombine.low %v9365_v60, %v9393_v31  ;;  %v25121_v23 = vsel %vm9113_vm2, %v25088_v47, %v8751_v50  ;;  %v7196_v43 = vcombine.high %v7194_v55, %v7194_v55  ;;  %v25136_v50 = vld [vmem:[%s29184_s2] ss:$0 sm:$0xff] }
 0x3c4   :  { %29919 = vst [vmem:[#allocation89_spill] sm:$0xff] %v25121_v23  ;;  %v7177_v2 = vrot.slane %v7163_v53, %v23666_v19  ;;  %v9287_v45 = vsel %vm9117_vm4, %v29917_v52, %v9286_v49  ;;  %v25126_v37 = vrot.slane %v8748_v58, 7  ;;  %v17697_v40 = vrot.slane %v7195_v10, 9 }
 0x3c5   :  { %v6263_v17 = vadd.f32 %v6112_v14, %v29921_v24  ;;  %v9316_v8 = vsel %vm9119_vm5, %v29915_v11, %v9315_v18  ;;  %v25131_v46 = vrot.slane %v8754_v25, 7  ;;  %v8750_v60 = vmax.f32 %v7145_v4, %v17687_v35 }
 0x3c6   :  { %29920 = vst [vmem:[#allocation70_spill] sm:$0xff] %v25126_v37  ;;  %v17696_v31 = vrot.slane %v7187_v59, 9  ;;  %v6334_v53 = vadd.f32 %v25136_v50, %v6264_v0  ;;  %v25140_v49 = vmax.f32 %v25050_v44, %v17686_v5  ;;  %v17693_v58 = vrot.slane %v7178_v63, 9  ;;  %v19625_v5 = vpop.f32.mrf.mxu0 }
 0x3c7   :  { %29922 = vst [vmem:[#allocation19_spill] sm:$0xff] %v25131_v46  ;;  %v25143_v14 = vrot.slane %v10309_v3, %v23856_v20  ;;  %v9288_v25 = vsel %vm9119_vm5, %v29917_v52, %v9287_v45  ;;  %v17698_v11 = vrot.slane %v7194_v55, 9  ;;  %v17699_v4 = vrot.slane %v7196_v43, 9 }
 0x3c8   :  { %29923 = vst [vmem:[#allocation21_spill] sm:$0xff] %v25140_v49  ;;  %v7179_v35 = vcombine.high %v7177_v2, %v7177_v2  ;;  %v10246_v18 = vcombine.low %v9288_v25, %v9316_v8  ;;  %v25149_v24 = vsel %vm9113_vm2, %v25126_v37, %v8747_v51  ;;  %v8760_v46 = vmax.f32 %v7195_v10, %v17697_v40  ;;  %v29927_v10 = vld [vmem:[#allocation102_spill] sm:$0xff] }
 0x3c9   :  { %29924 = vst [vmem:[#allocation39_spill] sm:$0xff] %v25149_v24  ;;  %v6333_v0 = vadd.f32 %v25136_v50, %v6263_v17  ;;  %v11644_v44 = vrot.slane %v25143_v14, %v23666_v19  ;;  %v25154_v3 = vrot.slane %v8750_v60, 7  ;;  %v8759_v49 = vmax.f32 %v7187_v59, %v17696_v31  ;;  %v29928_v51 = vld [vmem:[#allocation98_spill] sm:$0xff] }
 0x3ca   :  { %v6398_v21 = vmax.f32 %v6334_v53, 0.0  ;;  %v25157_v52 = vrot.slane %v10246_v18, %v23856_v20  ;;  %v17692_v45 = vrot.slane %v25091_v56, 9  ;;  %v17694_v8 = vrot.slane %v7177_v2, 9  ;;  %v6122_v18 = vpop.f32.mrf.mxu0 }
 0x3cb   :  { %29925 = vst [vmem:[#allocation49_spill] sm:$0xff] %v25154_v3  ;;  %v8756_v25 = vmax.f32 %v7178_v63, %v17693_v58  ;;  %11730 = vrot.lane.b32.xlu1 %v11644_v44, %s19944_s27  ;;  %v9342_v40 = vsel %vm9115_vm3, %v29928_v51, %v29927_v10  ;;  %v25164_v17 = vmax.f32 %v7194_v55, %v17698_v11  ;;  %v17695_v60 = vrot.slane %v7179_v35, 9  ;;  %v29931_v58 = vld [vmem:[#allocation88_spill] sm:$0xff]  ;;  %v29932_v44 = vld [vmem:[#allocation106_spill] sm:$0xff] }
 0x3cc   :  { %29926 = vst [vmem:[#allocation73_spill] sm:$0xff] %v25157_v52  ;;  %v8762_v37 = vmax.f32 %v7196_v43, %v17699_v4  ;;  %v10254_v59 = vcombine.high %v25157_v52, %v29804_v28  ;;  %v25168_v31 = vrot.slane %v8760_v46, 7  ;;  %v6397_v53 = vmax.f32 %v6333_v0, 0.0  ;;  %v29934_v46 = vld [vmem:[#allocation42_spill] sm:$0xff] }
 0x3cd   :  { %29929 = vst [vmem:[#allocation90_spill] sm:$0xff] %v25164_v17  ;;  %v9343_v63 = vsel %vm9117_vm4, %v29928_v51, %v9342_v40  ;;  %v9370_v3 = vsel %vm9115_vm3, %v29932_v44, %v29931_v58  ;;  %v7214_v24 = vcombine.high %v6398_v21, %v6398_v21  ;;  %v7221_v55 = vrot.slane %v6398_v21, %v23666_v19  ;;  %v29935_v21 = vld [vmem:[#allocation55_spill] sm:$0xff] }
 0x3ce   :  { %29930 = vst [vmem:[#allocation23_spill] sm:$0xff] %v25168_v31  ;;  %v10757_v43 = vrot.slane %v10254_v59, %v23666_v19  ;;  %v9371_v11 = vsel %vm9117_vm4, %v29932_v44, %v9370_v3  ;;  %v25179_v4 = vrot.slane %v8756_v25, 7  ;;  %v6266_v0 = vadd.f32 %v19625_v5, %v29934_v46  ;;  %v29937_v5 = vld [vmem:[#allocation82_spill] sm:$0xff]  ;;  %v29938_v46 = vld [vmem:[#allocation79_spill] sm:$0xff] }
 0x3cf   :  { %v9344_v10 = vsel %vm9119_vm5, %v29928_v51, %v9343_v63  ;;  %v9372_v40 = vsel %vm9119_vm5, %v29932_v44, %v9371_v11  ;;  %v8755_v58 = vmax.f32 %v25091_v56, %v17692_v45  ;;  %v8758_v52 = vmax.f32 %v7179_v35, %v17695_v60  ;;  %v29944_v44 = vld [vmem:[#allocation105_spill] sm:$0xff] }
 0x3d0   :  { %29933 = vst [vmem:[#allocation50_spill] sm:$0xff] %v25179_v4  ;;  %10848 = vrot.lane.b32.xlu0 %v10757_v43, %s19947_s30  ;;  %v6265_v59 = vadd.f32 %v6122_v18, %v29935_v21  ;;  %v10282_v17 = vcombine.low %v9344_v10, %v9372_v40  ;;  %v25189_v47 = vmax.f32 %v7177_v2, %v17694_v8  ;;  %v19628_v2 = vpop.f32.mrf.mxu0  ;;  %v25207_v8 = vrot.slane %v8762_v37, 7  ;;  %v29943_v18 = vld [vmem:[#allocation108_spill] sm:$0xff] }
 0x3d1   :  { %v7197_v3 = vcombine.high %v6397_v53, %v6397_v53  ;;  %v25192_v25 = vrot.slane %v6397_v53, %v23666_v19  ;;  %v9356_v51 = vsel %vm9115_vm3, %v29938_v46, %v29937_v5  ;;  %v25199_v63 = vsel %vm9113_vm2, %v25168_v31, %v8759_v49 }
 0x3d2   :  { %29936 = vst [vmem:[#allocation96_spill] sm:$0xff] %v25189_v47  ;;  %29939 = vst [vmem:[#allocation76_spill] sm:$0xff] %v25199_v63  ;;  %v25202_v56 = vrot.slane %v7214_v24, %v23666_v19  ;;  %v7229_v35 = vcombine.high %v7221_v55, %v7221_v55  ;;  %v25205_v45 = vrot.slane %v10282_v17, %v23856_v20  ;;  %v25217_v43 = vrot.slane %v8758_v52, 7  ;;  %v6132_v5 = vpop.f32.mrf.mxu0 }
 0x3d3   :  { %29941 = vst [vmem:[#allocation52_spill] sm:$0xff] %v25207_v8  ;;  %v25211_v60 = vsel %vm9113_vm2, %v25179_v4, %v8755_v58  ;;  %v6336_v53 = vadd.f32 %v25136_v50, %v6266_v0  ;;  %v9384_v49 = vsel %vm9115_vm3, %v29944_v44, %v29943_v18  ;;  %v17704_v24 = vrot.slane %v7221_v55, 9 }
 0x3d4   :  { %29940 = vst [vmem:[#allocation40_spill] sm:$0xff] %v25205_v45  ;;  %29942 = vst [vmem:[#allocation85_spill] sm:$0xff] %v25211_v60  ;;  %v6335_v11 = vadd.f32 %v25136_v50, %v6265_v59  ;;  %v9357_v17 = vsel %vm9117_vm4, %v29938_v46, %v9356_v51  ;;  %v7211_v37 = vrot.slane %v7197_v3, %v23666_v19  ;;  %v17700_v40 = vrot.slane %v25192_v25, 9  ;;  %v29946_v60 = vld [vmem:[#allocation43_spill] sm:$0xff] }
 0x3d5   :  { %29945 = vst [vmem:[#allocation97_spill] sm:$0xff] %v25217_v43  ;;  %v7212_v10 = vcombine.high %v25192_v25, %v25192_v25  ;;  %v10290_v0 = vcombine.high %v25205_v45, %v29804_v28  ;;  %v7230_v52 = vcombine.high %v25202_v56, %v25202_v56  ;;  %v17705_v58 = vrot.slane %v7229_v35, 9 }
 0x3d6   :  { %v17706_v21 = vrot.slane %v25202_v56, 9  ;;  %v9385_v59 = vsel %vm9117_vm4, %v29944_v44, %v9384_v49  ;;  %v6400_v51 = vmax.f32 %v6336_v53, 0.0  ;;  %v9358_v18 = vsel %vm9119_vm5, %v29938_v46, %v9357_v17  ;;  %v29947_v49 = vld [vmem:[#allocation56_spill] sm:$0xff] }
 0x3d7   :  { %v10764_v3 = vrot.slane %v10290_v0, %v23666_v19  ;;  %v9386_v43 = vsel %vm9119_vm5, %v29944_v44, %v9385_v59  ;;  %v8767_v45 = vmax.f32 %v7221_v55, %v17704_v24  ;;  %v6399_v47 = vmax.f32 %v6335_v11, 0.0  ;;  %v29948_v53 = vld [vmem:[#allocation100_spill] sm:$0xff]  ;;  %v29951_v24 = vld [vmem:[#allocation110_spill] sm:$0xff] }
 0x3d8   :  { %v10300_v4 = vcombine.low %v9358_v18, %v9386_v43  ;;  %v6268_v8 = vadd.f32 %v19628_v2, %v29946_v60  ;;  %v7213_v31 = vcombine.high %v7211_v37, %v7211_v37  ;;  %v17701_v63 = vrot.slane %v7212_v10, 9  ;;  %v29950_v60 = vld [vmem:[#allocation109_spill] sm:$0xff] }
 0x3d9   :  { %10850 = vrot.lane.b32.xlu1 %v10764_v3, %s19947_s30  ;;  %v6267_v23 = vadd.f32 %v6132_v5, %v29947_v49  ;;  %v9348_v0 = vsel %vm9113_vm2, %v29949_v39, %v29948_v53  ;;  %v17707_v36 = vrot.slane %v7230_v52, 9  ;;  %v8768_v46 = vmax.f32 %v7229_v35, %v17705_v58 }
 0x3da   :  { %v10307_v17 = vrot.slane %v10300_v4, %v23856_v20  ;;  %v6338_v55 = vadd.f32 %v25136_v50, %v6268_v8  ;;  %v7248_v44 = vcombine.high %v6400_v51, %v6400_v51  ;;  %v25247_v43 = vrot.slane %v6400_v51, %v23666_v19 }
 0x3db   :  { %v9349_v2 = vsel %vm9115_vm3, %v29949_v39, %v9348_v0  ;;  %v9376_v11 = vsel %vm9113_vm2, %v29951_v24, %v29950_v60  ;;  %v25255_v59 = vrot.slane %v6399_v47, %v23666_v19  ;;  %v8764_v58 = vmax.f32 %v7212_v10, %v17701_v63  ;;  %v19631_v60 = vpop.f32.mrf.mxu0 }
 0x3dc   :  { %v11292_v35 = vrot.slane %v10307_v17, %v23666_v19  ;;  %v9350_v4 = vsel %vm9117_vm4, %v29949_v39, %v9349_v2  ;;  %v9377_v8 = vsel %vm9115_vm3, %v29951_v24, %v9376_v11  ;;  %v6337_v5 = vadd.f32 %v25136_v50, %v6267_v23 }
 0x3dd   :  { %v9378_v51 = vsel %vm9117_vm4, %v29951_v24, %v9377_v8  ;;  %v10308_v3 = vcombine.high %v10307_v17, %v29804_v28  ;;  %v17702_v18 = vrot.slane %v7211_v37, 9  ;;  %v6402_v49 = vmax.f32 %v6338_v55, 0.0 }
 0x3de   :  { %11378 = vrot.lane.b32.xlu0 %v11292_v35, %s19941_s25  ;;  %v9351_v53 = vsel %vm9119_vm5, %v29949_v39, %v9350_v4  ;;  %v9379_v0 = vsel %vm9119_vm5, %v29951_v24, %v9378_v51  ;;  %v17703_v2 = vrot.slane %v7213_v31, 9  ;;  %v7262_v63 = vrot.slane %v7248_v44, %v23666_v19  ;;  %v29955_v51 = vld [vmem:[#allocation44_spill] sm:$0xff] }
 0x3df   :  { %v7231_v10 = vcombine.high %v6399_v47, %v6399_v47  ;;  %v10291_v23 = vcombine.low %v9351_v53, %v9379_v0  ;;  %v25272_v11 = vrot.slane %v8768_v46, 7  ;;  %v7263_v17 = vcombine.high %v25247_v43, %v25247_v43 }
 0x3e0   :  { %v7246_v55 = vcombine.high %v25255_v59, %v25255_v59  ;;  %v11468_v35 = vrot.slane %v10308_v3, %v23666_v19  ;;  %v8770_v39 = vmax.f32 %v7230_v52, %v17707_v36  ;;  %v25279_v4 = vrot.slane %v8764_v58, 7 }
 0x3e1   :  { %29952 = vst [vmem:[#allocation94_spill] sm:$0xff] %v25272_v11  ;;  %v6401_v24 = vmax.f32 %v6337_v5, 0.0  ;;  %v10298_v8 = vrot.slane %v10291_v23, %v23856_v20  ;;  %v25283_v47 = vmax.f32 %v25202_v56, %v17706_v21  ;;  %v8763_v46 = vmax.f32 %v25192_v25, %v17700_v40  ;;  %v6142_v5 = vpop.f32.mrf.mxu0 }
 0x3e2   :  { %29953 = vst [vmem:[#allocation93_spill] sm:$0xff] %v25279_v4  ;;  %v7282_v44 = vcombine.high %v6402_v49, %v6402_v49  ;;  %11554 = vrot.lane.b32.xlu0 %v11468_v35, %s19942_s1  ;;  %v6270_v53 = vadd.f32 %v19631_v60, %v29955_v51  ;;  %v25288_v0 = vmax.f32 %v7211_v37, %v17702_v18  ;;  %v17713_v58 = vrot.slane %v7263_v17, 9  ;;  %v29961_v51 = vld [vmem:[#allocation58_spill] sm:$0xff] }
 0x3e3   :  { %29954 = vst [vmem:[#allocation92_spill] sm:$0xff] %v25283_v47  ;;  %v8766_v27 = vmax.f32 %v7213_v31, %v17703_v2  ;;  %v7264_v3 = vcombine.high %v7262_v63, %v7262_v63  ;;  %v7245_v36 = vrot.slane %v7231_v10, %v23666_v19  ;;  %v25293_v52 = vsel %vm9113_vm2, %v25272_v11, %v8767_v45 }
 0x3e4   :  { %29956 = vst [vmem:[#allocation41_spill] sm:$0xff] %v25288_v0  ;;  %29957 = vst [vmem:[#allocation53_spill] sm:$0xff] %v25293_v52  ;;  %v17709_v56 = vrot.slane %v7246_v55, 9  ;;  %v10940_v21 = vrot.slane %v10298_v8, %v23666_v19  ;;  %v25296_v25 = vrot.slane %v8770_v39, 7  ;;  %v25300_v40 = vsel %vm9113_vm2, %v25279_v4, %v8763_v46 }
 0x3e5   :  { %29959 = vst [vmem:[#allocation98_spill] sm:$0xff] %v25300_v40  ;;  %v7289_v37 = vrot.slane %v6402_v49, %v23666_v19  ;;  %v7265_v31 = vcombine.high %v6401_v24, %v6401_v24  ;;  %v25304_v18 = vrot.slane %v7282_v44, %v23666_v19  ;;  %v7272_v45 = vrot.slane %v6401_v24, %v23666_v19 }
 0x3e6   :  { %29958 = vst [vmem:[#allocation102_spill] sm:$0xff] %v25296_v25  ;;  %11026 = vrot.lane.b32.xlu1 %v10940_v21, %s19943_s26  ;;  %v6340_v2 = vadd.f32 %v25136_v50, %v6270_v53  ;;  %v10317_v10 = vcombine.high %v25143_v14, %v29804_v28  ;;  %v25311_v23 = vrot.slane %v8766_v27, 7  ;;  %v17712_v60 = vrot.slane %v25247_v43, 9 }
 0x3e7   :  { %v17715_v35 = vrot.slane %v7264_v3, 9  ;;  %v7247_v49 = vcombine.high %v7245_v36, %v7245_v36  ;;  %v8776_v39 = vmax.f32 %v7263_v17, %v17713_v58  ;;  %v8772_v46 = vmax.f32 %v7246_v55, %v17709_v56 }
 0x3e8   :  { %29960 = vst [vmem:[#allocation88_spill] sm:$0xff] %v25311_v23  ;;  %v6269_v44 = vadd.f32 %v6142_v5, %v29961_v51  ;;  %v11820_v0 = vrot.slane %v10317_v10, %v23666_v19  ;;  %v17714_v24 = vrot.slane %v7262_v63, 9  ;;  %v17708_v21 = vrot.slane %v25255_v59, 9 }
 0x3e9   :  { %v7297_v4 = vcombine.high %v7289_v37, %v7289_v37  ;;  %v25318_v53 = vrot.slane %v7265_v31, %v23666_v19  ;;  %v7298_v27 = vcombine.high %v25304_v18, %v25304_v18  ;;  %v7280_v14 = vcombine.high %v7272_v45, %v7272_v45 }
 0x3ea   :  { %v6404_v23 = vmax.f32 %v6340_v2, 0.0  ;;  %11906 = vrot.lane.b32.xlu1 %v11820_v0, %s19945_s28  ;;  %v10299_v17 = vcombine.high %v10298_v8, %v29804_v28  ;;  %v8775_v55 = vmax.f32 %v25247_v43, %v17712_v60  ;;  %v8778_v58 = vmax.f32 %v7264_v3, %v17715_v35  ;;  %v19634_v35 = vpop.f32.mrf.mxu0 }
 0x3eb   :  { %v17710_v56 = vrot.slane %v7245_v36, 9  ;;  %v17711_v5 = vrot.slane %v7247_v49, 9  ;;  %v25325_v10 = vrot.slane %v8776_v39, 7  ;;  %v25327_v51 = vrot.slane %v8772_v46, 7 }
 0x3ec   :  { %v6339_v31 = vadd.f32 %v25136_v50, %v6269_v44  ;;  %v11116_v40 = vrot.slane %v10299_v17, %v23666_v19  ;;  %v8777_v25 = vmax.f32 %v7262_v63, %v17714_v24  ;;  %v8771_v2 = vmax.f32 %v25255_v59, %v17708_v21 }
 0x3ed   :  { %29962 = vst [vmem:[#allocation106_spill] sm:$0xff] %v25325_v10  ;;  %29963 = vst [vmem:[#allocation42_spill] sm:$0xff] %v25327_v51  ;;  %v17721_v47 = vrot.slane %v7297_v4, 9  ;;  %v7281_v8 = vcombine.high %v25318_v53, %v25318_v53  ;;  %v17723_v0 = vrot.slane %v7298_v27, 9  ;;  %v17717_v43 = vrot.slane %v7280_v14, 9 }
 0x3ee   :  { %v7316_v3 = vcombine.high %v6404_v23, %v6404_v23  ;;  %v7323_v60 = vrot.slane %v6404_v23, %v23666_v19  ;;  %11202 = vrot.lane.b32.xlu0 %v11116_v40, %s19946_s29  ;;  %v25336_v39 = vrot.slane %v8778_v58, 7  ;;  %v25338_v46 = vmax.f32 %v7245_v36, %v17710_v56  ;;  %v29967_v58 = vld [vmem:[#allocation45_spill] sm:$0xff] }
 0x3ef   :  { %v8774_v44 = vmax.f32 %v7247_v49, %v17711_v5  ;;  %v17720_v63 = vrot.slane %v7289_v37, 9  ;;  %v25342_v59 = vsel %vm9113_vm2, %v25325_v10, %v8775_v55  ;;  %v25346_v24 = vsel %vm9113_vm2, %v25327_v51, %v8771_v2 }
 0x3f0   :  { %29964 = vst [vmem:[#allocation55_spill] sm:$0xff] %v25336_v39  ;;  %29965 = vst [vmem:[#allocation82_spill] sm:$0xff] %v25342_v59  ;;  %v17716_v21 = vrot.slane %v7272_v45, 9  ;;  %v6403_v17 = vmax.f32 %v6339_v31, 0.0  ;;  %v17722_v23 = vrot.slane %v25304_v18, 9  ;;  %v8784_v40 = vmax.f32 %v7297_v4, %v17721_v47  ;;  %v6152_v47 = vpop.f32.mrf.mxu0 }
 0x3f1   :  { %29966 = vst [vmem:[#allocation79_spill] sm:$0xff] %v25346_v24  ;;  %v17719_v11 = vrot.slane %v7281_v8, 9  ;;  %v6272_v52 = vadd.f32 %v19634_v35, %v29967_v58  ;;  %v8786_v36 = vmax.f32 %v7298_v27, %v17723_v0  ;;  %v8780_v56 = vmax.f32 %v7280_v14, %v17717_v43 }
 0x3f2   :  { %v7330_v49 = vrot.slane %v7316_v3, %v23666_v19  ;;  %v7331_v5 = vcombine.high %v7323_v60, %v7323_v60  ;;  %v25353_v55 = vsel %vm9113_vm2, %v25336_v39, %v8777_v25  ;;  %v25355_v10 = vrot.slane %v8774_v44, 7 }
 0x3f3   :  { %29968 = vst [vmem:[#allocation108_spill] sm:$0xff] %v25353_v55  ;;  %v8783_v2 = vmax.f32 %v7289_v37, %v17720_v63  ;;  %v17718_v31 = vrot.slane %v25318_v53, 9  ;;  %v8779_v51 = vmax.f32 %v7272_v45, %v17716_v21  ;;  %v7299_v24 = vcombine.high %v6403_v17, %v6403_v17  ;;  %v29972_v63 = vld [vmem:[#allocation59_spill] sm:$0xff] }
 0x3f4   :  { %v7306_v4 = vrot.slane %v6403_v17, %v23666_v19  ;;  %v9412_v27 = vsel %vm9115_vm3, %v24538_v29, %v24559_v6  ;;  %v8785_v14 = vmax.f32 %v25304_v18, %v17722_v23  ;;  %v25363_v0 = vrot.slane %v8784_v40, 7  ;;  %v29999_v55 = vld [vmem:[#allocation103_spill] sm:$0xff] }
 0x3f5   :  { %v8782_v25 = vmax.f32 %v7281_v8, %v17719_v11  ;;  %v6342_v43 = vadd.f32 %v25136_v50, %v6272_v52  ;;  %v25366_v3 = vrot.slane %v8786_v36, 7  ;;  %v25368_v37 = vrot.slane %v8780_v56, 7  ;;  %v19637_v56 = vpop.f32.mrf.mxu0 }
 0x3f6   :  { %29969 = vst [vmem:[#allocation105_spill] sm:$0xff] %v25363_v0  ;;  %v7332_v45 = vcombine.high %v7330_v49, %v7330_v49  ;;  %v17729_v35 = vrot.slane %v7331_v5, 9  ;;  %v17728_v44 = vrot.slane %v7323_v60, 9  ;;  %v6271_v21 = vadd.f32 %v6152_v47, %v29972_v63 }
 0x3f7   :  { %29970 = vst [vmem:[#allocation43_spill] sm:$0xff] %v25366_v3  ;;  %29971 = vst [vmem:[#allocation56_spill] sm:$0xff] %v25368_v37  ;;  %v9413_v17 = vsel %vm9117_vm4, %v24538_v29, %v9412_v27  ;;  %v9440_v6 = vsel %vm9115_vm3, %v24579_v22, %v24603_v38  ;;  %v17730_v18 = vrot.slane %v7330_v49, 9  ;;  %v7313_v11 = vrot.slane %v7299_v24, %v23666_v19 }
 0x3f8   :  { %v7314_v52 = vcombine.high %v7306_v4, %v7306_v4  ;;  %v9441_v8 = vsel %vm9117_vm4, %v24579_v22, %v9440_v6  ;;  %v25381_v23 = vsel %vm9113_vm2, %v25363_v0, %v8783_v2  ;;  %v25384_v40 = vmax.f32 %v25318_v53, %v17718_v31 }
 0x3f9   :  { %29973 = vst [vmem:[#allocation100_spill] sm:$0xff] %v25381_v23  ;;  %v6406_v58 = vmax.f32 %v6342_v43, 0.0  ;;  %v9442_v36 = vsel %vm9119_vm5, %v24579_v22, %v9441_v8  ;;  %v25390_v38 = vsel %vm9113_vm2, %v25368_v37, %v8779_v51  ;;  %v17731_v24 = vrot.slane %v7332_v45, 9  ;;  %v29980_v37 = vld [vmem:[#allocation17_spill] sm:$0xff] }
 0x3fa   :  { %29974 = vst [vmem:[#allocation104_spill] sm:$0xff] %v25384_v40  ;;  %29975 = vst [vmem:[#allocation109_spill] sm:$0xff] %v25390_v38  ;;  %v8792_v47 = vmax.f32 %v7331_v5, %v17729_v35  ;;  %v9414_v27 = vsel %vm9119_vm5, %v24538_v29, %v9413_v17  ;;  %v25396_v2 = vsel %vm9113_vm2, %v25366_v3, %v8785_v14  ;;  %v25398_v53 = vrot.slane %v8782_v25, 7  ;;  %v6162_v29 = vpop.f32.mrf.mxu0  ;;  %v29979_v17 = vld [vmem:[#allocation91_spill] sm:$0xff] }
 0x3fb   :  { %29976 = vst [vmem:[#allocation110_spill] sm:$0xff] %v25396_v2  ;;  %v6341_v31 = vadd.f32 %v25136_v50, %v6271_v21  ;;  %v10336_v43 = vcombine.low %v9414_v27, %v9442_v36  ;;  %v8791_v22 = vmax.f32 %v7323_v60, %v17728_v44  ;;  %v25401_v63 = vmax.f32 %v7330_v49, %v17730_v18  ;;  %v29982_v36 = vld [vmem:[#allocation61_spill] sm:$0xff]  ;;  %v29983_v27 = vld [vmem:[#allocation107_spill] sm:$0xff]  ;;  %v29985_v2 = vld [vmem:[#allocation46_spill] sm:$0xff] }
 0x3fc   :  { %29977 = vst [vmem:[#allocation44_spill] sm:$0xff] %v25398_v53  ;;  %v7315_v6 = vcombine.high %v7313_v11, %v7313_v11  ;;  %v17725_v51 = vrot.slane %v7314_v52, 9  ;;  %v7350_v8 = vcombine.high %v6406_v58, %v6406_v58  ;;  %v7357_v5 = vrot.slane %v6406_v58, %v23666_v19  ;;  %v29984_v58 = vld [vmem:[#allocation7_spill] sm:$0xff] }
 0x3fd   :  { %29978 = vst [vmem:[#allocation58_spill] sm:$0xff] %v25401_v63  ;;  %v10343_v35 = vrot.slane %v10336_v43, %v23856_v20  ;;  %v9404_v14 = vsel %vm9113_vm2, %v29980_v37, %v29979_v17  ;;  %v8794_v25 = vmax.f32 %v7332_v45, %v17731_v24  ;;  %v25408_v38 = vrot.slane %v8792_v47, 7 }
 0x3fe   :  { %v17724_v21 = vrot.slane %v7306_v4, 9  ;;  %v6274_v60 = vadd.f32 %v19637_v56, %v29982_v36  ;;  %v6405_v49 = vmax.f32 %v6341_v31, 0.0  ;;  %v9432_v43 = vsel %vm9113_vm2, %v29984_v58, %v29983_v27 }
 0x3ff   :  { %29981 = vst [vmem:[#allocation45_spill] sm:$0xff] %v25408_v38  ;;  %v11299_v44 = vrot.slane %v10343_v35, %v23666_v19  ;;  %v10344_v18 = vcombine.high %v10343_v35, %v29804_v28  ;;  %v17726_v63 = vrot.slane %v7313_v11, 9  ;;  %v8788_v3 = vmax.f32 %v7314_v52, %v17725_v51 }
 0x400   :  { %v6273_v39 = vadd.f32 %v6162_v29, %v29985_v2  ;;  %v9405_v45 = vsel %vm9115_vm3, %v29980_v37, %v9404_v14  ;;  %v17727_v24 = vrot.slane %v7315_v6, 9  ;;  %v25420_v47 = vrot.slane %v7350_v8, %v23666_v19 }
 0x401   :  { %v7365_v56 = vcombine.high %v7357_v5, %v7357_v5  ;;  %11380 = vrot.lane.b32.xlu1 %v11299_v44, %s19941_s25  ;;  %v11475_v31 = vrot.slane %v10344_v18, %v23666_v19  ;;  %v25426_v35 = vsel %vm9113_vm2, %v25408_v38, %v8791_v22  ;;  %v8787_v17 = vmax.f32 %v7306_v4, %v17724_v21 }
 0x402   :  { %29986 = vst [vmem:[#allocation59_spill] sm:$0xff] %v25426_v35  ;;  %v6344_v52 = vadd.f32 %v25136_v50, %v6274_v60  ;;  %v9433_v2 = vsel %vm9115_vm3, %v29984_v58, %v9432_v43  ;;  %v25431_v51 = vrot.slane %v8794_v25, 7  ;;  %v17736_v29 = vrot.slane %v7357_v5, 9 }
 0x403   :  { %v7333_v8 = vcombine.high %v6405_v49, %v6405_v49  ;;  %11556 = vrot.lane.b32.xlu0 %v11475_v31, %s19942_s1  ;;  %v9406_v14 = vsel %vm9117_vm4, %v29980_v37, %v9405_v45  ;;  %v25436_v36 = vrot.slane %v8788_v3, 7  ;;  %v25439_v22 = vrot.slane %v6405_v49, %v23666_v19  ;;  %v29991_v31 = vld [vmem:[#allocation22_spill] sm:$0xff] }
 0x404   :  { %29987 = vst [vmem:[#allocation91_spill] sm:$0xff] %v25431_v51  ;;  %v6343_v4 = vadd.f32 %v25136_v50, %v6273_v39  ;;  %v9434_v21 = vsel %vm9117_vm4, %v29984_v58, %v9433_v2  ;;  %v8790_v60 = vmax.f32 %v7315_v6, %v17727_v24  ;;  %v7366_v25 = vcombine.high %v25420_v47, %v25420_v47  ;;  %v29990_v24 = vld [vmem:[#allocation112_spill] sm:$0xff] }
 0x405   :  { %29988 = vst [vmem:[#allocation17_spill] sm:$0xff] %v25436_v36  ;;  %v17737_v44 = vrot.slane %v7365_v56, 9  ;;  %v9435_v18 = vsel %vm9119_vm5, %v29984_v58, %v9434_v21  ;;  %v25448_v27 = vmax.f32 %v7313_v11, %v17726_v63  ;;  %v17738_v3 = vrot.slane %v25420_v47, 9 }
 0x406   :  { %v6408_v43 = vmax.f32 %v6344_v52, 0.0  ;;  %v9407_v49 = vsel %vm9119_vm5, %v29980_v37, %v9406_v14  ;;  %v25453_v39 = vmax.f32 %v7357_v5, %v17736_v29  ;;  %v25456_v45 = vrot.slane %v7333_v8, %v23666_v19  ;;  %v19640_v14 = vpop.f32.mrf.mxu0 }
 0x407   :  { %29989 = vst [vmem:[#allocation61_spill] sm:$0xff] %v25448_v27  ;;  %v10327_v6 = vcombine.low %v9407_v49, %v9435_v18  ;;  %v9418_v2 = vsel %vm9113_vm2, %v29991_v31, %v29990_v24  ;;  %v25463_v11 = vsel %vm9113_vm2, %v25436_v36, %v8787_v17  ;;  %v7348_v63 = vcombine.high %v25439_v22, %v25439_v22  ;;  %v29994_v49 = vld [vmem:[#allocation99_spill] sm:$0xff]  ;;  %v29995_v24 = vld [vmem:[#allocation12_spill] sm:$0xff]  ;;  %v29997_v36 = vld [vmem:[#allocation114_spill] sm:$0xff] }
 0x408   :  { %29992 = vst [vmem:[#allocation107_spill] sm:$0xff] %v25463_v11  ;;  %v6407_v58 = vmax.f32 %v6343_v4, 0.0  ;;  %v9419_v37 = vsel %vm9115_vm3, %v29991_v31, %v9418_v2  ;;  %v25469_v5 = vrot.slane %v8790_v60, 7  ;;  %v17739_v52 = vrot.slane %v7366_v25, 9  ;;  %v6172_v35 = vpop.f32.mrf.mxu0 }
 0x409   :  { %v8800_v29 = vmax.f32 %v7365_v56, %v17737_v44  ;;  %v10334_v8 = vrot.slane %v10327_v6, %v23856_v20  ;;  %v17732_v21 = vrot.slane %v25439_v22, 9  ;;  %v7384_v18 = vcombine.high %v6408_v43, %v6408_v43 }
 0x40a   :  { %29993 = vst [vmem:[#allocation7_spill] sm:$0xff] %v25469_v5  ;;  %v9420_v17 = vsel %vm9117_vm4, %v29991_v31, %v9419_v37  ;;  %v9446_v4 = vsel %vm9113_vm2, %v29995_v24, %v29994_v49  ;;  %v7349_v2 = vcombine.high %v25456_v45, %v25456_v45  ;;  %v25481_v60 = vrot.slane %v6408_v43, %v23666_v19 }
 0x40b   :  { %v10947_v56 = vrot.slane %v10334_v8, %v23666_v19  ;;  %v9447_v44 = vsel %vm9115_vm3, %v29995_v24, %v9446_v4  ;;  %v17733_v6 = vrot.slane %v7348_v63, 9  ;;  %v7367_v5 = vcombine.high %v6407_v58, %v6407_v58  ;;  %v29996_v4 = vld [vmem:[#allocation95_spill] sm:$0xff] }
 0x40c   :  { %v9448_v37 = vsel %vm9117_vm4, %v29995_v24, %v9447_v44  ;;  %v10335_v27 = vcombine.high %v10334_v8, %v29804_v28  ;;  %v25490_v49 = vrot.slane %v6407_v58, %v23666_v19  ;;  %v9421_v43 = vsel %vm9119_vm5, %v29991_v31, %v9420_v17  ;;  %v29998_v8 = vld [vmem:[#allocation111_spill] sm:$0xff]  ;;  %v30000_v17 = vld [vmem:[#allocation62_spill] sm:$0xff] }
 0x40d   :  { %11028 = vrot.lane.b32.xlu1 %v10947_v56, %s19943_s26  ;;  %v9449_v38 = vsel %vm9119_vm5, %v29995_v24, %v9448_v37  ;;  %v9398_v11 = vsel %vm9115_vm3, %v29997_v36, %v29996_v4  ;;  %v7398_v44 = vrot.slane %v7384_v18, %v23666_v19  ;;  %v9426_v56 = vsel %vm9115_vm3, %v29999_v55, %v29998_v8 }
 0x40e   :  { %v10345_v51 = vcombine.low %v9421_v43, %v9449_v38  ;;  %v9399_v58 = vsel %vm9117_vm4, %v29997_v36, %v9398_v11  ;;  %v7399_v31 = vcombine.high %v25481_v60, %v25481_v60  ;;  %v6276_v24 = vadd.f32 %v19640_v14, %v30000_v17  ;;  %v30002_v14 = vld [vmem:[#allocation47_spill] sm:$0xff] }
 0x40f   :  { %v11123_v37 = vrot.slane %v10335_v27, %v23666_v19  ;;  %v9427_v4 = vsel %vm9117_vm4, %v29999_v55, %v9426_v56  ;;  %v8802_v0 = vmax.f32 %v7366_v25, %v17739_v52  ;;  %v25512_v18 = vrot.slane %v8800_v29, 7  ;;  %v19643_v27 = vpop.f32.mrf.mxu0 }
 0x410   :  { %v25515_v38 = vrot.slane %v10345_v51, %v23856_v20  ;;  %v9428_v11 = vsel %vm9119_vm5, %v29999_v55, %v9427_v4  ;;  %v7381_v43 = vrot.slane %v7367_v5, %v23666_v19  ;;  %v7382_v8 = vcombine.high %v25490_v49, %v25490_v49 }
 0x411   :  { %30001 = vst [vmem:[#allocation46_spill] sm:$0xff] %v25512_v18  ;;  %v6275_v17 = vadd.f32 %v6172_v35, %v30002_v14  ;;  %11204 = vrot.lane.b32.xlu1 %v11123_v37, %s19946_s29  ;;  %v9400_v25 = vsel %vm9119_vm5, %v29997_v36, %v9399_v58  ;;  %v17735_v52 = vrot.slane %v7349_v2, 9  ;;  %v8796_v29 = vmax.f32 %v7348_v63, %v17733_v6  ;;  %v30005_v63 = vld [vmem:[#allocation63_spill] sm:$0xff] }
 0x412   :  { %v11651_v51 = vrot.slane %v25515_v38, %v23666_v19  ;;  %v10318_v56 = vcombine.low %v9400_v25, %v9428_v11  ;;  %v25529_v55 = vmax.f32 %v25420_v47, %v17738_v3  ;;  %v7400_v5 = vcombine.high %v7398_v44, %v7398_v44 }
 0x413   :  { %v17745_v4 = vrot.slane %v7399_v31, 9  ;;  %v6346_v23 = vadd.f32 %v25136_v50, %v6276_v24  ;;  %v17734_v35 = vrot.slane %v25456_v45, 9  ;;  %v8795_v37 = vmax.f32 %v25439_v22, %v17732_v21 }
 0x414   :  { %30003 = vst [vmem:[#allocation112_spill] sm:$0xff] %v25529_v55  ;;  %11732 = vrot.lane.b32.xlu0 %v11651_v51, %s19944_s27  ;;  %v25536_v36 = vrot.slane %v10318_v56, %v23856_v20  ;;  %v6278_v6 = vadd.f32 %v19643_v27, %v30005_v63  ;;  %v25542_v47 = vsel %vm9113_vm2, %v25512_v18, %v25453_v39  ;;  %v17741_v58 = vrot.slane %v7382_v8, 9  ;;  %v6182_v63 = vpop.f32.mrf.mxu0 }
 0x415   :  { %30006 = vst [vmem:[#allocation99_spill] sm:$0xff] %v25542_v47  ;;  %v7383_v3 = vcombine.high %v7381_v43, %v7381_v43  ;;  %v6345_v24 = vadd.f32 %v25136_v50, %v6275_v17  ;;  %v25545_v11 = vrot.slane %v8802_v0, 7  ;;  %v8798_v14 = vmax.f32 %v7349_v2, %v17735_v52 }
 0x416   :  { %30004 = vst [vmem:[#allocation22_spill] sm:$0xff] %v25536_v36  ;;  %v25547_v22 = vrot.slane %v8796_v29, 7  ;;  %v17744_v21 = vrot.slane %v25481_v60, 9  ;;  %v17747_v25 = vrot.slane %v7400_v5, 9  ;;  %v8808_v51 = vmax.f32 %v7399_v31, %v17745_v4  ;;  %v30012_v4 = vld [vmem:[#allocation65_spill] sm:$0xff] }
 0x417   :  { %30007 = vst [vmem:[#allocation12_spill] sm:$0xff] %v25545_v11  ;;  %v6410_v56 = vmax.f32 %v6346_v23, 0.0  ;;  %v10326_v27 = vcombine.high %v25536_v36, %v29804_v28  ;;  %v17746_v39 = vrot.slane %v7398_v44, 9  ;;  %v17740_v18 = vrot.slane %v25490_v49, 9 }
 0x418   :  { %30008 = vst [vmem:[#allocation95_spill] sm:$0xff] %v25547_v22  ;;  %v17742_v47 = vrot.slane %v7381_v43, 9  ;;  %v6348_v17 = vadd.f32 %v25136_v50, %v6278_v6  ;;  %v17743_v0 = vrot.slane %v7383_v3, 9  ;;  %v8804_v11 = vmax.f32 %v7382_v8, %v17741_v58 }
 0x419   :  { %v6409_v2 = vmax.f32 %v6345_v24, 0.0  ;;  %v10771_v52 = vrot.slane %v10326_v27, %v23666_v19  ;;  %v25556_v29 = vmax.f32 %v25456_v45, %v17734_v35  ;;  %v25560_v23 = vsel %vm9113_vm2, %v25547_v22, %v8795_v37 }
 0x41a   :  { %30010 = vst [vmem:[#allocation111_spill] sm:$0xff] %v25560_v23  ;;  %v25562_v31 = vrot.slane %v8798_v14, 7  ;;  %v6277_v36 = vadd.f32 %v6182_v63, %v30012_v4  ;;  %v8810_v55 = vmax.f32 %v7400_v5, %v17747_v25  ;;  %v25565_v59 = vrot.slane %v8808_v51, 7 }
 0x41b   :  { %30009 = vst [vmem:[#allocation114_spill] sm:$0xff] %v25556_v29  ;;  %v7418_v6 = vcombine.high %v6410_v56, %v6410_v56  ;;  %v7425_v8 = vrot.slane %v6410_v56, %v23666_v19  ;;  %10852 = vrot.lane.b32.xlu0 %v10771_v52, %s19947_s30  ;;  %v8807_v58 = vmax.f32 %v25481_v60, %v17744_v21  ;;  %v6412_v37 = vmax.f32 %v6348_v17, 0.0  ;;  %v30017_v56 = vld [vmem:[#allocation25_spill] sm:$0xff]  ;;  %v30018_v60 = vld [vmem:[#allocation10_spill] sm:$0xff] }
 0x41c   :  { %30011 = vst [vmem:[#allocation103_spill] sm:$0xff] %v25562_v31  ;;  %30013 = vst [vmem:[#allocation62_spill] sm:$0xff] %v25565_v59  ;;  %v25570_v45 = vmax.f32 %v7398_v44, %v17746_v39  ;;  %v8803_v35 = vmax.f32 %v25490_v49, %v17740_v18  ;;  %v25573_v24 = vmax.f32 %v7381_v43, %v17742_v47  ;;  %v25575_v27 = vrot.slane %v8804_v11, 7  ;;  %v30019_v44 = vld [vmem:[#allocation24_spill] sm:$0xff] }
 0x41d   :  { %v8806_v14 = vmax.f32 %v7383_v3, %v17743_v0  ;;  %v7408_v5 = vrot.slane %v6409_v2, %v23666_v19  ;;  %v7401_v25 = vcombine.high %v6409_v2, %v6409_v2  ;;  %v6347_v51 = vadd.f32 %v25136_v50, %v6277_v36  ;;  %v19646_v3 = vpop.f32.mrf.mxu0 }
 0x41e   :  { %30014 = vst [vmem:[#allocation47_spill] sm:$0xff] %v25570_v45  ;;  %30015 = vst [vmem:[#allocation63_spill] sm:$0xff] %v25573_v24  ;;  %v9468_v63 = vsel %vm9115_vm3, %v30017_v56, %v24690_v61  ;;  %v9496_v21 = vsel %vm9115_vm3, %v30019_v44, %v30018_v60  ;;  %v25587_v49 = vsel %vm9113_vm2, %v25565_v59, %v8807_v58  ;;  %v25589_v18 = vrot.slane %v8810_v55, 7  ;;  %v30028_v24 = vld [vmem:[#allocation67_spill] sm:$0xff]  ;;  %v30029_v59 = vld [vmem:[#allocation8_spill] sm:$0xff] }
 0x41f   :  { %30016 = vst [vmem:[#allocation65_spill] sm:$0xff] %v25575_v27  ;;  %30020 = vst [vmem:[#allocation25_spill] sm:$0xff] %v25587_v49  ;;  %v7432_v43 = vrot.slane %v7418_v6, %v23666_v19  ;;  %v7433_v47 = vcombine.high %v7425_v8, %v7425_v8  ;;  %v7452_v11 = vcombine.high %v6412_v37, %v6412_v37  ;;  %v17752_v55 = vrot.slane %v7425_v8, 9 }
 0x420   :  { %30021 = vst [vmem:[#allocation10_spill] sm:$0xff] %v25589_v18  ;;  %v9469_v36 = vsel %vm9117_vm4, %v30017_v56, %v9468_v63  ;;  %v9497_v61 = vsel %vm9117_vm4, %v30019_v44, %v9496_v21  ;;  %v10353_v39 = vcombine.high %v25515_v38, %v29804_v28  ;;  %v25600_v17 = vsel %vm9113_vm2, %v25575_v27, %v8803_v35  ;;  %v6192_v21 = vpop.f32.mrf.mxu0 }
 0x421   :  { %30022 = vst [vmem:[#allocation24_spill] sm:$0xff] %v25600_v17  ;;  %v7416_v0 = vcombine.high %v7408_v5, %v7408_v5  ;;  %v25603_v2 = vrot.slane %v6412_v37, %v23666_v19  ;;  %v25605_v52 = vrot.slane %v8806_v14, 7  ;;  %v7415_v4 = vrot.slane %v7401_v25, %v23666_v19 }
 0x422   :  { %v6411_v6 = vmax.f32 %v6347_v51, 0.0  ;;  %v9498_v58 = vsel %vm9119_vm5, %v30019_v44, %v9497_v61  ;;  %v7434_v63 = vcombine.high %v7432_v43, %v7432_v43  ;;  %v17753_v60 = vrot.slane %v7433_v47, 9  ;;  %v30024_v44 = vld [vmem:[#allocation66_spill] sm:$0xff] }
 0x423   :  { %30023 = vst [vmem:[#allocation115_spill] sm:$0xff] %v25605_v52  ;;  %v17748_v38 = vrot.slane %v7408_v5, 9  ;;  %v9470_v35 = vsel %vm9119_vm5, %v30017_v56, %v9469_v36  ;;  %v17754_v27 = vrot.slane %v7432_v43, 9  ;;  %v25613_v17 = vrot.slane %v7452_v11, %v23666_v19  ;;  %v30025_v11 = vld [vmem:[#allocation48_spill] sm:$0xff] }
 0x424   :  { %v10372_v37 = vcombine.low %v9470_v35, %v9498_v58  ;;  %v11827_v14 = vrot.slane %v10353_v39, %v23666_v19  ;;  %v8815_v18 = vmax.f32 %v7425_v8, %v17752_v55  ;;  %v17749_v25 = vrot.slane %v7416_v0, 9  ;;  %v30026_v39 = vld [vmem:[#allocation27_spill] sm:$0xff]  ;;  %v30027_v8 = vld [vmem:[#allocation20_spill] sm:$0xff] }
 0x425   :  { %v7467_v51 = vcombine.high %v25603_v2, %v25603_v2  ;;  %v6280_v61 = vadd.f32 %v19646_v3, %v30024_v44  ;;  %v7417_v45 = vcombine.high %v7415_v4, %v7415_v4  ;;  %v25620_v52 = vrot.slane %v6411_v6, %v23666_v19 }
 0x426   :  { %v10379_v56 = vrot.slane %v10372_v37, %v23856_v20  ;;  %11908 = vrot.lane.b32.xlu0 %v11827_v14, %s19945_s28  ;;  %v6279_v36 = vadd.f32 %v6192_v21, %v30025_v11  ;;  %v17755_v58 = vrot.slane %v7434_v63, 9  ;;  %v7435_v35 = vcombine.high %v6411_v6, %v6411_v6 }
 0x427   :  { %v9454_v55 = vsel %vm9115_vm3, %v30027_v8, %v30026_v39  ;;  %v9482_v3 = vsel %vm9115_vm3, %v30029_v59, %v30028_v24  ;;  %v8816_v44 = vmax.f32 %v7433_v47, %v17753_v60  ;;  %v7468_v49 = vcombine.high %v25613_v17, %v25613_v17 }
 0x428   :  { %v11306_v37 = vrot.slane %v10379_v56, %v23666_v19  ;;  %v10380_v14 = vcombine.high %v10379_v56, %v29804_v28  ;;  %v17750_v31 = vrot.slane %v7415_v4, 9  ;;  %v8812_v21 = vmax.f32 %v7416_v0, %v17749_v25 }
 0x429   :  { %v17761_v11 = vrot.slane %v7467_v51, 9  ;;  %v6350_v6 = vadd.f32 %v25136_v50, %v6280_v61  ;;  %v7450_v39 = vcombine.high %v25620_v52, %v25620_v52  ;;  %v6349_v24 = vadd.f32 %v25136_v50, %v6279_v36  ;;  %v19649_v36 = vpop.f32.mrf.mxu0 }
 0x42a   :  { %11382 = vrot.lane.b32.xlu1 %v11306_v37, %s19941_s25  ;;  %v9455_v47 = vsel %vm9117_vm4, %v30027_v8, %v9454_v55  ;;  %v9483_v60 = vsel %vm9117_vm4, %v30029_v59, %v9482_v3  ;;  %v8818_v29 = vmax.f32 %v7434_v63, %v17755_v58  ;;  %v17751_v56 = vrot.slane %v7417_v45, 9 }
 0x42b   :  { %v8811_v22 = vmax.f32 %v7408_v5, %v17748_v38  ;;  %v7449_v0 = vrot.slane %v7435_v35, %v23666_v19  ;;  %v25645_v25 = vrot.slane %v8816_v44, 7  ;;  %v17763_v61 = vrot.slane %v7468_v49, 9 }
 0x42c   :  { %v11482_v23 = vrot.slane %v10380_v14, %v23666_v19  ;;  %v9484_v37 = vsel %vm9119_vm5, %v30029_v59, %v9483_v60  ;;  %v25650_v53 = vmax.f32 %v7432_v43, %v17754_v27  ;;  %v8824_v55 = vmax.f32 %v7467_v51, %v17761_v11  ;;  %v30032_v14 = vld [vmem:[#allocation54_spill] sm:$0xff]  ;;  %v6202_v60 = vpop.f32.mrf.mxu0 }
 0x42d   :  { %v6414_v40 = vmax.f32 %v6350_v6, 0.0  ;;  %v9456_v63 = vsel %vm9119_vm5, %v30027_v8, %v9455_v47  ;;  %v25654_v58 = vrot.slane %v8812_v21, 7  ;;  %v17757_v5 = vrot.slane %v7450_v39, 9 }
 0x42e   :  { %30030 = vst [vmem:[#allocation66_spill] sm:$0xff] %v25650_v53  ;;  %v6413_v38 = vmax.f32 %v6349_v24, 0.0  ;;  %11558 = vrot.lane.b32.xlu1 %v11482_v23, %s19942_s1  ;;  %v10354_v35 = vcombine.low %v9456_v63, %v9484_v37  ;;  %v25657_v3 = vmax.f32 %v7415_v4, %v17750_v31  ;;  %v17760_v44 = vrot.slane %v25603_v2, 9 }
 0x42f   :  { %30031 = vst [vmem:[#allocation48_spill] sm:$0xff] %v25654_v58  ;;  %v7451_v59 = vcombine.high %v7449_v0, %v7449_v0  ;;  %v6282_v27 = vadd.f32 %v19649_v36, %v30032_v14  ;;  %v25663_v43 = vsel %vm9113_vm2, %v25645_v25, %v8815_v18  ;;  %v25665_v51 = vrot.slane %v8818_v29, 7  ;;  %v30041_v14 = vld [vmem:[#allocation26_spill] sm:$0xff] }
 0x430   :  { %v8814_v8 = vmax.f32 %v7417_v45, %v17751_v56  ;;  %v8826_v21 = vmax.f32 %v7468_v49, %v17763_v61  ;;  %v25667_v11 = vrot.slane %v8824_v55, 7  ;;  %v7486_v6 = vcombine.high %v6414_v40, %v6414_v40 }
 0x431   :  { %30033 = vst [vmem:[#allocation27_spill] sm:$0xff] %v25665_v51  ;;  %v25670_v23 = vrot.slane %v6414_v40, %v23666_v19  ;;  %v25673_v31 = vrot.slane %v10354_v35, %v23856_v20  ;;  %v25677_v4 = vsel %vm9113_vm2, %v25654_v58, %v8811_v22  ;;  %v17762_v18 = vrot.slane %v25613_v17, 9  ;;  %v30039_v35 = vld [vmem:[#allocation78_spill] sm:$0xff] }
 0x432   :  { %30034 = vst [vmem:[#allocation20_spill] sm:$0xff] %v25667_v11  ;;  %30036 = vst [vmem:[#allocation8_spill] sm:$0xff] %v25677_v4  ;;  %v8820_v24 = vmax.f32 %v7450_v39, %v17757_v5  ;;  %v7469_v29 = vcombine.high %v6413_v38, %v6413_v38  ;;  %v8823_v45 = vmax.f32 %v25603_v2, %v17760_v44  ;;  %v17759_v49 = vrot.slane %v7451_v59, 9 }
 0x433   :  { %30035 = vst [vmem:[#allocation67_spill] sm:$0xff] %v25673_v31  ;;  %v10362_v47 = vcombine.high %v25673_v31, %v29804_v28  ;;  %v6352_v40 = vadd.f32 %v25136_v50, %v6282_v27  ;;  %v25684_v56 = vrot.slane %v8826_v21, 7  ;;  %v17756_v61 = vrot.slane %v25620_v52, 9 }
 0x434   :  { %v17758_v37 = vrot.slane %v7449_v0, 9  ;;  %v25688_v22 = vrot.slane %v6413_v38, %v23666_v19  ;;  %v9915_v39 = vsel %vm9113_vm2, %v25667_v11, %v8823_v45  ;;  %v25693_v2 = vrot.slane %v7486_v6, %v23666_v19  ;;  %v30040_v38 = vld [vmem:[#allocation9_spill] sm:$0xff] }
 0x435   :  { %30037 = vst [vmem:[#allocation54_spill] sm:$0xff] %v25684_v56  ;;  %v7501_v36 = vcombine.high %v25670_v23, %v25670_v23  ;;  %v10778_v55 = vrot.slane %v10362_v47, %v23666_v19  ;;  %v25698_v63 = vrot.slane %v8820_v24, 7  ;;  %v25701_v5 = vrot.slane %v7469_v29, %v23666_v19 }
 0x436   :  { %v6281_v44 = vadd.f32 %v6202_v60, %v30039_v35  ;;  %v9474_v27 = vsel %vm9113_vm2, %v30041_v14, %v30040_v38  ;;  %v25707_v21 = vrot.slane %v8814_v8, 7  ;;  %v8825_v6 = vmax.f32 %v25613_v17, %v17762_v18  ;;  %v30044_v18 = vld [vmem:[#allocation11_spill] sm:$0xff] }
 0x437   :  { %30038 = vst [vmem:[#allocation116_spill] sm:$0xff] %v25698_v63  ;;  %v8822_v45 = vmax.f32 %v7451_v59, %v17759_v49  ;;  %10854 = vrot.lane.b32.xlu0 %v10778_v55, %s19947_s30  ;;  %v6416_v31 = vmax.f32 %v6352_v40, 0.0  ;;  %v25713_v24 = vsel %vm9115_vm3, %v25667_v11, %v9915_v39  ;;  %v8819_v29 = vmax.f32 %v25620_v52, %v17756_v61  ;;  %v30043_v59 = vld [vmem:[#allocation6_spill] sm:$0xff]  ;;  %v25727_v40 = vpop.permute.xlu1 %11370 }
 0x438   :  { %30042 = vst [vmem:[#allocation78_spill] sm:$0xff] %v25713_v24  ;;  %v25716_v47 = vmax.f32 %v7449_v0, %v17758_v37  ;;  %v7484_v60 = vcombine.high %v25688_v22, %v25688_v22  ;;  %v7502_v8 = vcombine.high %v25693_v2, %v25693_v2  ;;  %v17769_v35 = vrot.slane %v7501_v36, 9 }
 0x439   :  { %v9475_v17 = vsel %vm9115_vm3, %v30041_v14, %v9474_v27  ;;  %v9502_v49 = vsel %vm9113_vm2, %v30044_v18, %v30043_v59  ;;  %v25731_v52 = vsel %vm9113_vm2, %v25684_v56, %v8825_v6  ;;  %v9901_v0 = vsel %vm9113_vm2, %v25698_v63, %v8819_v29  ;;  %v30047_v27 = vld [vmem:[#allocation15_spill] sm:$0xff]  ;;  %v30048_v59 = vld [vmem:[#allocation14_spill] sm:$0xff]  ;;  %v25745_v6 = vpop.permute.xlu0 %11018 }
 0x43a   :  { %30045 = vst [vmem:[#allocation9_spill] sm:$0xff] %v25731_v52  ;;  %v7485_v61 = vcombine.high %v25701_v5, %v25701_v5  ;;  %v6351_v37 = vadd.f32 %v25136_v50, %v6281_v44  ;;  %v25738_v39 = vrot.slane %v8822_v45, 7  ;;  %v7520_v55 = vcombine.high %v6416_v31, %v6416_v31 }
 0x43b   :  { %v9503_v38 = vsel %vm9115_vm3, %v30044_v18, %v9502_v49  ;;  %v9460_v11 = vsel %vm9113_vm2, %v30048_v59, %v30047_v27  ;;  %v17768_v56 = vrot.slane %v25670_v23, 9  ;;  %v17765_v29 = vrot.slane %v7484_v60, 9  ;;  %v25772_v53 = vpop.permute.xlu1 %11546 }
 0x43c   :  { %30046 = vst [vmem:[#allocation26_spill] sm:$0xff] %v25738_v39  ;;  %v25749_v52 = vrot.slane %v6416_v31, %v23666_v19  ;;  %v9476_v50 = vsel %vm9117_vm4, %v30041_v14, %v9475_v17  ;;  %v17771_v44 = vrot.slane %v7502_v8, 9  ;;  %v8832_v45 = vmax.f32 %v7501_v36, %v17769_v35  ;;  %v30050_v17 = vld [vmem:[#allocation13_spill] sm:$0xff]  ;;  %30052 = vst [vmem:[#allocation11_spill] sm:$0xff] %v25772_v53 }
 0x43d   :  { %v9504_v49 = vsel %vm9117_vm4, %v30044_v18, %v9503_v38  ;;  %v9461_v24 = vsel %vm9115_vm3, %v30048_v59, %v9460_v11  ;;  %v25759_v27 = vsel %vm9115_vm3, %v25698_v63, %v9901_v0  ;;  %v17764_v58 = vrot.slane %v25688_v22, 9  ;;  %v30051_v38 = vld [vmem:[#allocation28_spill] sm:$0xff] }
 0x43e   :  { %30049 = vst [vmem:[#allocation6_spill] sm:$0xff] %v25759_v27  ;;  %v17767_v4 = vrot.slane %v7485_v61, 9  ;;  %v6415_v31 = vmax.f32 %v6351_v37, 0.0  ;;  %v25763_v51 = vrot.slane %v7520_v55, %v23666_v19  ;;  %v9477_v36 = vsel %vm9119_vm5, %v30041_v14, %v9476_v50 }
 0x43f   :  { %v9505_v35 = vsel %vm9119_vm5, %v30044_v18, %v9504_v49  ;;  %v9488_v11 = vsel %vm9113_vm2, %v30051_v38, %v30050_v17  ;;  %v8831_v0 = vmax.f32 %v25670_v23, %v17768_v56  ;;  %v7535_v37 = vcombine.high %v25749_v52, %v25749_v52  ;;  %v25783_v49 = vpop.permute.xlu0 %11898 }
 0x440   :  { %v10381_v63 = vcombine.low %v9477_v36, %v9505_v35  ;;  %v9462_v55 = vsel %vm9117_vm4, %v30048_v59, %v9461_v24  ;;  %v8834_v27 = vmax.f32 %v7502_v8, %v17771_v44  ;;  %v25779_v14 = vrot.slane %v8832_v45, 7  ;;  %30053 = vst [vmem:[#allocation15_spill] sm:$0xff] %v25783_v49  ;;  %v30055_v44 = vld [vmem:[#allocation71_spill] sm:$0xff] }
 0x441   :  { %v8828_v50 = vmax.f32 %v7484_v60, %v17765_v29  ;;  %v9489_v18 = vsel %vm9115_vm3, %v30051_v38, %v9488_v11  ;;  %v8830_v17 = vmax.f32 %v7485_v61, %v17767_v4  ;;  %v7503_v53 = vcombine.high %v6415_v31, %v6415_v31 }
 0x442   :  { %v10388_v23 = vrot.slane %v10381_v63, %v23856_v20  ;;  %v9490_v56 = vsel %vm9117_vm4, %v30051_v38, %v9489_v18  ;;  %v7536_v36 = vcombine.high %v25763_v51, %v25763_v51  ;;  %v25791_v24 = vrot.slane %v6415_v31, %v23666_v19  ;;  %v30054_v63 = vld [vmem:[#allocation69_spill] sm:$0xff] }
 0x443   :  { %v9463_v60 = vsel %vm9119_vm5, %v30048_v59, %v9462_v55  ;;  %v9491_v8 = vsel %vm9119_vm5, %v30051_v38, %v9490_v56  ;;  %v17777_v29 = vrot.slane %v7535_v37, 9  ;;  %v9530_v45 = vsel %vm9113_vm2, %v30055_v44, %v30054_v63  ;;  %v25806_v59 = vpop.permute.xlu1 %11722 }
 0x444   :  { %v11658_v4 = vrot.slane %v10388_v23, %v23666_v19  ;;  %v10363_v61 = vcombine.low %v9463_v60, %v9491_v8  ;;  %v17770_v35 = vrot.slane %v25693_v2, 9  ;;  %v17766_v11 = vrot.slane %v25701_v5, 9 }
 0x445   :  { %v8827_v31 = vmax.f32 %v25688_v22, %v17764_v58  ;;  %v25804_v18 = vrot.slane %v8828_v50, 7  ;;  %v9943_v38 = vsel %vm9113_vm2, %v25779_v14, %v8831_v0  ;;  %v25811_v55 = vrot.slane %v7503_v53, %v23666_v19  ;;  %v25826_v53 = vpop.permute.xlu0 %11194 }
 0x446   :  { %11734 = vrot.lane.b32.xlu1 %v11658_v4, %s19944_s27  ;;  %v10370_v56 = vrot.slane %v10363_v61, %v23856_v20  ;;  %v9558_v60 = vsel %vm9113_vm2, %v24891_v12, %v24870_v48  ;;  %v25818_v8 = vrot.slane %v8834_v27, 7  ;;  %v25820_v58 = vrot.slane %v8830_v17, 7 }
 0x447   :  { %30056 = vst [vmem:[#allocation14_spill] sm:$0xff] %v25804_v18  ;;  %v7518_v22 = vcombine.high %v25791_v24, %v25791_v24  ;;  %v9531_v0 = vsel %vm9115_vm3, %v30055_v44, %v9530_v45  ;;  %v17779_v50 = vrot.slane %v7536_v36, 9  ;;  %v8840_v4 = vmax.f32 %v7535_v37, %v17777_v29 }
 0x448   :  { %30057 = vst [vmem:[#allocation13_spill] sm:$0xff] %v25818_v8  ;;  %30058 = vst [vmem:[#allocation28_spill] sm:$0xff] %v25820_v58  ;;  %v10954_v61 = vrot.slane %v10370_v56, %v23666_v19  ;;  %v9559_v63 = vsel %vm9115_vm3, %v24891_v12, %v9558_v60  ;;  %v25834_v48 = vsel %vm9113_vm2, %v25738_v39, %v25716_v47  ;;  %v17776_v29 = vrot.slane %v25749_v52, 9 }
 0x449   :  { %30059 = vst [vmem:[#allocation69_spill] sm:$0xff] %v25834_v48  ;;  %v8833_v27 = vmax.f32 %v25693_v2, %v17770_v35  ;;  %v8829_v17 = vmax.f32 %v25701_v5, %v17766_v11  ;;  %v9929_v45 = vsel %vm9113_vm2, %v25804_v18, %v8827_v31  ;;  %v25842_v37 = vsel %vm9115_vm3, %v25779_v14, %v9943_v38  ;;  %v19652_v11 = vpop.f32.mrf.mxu0  ;;  %v25857_v38 = vpop.permute.xlu1 %10842 }
 0x44a   :  { %v7519_v60 = vcombine.high %v25811_v55, %v25811_v55  ;;  %11030 = vrot.lane.b32.xlu0 %v10954_v61, %s19943_s26  ;;  %v9532_v47 = vsel %vm9117_vm4, %v30055_v44, %v9531_v0  ;;  %v17778_v5 = vrot.slane %v25763_v51, 9  ;;  %v17773_v35 = vrot.slane %v7518_v22, 9  ;;  %v25875_v49 = vpop.permute.xlu0 %11724 }
 0x44b   :  { %v25852_v2 = vsel %vm9113_vm2, %v25818_v8, %v8833_v27  ;;  %v9560_v31 = vsel %vm9117_vm4, %v24891_v12, %v9559_v63  ;;  %v25861_v39 = vsel %vm9115_vm3, %v25804_v18, %v9929_v45  ;;  %v25865_v0 = vsel %vm9113_vm2, %v25820_v58, %v8829_v17  ;;  %v30063_v17 = vld [vmem:[#allocation60_spill] sm:$0xff] }
 0x44c   :  { %30060 = vst [vmem:[#allocation71_spill] sm:$0xff] %v25852_v2  ;;  %30061 = vst [vmem:[#allocation117_spill] sm:$0xff] %v25861_v39  ;;  %v8842_v61 = vmax.f32 %v7536_v36, %v17779_v50  ;;  %v25867_v27 = vrot.slane %v8840_v4, 7  ;;  %v17772_v48 = vrot.slane %v25791_v24, 9  ;;  %v9533_v8 = vsel %vm9119_vm5, %v30055_v44, %v9532_v47  ;;  %v30064_v47 = vld [vmem:[#allocation29_spill] sm:$0xff] }
 0x44d   :  { %30062 = vst [vmem:[#allocation118_spill] sm:$0xff] %v25865_v0  ;;  %v9561_v63 = vsel %vm9119_vm5, %v24891_v12, %v9560_v31  ;;  %v10389_v2 = vcombine.high %v10388_v23, %v29804_v28  ;;  %v8839_v45 = vmax.f32 %v25749_v52, %v17776_v29  ;;  %v17775_v18 = vrot.slane %v7519_v60, 9  ;;  %v6212_v0 = vpop.f32.mrf.mxu0  ;;  %v30065_v39 = vld [vmem:[#allocation77_spill] sm:$0xff] }
 0x44e   :  { %v6284_v58 = vadd.f32 %v19652_v11, %v30063_v17  ;;  %v10417_v36 = vcombine.low %v9533_v8, %v9561_v63  ;;  %v25880_v50 = vmax.f32 %v25763_v51, %v17778_v5  ;;  %v8836_v4 = vmax.f32 %v7518_v22, %v17773_v35  ;;  %v25904_v35 = vpop.permute.xlu1 %11372  ;;  %v19915_v31 = vld [vmem:[%s29184_s2] ss:$0 sm:$0xff]  ;;  %v30067_v17 = vld [vmem:[#allocation75_spill] sm:$0xff]  ;;  %s19948_s2 = smov 112  }
 0x44f   :  { %v11834_v44 = vrot.slane %v10389_v2, %v23666_v19  ;;  %v9510_v12 = vsel %vm9115_vm3, %v30065_v39, %v30064_v47  ;;  %v25888_v23 = vsel %vm9113_vm2, %v25867_v27, %v8839_v45  ;;  %v25890_v52 = vrot.slane %v8842_v61, 7 }
 0x450   :  { %v17774_v29 = vrot.slane %v25811_v55, 9  ;;  %v25894_v8 = vrot.slane %v10417_v36, %v23856_v20  ;;  %v8835_v51 = vmax.f32 %v25791_v24, %v17772_v48  ;;  %v9511_v22 = vsel %vm9117_vm4, %v30065_v39, %v9510_v12  ;;  %v30066_v24 = vld [vmem:[#allocation83_spill] sm:$0xff]  ;;  %v30068_v36 = vld [vmem:[#allocation80_spill] sm:$0xff] }
 0x451   :  { %11910 = vrot.lane.b32.xlu0 %v11834_v44, %s19945_s28  ;;  %v9538_v2 = vsel %vm9115_vm3, %v24882_v54, %v24902_v26  ;;  %v10371_v5 = vcombine.high %v10370_v56, %v29804_v28  ;;  %v8838_v11 = vmax.f32 %v7519_v60, %v17775_v18  ;;  %v6354_v61 = vadd.f32 %v19915_v31, %v6284_v58  ;;  %v25920_v60 = vpop.permute.xlu0 %10844 }
 0x452   :  { %v6283_v48 = vadd.f32 %v6212_v0, %v30066_v24  ;;  %v11665_v63 = vrot.slane %v25894_v8, %v23666_v19  ;;  %v25912_v45 = vrot.slane %v8836_v4, 7  ;;  %v9539_v26 = vsel %vm9117_vm4, %v24882_v54, %v9538_v2 }
 0x453   :  { %v11130_v56 = vrot.slane %v10371_v5, %v23666_v19  ;;  %v9516_v18 = vsel %vm9113_vm2, %v30068_v36, %v30067_v17  ;;  %v9512_v58 = vsel %vm9119_vm5, %v30065_v39, %v9511_v22  ;;  %v9540_v0 = vsel %vm9119_vm5, %v24882_v54, %v9539_v26  ;;  %v30069_v39 = vld [vmem:[#allocation74_spill] sm:$0xff]  ;;  %v30070_v22 = vld [vmem:[#allocation51_spill] sm:$0xff] }
 0x454   :  { %11736 = vrot.lane.b32.xlu1 %v11665_v63, %s19944_s27  ;;  %v9517_v4 = vsel %vm9115_vm3, %v30068_v36, %v9516_v18  ;;  %v9544_v44 = vsel %vm9113_vm2, %v24904_v30, %v24873_v42  ;;  %v10390_v47 = vcombine.low %v9512_v58, %v9540_v0  ;;  %v9524_v54 = vsel %vm9115_vm3, %v30070_v22, %v30069_v39  ;;  %v25958_v18 = vpop.permute.xlu1 %11548 }
 0x455   :  { %11206 = vrot.lane.b32.xlu0 %v11130_v56, %s19946_s29  ;;  %v9518_v12 = vsel %vm9117_vm4, %v30068_v36, %v9517_v4  ;;  %v9545_v2 = vsel %vm9115_vm3, %v24904_v30, %v9544_v44  ;;  %v25940_v5 = vmax.f32 %v6354_v61, 0.0  ;;  %v9525_v42 = vsel %vm9117_vm4, %v30070_v22, %v9524_v54 }
 0x456   :  { %v9546_v24 = vsel %vm9117_vm4, %v24904_v30, %v9545_v2  ;;  %v9552_v63 = vsel %vm9115_vm3, %v24867_v34, %v24880_v16  ;;  %v25950_v26 = vrot.slane %v10390_v47, %v23856_v20  ;;  %v9519_v56 = vsel %vm9119_vm5, %v30068_v36, %v9518_v12  ;;  %v25974_v12 = vpop.permute.xlu0 %11900 }
 0x457   :  { %v9547_v61 = vsel %vm9119_vm5, %v24904_v30, %v9546_v24  ;;  %v9553_v17 = vsel %vm9117_vm4, %v24867_v34, %v9552_v63  ;;  %v9526_v0 = vsel %vm9119_vm5, %v30070_v22, %v9525_v42  ;;  %v9580_v4 = vsel %vm9115_vm3, %v24886_v33, %v24912_v15 }
 0x458   :  { %30071 = vst [vmem:[#allocation60_spill] sm:$0xff] %v25950_v26  ;;  %v10399_v58 = vcombine.low %v9519_v56, %v9547_v61  ;;  %v9554_v16 = vsel %vm9119_vm5, %v24867_v34, %v9553_v17  ;;  %v10398_v36 = vcombine.high %v25950_v26, %v29804_v28  ;;  %v9581_v44 = vsel %vm9117_vm4, %v24886_v33, %v9580_v4  ;;  %v30073_v4 = vld [vmem:[#allocation72_spill] sm:$0xff] }
 0x459   :  { %v10408_v30 = vcombine.low %v9526_v0, %v9554_v16  ;;  %v9608_v47 = vsel %vm9115_vm3, %v24992_v32, %v25014_v41  ;;  %v25976_v2 = vadd.f32 %v19915_v31, %v6283_v48  ;;  %v9582_v15 = vsel %vm9119_vm5, %v24886_v33, %v9581_v44  ;;  %v30072_v16 = vld [vmem:[#allocation32_spill] sm:$0xff] }
 0x45a   :  { %v10406_v34 = vrot.slane %v10399_v58, %v23856_v20  ;;  %v9609_v39 = vsel %vm9117_vm4, %v24992_v32, %v9608_v47  ;;  %v10785_v22 = vrot.slane %v10398_v36, %v23666_v19  ;;  %v9572_v41 = vsel %vm9113_vm2, %v24930_v9, %v24916_v57  ;;  %v26025_v47 = vpop.permute.xlu0 %11196  ;;  %v30106_v26 = vld [vmem:[#allocation92_spill] sm:$0xff] }
 0x45b   :  { %v10415_v54 = vrot.slane %v10408_v30, %v23856_v20  ;;  %v9610_v24 = vsel %vm9119_vm5, %v24992_v32, %v9609_v39  ;;  %v25992_v31 = vsel %vm9113_vm2, %v25912_v45, %v8835_v51  ;;  %v25994_v48 = vrot.slane %v8838_v11, 7  ;;  %v26006_v51 = vpop.permute.xlu1 %11020  ;;  %v30074_v30 = vld [vmem:[#allocation81_spill] sm:$0xff] }
 0x45c   :  { %v10444_v33 = vcombine.low %v9582_v15, %v9610_v24  ;;  %v9573_v42 = vsel %vm9115_vm3, %v24930_v9, %v9572_v41  ;;  %10856 = vrot.lane.b32.xlu1 %v10785_v22, %s19947_s30  ;;  %v9600_v57 = vsel %vm9113_vm2, %v25046_v7, %v25016_v62  ;;  %v7554_v11 = vcombine.high %v25940_v5, %v25940_v5  ;;  %v30075_v41 = vld [vmem:[#allocation57_spill] sm:$0xff] }
 0x45d   :  { %v11313_v63 = vrot.slane %v10415_v54, %v23666_v19  ;;  %v10416_v32 = vcombine.high %v10415_v54, %v29804_v28  ;;  %v9574_v56 = vsel %vm9117_vm4, %v24930_v9, %v9573_v42  ;;  %v10961_v61 = vrot.slane %v10406_v34, %v23666_v19  ;;  %v30076_v42 = vld [vmem:[#allocation31_spill] sm:$0xff] }
 0x45e   :  { %v10425_v17 = vcombine.high %v25894_v8, %v29804_v28  ;;  %v9601_v58 = vsel %vm9115_vm3, %v25046_v7, %v9600_v57  ;;  %v10407_v0 = vcombine.high %v10406_v34, %v29804_v28  ;;  %v9586_v36 = vsel %vm9113_vm2, %v30073_v4, %v30072_v16 }
 0x45f   :  { %11384 = vrot.lane.b32.xlu0 %v11313_v63, %s19941_s25  ;;  %v9602_v62 = vsel %vm9117_vm4, %v25046_v7, %v9601_v58  ;;  %v9614_v44 = vsel %vm9113_vm2, %v25021_v1, %v30074_v30  ;;  %v11489_v8 = vrot.slane %v10416_v32, %v23666_v19  ;;  %v9575_v15 = vsel %vm9119_vm5, %v24930_v9, %v9574_v56  ;;  %v26060_v16 = vpop.permute.xlu1 %11550 }
 0x460   :  { %v9603_v34 = vsel %vm9119_vm5, %v25046_v7, %v9602_v62  ;;  %v9587_v39 = vsel %vm9115_vm3, %v30073_v4, %v9586_v36  ;;  %11032 = vrot.lane.b32.xlu1 %v10961_v61, %s19943_s26  ;;  %v9615_v24 = vsel %vm9115_vm3, %v25021_v1, %v9614_v44  ;;  %v9566_v63 = vsel %vm9115_vm3, %v30076_v42, %v30075_v41  ;;  %v30077_v62 = vld [vmem:[#allocation64_spill] sm:$0xff]  ;;  %v30080_v41 = vld [vmem:[#allocation18_spill] sm:$0xff] }
 0x461   :  { %v10435_v22 = vcombine.low %v9575_v15, %v9603_v34  ;;  %v9588_v54 = vsel %vm9117_vm4, %v30073_v4, %v9587_v39  ;;  %v26044_v9 = vrot.slane %v25940_v5, %v23666_v19  ;;  %v11841_v7 = vrot.slane %v10425_v17, %v23666_v19  ;;  %30078 = vst [vmem:[#allocation29_spill] sm:$0xff] %v26060_v16  ;;  %v30119_v16 = vld [vmem:[#allocation97_spill] sm:$0xff] }
 0x462   :  { %v9616_v32 = vsel %vm9117_vm4, %v25021_v1, %v9615_v24  ;;  %v9567_v56 = vsel %vm9117_vm4, %v30076_v42, %v9566_v63  ;;  %v10451_v57 = vrot.slane %v10444_v33, %v23856_v20  ;;  %v9589_v61 = vsel %vm9119_vm5, %v30073_v4, %v9588_v54 }
 0x463   :  { %11560 = vrot.lane.b32.xlu0 %v11489_v8, %s19942_s1  ;;  %v9617_v58 = vsel %vm9119_vm5, %v25021_v1, %v9616_v32  ;;  %v9594_v17 = vsel %vm9115_vm3, %v30077_v62, %v25043_v13  ;;  %v10442_v36 = vrot.slane %v10435_v22, %v23856_v20  ;;  %v26068_v33 = vsel %vm9115_vm3, %v25867_v27, %v25888_v23  ;;  %v26116_v23 = vpop.permute.xlu0 %11374  ;;  %v30083_v32 = vld [vmem:[#allocation84_spill] sm:$0xff] }
 0x464   :  { %v10453_v30 = vcombine.low %v9589_v61, %v9617_v58  ;;  %v9595_v44 = vsel %vm9117_vm4, %v30077_v62, %v9594_v17  ;;  %11912 = vrot.lane.b32.xlu1 %v11841_v7, %s19945_s28  ;;  %v11137_v1 = vrot.slane %v10407_v0, %v23666_v19  ;;  %v9568_v13 = vsel %vm9119_vm5, %v30076_v42, %v9567_v56  ;;  %v30081_v42 = vld [vmem:[#allocation34_spill] sm:$0xff]  ;;  %v30082_v7 = vld [vmem:[#allocation89_spill] sm:$0xff]  ;;  %v30085_v56 = vld [vmem:[#allocation35_spill] sm:$0xff]  ;;  %v26164_v61 = vpop.permute.xlu1 %11726 }
 0x465   :  { %v9596_v4 = vsel %vm9119_vm5, %v30077_v62, %v9595_v44  ;;  %30079 = vst [vmem:[#allocation77_spill] sm:$0xff] %v26116_v23  ;;  %v8837_v0 = vmax.f32 %v25811_v55, %v17774_v29  ;;  %v26122_v8 = vmax.f32 %v25976_v2, 0.0  ;;  %v26128_v39 = vsel %vm9113_vm2, %v25890_v52, %v25880_v50  ;;  %30086 = vst [vmem:[#allocation83_spill] sm:$0xff] %v26164_v61  ;;  %v30091_v62 = vld [vmem:[#allocation36_spill] sm:$0xff] }
 0x466   :  { %v10460_v15 = vrot.slane %v10453_v30, %v23856_v20  ;;  %v10426_v34 = vcombine.low %v9568_v13, %v9596_v4  ;;  %v26133_v22 = vsel %vm9115_vm3, %v25912_v45, %v25992_v31  ;;  %v11320_v54 = vrot.slane %v10451_v57, %v23666_v19  ;;  %v30118_v61 = vld [vmem:[#allocation96_spill] sm:$0xff] }
 0x467   :  { %11208 = vrot.lane.b32.xlu0 %v11137_v1, %s19946_s29  ;;  %v10452_v55 = vcombine.high %v10451_v57, %v29804_v28  ;;  %v26140_v29 = vsel %vm9113_vm2, %v25994_v48, %v8837_v0  ;;  %v26146_v50 = vrot.slane %v7554_v11, %v23666_v19  ;;  %v26150_v2 = vcombine.high %v26044_v9, %v26044_v9  ;;  %v30084_v11 = vld [vmem:[#allocation33_spill] sm:$0xff]  ;;  %v26184_v0 = vpop.permute.xlu0 %10846 }
 0x468   :  { %v10968_v31 = vrot.slane %v10442_v36, %v23666_v19  ;;  %11386 = vrot.lane.b32.xlu1 %v11320_v54, %s19941_s25  ;;  %v10461_v24 = vcombine.high %v10460_v15, %v29804_v28  ;;  %v9636_v63 = vsel %vm9115_vm3, %v30081_v42, %v30080_v41  ;;  %v9664_v5 = vsel %vm9115_vm3, %v30083_v32, %v30082_v7 }
 0x469   :  { %v9642_v57 = vsel %vm9113_vm2, %v30085_v56, %v30084_v11  ;;  %v26171_v17 = vrot.slane %v26122_v8, %v23666_v19  ;;  %v9637_v30 = vsel %vm9117_vm4, %v30081_v42, %v9636_v63  ;;  %v11496_v44 = vrot.slane %v10452_v55, %v23666_v19  ;;  %v30089_v11 = vld [vmem:[#allocation19_spill] sm:$0xff] }
 0x46a   :  { %v26178_v1 = vrot.slane %v10426_v34, %v23856_v20  ;;  %v9665_v13 = vsel %vm9117_vm4, %v30083_v32, %v9664_v5  ;;  %v9643_v4 = vsel %vm9115_vm3, %v30085_v56, %v9642_v57  ;;  %v26188_v54 = vcombine.high %v26146_v50, %v26146_v50  ;;  %v30088_v5 = vld [vmem:[#allocation86_spill] sm:$0xff] }
 0x46b   :  { %11034 = vrot.lane.b32.xlu0 %v10968_v31, %s19943_s26  ;;  %v10443_v41 = vcombine.high %v10442_v36, %v29804_v28  ;;  %v9638_v55 = vsel %vm9119_vm5, %v30081_v42, %v9637_v30  ;;  %v9666_v34 = vsel %vm9119_vm5, %v30083_v32, %v9665_v13  ;;  %v11848_v31 = vrot.slane %v10461_v24, %v23666_v19  ;;  %v30090_v30 = vld [vmem:[#allocation68_spill] sm:$0xff]  ;;  %v30093_v13 = vld [vmem:[#allocation70_spill] sm:$0xff] }
 0x46c   :  { %30087 = vst [vmem:[#allocation75_spill] sm:$0xff] %v26178_v1  ;;  %11562 = vrot.lane.b32.xlu1 %v11496_v44, %s19942_s1  ;;  %v10480_v63 = vcombine.low %v9638_v55, %v9666_v34  ;;  %v9644_v7 = vsel %vm9117_vm4, %v30085_v56, %v9643_v4  ;;  %v9670_v57 = vsel %vm9113_vm2, %v30089_v11, %v30088_v5  ;;  %v30092_v44 = vld [vmem:[#allocation39_spill] sm:$0xff]  ;;  %v26220_v5 = vpop.permute.xlu1 %11022 }
 0x46d   :  { %v11672_v36 = vrot.slane %v10460_v15, %v23666_v19  ;;  %v9671_v42 = vsel %vm9115_vm3, %v30089_v11, %v9670_v57  ;;  %v9622_v32 = vsel %vm9115_vm3, %v30091_v62, %v30090_v30  ;;  %v9650_v24 = vsel %vm9115_vm3, %v30093_v13, %v30092_v44  ;;  %v30099_v44 = vld [vmem:[#allocation87_spill] sm:$0xff] }
 0x46e   :  { %v10434_v4 = vcombine.high %v26178_v1, %v29804_v28  ;;  %v9672_v55 = vsel %vm9117_vm4, %v30089_v11, %v9671_v42  ;;  %v9623_v15 = vsel %vm9117_vm4, %v30091_v62, %v9622_v32  ;;  %v9651_v34 = vsel %vm9117_vm4, %v30093_v13, %v9650_v24  ;;  %v26233_v1 = vpop.permute.xlu0 %11198 }
 0x46f   :  { %11914 = vrot.lane.b32.xlu0 %v11848_v31, %s19945_s28  ;;  %v9645_v57 = vsel %vm9119_vm5, %v30085_v56, %v9644_v7  ;;  %v9673_v31 = vsel %vm9119_vm5, %v30089_v11, %v9672_v55  ;;  %v9624_v30 = vsel %vm9119_vm5, %v30091_v62, %v9623_v15  ;;  %v9652_v42 = vsel %vm9119_vm5, %v30093_v13, %v9651_v34  ;;  %v30094_v7 = vld [vmem:[#allocation76_spill] sm:$0xff]  ;;  %v30095_v11 = vld [vmem:[#allocation23_spill] sm:$0xff]  ;;  %v30096_v62 = vld [vmem:[#allocation53_spill] sm:$0xff] }
 0x470   :  { %11738 = vrot.lane.b32.xlu1 %v11672_v36, %s19944_s27  ;;  %v11144_v32 = vrot.slane %v10443_v41, %v23666_v19  ;;  %v10489_v24 = vcombine.low %v9645_v57, %v9673_v31  ;;  %v10462_v58 = vcombine.low %v9624_v30, %v9652_v42  ;;  %v10487_v56 = vrot.slane %v10480_v63, %v23856_v20  ;;  %v30097_v15 = vld [vmem:[#allocation94_spill] sm:$0xff]  ;;  %v30098_v34 = vld [vmem:[#allocation37_spill] sm:$0xff] }
 0x471   :  { %v9692_v55 = vsel %vm9115_vm3, %v30095_v11, %v30094_v7  ;;  %v9720_v13 = vsel %vm9115_vm3, %v30097_v15, %v30096_v62  ;;  %v9628_v36 = vsel %vm9113_vm2, %v30099_v44, %v30098_v34  ;;  %v10792_v41 = vrot.slane %v10434_v4, %v23666_v19  ;;  %v30101_v4 = vld [vmem:[#allocation21_spill] sm:$0xff] }
 0x472   :  { %v10496_v57 = vrot.slane %v10489_v24, %v23856_v20  ;;  %v26249_v63 = vrot.slane %v10462_v58, %v23856_v20  ;;  %v9693_v31 = vsel %vm9117_vm4, %v30095_v11, %v9692_v55  ;;  %v9721_v42 = vsel %vm9117_vm4, %v30097_v15, %v9720_v13  ;;  %v30102_v62 = vld [vmem:[#allocation49_spill] sm:$0xff]  ;;  %v26270_v13 = vpop.permute.xlu1 %11902 }
 0x473   :  { %11210 = vrot.lane.b32.xlu0 %v11144_v32, %s19946_s29  ;;  %v9694_v30 = vsel %vm9119_vm5, %v30095_v11, %v9693_v31  ;;  %v9629_v7 = vsel %vm9115_vm3, %v30099_v44, %v9628_v36  ;;  %v9656_v32 = vsel %vm9113_vm2, %v30102_v62, %v30101_v4  ;;  %v9722_v11 = vsel %vm9119_vm5, %v30097_v15, %v9721_v42  ;;  %v30104_v42 = vld [vmem:[#allocation90_spill] sm:$0xff] }
 0x474   :  { %30100 = vst [vmem:[#allocation80_spill] sm:$0xff] %v26249_v63  ;;  %10858 = vrot.lane.b32.xlu1 %v10792_v41, %s19947_s30  ;;  %v11679_v58 = vrot.slane %v10496_v57, %v23666_v19  ;;  %v10470_v24 = vcombine.high %v26249_v63, %v29804_v28  ;;  %v9630_v55 = vsel %vm9117_vm4, %v30099_v44, %v9629_v7  ;;  %30103 = vst [vmem:[#allocation74_spill] sm:$0xff] %v26270_v13  ;;  %v30105_v7 = vld [vmem:[#allocation52_spill] sm:$0xff]  ;;  %v30107_v13 = vld [vmem:[#allocation102_spill] sm:$0xff] }
 0x475   :  { %v11327_v34 = vrot.slane %v10487_v56, %v23666_v19  ;;  %v10488_v36 = vcombine.high %v10487_v56, %v29804_v28  ;;  %v10516_v31 = vcombine.low %v9694_v30, %v9722_v11  ;;  %v9657_v41 = vsel %vm9115_vm3, %v30102_v62, %v9656_v32  ;;  %v26287_v30 = vpop.permute.xlu0 %11376 }
 0x476   :  { %v9631_v4 = vsel %vm9119_vm5, %v30099_v44, %v9630_v55  ;;  %v9658_v15 = vsel %vm9117_vm4, %v30102_v62, %v9657_v41  ;;  %v9698_v63 = vsel %vm9113_vm2, %v30105_v7, %v30104_v42  ;;  %v9726_v56 = vsel %vm9113_vm2, %v30107_v13, %v30106_v26  ;;  %30108 = vst [vmem:[#allocation51_spill] sm:$0xff] %v26287_v30 }
 0x477   :  { %11740 = vrot.lane.b32.xlu0 %v11679_v58, %s19944_s27  ;;  %v26290_v32 = vrot.slane %v10516_v31, %v23856_v20  ;;  %v9659_v58 = vsel %vm9119_vm5, %v30102_v62, %v9658_v15  ;;  %v9699_v44 = vsel %vm9115_vm3, %v30105_v7, %v9698_v63  ;;  %v9727_v11 = vsel %vm9115_vm3, %v30107_v13, %v9726_v56 }
 0x478   :  { %11388 = vrot.lane.b32.xlu1 %v11327_v34, %s19941_s25  ;;  %v10799_v55 = vrot.slane %v10470_v24, %v23666_v19  ;;  %v10471_v41 = vcombine.low %v9631_v4, %v9659_v58  ;;  %v9700_v26 = vsel %vm9117_vm4, %v30105_v7, %v9699_v44  ;;  %v9728_v31 = vsel %vm9117_vm4, %v30107_v13, %v9727_v11  ;;  %v26319_v44 = vpop.permute.xlu1 %11024 }
 0x479   :  { %v17786_v42 = vrot.slane %v26146_v50, 9  ;;  %v10524_v62 = vcombine.high %v26290_v32, %v29804_v28  ;;  %v9701_v63 = vsel %vm9119_vm5, %v30105_v7, %v9700_v26  ;;  %v9729_v34 = vsel %vm9119_vm5, %v30107_v13, %v9728_v31  ;;  %30110 = vst [vmem:[#allocation32_spill] sm:$0xff] %v26319_v44  ;;  %v30113_v26 = vld [vmem:[#allocation50_spill] sm:$0xff] }
 0x47a   :  { %v30109_v24 = vrot.slane %v26044_v9, 9  ;;  %v11503_v15 = vrot.slane %v10488_v36, %v23666_v19  ;;  %v10478_v56 = vrot.slane %v10471_v41, %v23856_v20  ;;  %v10525_v58 = vcombine.low %v9701_v63, %v9729_v34  ;;  %v30114_v31 = vld [vmem:[#allocation98_spill] sm:$0xff] }
 0x47b   :  { %10860 = vrot.lane.b32.xlu0 %v10799_v55, %s19947_s30  ;;  %v30111_v7 = vcombine.high %v26122_v8, %v26122_v8  ;;  %v7552_v13 = vcombine.high %v26171_v17, %v26171_v17  ;;  %v30115_v55 = vld [vmem:[#allocation93_spill] sm:$0xff]  ;;  %v17780_v63 = vrot.slane %v26171_v17, 9  ;;  %v10497_v8 = vcombine.high %v10496_v57, %v29804_v28 }
 0x47c   :  { %v26314_v4 = vmax.f32 %v26044_v9, %v30109_v24  ;;  %v30112_v9 = vld [vmem:[#allocation85_spill] sm:$0xff]  ;;  %v9706_v41 = vsel %vm9115_vm3, %v30115_v55, %v30114_v31  ;;  %11564 = vrot.lane.b32.xlu1 %v11503_v15, %s19942_s1  ;;  %v10975_v34 = vrot.slane %v10478_v56, %v23666_v19  ;;  %v17787_v30 = vrot.slane %v26188_v54, 9 }
 0x47d   :  { %v26325_v11 = vrot.slane %v30111_v7, %v23666_v19  ;;  %v9678_v36 = vsel %vm9115_vm3, %v30113_v26, %v30112_v9  ;;  %v26341_v7 = vpop.permute.xlu0 %11552  ;;  %v30117_v9 = vrot.slane %v26150_v2, 9  ;;  %v11510_v31 = vrot.slane %v10524_v62, %v23666_v19 }
 0x47e   :  { %v9679_v24 = vsel %vm9117_vm4, %v30113_v26, %v9678_v36  ;;  %30116 = vst [vmem:[#allocation72_spill] sm:$0xff] %v26341_v7  ;;  %v9707_v15 = vsel %vm9117_vm4, %v30115_v55, %v9706_v41  ;;  %v10532_v57 = vrot.slane %v10525_v58, %v23856_v20  ;;  %v9684_v23 = vsel %vm9113_vm2, %v30119_v16, %v30118_v61 }
 0x47f   :  { %v8848_v44 = vmax.f32 %v26150_v2, %v30117_v9  ;;  %11036 = vrot.lane.b32.xlu0 %v10975_v34, %s19943_s26  ;;  %v9680_v36 = vsel %vm9119_vm5, %v30113_v26, %v9679_v24  ;;  %v9708_v7 = vsel %vm9119_vm5, %v30115_v55, %v9707_v15  ;;  %v26360_v2 = vmax.f32 %v26146_v50, %v17786_v42  ;;  %v30120_v34 = vld [vmem:[#allocation41_spill] sm:$0xff]  ;;  %v30121_v9 = vld [vmem:[#allocation88_spill] sm:$0xff]  ;;  %v26374_v42 = vpop.permute.xlu1 %11904 }
 0x480   :  { %v10498_v62 = vcombine.low %v9680_v36, %v9708_v7  ;;  %v9685_v41 = vsel %vm9115_vm3, %v30119_v16, %v9684_v23  ;;  %v9712_v58 = vsel %vm9113_vm2, %v30121_v9, %v30120_v34  ;;  %11566 = vrot.lane.b32.xlu1 %v11510_v31, %s19942_s1  ;;  %v11855_v26 = vrot.slane %v10497_v8, %v23666_v19 }
 0x481   :  { %v10479_v55 = vcombine.high %v10478_v56, %v29804_v28  ;;  %v9686_v61 = vsel %vm9117_vm4, %v30119_v16, %v9685_v41  ;;  %v9713_v50 = vsel %vm9115_vm3, %v30121_v9, %v9712_v58  ;;  %30122 = vst [vmem:[#allocation81_spill] sm:$0xff] %v26374_v42  ;;  %v26378_v23 = vcombine.high %v26325_v11, %v26325_v11  ;;  %v26394_v41 = vpop.permute.xlu0 %11728 }
 0x482   :  { %v17781_v24 = vrot.slane %v7552_v13, 9  ;;  %v26381_v7 = vrot.slane %v10498_v62, %v23856_v20  ;;  %v9714_v8 = vsel %vm9117_vm4, %v30121_v9, %v9713_v50  ;;  %v11686_v56 = vrot.slane %v10532_v57, %v23666_v19  ;;  %30124 = vst [vmem:[#allocation31_spill] sm:$0xff] %v26394_v41  ;;  %v30126_v50 = vld [vmem:[#allocation44_spill] sm:$0xff]  ;;  %v30134_v41 = vld [vmem:[#allocation43_spill] sm:$0xff] }
 0x483   :  { %11916 = vrot.lane.b32.xlu0 %v11855_v26, %s19945_s28  ;;  %v9687_v31 = vsel %vm9119_vm5, %v30119_v16, %v9686_v61  ;;  %v9715_v15 = vsel %vm9119_vm5, %v30121_v9, %v9714_v8  ;;  %v9740_v36 = vsel %vm9113_vm2, %v25355_v10, %v25338_v46  ;;  %v17782_v62 = vrot.slane %v26325_v11, 9  ;;  %v30125_v61 = vld [vmem:[#allocation104_spill] sm:$0xff] }
 0x484   :  { %30123 = vst [vmem:[#allocation57_spill] sm:$0xff] %v26381_v7  ;;  %v10506_v34 = vcombine.high %v26381_v7, %v29804_v28  ;;  %v10507_v58 = vcombine.low %v9687_v31, %v9715_v15  ;;  %v9741_v26 = vsel %vm9115_vm3, %v25355_v10, %v9740_v36  ;;  %v26402_v16 = vmax.f32 %v26188_v54, %v17787_v30  ;;  %v30130_v36 = vld [vmem:[#allocation105_spill] sm:$0xff]  ;;  %v26428_v31 = vpop.permute.xlu1 %11200 }
 0x485   :  { %v26405_v9 = vmax.f32 %v26171_v17, %v17780_v63  ;;  %11742 = vrot.lane.b32.xlu1 %v11686_v56, %s19944_s27  ;;  %v11151_v46 = vrot.slane %v10479_v55, %v23666_v19  ;;  %v9768_v8 = vsel %vm9113_vm2, %v30126_v50, %v30125_v61  ;;  %v26412_v42 = vrot.slane %v8848_v44, 7  ;;  %v30127_v63 = vld [vmem:[#allocation82_spill] sm:$0xff]  ;;  %v30129_v44 = vld [vmem:[#allocation100_spill] sm:$0xff] }
 0x486   :  { %v10514_v15 = vrot.slane %v10507_v58, %v23856_v20  ;;  %v9742_v54 = vsel %vm9117_vm4, %v25355_v10, %v9741_v26  ;;  %v10806_v17 = vrot.slane %v10506_v34, %v23666_v19  ;;  %v9769_v30 = vsel %vm9115_vm3, %v30126_v50, %v9768_v8  ;;  %v30128_v55 = vld [vmem:[#allocation106_spill] sm:$0xff] }
 0x487   :  { %11212 = vrot.lane.b32.xlu0 %v11151_v46, %s19946_s29  ;;  %v9748_v56 = vsel %vm9115_vm3, %v30128_v55, %v30127_v63  ;;  %v9776_v61 = vsel %vm9115_vm3, %v30130_v36, %v30129_v44  ;;  %v8844_v58 = vmax.f32 %v7552_v13, %v17781_v24  ;;  %v11334_v26 = vrot.slane %v26290_v32, %v23666_v19  ;;  %v26444_v32 = vpop.permute.xlu0 %10848 }
 0x488   :  { %v10515_v34 = vcombine.high %v10514_v15, %v29804_v28  ;;  %v9770_v46 = vsel %vm9117_vm4, %v30126_v50, %v9769_v30  ;;  %v9743_v8 = vsel %vm9119_vm5, %v25355_v10, %v9742_v54  ;;  %v9749_v44 = vsel %vm9117_vm4, %v30128_v55, %v9748_v56  ;;  %v30131_v30 = vld [vmem:[#allocation108_spill] sm:$0xff]  ;;  %v30132_v56 = vld [vmem:[#allocation55_spill] sm:$0xff] }
 0x489   :  { %10862 = vrot.lane.b32.xlu1 %v10806_v17, %s19947_s30  ;;  %v9771_v63 = vsel %vm9119_vm5, %v30126_v50, %v9770_v46  ;;  %v9777_v13 = vsel %vm9117_vm4, %v30130_v36, %v9776_v61  ;;  %v10533_v24 = vcombine.high %v10532_v57, %v29804_v28  ;;  %v9750_v17 = vsel %vm9119_vm5, %v30128_v55, %v9749_v44  ;;  %v30133_v46 = vld [vmem:[#allocation110_spill] sm:$0xff] }
 0x48a   :  { %v10543_v7 = vcombine.low %v9743_v8, %v9771_v63  ;;  %v9778_v10 = vsel %vm9119_vm5, %v30130_v36, %v9777_v13  ;;  %v10982_v54 = vrot.slane %v10514_v15, %v23666_v19  ;;  %v9755_v61 = vsel %vm9115_vm3, %v30132_v56, %v30131_v30  ;;  %v30135_v15 = vld [vmem:[#allocation58_spill] sm:$0xff]  ;;  %v30136_v63 = vld [vmem:[#allocation91_spill] sm:$0xff] }
 0x48b   :  { %11390 = vrot.lane.b32.xlu0 %v11334_v26, %s19941_s25  ;;  %v10552_v50 = vcombine.low %v9750_v17, %v9778_v10  ;;  %v9783_v57 = vsel %vm9115_vm3, %v30134_v41, %v30133_v46  ;;  %v11158_v8 = vrot.slane %v10515_v34, %v23666_v19  ;;  %v9756_v55 = vsel %vm9117_vm4, %v30132_v56, %v9755_v61  ;;  %v26475_v10 = vpop.permute.xlu1 %11730 }
 0x48c   :  { %v9784_v36 = vsel %vm9117_vm4, %v30134_v41, %v9783_v57  ;;  %v9810_v26 = vsel %vm9113_vm2, %v30136_v63, %v30135_v15  ;;  %v9757_v13 = vsel %vm9119_vm5, %v30132_v56, %v9756_v55  ;;  %30137 = vst [vmem:[#allocation64_spill] sm:$0xff] %v26475_v10  ;;  %v9999_v30 = vsel %vm9113_vm2, %v26412_v42, %v26314_v4  ;;  %v30138_v57 = vld [vmem:[#allocation112_spill] sm:$0xff]  ;;  %v26493_v4 = vpop.permute.xlu0 %11378  ;;  %v30146_v10 = vld [vmem:[#allocation17_spill] sm:$0xff] }
 0x48d   :  { %11038 = vrot.lane.b32.xlu1 %v10982_v54, %s19943_s26  ;;  %v10559_v44 = vrot.slane %v10552_v50, %v23856_v20  ;;  %v9785_v34 = vsel %vm9119_vm5, %v30134_v41, %v9784_v36  ;;  %v9811_v17 = vsel %vm9115_vm3, %v30136_v63, %v9810_v26  ;;  %v26481_v61 = vmax.f32 %v26325_v11, %v17782_v62  ;;  %v30139_v55 = vld [vmem:[#allocation12_spill] sm:$0xff] }
 0x48e   :  { %v10550_v54 = vrot.slane %v10543_v7, %v23856_v20  ;;  %v10561_v50 = vcombine.low %v9757_v13, %v9785_v34  ;;  %v26484_v46 = vrot.slane %v8844_v58, 7  ;;  %v11862_v56 = vrot.slane %v10533_v24, %v23666_v19  ;;  %30140 = vst [vmem:[#allocation18_spill] sm:$0xff] %v26493_v4  ;;  %v30141_v58 = vld [vmem:[#allocation79_spill] sm:$0xff]  ;;  %v30142_v24 = vld [vmem:[#allocation42_spill] sm:$0xff]  ;;  %v30143_v34 = vld [vmem:[#allocation109_spill] sm:$0xff] }
 0x48f   :  { %11214 = vrot.lane.b32.xlu0 %v11158_v8, %s19946_s29  ;;  %v9812_v41 = vsel %vm9117_vm4, %v30136_v63, %v9811_v17  ;;  %v9838_v36 = vsel %vm9113_vm2, %v30139_v55, %v30138_v57  ;;  %v11341_v11 = vrot.slane %v10559_v44, %v23666_v19  ;;  %v9734_v8 = vsel %vm9115_vm3, %v30142_v24, %v30141_v58  ;;  %v30144_v17 = vld [vmem:[#allocation56_spill] sm:$0xff]  ;;  %v26526_v4 = vpop.permute.xlu1 %10850 }
 0x490   :  { %v10568_v7 = vrot.slane %v10561_v50, %v23856_v20  ;;  %v9839_v62 = vsel %vm9115_vm3, %v30139_v55, %v9838_v36  ;;  %v10560_v15 = vcombine.high %v10559_v44, %v29804_v28  ;;  %v9735_v13 = vsel %vm9117_vm4, %v30142_v24, %v9734_v8  ;;  %30147 = vst [vmem:[#allocation34_spill] sm:$0xff] %v26526_v4  ;;  %v30153_v4 = vld [vmem:[#allocation99_spill] sm:$0xff] }
 0x491   :  { %11918 = vrot.lane.b32.xlu1 %v11862_v56, %s19945_s28  ;;  %v9840_v26 = vsel %vm9117_vm4, %v30139_v55, %v9839_v62  ;;  %v9762_v50 = vsel %vm9115_vm3, %v30144_v17, %v30143_v34  ;;  %v26512_v57 = vrot.slane %v26402_v16, 7  ;;  %v10989_v36 = vrot.slane %v10550_v54, %v23666_v19  ;;  %v30145_v34 = vld [vmem:[#allocation107_spill] sm:$0xff] }
 0x492   :  { %v9813_v56 = vsel %vm9119_vm5, %v30136_v63, %v9812_v41  ;;  %v9841_v44 = vsel %vm9119_vm5, %v30139_v55, %v9840_v26  ;;  %v10569_v62 = vcombine.high %v10568_v7, %v29804_v28  ;;  %v9763_v8 = vsel %vm9117_vm4, %v30144_v17, %v9762_v50 }
 0x493   :  { %11392 = vrot.lane.b32.xlu0 %v11341_v11, %s19941_s25  ;;  %v10597_v58 = vcombine.low %v9813_v56, %v9841_v44  ;;  %v9790_v16 = vsel %vm9115_vm3, %v30146_v10, %v30145_v34  ;;  %v26530_v63 = vsel %vm9115_vm3, %v26412_v42, %v9999_v30  ;;  %v30148_v41 = vrot.slane %v26378_v23, 9  ;;  %v30150_v34 = vld [vmem:[#allocation95_spill] sm:$0xff] }
 0x494   :  { %v9736_v11 = vsel %vm9119_vm5, %v30142_v24, %v9735_v13  ;;  %v9764_v26 = vsel %vm9119_vm5, %v30144_v17, %v9763_v8  ;;  %v26542_v50 = vsel %vm9113_vm2, %v26484_v46, %v26405_v9  ;;  %v11517_v30 = vrot.slane %v10560_v15, %v23666_v19  ;;  %v30149_v13 = vld [vmem:[#allocation111_spill] sm:$0xff] }
 0x495   :  { %v8846_v55 = vmax.f32 %v26378_v23, %v30148_v41  ;;  %11040 = vrot.lane.b32.xlu1 %v10989_v36, %s19943_s26  ;;  %v10534_v56 = vcombine.low %v9736_v11, %v9764_v26  ;;  %v9791_v44 = vsel %vm9117_vm4, %v30146_v10, %v9790_v16  ;;  %v26548_v23 = vpop.permute.xlu0 %11554  ;;  %v10551_v24 = vcombine.high %v10550_v54, %v29804_v28  ;;  %v30151_v8 = vld [vmem:[#allocation59_spill] sm:$0xff]  ;;  %v30152_v41 = vld [vmem:[#allocation45_spill] sm:$0xff]  ;;  %v30154_v36 = vld [vmem:[#allocation46_spill] sm:$0xff] }
 0x496   :  { %v9818_v17 = vsel %vm9115_vm3, %v30150_v34, %v30149_v13  ;;  %v9804_v9 = vsel %vm9115_vm3, %v30152_v41, %v30151_v8  ;;  %v9832_v15 = vsel %vm9115_vm3, %v30154_v36, %v30153_v4  ;;  %v11869_v11 = vrot.slane %v10569_v62, %v23666_v19  ;;  %v26582_v8 = vpop.permute.xlu1 %11026 }
 0x497   :  { %11568 = vrot.lane.b32.xlu0 %v11517_v30, %s19942_s1  ;;  %v26563_v16 = vrot.slane %v10534_v56, %v23856_v20  ;;  %v9819_v54 = vsel %vm9117_vm4, %v30150_v34, %v9818_v17  ;;  %v9792_v26 = vsel %vm9119_vm5, %v30146_v10, %v9791_v44  ;;  %v9805_v4 = vsel %vm9117_vm4, %v30152_v41, %v9804_v9  ;;  %v30155_v30 = vld [vmem:[#allocation101_spill] sm:$0xff] }
 0x498   :  { %v9820_v13 = vsel %vm9119_vm5, %v30150_v34, %v9819_v54  ;;  %v9833_v62 = vsel %vm9117_vm4, %v30154_v36, %v9832_v15  ;;  %v11947_v56 = vsel %vm11946_vm6, %v30155_v30, %v25857_v38  ;;  %v11693_v17 = vrot.slane %v10568_v7, %v23666_v19  ;;  %v30156_v54 = vld [vmem:[#allocation61_spill] sm:$0xff]  ;;  %v30157_v38 = vld [vmem:[#allocation7_spill] sm:$0xff] }
 0x499   :  { %11920 = vrot.lane.b32.xlu1 %v11869_v11, %s19945_s28  ;;  %v10542_v10 = vcombine.high %v26563_v16, %v29804_v28  ;;  %v10570_v44 = vcombine.low %v9792_v26, %v9820_v13  ;;  %v11165_v34 = vrot.slane %v10551_v24, %v23666_v19  ;;  %v9806_v9 = vsel %vm9119_vm5, %v30152_v41, %v9805_v4  ;;  %v26599_v30 = vpop.permute.xlu0 %11202 }
 0x49a   :  { %v9834_v15 = vsel %vm9119_vm5, %v30154_v36, %v9833_v62  ;;  %v9796_v11 = vsel %vm9113_vm2, %v30157_v38, %v30156_v54  ;;  %v10604_v7 = vrot.slane %v10597_v58, %v23856_v20  ;;  %v26601_v41 = vrot.slane %v8846_v55, 7  ;;  %v30159_v62 = vld [vmem:[#allocation114_spill] sm:$0xff] }
 0x49b   :  { %11744 = vrot.lane.b32.xlu0 %v11693_v17, %s19944_s27  ;;  %v26595_v26 = vrot.slane %v10570_v44, %v23856_v20  ;;  %v10588_v13 = vcombine.low %v9806_v9, %v9834_v15  ;;  %v9797_v24 = vsel %vm9115_vm3, %v30157_v38, %v9796_v11  ;;  %v11964_v36 = vsel %vm11963_vm7, %v11947_v56, %v25745_v6  ;;  %v30160_v17 = vld [vmem:[#allocation103_spill] sm:$0xff]  ;;  %v30161_v15 = vld [vmem:[#allocation25_spill] sm:$0xff]  ;;  %v30162_v54 = vld [vmem:[#allocation62_spill] sm:$0xff] }
 0x49c   :  { %v9798_v4 = vsel %vm9117_vm4, %v30157_v38, %v9797_v24  ;;  %v9824_v58 = vsel %vm9113_vm2, %v30160_v17, %v30159_v62  ;;  %v10813_v44 = vrot.slane %v10542_v10, %v23666_v19  ;;  %v9860_v11 = vsel %vm9115_vm3, %v30162_v54, %v30161_v15 }
 0x49d   :  { %30158 = vst [vmem:[#allocation89_spill] sm:$0xff] %v26595_v26  ;;  %11216 = vrot.lane.b32.xlu1 %v11165_v34, %s19946_s29  ;;  %v10595_v9 = vrot.slane %v10588_v13, %v23856_v20  ;;  %v9825_v55 = vsel %vm9115_vm3, %v30160_v17, %v9824_v58  ;;  %v10578_v6 = vcombine.high %v26595_v26, %v29804_v28  ;;  %v30163_v34 = vld [vmem:[#allocation113_spill] sm:$0xff]  ;;  %v26631_v58 = vpop.permute.xlu1 %11906 }
 0x49e   :  { %v9826_v56 = vsel %vm9117_vm4, %v30160_v17, %v9825_v55  ;;  %v11948_v10 = vsel %vm11946_vm6, %v30163_v34, %v25920_v60  ;;  %v11700_v13 = vrot.slane %v10604_v7, %v23666_v19  ;;  %v9799_v24 = vsel %vm9119_vm5, %v30157_v38, %v9798_v4  ;;  %v30165_v34 = vld [vmem:[#allocation115_spill] sm:$0xff] }
 0x49f   :  { %10864 = vrot.lane.b32.xlu0 %v10813_v44, %s19947_s30  ;;  %v9827_v62 = vsel %vm9119_vm5, %v30160_v17, %v9826_v56  ;;  %v11965_v55 = vsel %vm11963_vm7, %v11948_v10, %v26006_v51  ;;  %v10596_v26 = vcombine.high %v10595_v9, %v29804_v28  ;;  %v9861_v60 = vsel %vm9117_vm4, %v30162_v54, %v9860_v11  ;;  %v26647_v17 = vpop.permute.xlu0 %11556 }
 0x4a0   :  { %v10579_v15 = vcombine.low %v9799_v24, %v9827_v62  ;;  %v11981_v44 = vsel %vm11980_vm8, %v11964_v36, %v25826_v53  ;;  %v11982_v38 = vsel %vm11980_vm8, %v11965_v55, %v26025_v47  ;;  %v11348_v4 = vrot.slane %v10595_v9, %v23666_v19  ;;  %v30164_v36 = vld [vmem:[#allocation63_spill] sm:$0xff] }
 0x4a1   :  { %11746 = vrot.lane.b32.xlu1 %v11700_v13, %s19944_s27  ;;  %v9888_v51 = vsel %vm9115_vm3, %v25645_v25, %v25663_v43  ;;  %v10820_v56 = vrot.slane %v10578_v6, %v23666_v19  ;;  %v9852_v47 = vsel %vm9113_vm2, %v30165_v34, %v30164_v36  ;;  %v9862_v9 = vsel %vm9119_vm5, %v30162_v54, %v9861_v60  ;;  %v26671_v54 = vpop.permute.xlu1 %11380  ;;  %v30167_v60 = vld [vmem:[#allocation10_spill] sm:$0xff] }
 0x4a2   :  { %v10586_v11 = vrot.slane %v10579_v15, %v23856_v20  ;;  %v9889_v53 = vsel %vm9117_vm4, %v25645_v25, %v9888_v51  ;;  %v9853_v6 = vsel %vm9115_vm3, %v30165_v34, %v9852_v47  ;;  %v9880_v10 = vsel %vm9113_vm2, %v25707_v21, %v25657_v3  ;;  %v30166_v3 = vld [vmem:[#allocation47_spill] sm:$0xff] }
 0x4a3   :  { %11394 = vrot.lane.b32.xlu0 %v11348_v4, %s19941_s25  ;;  %v9890_v43 = vsel %vm9119_vm5, %v25645_v25, %v9889_v53  ;;  %v11998_v13 = vsel %vm11997_vm9, %v11981_v44, %v25727_v40  ;;  %v11524_v24 = vrot.slane %v10596_v26, %v23666_v19  ;;  %v9854_v25 = vsel %vm9117_vm4, %v30165_v34, %v9853_v6  ;;  %v30168_v40 = vld [vmem:[#allocation66_spill] sm:$0xff]  ;;  %v30169_v44 = vld [vmem:[#allocation27_spill] sm:$0xff]  ;;  %v26695_v6 = vpop.permute.xlu0 %11732 }
 0x4a4   :  { %v10587_v62 = vcombine.high %v10586_v11, %v29804_v28  ;;  %v10624_v55 = vcombine.low %v9862_v9, %v9890_v43  ;;  %v9881_v15 = vsel %vm9115_vm3, %v25707_v21, %v9880_v10  ;;  %v9866_v4 = vsel %vm9113_vm2, %v30167_v60, %v30166_v3 }
 0x4a5   :  { %10866 = vrot.lane.b32.xlu1 %v10820_v56, %s19947_s30  ;;  %v9894_v26 = vsel %vm9113_vm2, %v30169_v44, %v30168_v40  ;;  %v11999_v51 = vsel %vm11997_vm9, %v11982_v38, %v25904_v35  ;;  %v10996_v56 = vrot.slane %v10586_v11, %v23666_v19  ;;  %v10605_v53 = vcombine.high %v10604_v7, %v29804_v28  ;;  %v30170_v35 = vld [vmem:[#allocation24_spill] sm:$0xff]  ;;  %v30171_v38 = vld [vmem:[#allocation65_spill] sm:$0xff] }
 0x4a6   :  { %v10631_v36 = vrot.slane %v10624_v55, %v23856_v20  ;;  %v9882_v47 = vsel %vm9117_vm4, %v25707_v21, %v9881_v15  ;;  %v9867_v9 = vsel %vm9115_vm3, %v30167_v60, %v9866_v4  ;;  %v9895_v43 = vsel %vm9115_vm3, %v30169_v44, %v9894_v26  ;;  %v30172_v40 = vld [vmem:[#allocation8_spill] sm:$0xff] }
 0x4a7   :  { %11570 = vrot.lane.b32.xlu0 %v11524_v24, %s19942_s1  ;;  %v9846_v11 = vsel %vm9115_vm3, %v30171_v38, %v30170_v35  ;;  %v11172_v7 = vrot.slane %v10587_v62, %v23666_v19  ;;  %v9855_v10 = vsel %vm9119_vm5, %v30165_v34, %v9854_v25  ;;  %v9883_v24 = vsel %vm9119_vm5, %v25707_v21, %v9882_v47  ;;  %v30173_v26 = vld [vmem:[#allocation48_spill] sm:$0xff]  ;;  %v30174_v47 = vld [vmem:[#allocation11_spill] sm:$0xff] }
 0x4a8   :  { %v9868_v55 = vsel %vm9117_vm4, %v30167_v60, %v9867_v9  ;;  %v10632_v15 = vcombine.high %v10631_v36, %v29804_v28  ;;  %v10615_v3 = vcombine.low %v9855_v10, %v9883_v24  ;;  %v9896_v4 = vsel %vm9117_vm4, %v30169_v44, %v9895_v43  ;;  %v30176_v10 = vld [vmem:[#allocation20_spill] sm:$0xff] }
 0x4a9   :  { %11042 = vrot.lane.b32.xlu1 %v10996_v56, %s19943_s26  ;;  %v9847_v62 = vsel %vm9117_vm4, %v30171_v38, %v9846_v11  ;;  %v12016_v34 = vsel %vm12014_vm10, %v11999_v51, %v25958_v18  ;;  %v9869_v21 = vsel %vm9119_vm5, %v30167_v60, %v9868_v55  ;;  %v9897_v25 = vsel %vm9119_vm5, %v30169_v44, %v9896_v4  ;;  %v26726_v11 = vpop.permute.xlu1 %11028  ;;  %v30175_v51 = vld [vmem:[#allocation78_spill] sm:$0xff]  ;;  %v26745_v4 = vpop.permute.xlu0 %10852 }
 0x4aa   :  { %v9874_v56 = vsel %vm9115_vm3, %v30173_v26, %v30172_v40  ;;  %v12015_v9 = vsel %vm12014_vm10, %v11998_v13, %v30174_v47  ;;  %v11876_v43 = vrot.slane %v10605_v53, %v23666_v19  ;;  %v10633_v35 = vcombine.low %v9869_v21, %v9897_v25  ;;  %v30177_v25 = vld [vmem:[#allocation6_spill] sm:$0xff]  ;;  %v30178_v40 = vld [vmem:[#allocation116_spill] sm:$0xff]  ;;  %v30179_v47 = vld [vmem:[#allocation117_spill] sm:$0xff] }
 0x4ab   :  { %11218 = vrot.lane.b32.xlu0 %v11172_v7, %s19946_s29  ;;  %v9875_v18 = vsel %vm9117_vm4, %v30173_v26, %v9874_v56  ;;  %v9848_v60 = vsel %vm9119_vm5, %v30171_v38, %v9847_v62  ;;  %v9917_v13 = vsel %vm9117_vm4, %v30176_v10, %v30175_v51  ;;  %v9945_v53 = vsel %vm9117_vm4, %v25779_v14, %v25842_v37 }
 0x4ac   :  { %v9876_v44 = vsel %vm9119_vm5, %v30173_v26, %v9875_v18  ;;  %v12033_v7 = vsel %vm12031_vm11, %v12016_v34, %v25875_v49  ;;  %v11531_v24 = vrot.slane %v10632_v15, %v23666_v19  ;;  %v10640_v38 = vrot.slane %v10633_v35, %v23856_v20 }
 0x4ad   :  { %11922 = vrot.lane.b32.xlu1 %v11876_v43, %s19945_s28  ;;  %v10606_v55 = vcombine.low %v9848_v60, %v9876_v44  ;;  %v10622_v62 = vrot.slane %v10615_v3, %v23856_v20  ;;  %v9918_v21 = vsel %vm9119_vm5, %v30176_v10, %v9917_v13  ;;  %v9946_v37 = vsel %vm9119_vm5, %v25779_v14, %v9945_v53  ;;  %v30180_v43 = vld [vmem:[#allocation14_spill] sm:$0xff]  ;;  %v26776_v60 = vpop.permute.xlu1 %11204  ;;  %v30181_v13 = vld [vmem:[#allocation15_spill] sm:$0xff] }
 0x4ae   :  { %v9903_v49 = vsel %vm9117_vm4, %v30178_v40, %v30177_v25  ;;  %v11355_v15 = vrot.slane %v10631_v36, %v23666_v19  ;;  %v10660_v26 = vcombine.low %v9918_v21, %v9946_v37  ;;  %v10006_v3 = vsel %vm9113_vm2, %v26512_v57, %v26360_v2  ;;  %v30182_v21 = vld [vmem:[#allocation9_spill] sm:$0xff]  ;;  %v30183_v37 = vld [vmem:[#allocation54_spill] sm:$0xff]  ;;  %v30184_v25 = vld [vmem:[#allocation71_spill] sm:$0xff] }
 0x4af   :  { %11572 = vrot.lane.b32.xlu0 %v11531_v24, %s19942_s1  ;;  %v26758_v34 = vrot.slane %v10606_v55, %v23856_v20  ;;  %v12032_v14 = vsel %vm12031_vm11, %v12015_v9, %v25806_v59  ;;  %v26767_v56 = vsel %vm12048_vm12, %v12033_v7, %v25974_v12  ;;  %v9931_v36 = vsel %vm9117_vm4, %v30180_v43, %v30179_v47  ;;  %v30187_v47 = vld [vmem:[#allocation26_spill] sm:$0xff] }
 0x4b0   :  { %v11707_v35 = vrot.slane %v10640_v38, %v23666_v19  ;;  %v9904_v59 = vsel %vm9119_vm5, %v30178_v40, %v9903_v49  ;;  %v9932_v12 = vsel %vm9119_vm5, %v30180_v43, %v9931_v36  ;;  %v9986_v2 = vsel %vm9115_vm3, %v26484_v46, %v26542_v50  ;;  %v26797_v50 = vpop.permute.xlu0 %11908  ;;  %v30185_v40 = vld [vmem:[#allocation13_spill] sm:$0xff] }
 0x4b1   :  { %11396 = vrot.lane.b32.xlu1 %v11355_v15, %s19941_s25  ;;  %v10614_v18 = vcombine.high %v26758_v34, %v29804_v28  ;;  %v10623_v9 = vcombine.high %v10622_v62, %v29804_v28  ;;  %v10641_v44 = vcombine.high %v10640_v38, %v29804_v28  ;;  %v10642_v51 = vcombine.low %v9904_v59, %v9932_v12  ;;  %v26825_v12 = vpop.permute.xlu1 %11382 }
 0x4b2   :  { %v9992_v10 = vsel %vm9113_vm2, %v26601_v41, %v26481_v61  ;;  %v26792_v53 = vsel %vm12048_vm12, %v12032_v14, %v30181_v13  ;;  %v12082_v7 = vrot.slane %v26767_v56, 1  ;;  %v11003_v24 = vrot.slane %v10622_v62, %v23666_v19 }
 0x4b3   :  { %11748 = vrot.lane.b32.xlu0 %v11707_v35, %s19944_s27  ;;  %v10827_v55 = vrot.slane %v10614_v18, %v23666_v19  ;;  %v10667_v38 = vrot.slane %v10660_v26, %v23856_v20  ;;  %v9923_v61 = vsel %vm9115_vm3, %v30183_v37, %v30182_v21  ;;  %v9951_v49 = vsel %vm9115_vm3, %v30185_v40, %v30184_v25  ;;  %v30186_v26 = vld [vmem:[#allocation69_spill] sm:$0xff]  ;;  %v30189_v21 = vld [vmem:[#allocation28_spill] sm:$0xff] }
 0x4b4   :  { %v26809_v62 = vrot.slane %v10642_v51, %v23856_v20  ;;  %v9924_v15 = vsel %vm9117_vm4, %v30183_v37, %v9923_v61  ;;  %v9952_v14 = vsel %vm9117_vm4, %v30185_v40, %v9951_v49  ;;  %v9909_v43 = vsel %vm9115_vm3, %v30187_v47, %v30186_v26  ;;  %v26844_v49 = vpop.permute.xlu0 %10854 }
 0x4b5   :  { %11044 = vrot.lane.b32.xlu1 %v11003_v24, %s19943_s26  ;;  %v11179_v36 = vrot.slane %v10623_v9, %v23666_v19  ;;  %v11883_v35 = vrot.slane %v10641_v44, %v23666_v19  ;;  %v9925_v18 = vsel %vm9119_vm5, %v30183_v37, %v9924_v15  ;;  %v9953_v59 = vsel %vm9119_vm5, %v30185_v40, %v9952_v14  ;;  %v30188_v24 = vld [vmem:[#allocation118_spill] sm:$0xff] }
 0x4b6   :  { %v10669_v51 = vcombine.low %v9925_v18, %v9953_v59  ;;  %v9910_v13 = vsel %vm9117_vm4, %v30187_v47, %v9909_v43  ;;  %v9937_v9 = vsel %vm9115_vm3, %v30189_v21, %v30188_v24  ;;  %v9979_v44 = vsel %vm9115_vm3, %v25890_v52, %v26128_v39 }
 0x4b7   :  { %10868 = vrot.lane.b32.xlu0 %v10827_v55, %s19947_s30  ;;  %v11362_v37 = vrot.slane %v10667_v38, %v23666_v19  ;;  %v10668_v61 = vcombine.high %v10667_v38, %v29804_v28  ;;  %v9938_v55 = vsel %vm9117_vm4, %v30189_v21, %v9937_v9  ;;  %v9980_v25 = vsel %vm9117_vm4, %v25890_v52, %v9979_v44 }
 0x4b8   :  { %v10650_v40 = vcombine.high %v26809_v62, %v29804_v28  ;;  %v9911_v39 = vsel %vm9119_vm5, %v30187_v47, %v9910_v13  ;;  %v9939_v15 = vsel %vm9119_vm5, %v30189_v21, %v9938_v55  ;;  %v10007_v38 = vsel %vm9115_vm3, %v26512_v57, %v10006_v3 }
 0x4b9   :  { %11220 = vrot.lane.b32.xlu1 %v11179_v36, %s19946_s29  ;;  %v10651_v14 = vcombine.low %v9911_v39, %v9939_v15  ;;  %v10008_v26 = vsel %vm9117_vm4, %v26512_v57, %v10007_v38  ;;  %v9959_v43 = vsel %vm9117_vm4, %v25912_v45, %v26133_v22  ;;  %v9987_v36 = vsel %vm9117_vm4, %v26484_v46, %v9986_v2 }
 0x4ba   :  { %v10676_v47 = vrot.slane %v10669_v51, %v23856_v20  ;;  %v9981_v18 = vsel %vm9119_vm5, %v25890_v52, %v9980_v25  ;;  %v10009_v3 = vsel %vm9119_vm5, %v26512_v57, %v10008_v26  ;;  %v9960_v59 = vsel %vm9119_vm5, %v25912_v45, %v9959_v43 }
 0x4bb   :  { %11924 = vrot.lane.b32.xlu0 %v11883_v35, %s19945_s28  ;;  %v10658_v13 = vrot.slane %v10651_v14, %v23856_v20  ;;  %v10705_v24 = vcombine.low %v9981_v18, %v10009_v3  ;;  %v9988_v22 = vsel %vm9119_vm5, %v26484_v46, %v9987_v36  ;;  %v9965_v2 = vsel %vm9115_vm3, %v25994_v48, %v26140_v29  ;;  %v26875_v35 = vpop.permute.xlu1 %11558 }
 0x4bc   :  { %v10834_v52 = vrot.slane %v10650_v40, %v23666_v19  ;;  %v10678_v57 = vcombine.low %v9960_v59, %v9988_v22  ;;  %v12081_v51 = vrot.slane %v26792_v53, 1  ;;  %v26879_v45 = vmax.f32 %v26767_v56, %v12082_v7  ;;  %v26885_v29 = vpop.permute.xlu0 %11030  ;;  %v30190_v22 = vld [vmem:[#allocation30_spill] sm:$0xff] }
 0x4bd   :  { %11398 = vrot.lane.b32.xlu1 %v11362_v37, %s19941_s25  ;;  %v9966_v21 = vsel %vm9117_vm4, %v25994_v48, %v9965_v2  ;;  %v11538_v46 = vrot.slane %v10668_v61, %v23666_v19  ;;  %v9993_v9 = vsel %vm9115_vm3, %v26601_v41, %v9992_v10  ;;  %v9973_v44 = vsel %vm9117_vm4, %v25867_v27, %v26068_v33 }
 0x4be   :  { %v10001_v56 = vsel %vm9117_vm4, %v26412_v42, %v26530_v63  ;;  %v11010_v7 = vrot.slane %v10658_v13, %v23666_v19  ;;  %v10677_v37 = vcombine.high %v10676_v47, %v29804_v28  ;;  %v9994_v61 = vsel %vm9117_vm4, %v26601_v41, %v9993_v9 }
 0x4bf   :  { %10870 = vrot.lane.b32.xlu0 %v10834_v52, %s19947_s30  ;;  %v9967_v10 = vsel %vm9119_vm5, %v25994_v48, %v9966_v21  ;;  %v9995_v55 = vsel %vm9119_vm5, %v26601_v41, %v9994_v61  ;;  %v9974_v33 = vsel %vm9119_vm5, %v25867_v27, %v9973_v44  ;;  %v10002_v63 = vsel %vm9119_vm5, %v26412_v42, %v10001_v56  ;;  %v26913_v38 = vpop.permute.xlu1 %11734 }
 0x4c0   :  { %v26909_v25 = vmax.f32 %v26792_v53, %v12081_v51  ;;  %v10687_v40 = vcombine.low %v9967_v10, %v9995_v55  ;;  %v10696_v39 = vcombine.low %v9974_v33, %v10002_v63  ;;  %v11714_v15 = vrot.slane %v10676_v47, %v23666_v19  ;;  %v30192_v33 = vld [vmem:[#allocation29_spill] sm:$0xff] }
 0x4c1   :  { %11574 = vrot.lane.b32.xlu1 %v11538_v46, %s19942_s1  ;;  %v10712_v48 = vrot.slane %v10705_v24, %v23856_v20  ;;  %v26917_v41 = vrot.slane %v10678_v57, %v23856_v20  ;;  %v12369_v27 = vrot.slane %v26879_v45, 7  ;;  %v11890_v42 = vrot.slane %v10677_v37, %v23666_v19 }
 0x4c2   :  { %v10659_v14 = vcombine.high %v10658_v13, %v29804_v28  ;;  %v10703_v3 = vrot.slane %v10696_v39, %v23856_v20  ;;  %v10694_v24 = vrot.slane %v10687_v40, %v23856_v20  ;;  %v11949_v2 = vsel %vm11946_vm6, %v30190_v22, %v26184_v0  ;;  %v30193_v39 = vld [vmem:[#allocation83_spill] sm:$0xff] }
 0x4c3   :  { %11046 = vrot.lane.b32.xlu0 %v11010_v7, %s19943_s26  ;;  %v26922_v53 = vpop.permute.xlu0 %11910  ;;  %v26927_v26 = vsel %vm9113_vm2, %v12369_v27, %v26909_v25  ;;  %v11721_v43 = vrot.slane %v10712_v48, %v23666_v19  ;;  %v10686_v36 = vcombine.high %v26917_v41, %v29804_v28  ;;  %v11966_v51 = vsel %vm11963_vm7, %v11949_v2, %v26220_v5  ;;  %v30191_v5 = vld [vmem:[#allocation77_spill] sm:$0xff] }
 0x4c4   :  { %v11186_v18 = vrot.slane %v10659_v14, %v23666_v19  ;;  %v11369_v52 = vrot.slane %v10703_v3, %v23666_v19  ;;  %v10704_v57 = vcombine.high %v10703_v3, %v29804_v28  ;;  %v11017_v46 = vrot.slane %v10694_v24, %v23666_v19  ;;  %v30194_v27 = vld [vmem:[#allocation73_spill] sm:$0xff] }
 0x4c5   :  { %11750 = vrot.lane.b32.xlu1 %v11714_v15, %s19944_s27  ;;  %v10841_v59 = vrot.slane %v10686_v36, %v23666_v19  ;;  %v10713_v9 = vcombine.high %v10712_v48, %v29804_v28  ;;  %v11983_v0 = vsel %vm11980_vm8, %v11966_v51, %v26233_v1  ;;  %v10695_v7 = vcombine.high %v10694_v24, %v29804_v28 }
 0x4c6   :  { %v26934_v47 = vpop.permute.xlu1 %11736  ;;  %v11545_v56 = vrot.slane %v10704_v57, %v23666_v19  ;;  %v12000_v37 = vsel %vm11997_vm9, %v11983_v0, %v30191_v5  ;;  %v30197_v57 = vld [vmem:[#allocation51_spill] sm:$0xff] }
 0x4c7   :  { %11926 = vrot.lane.b32.xlu0 %v11890_v42, %s19945_s28  ;;  %v26940_v13 = vpop.permute.xlu0 %11206  ;;  %v11897_v10 = vrot.slane %v10713_v9, %v23666_v19  ;;  %v11193_v55 = vrot.slane %v10695_v7, %v23666_v19  ;;  %v12017_v63 = vsel %vm12014_vm10, %v12000_v37, %v30192_v33  ;;  %v11950_v42 = vsel %vm11946_vm6, %v30194_v27, %v26444_v32  ;;  %v30198_v9 = vld [vmem:[#allocation72_spill] sm:$0xff]  ;;  %v30199_v7 = vld [vmem:[#allocation31_spill] sm:$0xff] }
 0x4c8   :  { %v12034_v15 = vsel %vm12031_vm11, %v12017_v63, %v30193_v39 }
 0x4c9   :  { %11752 = vrot.lane.b32.xlu1 %v11721_v43, %s19944_s27  ;;  %v30195_v43 = vld [vmem:[#allocation74_spill] sm:$0xff] }
 0x4ca   :  { %v12051_v36 = vsel %vm12048_vm12, %v12034_v15, %v30195_v43 }
 0x4cb   :  { %11222 = vrot.lane.b32.xlu0 %v11186_v18, %s19946_s29  ;;  %v30196_v18 = vld [vmem:[#allocation32_spill] sm:$0xff]  ;;  %v12083_v24 = vrot.slane %v12051_v36, 1 }
 0x4cc   :  { %v11967_v3 = vsel %vm11963_vm7, %v11950_v42, %v30196_v18 }
 0x4cd   :  { %10872 = vrot.lane.b32.xlu1 %v10841_v59, %s19947_s30  ;;  %v11984_v22 = vsel %vm11980_vm8, %v11967_v3, %v26428_v31 }
 0x4ce   :  { %v26951_v21 = vpop.permute.xlu1 %10856  ;;  %v12001_v51 = vsel %vm11997_vm9, %v11984_v22, %v30197_v57  ;;  %v30202_v22 = vld [vmem:[#allocation40_spill] sm:$0xff] }
 0x4cf   :  { %11400 = vrot.lane.b32.xlu0 %v11369_v52, %s19941_s25  ;;  %v27009_v52 = vmax.f32 %v12051_v36, %v12083_v24  ;;  %v12018_v0 = vsel %vm12014_vm10, %v12001_v51, %v30198_v9  ;;  %v30201_v24 = vld [vmem:[#allocation34_spill] sm:$0xff] }
 0x4d0   :  { %v12035_v5 = vsel %vm12031_vm11, %v12018_v0, %v30199_v7  ;;  %v11951_v57 = vsel %vm11946_vm6, %v30202_v22, %v30201_v24  ;;  %v30203_v7 = vld [vmem:[#allocation18_spill] sm:$0xff]  ;;  %v30205_v22 = vld [vmem:[#allocation64_spill] sm:$0xff] }
 0x4d1   :  { %11048 = vrot.lane.b32.xlu1 %v11017_v46, %s19943_s26  ;;  %v26959_v44 = vpop.permute.xlu0 %11384 }
 0x4d2   :  { %v26965_v61 = vpop.permute.xlu1 %11032 }
 0x4d3   :  { %11576 = vrot.lane.b32.xlu0 %v11545_v56, %s19942_s1 }
 0x4d5   :  { %11928 = vrot.lane.b32.xlu1 %v11897_v10, %s19945_s28  ;;  %v26970_v1 = vpop.permute.xlu0 %11560 }
 0x4d6   :  { %v26975_v40 = vpop.permute.xlu1 %11912 }
 0x4d7   :  { %11224 = vrot.lane.b32.xlu0 %v11193_v55, %s19946_s29  ;;  %v30200_v55 = vld [vmem:[#allocation81_spill] sm:$0xff] }
 0x4d8   :  { %v12052_v33 = vsel %vm12048_vm12, %v12035_v5, %v30200_v55 }
 0x4d9   :  { %12179 = vrot.lane.b32.xlu1 %v26879_v45, %s19948_s2  ;;  %v26982_v48 = vpop.permute.xlu0 %11208  ;;  %v12084_v39 = vrot.slane %v12052_v33, 1 }
 0x4da   :  { %v26987_v14 = vpop.permute.xlu1 %11386 }
 0x4db   :  { %12145 = vrot.lane.b32.xlu0 %v26909_v25, %s19949_s14  ;;  %v27051_v42 = vmax.f32 %v12052_v33, %v12084_v39  ;;  %v30204_v33 = vld [vmem:[#allocation22_spill] sm:$0xff] }
 0x4dc   :  { %v11952_v39 = vsel %vm11946_vm6, %v30204_v33, %v26745_v4 }
 0x4dd   :  { %12243 = vrot.lane.b32.xlu1 %v26879_v45, %s19950_s15  ;;  %v26997_v59 = vpop.permute.xlu0 %11034 }
 0x4de   :  { %v26999_v32 = vpop.permute.xlu1 %11562 }
 0x4df   :  { %12177 = vrot.lane.b32.xlu0 %v26909_v25, %s19948_s2 }
 0x4e1   :  { %12307 = vrot.lane.b32.xlu1 %v26879_v45, %s19951_s16  ;;  %v27007_v2 = vpop.permute.xlu0 %11914 }
 0x4e2   :  { %v27013_v46 = vpop.permute.xlu1 %11738 }
 0x4e3   :  { %12209 = vrot.lane.b32.xlu0 %v26909_v25, %s19952_s17 }
 0x4e5   :  { %12149 = vrot.lane.b32.xlu1 %v27009_v52, %s19949_s14  ;;  %v27019_v31 = vpop.permute.xlu0 %11210 }
 0x4e6   :  { %v27023_v56 = vpop.permute.xlu1 %10858 }
 0x4e7   :  { %12241 = vrot.lane.b32.xlu0 %v26909_v25, %s19950_s15 }
 0x4e9   :  { %12213 = vrot.lane.b32.xlu1 %v27009_v52, %s19952_s17  ;;  %v27031_v37 = vpop.permute.xlu0 %11740 }
 0x4ea   :  { %v27033_v10 = vpop.permute.xlu1 %11388 }
 0x4eb   :  { %12273 = vrot.lane.b32.xlu0 %v26909_v25, %s19953_s18 }
 0x4ed   :  { %12277 = vrot.lane.b32.xlu1 %v27009_v52, %s19953_s18  ;;  %v27041_v63 = vpop.permute.xlu0 %10860 }
 0x4ee   :  { %v27043_v15 = vpop.permute.xlu1 %11564 }
 0x4ef   :  { %12305 = vrot.lane.b32.xlu0 %v26909_v25, %s19951_s16 }
 0x4f1   :  { %12341 = vrot.lane.b32.xlu1 %v27009_v52, %s19954_s19  ;;  %v27049_v27 = vpop.permute.xlu0 %11036 }
 0x4f2   :  { %v27053_v43 = vpop.permute.xlu1 %11566 }
 0x4f3   :  { %12337 = vrot.lane.b32.xlu0 %v26909_v25, %s19954_s19  ;;  %v11968_v25 = vsel %vm11963_vm7, %v11951_v57, %v26582_v8 }
 0x4f4   :  { %v11985_v9 = vsel %vm11980_vm8, %v11968_v25, %v26599_v30  ;;  %v11969_v25 = vsel %vm11963_vm7, %v11952_v39, %v26726_v11 }
 0x4f5   :  { %12151 = vrot.lane.b32.xlu1 %v27051_v42, %s19949_s14  ;;  %v27059_v36 = vpop.permute.xlu0 %11916  ;;  %v12002_v5 = vsel %vm11997_vm9, %v11985_v9, %v30203_v7 }
 0x4f6   :  { %v12019_v30 = vsel %vm12014_vm10, %v12002_v5, %v26548_v23 }
 0x4f7   :  { %v27061_v18 = vpop.permute.xlu1 %11742  ;;  %12147 = vrot.lane.b32.xlu0 %v26879_v45, %s19949_s14  ;;  %v12036_v57 = vsel %vm12031_vm11, %v12019_v30, %v30205_v22 }
 0x4f8   :  { %v12053_v4 = vsel %vm12048_vm12, %v12036_v57, %v26631_v58 }
 0x4f9   :  { %12183 = vrot.lane.b32.xlu1 %v27051_v42, %s19948_s2  ;;  %v27067_v3 = vpop.permute.xlu0 %11212  ;;  %v12085_v7 = vrot.slane %v12053_v4, 1 }
 0x4fb   :  { %v27074_v51 = vpop.permute.xlu1 %10862  ;;  %12211 = vrot.lane.b32.xlu0 %v26879_v45, %s19952_s17  ;;  %v27135_v33 = vmax.f32 %v12053_v4, %v12085_v7 }
 0x4fd   :  { %12215 = vrot.lane.b32.xlu1 %v27051_v42, %s19952_s17  ;;  %v27082_v0 = vpop.permute.xlu0 %11390 }
 0x4ff   :  { %v27086_v55 = vpop.permute.xlu1 %11038  ;;  %12275 = vrot.lane.b32.xlu0 %v26879_v45, %s19953_s18 }
 0x501   :  { %12247 = vrot.lane.b32.xlu1 %v27051_v42, %s19950_s15  ;;  %v27092_v8 = vpop.permute.xlu0 %11214 }
 0x503   :  { %v27099_v24 = vpop.permute.xlu1 %11918  ;;  %12339 = vrot.lane.b32.xlu0 %v26879_v45, %s19954_s19  ;;  %v11986_v45 = vsel %vm11980_vm8, %v11969_v25, %v26776_v60 }
 0x504   :  { %v12003_v5 = vsel %vm11997_vm9, %v11986_v45, %v26671_v54 }
 0x505   :  { %12279 = vrot.lane.b32.xlu1 %v27051_v42, %s19953_s18  ;;  %v27109_v9 = vpop.permute.xlu0 %11392  ;;  %v12020_v60 = vsel %vm12014_vm10, %v12003_v5, %v26647_v17 }
 0x506   :  { %v12037_v54 = vsel %vm12031_vm11, %v12020_v60, %v26695_v6  ;;  %v30206_v6 = vld [vmem:[#allocation67_spill] sm:$0xff] }
 0x507   :  { %v27111_v23 = vpop.permute.xlu1 %11040  ;;  %12181 = vrot.lane.b32.xlu0 %v27009_v52, %s19948_s2  ;;  %v12054_v17 = vsel %vm12048_vm12, %v12037_v54, %v26797_v50  ;;  %v11953_v4 = vsel %vm11946_vm6, %v30206_v6, %v26844_v49 }
 0x508   :  { %v12086_v45 = vrot.slane %v12054_v17, 1  ;;  %v11970_v7 = vsel %vm11963_vm7, %v11953_v4, %v26885_v29 }
 0x509   :  { %12311 = vrot.lane.b32.xlu1 %v27051_v42, %s19951_s16  ;;  %v27121_v11 = vpop.permute.xlu0 %11568  ;;  %v11987_v50 = vsel %vm11980_vm8, %v11970_v7, %v26940_v13 }
 0x50a   :  { %v27172_v54 = vmax.f32 %v12054_v17, %v12086_v45  ;;  %v12004_v49 = vsel %vm11997_vm9, %v11987_v50, %v26825_v12  ;;  %v30207_v45 = vld [vmem:[#allocation60_spill] sm:$0xff] }
 0x50b   :  { %v27125_v30 = vpop.permute.xlu1 %11920  ;;  %12245 = vrot.lane.b32.xlu0 %v27009_v52, %s19950_s15  ;;  %v12021_v13 = vsel %vm12014_vm10, %v12004_v49, %v26875_v35  ;;  %v11954_v7 = vsel %vm11946_vm6, %v30207_v45, %v26951_v21 }
 0x50c   :  { %v12038_v12 = vsel %vm12031_vm11, %v12021_v13, %v26913_v38  ;;  %v11971_v35 = vsel %vm11963_vm7, %v11954_v7, %v26965_v61 }
 0x50d   :  { %12343 = vrot.lane.b32.xlu1 %v27051_v42, %s19954_s19  ;;  %v27131_v58 = vpop.permute.xlu0 %11744  ;;  %v12055_v38 = vsel %vm12048_vm12, %v12038_v12, %v26922_v53  ;;  %v11988_v49 = vsel %vm11980_vm8, %v11971_v35, %v26982_v48 }
 0x50e   :  { %v12087_v21 = vrot.slane %v12055_v38, 1  ;;  %v12005_v61 = vsel %vm11997_vm9, %v11988_v49, %v26959_v44 }
 0x50f   :  { %v27137_v39 = vpop.permute.xlu1 %11216  ;;  %12309 = vrot.lane.b32.xlu0 %v27009_v52, %s19951_s16  ;;  %v12022_v48 = vsel %vm12014_vm10, %v12005_v61, %v26970_v1  ;;  %v30209_v61 = vld [vmem:[#allocation80_spill] sm:$0xff] }
 0x510   :  { %v27225_v12 = vmax.f32 %v12055_v38, %v12087_v21  ;;  %v12039_v44 = vsel %vm12031_vm11, %v12022_v48, %v26934_v47  ;;  %v30208_v38 = vld [vmem:[#allocation75_spill] sm:$0xff]  ;;  %v11956_v48 = vsel %vm11946_vm6, %v30209_v61, %v27041_v63 }
 0x511   :  { %12185 = vrot.lane.b32.xlu1 %v27135_v33, %s19948_s2  ;;  %v27145_v22 = vpop.permute.xlu0 %10864  ;;  %v12056_v1 = vsel %vm12048_vm12, %v12039_v44, %v26975_v40  ;;  %v11955_v21 = vsel %vm11946_vm6, %v30208_v38, %v27023_v56  ;;  %v11973_v40 = vsel %vm11963_vm7, %v11956_v48, %v27049_v27 }
 0x512   :  { %v12088_v20 = vrot.slane %v12056_v1, 1  ;;  %v11972_v19 = vsel %vm11963_vm7, %v11955_v21, %v26997_v59  ;;  %v11990_v56 = vsel %vm11980_vm8, %v11973_v40, %v27067_v3  ;;  %v12940_v59 = vld [vmem:[%s29185_s3 + $0x8] sm:$0xff] }
 0x513   :  { %v27147_v57 = vpop.permute.xlu1 %11746  ;;  %12153 = vrot.lane.b32.xlu0 %v27135_v33, %s19949_s14  ;;  %v11989_v63 = vsel %vm11980_vm8, %v11972_v19, %v27019_v31  ;;  %19653 = vmatprep.subr.mxu1 %v12940_v59  ;;  %v12007_v21 = vsel %vm11997_vm9, %v11990_v56, %v27033_v10 }
 0x514   :  { %v27272_v27 = vmax.f32 %v12056_v1, %v12088_v20  ;;  %19654 = vmatpush3.msra.mxu1 %v12940_v59  ;;  %v12006_v3 = vsel %vm11997_vm9, %v11989_v63, %v26987_v14  ;;  %v12024_v19 = vsel %vm12014_vm10, %v12007_v21, %v27043_v15  ;;  %v30210_v1 = vld [vmem:[#allocation57_spill] sm:$0xff] }
 0x515   :  { %12249 = vrot.lane.b32.xlu1 %v27135_v33, %s19950_s15  ;;  %v27155_v25 = vpop.permute.xlu0 %11394  ;;  %v12023_v31 = vsel %vm12014_vm10, %v12006_v3, %v26999_v32  ;;  %v12041_v10 = vsel %vm12031_vm11, %v12024_v19, %v27031_v37  ;;  %v11957_v15 = vsel %vm11946_vm6, %v30210_v1, %v27074_v51 }
 0x516   :  { %v12040_v40 = vsel %vm12031_vm11, %v12023_v31, %v27013_v46  ;;  %v11974_v56 = vsel %vm11963_vm7, %v11957_v15, %v27086_v55  ;;  %v12058_v46 = vsel %vm12048_vm12, %v12041_v10, %v27059_v36 }
 0x517   :  { %v27162_v5 = vpop.permute.xlu1 %10866  ;;  %12217 = vrot.lane.b32.xlu0 %v27135_v33, %s19952_s17  ;;  %v11991_v37 = vsel %vm11980_vm8, %v11974_v56, %v27092_v8  ;;  %v12057_v55 = vsel %vm12048_vm12, %v12040_v40, %v27007_v2  ;;  %v12090_v59 = vrot.slane %v12058_v46, 1 }
 0x518   :  { %v12008_v63 = vsel %vm11997_vm9, %v11991_v37, %v27082_v0  ;;  %v12089_v36 = vrot.slane %v12057_v55, 1 }
 0x519   :  { %12313 = vrot.lane.b32.xlu1 %v27135_v33, %s19951_s16  ;;  %v27170_v60 = vpop.permute.xlu0 %11570  ;;  %v12025_v3 = vsel %vm12014_vm10, %v12008_v63, %v27053_v43  ;;  %v27373_v19 = vmax.f32 %v12058_v46, %v12090_v59  ;;  %v11958_v43 = vsel %vm11946_vm6, %v26563_v16, %v27145_v22  ;;  %v12965_v22 = vld [vmem:[#allocation2 + $0x1] sm:$0xff] }
 0x51a   :  { %v27379_v0 = vmax.f32 %v12057_v55, %v12089_v36  ;;  %v12042_v31 = vsel %vm12031_vm11, %v12025_v3, %v27061_v18  ;;  %v11975_v18 = vsel %vm11963_vm7, %v11958_v43, %v27111_v23  ;;  %19655 = vmatprep.mubr.msk.f32.mxu1 %vm11946_vm6, %v12965_v22 }
 0x51b   :  { %v27176_v6 = vpop.permute.xlu1 %11042  ;;  %12281 = vrot.lane.b32.xlu0 %v27135_v33, %s19953_s18  ;;  %v12059_v15 = vsel %vm12048_vm12, %v12042_v31, %v27099_v24  ;;  %v11992_v16 = vsel %vm11980_vm8, %v11975_v18, %v27137_v39  ;;  %v12943_v24 = vld [vmem:[%s29185_s3 + $0x20] sm:$0xff] }
 0x51c   :  { %30211 = vst [vmem:[#allocation84_spill] sm:$0xff] %v27379_v0  ;;  %v12091_v56 = vrot.slane %v12059_v15, 1  ;;  %19757 = vmatprep.subr.mxu0 %v12943_v24  ;;  %v12009_v55 = vsel %vm11997_vm9, %v11992_v16, %v27109_v9 }
 0x51d   :  { %12155 = vrot.lane.b32.xlu1 %v27172_v54, %s19949_s14  ;;  %v27182_v29 = vpop.permute.xlu0 %11218  ;;  %19758 = vmatpush3.msra.mxu0 %v12943_v24  ;;  %v12026_v63 = vsel %vm12014_vm10, %v12009_v55, %v27121_v11  ;;  %v30213_v55 = vld [vmem:[#allocation89_spill] sm:$0xff] }
 0x51e   :  { %v27416_v37 = vmax.f32 %v12059_v15, %v12091_v56  ;;  %v12043_v9 = vsel %vm12031_vm11, %v12026_v63, %v27131_v58  ;;  %v11959_v63 = vsel %vm11946_vm6, %v30213_v55, %v27162_v5 }
 0x51f   :  { %v27186_v4 = vpop.permute.xlu1 %11922  ;;  %12345 = vrot.lane.b32.xlu0 %v27135_v33, %s19954_s19  ;;  %v12060_v11 = vsel %vm12048_vm12, %v12043_v9, %v27125_v30  ;;  %v11976_v9 = vsel %vm11963_vm7, %v11959_v63, %v27176_v6 }
 0x520   :  { %v12092_v15 = vrot.slane %v12060_v11, 1 }
 0x521   :  { %12219 = vrot.lane.b32.xlu1 %v27172_v54, %s19952_s17  ;;  %v27194_v17 = vpop.permute.xlu0 %11572 }
 0x522   :  { %v27458_v56 = vmax.f32 %v12060_v11, %v12092_v15  ;;  %v11993_v15 = vsel %vm11980_vm8, %v11976_v9, %v27182_v29 }
 0x523   :  { %v27201_v50 = vpop.permute.xlu1 %11396  ;;  %12187 = vrot.lane.b32.xlu0 %v27172_v54, %s19948_s2 }
 0x524   :  { %30212 = vst [vmem:[#allocation33_spill] sm:$0xff] %v27458_v56 }
 0x525   :  { %12283 = vrot.lane.b32.xlu1 %v27172_v54, %s19953_s18  ;;  %v27211_v13 = vpop.permute.xlu0 %11748 }
 0x527   :  { %v27215_v45 = vpop.permute.xlu1 %11044  ;;  %12251 = vrot.lane.b32.xlu0 %v27172_v54, %s19950_s15 }
 0x529   :  { %12347 = vrot.lane.b32.xlu1 %v27172_v54, %s19954_s19  ;;  %v27221_v53 = vpop.permute.xlu0 %10868 }
 0x52a   :  { %v11960_v55 = vsel %vm11946_vm6, %v26758_v34, %v27221_v53 }
 0x52b   :  { %v27227_v7 = vpop.permute.xlu1 %11220  ;;  %12315 = vrot.lane.b32.xlu0 %v27172_v54, %s19951_s16  ;;  %v11977_v9 = vsel %vm11963_vm7, %v11960_v55, %v27215_v45 }
 0x52c   :  { %v11994_v53 = vsel %vm11980_vm8, %v11977_v9, %v27227_v7 }
 0x52d   :  { %12189 = vrot.lane.b32.xlu1 %v27225_v12, %s19948_s2  ;;  %v27235_v35 = vpop.permute.xlu0 %11924 }
 0x52f   :  { %v27237_v49 = vpop.permute.xlu1 %11398  ;;  %12157 = vrot.lane.b32.xlu0 %v27225_v12, %s19949_s14 }
 0x531   :  { %12253 = vrot.lane.b32.xlu1 %v27225_v12, %s19950_s15  ;;  %v27248_v47 = vpop.permute.xlu0 %10870 }
 0x533   :  { %v27257_v44 = vpop.permute.xlu1 %11574  ;;  %12221 = vrot.lane.b32.xlu0 %v27225_v12, %s19952_s17 }
 0x535   :  { %12317 = vrot.lane.b32.xlu1 %v27225_v12, %s19951_s16  ;;  %v27265_v38 = vpop.permute.xlu0 %11046 }
 0x537   :  { %v27276_v61 = vpop.permute.xlu1 %11750  ;;  %12285 = vrot.lane.b32.xlu0 %v27225_v12, %s19953_s18 }
 0x539   :  { %12159 = vrot.lane.b32.xlu1 %v27272_v27, %s19949_s14  ;;  %v27284_v48 = vpop.permute.xlu0 %11926 }
 0x53b   :  { %v27288_v20 = vpop.permute.xlu1 %11752  ;;  %12349 = vrot.lane.b32.xlu0 %v27225_v12, %s19954_s19 }
 0x53d   :  { %12223 = vrot.lane.b32.xlu1 %v27272_v27, %s19952_s17  ;;  %v27298_v14 = vpop.permute.xlu0 %11222 }
 0x53f   :  { %v27307_v32 = vpop.permute.xlu1 %10872  ;;  %12191 = vrot.lane.b32.xlu0 %v27272_v27, %s19948_s2 }
 0x541   :  { %12287 = vrot.lane.b32.xlu1 %v27272_v27, %s19953_s18  ;;  %v27357_v51 = vpop.permute.xlu0 %11400 }
 0x543   :  { %v27363_v21 = vpop.permute.xlu1 %11048  ;;  %12255 = vrot.lane.b32.xlu0 %v27272_v27, %s19950_s15 }
 0x545   :  { %12351 = vrot.lane.b32.xlu1 %v27272_v27, %s19954_s19  ;;  %v27369_v8 = vpop.permute.xlu0 %11576 }
 0x547   :  { %v27375_v2 = vpop.permute.xlu1 %11928  ;;  %12319 = vrot.lane.b32.xlu0 %v27272_v27, %s19951_s16 }
 0x549   :  { %12195 = vrot.lane.b32.xlu1 %v27373_v19, %s19948_s2  ;;  %v27385_v10 = vpop.permute.xlu0 %11224 }
 0x54b   :  { %v27390_v1 = vpop.permute.xlu1 %12179  ;;  %12161 = vrot.lane.b32.xlu0 %v27379_v0, %s19949_s14 }
 0x54d   :  { %12259 = vrot.lane.b32.xlu1 %v27373_v19, %s19950_s15  ;;  %v27400_v40 = vpop.permute.xlu0 %12145 }
 0x54f   :  { %v27402_v46 = vpop.permute.xlu1 %12243  ;;  %12193 = vrot.lane.b32.xlu0 %v27379_v0, %s19948_s2 }
 0x551   :  { %12323 = vrot.lane.b32.xlu1 %v27373_v19, %s19951_s16  ;;  %v27413_v23 = vpop.permute.xlu0 %12177 }
 0x553   :  { %v27420_v59 = vpop.permute.xlu1 %12307  ;;  %12225 = vrot.lane.b32.xlu0 %v27379_v0, %s19952_s17 }
 0x555   :  { %12165 = vrot.lane.b32.xlu1 %v27416_v37, %s19949_s14  ;;  %v27426_v39 = vpop.permute.xlu0 %12209 }
 0x557   :  { %v27430_v36 = vpop.permute.xlu1 %12149  ;;  %12257 = vrot.lane.b32.xlu0 %v27379_v0, %s19950_s15 }
 0x559   :  { %12229 = vrot.lane.b32.xlu1 %v27416_v37, %s19952_s17  ;;  %v27438_v3 = vpop.permute.xlu0 %12241 }
 0x55b   :  { %v27440_v31 = vpop.permute.xlu1 %12213  ;;  %12289 = vrot.lane.b32.xlu0 %v27379_v0, %s19953_s18 }
 0x55d   :  { %12293 = vrot.lane.b32.xlu1 %v27416_v37, %s19953_s18  ;;  %v27448_v43 = vpop.permute.xlu0 %12273 }
 0x55f   :  { %v27450_v58 = vpop.permute.xlu1 %12277  ;;  %12321 = vrot.lane.b32.xlu0 %v27379_v0, %s19951_s16 }
 0x561   :  { %12357 = vrot.lane.b32.xlu1 %v27416_v37, %s19954_s19  ;;  %v27456_v18 = vpop.permute.xlu0 %12305 }
 0x563   :  { %v27460_v16 = vpop.permute.xlu1 %12341  ;;  %12353 = vrot.lane.b32.xlu0 %v27379_v0, %s19954_s19  ;;  %v12010_v0 = vsel %vm11997_vm9, %v11993_v15, %v27155_v25 }
 0x564   :  { %v12027_v29 = vsel %vm12014_vm10, %v12010_v0, %v27170_v60  ;;  %v12011_v0 = vsel %vm11997_vm9, %v11994_v53, %v27201_v50 }
 0x565   :  { %12167 = vrot.lane.b32.xlu1 %v27458_v56, %s19949_s14  ;;  %v27466_v30 = vpop.permute.xlu0 %12337  ;;  %v12044_v25 = vsel %vm12031_vm11, %v12027_v29, %v27147_v57  ;;  %v12028_v7 = vsel %vm12014_vm10, %v12011_v0, %v27194_v17 }
 0x566   :  { %v12061_v34 = vsel %vm12048_vm12, %v12044_v25, %v27186_v4  ;;  %v12045_v50 = vsel %vm12031_vm11, %v12028_v7, %v27211_v13  ;;  %v11961_v13 = vsel %vm11946_vm6, %v26809_v62, %v27248_v47 }
 0x567   :  { %v27468_v22 = vpop.permute.xlu1 %12151  ;;  %12163 = vrot.lane.b32.xlu0 %v27373_v19, %s19949_s14  ;;  %v12093_v45 = vrot.slane %v12061_v34, 1  ;;  %v12062_v17 = vsel %vm12048_vm12, %v12045_v50, %v27235_v35  ;;  %v11978_v0 = vsel %vm11963_vm7, %v11961_v13, %v27265_v38 }
 0x568   :  { %v11995_v35 = vsel %vm11980_vm8, %v11978_v0, %v27298_v14 }
 0x569   :  { %12199 = vrot.lane.b32.xlu1 %v27458_v56, %s19948_s2  ;;  %v27474_v24 = vpop.permute.xlu0 %12147  ;;  %v27542_v55 = vmax.f32 %v12061_v34, %v12093_v45  ;;  %v12094_v45 = vrot.slane %v12062_v17, 1  ;;  %v12012_v62 = vsel %vm11997_vm9, %v11995_v35, %v27237_v49 }
 0x56a   :  { %v12029_v14 = vsel %vm12014_vm10, %v12012_v62, %v27257_v44 }
 0x56b   :  { %v27481_v11 = vpop.permute.xlu1 %12183  ;;  %12227 = vrot.lane.b32.xlu0 %v27373_v19, %s19952_s17 }
 0x56d   :  { %12231 = vrot.lane.b32.xlu1 %v27458_v56, %s19952_s17  ;;  %v27489_v28 = vpop.permute.xlu0 %12211 }
 0x56f   :  { %v27493_v5 = vpop.permute.xlu1 %12215  ;;  %12291 = vrot.lane.b32.xlu0 %v27373_v19, %s19953_s18 }
 0x571   :  { %12263 = vrot.lane.b32.xlu1 %v27458_v56, %s19950_s15  ;;  %v27499_v6 = vpop.permute.xlu0 %12275 }
 0x573   :  { %v27506_v63 = vpop.permute.xlu1 %12247  ;;  %12355 = vrot.lane.b32.xlu0 %v27373_v19, %s19954_s19 }
 0x575   :  { %12295 = vrot.lane.b32.xlu1 %v27458_v56, %s19953_s18  ;;  %v27516_v15 = vpop.permute.xlu0 %12339 }
 0x577   :  { %v27518_v60 = vpop.permute.xlu1 %12279  ;;  %12197 = vrot.lane.b32.xlu0 %v27416_v37, %s19948_s2 }
 0x579   :  { %12327 = vrot.lane.b32.xlu1 %v27458_v56, %s19951_s16  ;;  %v27528_v57 = vpop.permute.xlu0 %12181 }
 0x57b   :  { %v27532_v29 = vpop.permute.xlu1 %12311  ;;  %12261 = vrot.lane.b32.xlu0 %v27416_v37, %s19950_s15 }
 0x57d   :  { %12359 = vrot.lane.b32.xlu1 %v27458_v56, %s19954_s19  ;;  %v27538_v4 = vpop.permute.xlu0 %12245  ;;  %v27579_v56 = vmax.f32 %v12062_v17, %v12094_v45  ;;  %v11962_v17 = vsel %vm11946_vm6, %v26917_v41, %v27307_v32  ;;  %v12046_v45 = vsel %vm12031_vm11, %v12029_v14, %v27276_v61  ;;  %v12371_v14 = vrot.slane %v27009_v52, 6 }
 0x57e   :  { %v11979_v49 = vsel %vm11963_vm7, %v11962_v17, %v27363_v21  ;;  %v12063_v32 = vsel %vm12048_vm12, %v12046_v45, %v27284_v48  ;;  %v12375_v45 = vrot.slane %v27135_v33, 4  ;;  %v12411_v33 = vrot.slane %v27489_v28, 7 }
 0x57f   :  { %v27544_v25 = vpop.permute.xlu1 %12343  ;;  %12325 = vrot.lane.b32.xlu0 %v27416_v37, %s19951_s16  ;;  %v11996_v0 = vsel %vm11980_vm8, %v11979_v49, %v27385_v10  ;;  %v12095_v10 = vrot.slane %v12063_v32, 1 }
 0x580   :  { %v12013_v21 = vsel %vm11997_vm9, %v11996_v0, %v27357_v51 }
 0x581   :  { %12201 = vrot.lane.b32.xlu1 %v27542_v55, %s19948_s2  ;;  %v27552_v9 = vpop.permute.xlu0 %12309  ;;  %v12030_v35 = vsel %vm12014_vm10, %v12013_v21, %v27369_v8  ;;  %v27635_v17 = vmax.f32 %v12063_v32, %v12095_v10  ;;  %v12373_v8 = vrot.slane %v27051_v42, 5  ;;  %v12383_v32 = vrot.slane %v27474_v24, 7 }
 0x582   :  { %v12047_v51 = vsel %vm12031_vm11, %v12030_v35, %v27288_v20  ;;  %v12377_v20 = vrot.slane %v27172_v54, 3  ;;  %v12372_v21 = vsel %vm9107_vm14, %v12371_v14, %v26927_v26  ;;  %v12379_v42 = vrot.slane %v27225_v12, 2 }
 0x583   :  { %v27554_v53 = vpop.permute.xlu1 %12185  ;;  %12169 = vrot.lane.b32.xlu0 %v27542_v55, %s19949_s14  ;;  %v12064_v0 = vsel %vm12048_vm12, %v12047_v51, %v27375_v2  ;;  %v12374_v2 = vsel %vm9115_vm3, %v12373_v8, %v12372_v21  ;;  %v12381_v35 = vrot.slane %v27272_v27, 1  ;;  %v12397_v12 = vrot.slane %v27390_v1, 7 }
 0x584   :  { %v12096_v54 = vrot.slane %v12064_v0, 1  ;;  %v12376_v24 = vsel %vm9108_vm15, %v12375_v45, %v12374_v2  ;;  %v12384_v51 = vsel %vm9113_vm2, %v12383_v32, %v27400_v40  ;;  %v12439_v14 = vrot.slane %v27499_v6, 7 }
 0x585   :  { %12265 = vrot.lane.b32.xlu1 %v27542_v55, %s19950_s15  ;;  %v27562_v34 = vpop.permute.xlu0 %12153  ;;  %v12378_v28 = vsel %vm9117_vm4, %v12377_v20, %v12376_v24  ;;  %v12425_v27 = vrot.slane %v27402_v46, 7  ;;  %v12385_v45 = vrot.slane %v27430_v36, 6  ;;  %v12412_v21 = vsel %vm9113_vm2, %v12411_v33, %v27426_v39 }
 0x586   :  { %v12380_v8 = vsel %vm9110_vm0, %v12379_v42, %v12378_v28  ;;  %v27683_v40 = vmax.f32 %v12064_v0, %v12096_v54  ;;  %v12398_v6 = vsel %vm9113_vm2, %v12397_v12, %v27413_v23  ;;  %v12413_v46 = vrot.slane %v27440_v31, 6 }
 0x587   :  { %v27569_v7 = vpop.permute.xlu1 %12249  ;;  %12233 = vrot.lane.b32.xlu0 %v27542_v55, %s19952_s17  ;;  %v27681_v1 = vsel %vm9119_vm5, %v12381_v35, %v12380_v8  ;;  %v12467_v36 = vrot.slane %v27516_v15, 7  ;;  %v12453_v20 = vrot.slane %v27420_v59, 7  ;;  %v12426_v39 = vsel %vm9113_vm2, %v12425_v27, %v27438_v3 }
 0x588   :  { %v12441_v32 = vrot.slane %v27450_v58, 6  ;;  %v12386_v42 = vsel %vm9107_vm14, %v12385_v45, %v12384_v51  ;;  %v12414_v23 = vsel %vm9107_vm14, %v12413_v46, %v12412_v21  ;;  %v12440_v31 = vsel %vm9113_vm2, %v12439_v14, %v27448_v43 }
 0x589   :  { %12329 = vrot.lane.b32.xlu1 %v27542_v55, %s19951_s16  ;;  %v27577_v50 = vpop.permute.xlu0 %12217  ;;  %v12399_v15 = vrot.slane %v27528_v57, 6  ;;  %v12427_v59 = vrot.slane %v27538_v4, 6  ;;  %v12387_v3 = vrot.slane %v27468_v22, 5  ;;  %v12415_v58 = vrot.slane %v27493_v5, 5 }
 0x58a   :  { %v12443_v33 = vrot.slane %v27518_v60, 5  ;;  %v12455_v35 = vrot.slane %v27552_v9, 6  ;;  %v12469_v24 = vrot.slane %v27460_v16, 6  ;;  %v12454_v43 = vsel %vm9113_vm2, %v12453_v20, %v27456_v18 }
 0x58b   :  { %v27583_v47 = vpop.permute.xlu1 %12313  ;;  %12297 = vrot.lane.b32.xlu0 %v27542_v55, %s19953_s18  ;;  %v12401_v57 = vrot.slane %v27481_v11, 5  ;;  %v12468_v22 = vsel %vm9113_vm2, %v12467_v36, %v27466_v30  ;;  %v12429_v5 = vrot.slane %v27506_v63, 5  ;;  %v12442_v60 = vsel %vm9107_vm14, %v12441_v32, %v12440_v31 }
 0x58c   :  { %v12388_v4 = vsel %vm9115_vm3, %v12387_v3, %v12386_v42  ;;  %v12416_v9 = vsel %vm9115_vm3, %v12415_v58, %v12414_v23  ;;  %v12400_v18 = vsel %vm9107_vm14, %v12399_v15, %v12398_v6  ;;  %v12471_v11 = vrot.slane %v27544_v25, 5 }
 0x58d   :  { %12171 = vrot.lane.b32.xlu1 %v27579_v56, %s19949_s14  ;;  %v27589_v38 = vpop.permute.xlu0 %12281  ;;  %v12428_v28 = vsel %vm9107_vm14, %v12427_v59, %v12426_v39  ;;  %v12403_v30 = vrot.slane %v27554_v53, 4  ;;  %v12444_v63 = vsel %vm9115_vm3, %v12443_v33, %v12442_v60  ;;  %v12470_v12 = vsel %vm9107_vm14, %v12469_v24, %v12468_v22 }
 0x58e   :  { %v12456_v51 = vsel %vm9107_vm14, %v12455_v35, %v12454_v43  ;;  %v12389_v14 = vrot.slane %v27562_v34, 4  ;;  %v12457_v27 = vrot.slane %v27532_v29, 5  ;;  %v12431_v25 = vrot.slane %v27569_v7, 4 }
 0x58f   :  { %v27596_v13 = vpop.permute.xlu1 %12155  ;;  %12361 = vrot.lane.b32.xlu0 %v27542_v55, %s19954_s19  ;;  %v12459_v45 = vrot.slane %v27583_v47, 4  ;;  %v12417_v53 = vrot.slane %v27577_v50, 4  ;;  %v12402_v21 = vsel %vm9115_vm3, %v12401_v57, %v12400_v18  ;;  %v12430_v6 = vsel %vm9115_vm3, %v12429_v5, %v12428_v28 }
 0x590   :  { %v12445_v46 = vrot.slane %v27589_v38, 4  ;;  %v12472_v29 = vsel %vm9115_vm3, %v12471_v11, %v12470_v12  ;;  %v12404_v7 = vsel %vm9108_vm15, %v12403_v30, %v12402_v21  ;;  %v12458_v47 = vsel %vm9115_vm3, %v12457_v27, %v12456_v51 }
 0x591   :  { %12235 = vrot.lane.b32.xlu1 %v27579_v56, %s19952_s17  ;;  %v27608_v44 = vpop.permute.xlu0 %12345  ;;  %v12390_v20 = vsel %vm9108_vm15, %v12389_v14, %v12388_v4  ;;  %v12391_v39 = vrot.slane %v27596_v13, 3  ;;  %v12432_v42 = vsel %vm9108_vm15, %v12431_v25, %v12430_v6  ;;  %v12460_v23 = vsel %vm9108_vm15, %v12459_v45, %v12458_v47  ;;  %v27794_v45 = vld [vmem:[%s29185_s3] sm:$0xff] }
 0x592   :  { %v12418_v31 = vsel %vm9108_vm15, %v12417_v53, %v12416_v9  ;;  %v12473_v13 = vrot.slane %v27608_v44, 4  ;;  %19679 = vmatprep.subr.mxu1 %v27794_v45 }
 0x593   :  { %v27610_v41 = vpop.permute.xlu1 %12219  ;;  %12203 = vrot.lane.b32.xlu0 %v27579_v56, %s19948_s2  ;;  %v12392_v24 = vsel %vm9117_vm4, %v12391_v39, %v12390_v20 }
 0x594   :  { %v12419_v34 = vrot.slane %v27610_v41, 3  ;;  %v12474_v28 = vsel %vm9108_vm15, %v12473_v13, %v12472_v29 }
 0x595   :  { %12299 = vrot.lane.b32.xlu1 %v27579_v56, %s19953_s18  ;;  %v27620_v61 = vpop.permute.xlu0 %12187 }
 0x596   :  { %v12405_v50 = vrot.slane %v27620_v61, 3  ;;  %v12446_v61 = vsel %vm9108_vm15, %v12445_v46, %v12444_v63  ;;  %v12420_v59 = vsel %vm9117_vm4, %v12419_v34, %v12418_v31  ;;  %v30214_v34 = vld [vmem:[#allocation16_spill] sm:$0xff] }
 0x597   :  { %v27624_v62 = vpop.permute.xlu1 %12283  ;;  %12267 = vrot.lane.b32.xlu0 %v27579_v56, %s19950_s15 }
 0x598   :  { %v12447_v3 = vrot.slane %v27624_v62, 3  ;;  %v12406_v58 = vsel %vm9117_vm4, %v12405_v50, %v12404_v7 }
 0x599   :  { %12363 = vrot.lane.b32.xlu1 %v27579_v56, %s19954_s19  ;;  %v27630_v48 = vpop.permute.xlu0 %12251 }
 0x59a   :  { %v12433_v43 = vrot.slane %v27630_v48, 3 }
 0x59b   :  { %v27637_v49 = vpop.permute.xlu1 %12347  ;;  %12331 = vrot.lane.b32.xlu0 %v27579_v56, %s19951_s16 }
 0x59d   :  { %12205 = vrot.lane.b32.xlu1 %v27635_v17, %s19948_s2  ;;  %v27647_v52 = vpop.permute.xlu0 %12315 }
 0x59e   :  { %v12461_v62 = vrot.slane %v27647_v52, 3 }
 0x59f   :  { %v27655_v10 = vpop.permute.xlu1 %12189  ;;  %12173 = vrot.lane.b32.xlu0 %v27635_v17, %s19949_s14 }
 0x5a0   :  { %v12407_v38 = vrot.slane %v27655_v10, 2 }
 0x5a1   :  { %12269 = vrot.lane.b32.xlu1 %v27635_v17, %s19950_s15  ;;  %v27664_v26 = vpop.permute.xlu0 %12157 }
 0x5a2   :  { %v12393_v10 = vrot.slane %v27664_v26, 2  ;;  %v12408_v57 = vsel %vm9110_vm0, %v12407_v38, %v12406_v58  ;;  %v12475_v26 = vrot.slane %v27637_v49, 3  ;;  %v12448_v49 = vsel %vm9117_vm4, %v12447_v3, %v12446_v61 }
 0x5a3   :  { %v27676_v2 = vpop.permute.xlu1 %12253  ;;  %12237 = vrot.lane.b32.xlu0 %v27635_v17, %s19952_s17 }
 0x5a4   :  { %v12435_v4 = vrot.slane %v27676_v2, 2  ;;  %v12394_v48 = vsel %vm9110_vm0, %v12393_v10, %v12392_v24  ;;  %v12476_v14 = vsel %vm9117_vm4, %v12475_v26, %v12474_v28 }
 0x5a5   :  { %12333 = vrot.lane.b32.xlu1 %v27635_v17, %s19951_s16  ;;  %v27696_v0 = vpop.permute.xlu0 %12221 }
 0x5a6   :  { %v12421_v41 = vrot.slane %v27696_v0, 2 }
 0x5a7   :  { %v27707_v54 = vpop.permute.xlu1 %12317  ;;  %12301 = vrot.lane.b32.xlu0 %v27635_v17, %s19953_s18 }
 0x5a8   :  { %v12422_v44 = vsel %vm9110_vm0, %v12421_v41, %v12420_v59  ;;  %v12463_v63 = vrot.slane %v27707_v54, 2  ;;  %v12462_v54 = vsel %vm9117_vm4, %v12461_v62, %v12460_v23 }
 0x5a9   :  { %12175 = vrot.lane.b32.xlu1 %v27683_v40, %s19949_s14  ;;  %v27723_v16 = vpop.permute.xlu0 %12285 }
 0x5aa   :  { %v12449_v9 = vrot.slane %v27723_v16, 2  ;;  %v12464_v47 = vsel %vm9110_vm0, %v12463_v63, %v12462_v54 }
 0x5ab   :  { %v12160_v8 = vpop.permute.xlu1 %12159  ;;  %12365 = vrot.lane.b32.xlu0 %v27635_v17, %s19954_s19 }
 0x5ac   :  { %v12395_v33 = vrot.slane %v12160_v8, 1  ;;  %v12434_v8 = vsel %vm9117_vm4, %v12433_v43, %v12432_v42 }
 0x5ad   :  { %12239 = vrot.lane.b32.xlu1 %v27683_v40, %s19952_s17  ;;  %v12350_v36 = vpop.permute.xlu0 %12349  ;;  %v12436_v53 = vsel %vm9110_vm0, %v12435_v4, %v12434_v8 }
 0x5ae   :  { %v12477_v18 = vrot.slane %v12350_v36, 2  ;;  %v12396_v52 = vsel %vm9119_vm5, %v12395_v33, %v12394_v48 }
 0x5af   :  { %v12224_v32 = vpop.permute.xlu1 %12223  ;;  %12207 = vrot.lane.b32.xlu0 %v27683_v40, %s19948_s2 }
 0x5b0   :  { %v12423_v15 = vrot.slane %v12224_v32, 1  ;;  %v12478_v21 = vsel %vm9110_vm0, %v12477_v18, %v12476_v14 }
 0x5b1   :  { %12303 = vrot.lane.b32.xlu1 %v27683_v40, %s19953_s18  ;;  %v12192_v0 = vpop.permute.xlu0 %12191 }
 0x5b2   :  { %v12409_v35 = vrot.slane %v12192_v0, 1  ;;  %v12424_v5 = vsel %vm9119_vm5, %v12423_v15, %v12422_v44 }
 0x5b3   :  { %v12288_v22 = vpop.permute.xlu1 %12287  ;;  %12271 = vrot.lane.b32.xlu0 %v27683_v40, %s19950_s15  ;;  %v12625_v2 = vcombine.low %v12396_v52, %v12424_v5  ;;  %v12626_v46 = vcombine.high %v12396_v52, %v12424_v5 }
 0x5b4   :  { %v12410_v60 = vsel %vm9119_vm5, %v12409_v35, %v12408_v57  ;;  %v12451_v12 = vrot.slane %v12288_v22, 1 }
 0x5b5   :  { %12367 = vrot.lane.b32.xlu1 %v27683_v40, %s19954_s19  ;;  %v12256_v11 = vpop.permute.xlu0 %12255  ;;  %v12609_v30 = vcombine.low %v27681_v1, %v12410_v60  ;;  %v12610_v51 = vcombine.high %v27681_v1, %v12410_v60  ;;  %v12450_v1 = vsel %vm9110_vm0, %v12449_v9, %v12448_v49  ;;  %v12633_v50 = vrot.slane %v12625_v2, %v30214_v34  ;;  %v30215_v60 = vld [vmem:[#allocation38_spill] sm:$0xff] }
 0x5b6   :  { %v12437_v25 = vrot.slane %v12256_v11, 1  ;;  %v12452_v20 = vsel %vm9119_vm5, %v12451_v12, %v12450_v1  ;;  %v12640_v59 = vrot.slane %v12626_v46, %v30214_v34 }
 0x5b7   :  { %v12352_v16 = vpop.permute.xlu1 %12351  ;;  %12335 = vrot.lane.b32.xlu0 %v27683_v40, %s19951_s16  ;;  %v12617_v36 = vrot.slane %v12609_v30, %v30214_v34  ;;  %v12624_v39 = vrot.slane %v12610_v51, %v30214_v34 }
 0x5b8   :  { %v12479_v27 = vrot.slane %v12352_v16, 1  ;;  %v12438_v42 = vsel %vm9119_vm5, %v12437_v25, %v12436_v53 }
 0x5b9   :  { %v12320_v6 = vpop.permute.xlu0 %12319  ;;  %v12673_v13 = vcombine.low %v12617_v36, %v12633_v50  ;;  %v12674_v10 = vcombine.high %v12617_v36, %v12633_v50  ;;  %v12689_v24 = vcombine.low %v12624_v39, %v12640_v59  ;;  %v12690_v43 = vcombine.high %v12624_v39, %v12640_v59 }
 0x5ba   :  { %v12480_v29 = vsel %vm9119_vm5, %v12479_v27, %v12478_v21  ;;  %v12465_v7 = vrot.slane %v12320_v6, 1 }
 0x5bb   :  { %v12196_v38 = vpop.permute.xlu1 %12195  ;;  %v12657_v41 = vcombine.low %v12452_v20, %v12480_v29  ;;  %v12658_v32 = vcombine.high %v12452_v20, %v12480_v29  ;;  %v12681_v4 = vrot.slane %v12673_v13, %v30215_v60  ;;  %v12688_v48 = vrot.slane %v12674_v10, %v30215_v60  ;;  %v12945_v29 = vld [vmem:[%s29185_s3 + $0x30] sm:$0xff] }
 0x5bc   :  { %v12466_v23 = vsel %vm9119_vm5, %v12465_v7, %v12464_v47  ;;  %v12509_v57 = vrot.slane %v12196_v38, 7  ;;  %v12697_v30 = vrot.slane %v12689_v24, %v30215_v60  ;;  %v12704_v63 = vrot.slane %v12690_v43, %v30215_v60  ;;  %19809 = vmatprep.subr.mxu0 %v12945_v29 }
 0x5bd   :  { %v12641_v31 = vcombine.low %v12438_v42, %v12466_v23  ;;  %v12642_v15 = vcombine.high %v12438_v42, %v12466_v23  ;;  %v27809_v61 = vpop.permute.xlu0 %12161  ;;  %v12665_v0 = vrot.slane %v12657_v41, %v30214_v34  ;;  %v12672_v3 = vrot.slane %v12658_v32, %v30214_v34  ;;  %v27859_v41 = vld [vmem:[%s29185_s3 + $0x10] sm:$0xff] }
 0x5bf   :  { %v12649_v58 = vrot.slane %v12641_v31, %v30214_v34  ;;  %v12656_v33 = vrot.slane %v12642_v15, %v30214_v34  ;;  %v12260_v35 = vpop.permute.xlu1 %12259 }
 0x5c0   :  { %v12537_v1 = vrot.slane %v12260_v35, 7 }
 0x5c1   :  { %v12705_v44 = vcombine.low %v12649_v58, %v12665_v0  ;;  %v12706_v22 = vcombine.high %v12649_v58, %v12665_v0  ;;  %v12721_v26 = vcombine.low %v12656_v33, %v12672_v3  ;;  %v12722_v62 = vcombine.high %v12656_v33, %v12672_v3  ;;  %v12194_v5 = vpop.permute.xlu0 %12193  ;;  %v12973_v0 = vld [vmem:[#allocation2 + $0xa1] sm:$0xff] }
 0x5c2   :  { %v27819_v9 = vsel %vm9113_vm2, %v12509_v57, %v12194_v5 }
 0x5c3   :  { %v12713_v18 = vrot.slane %v12705_v44, %v30215_v60  ;;  %v12720_v11 = vrot.slane %v12706_v22, %v30215_v60  ;;  %v12729_v28 = vrot.slane %v12721_v26, %v30215_v60  ;;  %v12736_v49 = vrot.slane %v12722_v62, %v30215_v60  ;;  %v12324_v52 = vpop.permute.xlu1 %12323 }
 0x5c4   :  { %v12565_v20 = vrot.slane %v12324_v52, 7 }
 0x5c5   :  { %v12737_v2 = vcombine.low %v12681_v4, %v12713_v18  ;;  %v12738_v12 = vcombine.high %v12681_v4, %v12713_v18  ;;  %v12739_v51 = vcombine.low %v12688_v48, %v12720_v11  ;;  %v12740_v16 = vcombine.high %v12688_v48, %v12720_v11  ;;  %v27827_v14 = vpop.permute.xlu0 %12225 }
 0x5c6   :  { %v12741_v8 = vcombine.low %v12697_v30, %v12729_v28  ;;  %v12742_v27 = vcombine.high %v12697_v30, %v12729_v28  ;;  %v12743_v25 = vcombine.low %v12704_v63, %v12736_v49  ;;  %v12744_v54 = vcombine.high %v12704_v63, %v12736_v49 }
 0x5c7   :  { %12923 = vst.msk [vmem:[#allocation2 + $0x11] sm:$0xff] %vm11946_vm6, %v12737_v2  ;;  %12924 = vst.msk [vmem:[#allocation2 + $0x21] sm:$0xff] %vm11946_vm6, %v12738_v12  ;;  %v12166_v53 = vpop.permute.xlu1 %12165 }
 0x5c8   :  { %12925 = vst.msk [vmem:[#allocation2 + $0x31] sm:$0xff] %vm11946_vm6, %v12739_v51  ;;  %12926 = vst.msk [vmem:[#allocation2 + $0x41] sm:$0xff] %vm11946_vm6, %v12740_v16  ;;  %v12497_v58 = vrot.slane %v12166_v53, 6 }
 0x5c9   :  { %12927 = vst.msk [vmem:[#allocation2 + $0x51] sm:$0xff] %vm11946_vm6, %v12741_v8  ;;  %12928 = vst.msk [vmem:[#allocation2 + $0x61] sm:$0xff] %vm11946_vm6, %v12742_v27  ;;  %v12258_v21 = vpop.permute.xlu0 %12257 }
 0x5ca   :  { %12929 = vst.msk [vmem:[#allocation2 + $0x71] sm:$0xff] %vm11946_vm6, %v12743_v25  ;;  %12930 = vst.msk [vmem:[#allocation2 + $0x81] sm:$0xff] %vm11946_vm6, %v12744_v54  ;;  %v27838_v6 = vsel %vm9113_vm2, %v12537_v1, %v12258_v21 }
 0x5cb   :  { %v12230_v46 = vpop.permute.xlu1 %12229 }
 0x5cc   :  { %v12525_v62 = vrot.slane %v12230_v46, 6 }
 0x5cd   :  { %v12290_v36 = vpop.permute.xlu0 %12289 }
 0x5ce   :  { %v12966_v7 = vld [vmem:[#allocation2 + $0x11] sm:$0xff]  ;;  %v27843_v47 = vld [vmem:[#allocation2 + $0x21] sm:$0xff] }
 0x5cf   :  { %v12294_v50 = vpop.permute.xlu1 %12293  ;;  %19656 = vmatmul.mubr.msk.f32.vlgmr.msra.gmra.mxu1 %vm11946_vm6, %v12966_v7  ;;  %19759 = vmatprep.mubr.msk.f32.mxu0 %vm11946_vm6, %v12966_v7  ;;  %v27851_v39 = vld [vmem:[#allocation2 + $0x31] sm:$0xff]  ;;  %v27867_v23 = vld [vmem:[#allocation2 + $0x41] sm:$0xff] }
 0x5d0   :  { %19658 = vmatprep.mubr.msk.f32.mxu1 %vm11946_vm6, %v27843_v47  ;;  %19760 = vmatmul.mubr.msk.f32.vlgmr.msra.gmra.mxu0 %vm11946_vm6, %v27843_v47  ;;  %v27879_v59 = vld [vmem:[#allocation2 + $0x61] sm:$0xff]  ;;  %v12553_v49 = vrot.slane %v12294_v50, 6 }
 0x5d1   :  { %19762 = vmatprep.mubr.msk.f32.mxu0 %vm11946_vm6, %v27851_v39  ;;  %v12322_v38 = vpop.permute.xlu0 %12321  ;;  %19680 = vmatpush3.msra.mxu1 %v27794_v45  ;;  %v27873_v45 = vld [vmem:[#allocation2 + $0x51] sm:$0xff]  ;;  %v27891_v35 = vld [vmem:[#allocation2 + $0x81] sm:$0xff] }
 0x5d2   :  { %v27862_v32 = vsel %vm9113_vm2, %v12565_v20, %v12322_v38  ;;  %19705 = vmatprep.subr.mxu1 %v27859_v41  ;;  %19810 = vmatpush3.msra.mxu0 %v12945_v29  ;;  %v27885_v13 = vld [vmem:[#allocation2 + $0x71] sm:$0xff]  ;;  %v27920_v29 = vld [vmem:[%s29185_s3 + $0x40] sm:$0xff] }
 0x5d3   :  { %v12358_v42 = vpop.permute.xlu1 %12357  ;;  %19659 = vmatmul.mubr.msk.f32.gmra.mxu1 %vm11946_vm6, %v27851_v39  ;;  %19861 = vmatprep.subr.mxu0 %v27920_v29 }
 0x5d4   :  { %19661 = vmatprep.mubr.msk.f32.mxu1 %vm11946_vm6, %v27867_v23  ;;  %19763 = vmatmul.mubr.msk.f32.gmra.mxu0 %vm11946_vm6, %v27867_v23  ;;  %v12581_v51 = vrot.slane %v12358_v42, 6 }
 0x5d5   :  { %19765 = vmatprep.mubr.msk.f32.mxu0 %vm11946_vm6, %v27873_v45  ;;  %v12354_v31 = vpop.permute.xlu0 %12353 }
 0x5d7   :  { %v12168_v15 = vpop.permute.xlu1 %12167  ;;  %19662 = vmatmul.mubr.msk.f32.gmra.mxu1 %vm11946_vm6, %v27873_v45 }
 0x5d8   :  { %19664 = vmatprep.mubr.msk.f32.mxu1 %vm11946_vm6, %v27879_v59  ;;  %19766 = vmatmul.mubr.msk.f32.gmra.mxu0 %vm11946_vm6, %v27879_v59  ;;  %v12499_v24 = vrot.slane %v12168_v15, 5 }
 0x5d9   :  { %19768 = vmatprep.mubr.msk.f32.mxu0 %vm11946_vm6, %v27885_v13  ;;  %v12164_v10 = vpop.permute.xlu0 %12163 }
 0x5da   :  { %v12495_v3 = vrot.slane %v12164_v10, 7 }
 0x5db   :  { %v12200_v33 = vpop.permute.xlu1 %12199  ;;  %19665 = vmatmul.mubr.msk.f32.gmra.mxu1 %vm11946_vm6, %v27885_v13 }
 0x5dc   :  { %v12496_v43 = vsel %vm9113_vm2, %v12495_v3, %v27809_v61  ;;  %19769 = vmatmul.mubr.msk.f32.gmra.mxu0 %vm11946_vm6, %v27891_v35  ;;  %19667 = vmatprep.mubr.msk.f32.mxu1 %vm11946_vm6, %v12973_v0  ;;  %v12513_v54 = vrot.slane %v12200_v33, 5 }
 0x5dd   :  { %v12498_v57 = vsel %vm9107_vm14, %v12497_v58, %v12496_v43  ;;  %v12228_v44 = vpop.permute.xlu0 %12227 }
 0x5de   :  { %v12523_v22 = vrot.slane %v12228_v44, 7  ;;  %v27900_v26 = vsel %vm9115_vm3, %v12499_v24, %v12498_v57 }
 0x5df   :  { %v12232_v5 = vpop.permute.xlu1 %12231 }
 0x5e0   :  { %v12527_v4 = vrot.slane %v12232_v5, 5  ;;  %v12524_v48 = vsel %vm9113_vm2, %v12523_v22, %v27827_v14 }
 0x5e1   :  { %v12526_v61 = vsel %vm9107_vm14, %v12525_v62, %v12524_v48  ;;  %v12292_v18 = vpop.permute.xlu0 %12291  ;;  %v12483_v48 = vrot.slane %v27416_v37, 6 }
 0x5e2   :  { %v12551_v11 = vrot.slane %v12292_v18, 7  ;;  %v27906_v28 = vsel %vm9115_vm3, %v12527_v4, %v12526_v61  ;;  %v12481_v4 = vrot.slane %v27373_v19, 7  ;;  %v30216_v18 = vld [vmem:[#allocation33_spill] sm:$0xff] }
 0x5e3   :  { %v12264_v52 = vpop.permute.xlu1 %12263 }
 0x5e4   :  { %v12552_v30 = vsel %vm9113_vm2, %v12551_v11, %v12290_v36  ;;  %v12541_v7 = vrot.slane %v12264_v52, 5  ;;  %v12485_v11 = vrot.slane %v30216_v18, 5 }
 0x5e5   :  { %v27910_v63 = vsel %vm9107_vm14, %v12553_v49, %v12552_v30  ;;  %v12356_v2 = vpop.permute.xlu0 %12355  ;;  %v12487_v49 = vrot.slane %v27542_v55, 4 }
 0x5e6   :  { %v12579_v12 = vrot.slane %v12356_v2, 7  ;;  %v30217_v2 = vld [vmem:[#allocation84_spill] sm:$0xff] }
 0x5e7   :  { %v12296_v16 = vpop.permute.xlu1 %12295 }
 0x5e8   :  { %v12580_v14 = vsel %vm9113_vm2, %v12579_v12, %v12354_v31  ;;  %v12482_v12 = vsel %vm9113_vm2, %v12481_v4, %v30217_v2  ;;  %v12555_v19 = vrot.slane %v12296_v16, 5 }
 0x5e9   :  { %v12198_v8 = vpop.permute.xlu0 %12197  ;;  %v12582_v27 = vsel %vm9107_vm14, %v12581_v51, %v12580_v14  ;;  %v12489_v51 = vrot.slane %v27579_v56, 3  ;;  %v12484_v14 = vsel %vm9107_vm14, %v12483_v48, %v12482_v12 }
 0x5ea   :  { %v12511_v25 = vrot.slane %v12198_v8, 6  ;;  %v12491_v8 = vrot.slane %v27635_v17, 2  ;;  %v12486_v37 = vsel %vm9115_vm3, %v12485_v11, %v12484_v14  ;;  %v12556_v4 = vsel %vm9115_vm3, %v12555_v19, %v27910_v63 }
 0x5eb   :  { %v12328_v53 = vpop.permute.xlu1 %12327  ;;  %v12488_v55 = vsel %vm9108_vm15, %v12487_v49, %v12486_v37 }
 0x5ec   :  { %v12512_v1 = vsel %vm9107_vm14, %v12511_v25, %v27819_v9  ;;  %v12490_v56 = vsel %vm9117_vm4, %v12489_v51, %v12488_v55 }
 0x5ed   :  { %v12262_v21 = vpop.permute.xlu0 %12261  ;;  %v12514_v46 = vsel %vm9115_vm3, %v12513_v54, %v12512_v1  ;;  %v12493_v54 = vrot.slane %v27683_v40, 1 }
 0x5ee   :  { %v12539_v36 = vrot.slane %v12262_v21, 6 }
 0x5ef   :  { %v12360_v50 = vpop.permute.xlu1 %12359 }
 0x5f0   :  { %v12540_v20 = vsel %vm9107_vm14, %v12539_v36, %v27838_v6  ;;  %v12583_v1 = vrot.slane %v12360_v50, 5 }
 0x5f1   :  { %v12326_v38 = vpop.permute.xlu0 %12325  ;;  %v12542_v42 = vsel %vm9115_vm3, %v12541_v7, %v12540_v20  ;;  %v12569_v20 = vrot.slane %v12328_v53, 5 }
 0x5f2   :  { %v12567_v52 = vrot.slane %v12326_v38, 6  ;;  %v12492_v38 = vsel %vm9110_vm0, %v12491_v8, %v12490_v56  ;;  %v12584_v18 = vsel %vm9115_vm3, %v12583_v1, %v12582_v27 }
 0x5f3   :  { %v12202_v9 = vpop.permute.xlu1 %12201 }
 0x5f4   :  { %v12515_v21 = vrot.slane %v12202_v9, 4  ;;  %v12568_v36 = vsel %vm9107_vm14, %v12567_v52, %v27862_v32  ;;  %v12494_v9 = vsel %vm9119_vm5, %v12493_v54, %v12492_v38 }
 0x5f5   :  { %v12170_v31 = vpop.permute.xlu0 %12169  ;;  %v12570_v32 = vsel %vm9115_vm3, %v12569_v20, %v12568_v36 }
 0x5f6   :  { %v12501_v16 = vrot.slane %v12170_v31, 4  ;;  %v12516_v53 = vsel %vm9108_vm15, %v12515_v21, %v12514_v46 }
 0x5f7   :  { %v12266_v15 = vpop.permute.xlu1 %12265 }
 0x5f8   :  { %v12543_v17 = vrot.slane %v12266_v15, 4 }
 0x5f9   :  { %v12234_v10 = vpop.permute.xlu0 %12233 }
 0x5fa   :  { %v12529_v50 = vrot.slane %v12234_v10, 4  ;;  %v12544_v63 = vsel %vm9108_vm15, %v12543_v17, %v12542_v42  ;;  %v12502_v10 = vsel %vm9108_vm15, %v12501_v16, %v27900_v26 }
 0x5fb   :  { %v12330_v0 = vpop.permute.xlu1 %12329 }
 0x5fc   :  { %v12571_v40 = vrot.slane %v12330_v0, 4 }
 0x5fd   :  { %v27926_v3 = vpop.permute.xlu0 %12297 }
 0x5fe   :  { %v12557_v31 = vrot.slane %v27926_v3, 4  ;;  %v12572_v27 = vsel %vm9108_vm15, %v12571_v40, %v12570_v32 }
 0x5ff   :  { %v12172_v58 = vpop.permute.xlu1 %12171 }
 0x600   :  { %v12503_v11 = vrot.slane %v12172_v58, 3  ;;  %v12530_v58 = vsel %vm9108_vm15, %v12529_v50, %v27906_v28 }
 0x601   :  { %v27928_v33 = vpop.permute.xlu0 %12361 }
 0x602   :  { %v12585_v46 = vrot.slane %v27928_v33, 4 }
 0x603   :  { %v12236_v24 = vpop.permute.xlu1 %12235 }
 0x604   :  { %v12531_v49 = vrot.slane %v12236_v24, 3  ;;  %v12586_v54 = vsel %vm9108_vm15, %v12585_v46, %v12584_v18 }
 0x605   :  { %v27930_v43 = vpop.permute.xlu0 %12203 }
 0x606   :  { %v12517_v0 = vrot.slane %v27930_v43, 3  ;;  %v12532_v42 = vsel %vm9117_vm4, %v12531_v49, %v12530_v58  ;;  %v12558_v43 = vsel %vm9108_vm15, %v12557_v31, %v12556_v4 }
 0x607   :  { %v27932_v57 = vpop.permute.xlu1 %12299 }
 0x608   :  { %v12518_v33 = vsel %vm9117_vm4, %v12517_v0, %v12516_v53 }
 0x609   :  { %v27934_v44 = vpop.permute.xlu0 %12267 }
 0x60a   :  { %v12545_v36 = vrot.slane %v27934_v44, 3 }
 0x60b   :  { %v27936_v6 = vpop.permute.xlu1 %12363 }
 0x60c   :  { %v12587_v51 = vrot.slane %v27936_v6, 3 }
 0x60d   :  { %v27938_v22 = vpop.permute.xlu0 %12331 }
 0x60e   :  { %v12588_v17 = vsel %vm9117_vm4, %v12587_v51, %v12586_v54  ;;  %v12573_v16 = vrot.slane %v27938_v22, 3  ;;  %v12546_v22 = vsel %vm9117_vm4, %v12545_v36, %v12544_v63 }
 0x60f   :  { %v27940_v62 = vpop.permute.xlu1 %12205 }
 0x610   :  { %v12519_v3 = vrot.slane %v27940_v62, 2  ;;  %v12574_v0 = vsel %vm9117_vm4, %v12573_v16, %v12572_v27 }
 0x611   :  { %v12174_v5 = vpop.permute.xlu0 %12173 }
 0x612   :  { %v12505_v15 = vrot.slane %v12174_v5, 2  ;;  %v12504_v5 = vsel %vm9117_vm4, %v12503_v11, %v12502_v10 }
 0x613   :  { %v27944_v61 = vpop.permute.xlu1 %12269 }
 0x614   :  { %v12506_v14 = vsel %vm9110_vm0, %v12505_v15, %v12504_v5  ;;  %v12547_v50 = vrot.slane %v27944_v61, 2 }
 0x615   :  { %v12238_v30 = vpop.permute.xlu0 %12237 }
 0x616   :  { %v12533_v52 = vrot.slane %v12238_v30, 2  ;;  %v12559_v30 = vrot.slane %v27932_v57, 3  ;;  %v12520_v57 = vsel %vm9110_vm0, %v12519_v3, %v12518_v33  ;;  %v12548_v3 = vsel %vm9110_vm0, %v12547_v50, %v12546_v22  ;;  %v12949_v22 = vld [vmem:[#allocation2] sm:$0xff] }
 0x617   :  { %v27953_v25 = vpop.permute.xlu1 %12333 }
 0x618   :  { %v12534_v28 = vsel %vm9110_vm0, %v12533_v52, %v12532_v42  ;;  %v12560_v6 = vsel %vm9117_vm4, %v12559_v30, %v12558_v43 }
 0x619   :  { %v27960_v7 = vpop.permute.xlu0 %12301 }
 0x61a   :  { %v12561_v18 = vrot.slane %v27960_v7, 2 }
 0x61b   :  { %v12176_v48 = vpop.permute.xlu1 %12175 }
 0x61c   :  { %v12507_v12 = vrot.slane %v12176_v48, 1  ;;  %v12575_v48 = vrot.slane %v27953_v25, 2 }
 0x61d   :  { %v12366_v2 = vpop.permute.xlu0 %12365 }
 0x61e   :  { %v12508_v62 = vsel %vm9119_vm5, %v12507_v12, %v12506_v14  ;;  %v12589_v56 = vrot.slane %v12366_v2, 2  ;;  %v12562_v12 = vsel %vm9110_vm0, %v12561_v18, %v12560_v6  ;;  %v12576_v63 = vsel %vm9110_vm0, %v12575_v48, %v12574_v0  ;;  %v12957_v0 = vld [vmem:[#allocation2 + $0xa0] sm:$0xff] }
 0x61f   :  { %v12240_v24 = vpop.permute.xlu1 %12239 }
 0x620   :  { %v12535_v26 = vrot.slane %v12240_v24, 1 }
 0x621   :  { %v12208_v8 = vpop.permute.xlu0 %12207 }
 0x622   :  { %v12536_v19 = vsel %vm9119_vm5, %v12535_v26, %v12534_v28  ;;  %v12521_v37 = vrot.slane %v12208_v8, 1 }
 0x623   :  { %v12761_v1 = vcombine.low %v12508_v62, %v12536_v19  ;;  %v12762_v55 = vcombine.high %v12508_v62, %v12536_v19  ;;  %v12304_v21 = vpop.permute.xlu1 %12303 }
 0x624   :  { %v12522_v20 = vsel %vm9119_vm5, %v12521_v37, %v12520_v57  ;;  %v12563_v32 = vrot.slane %v12304_v21, 1 }
 0x625   :  { %v12745_v38 = vcombine.low %v12494_v9, %v12522_v20  ;;  %v12746_v4 = vcombine.high %v12494_v9, %v12522_v20  ;;  %v12272_v40 = vpop.permute.xlu0 %12271  ;;  %v12769_v11 = vrot.slane %v12761_v1, %v30214_v34  ;;  %v12776_v44 = vrot.slane %v12762_v55, %v30214_v34 }
 0x626   :  { %v12590_v9 = vsel %vm9110_vm0, %v12589_v56, %v12588_v17  ;;  %v12549_v61 = vrot.slane %v12272_v40, 1  ;;  %v12564_v24 = vsel %vm9119_vm5, %v12563_v32, %v12562_v12  ;;  %v14275_v12 = vld [vmem:[#allocation2 + $0x90] sm:$0xff] }
 0x627   :  { %v12753_v49 = vrot.slane %v12745_v38, %v30214_v34  ;;  %v12760_v53 = vrot.slane %v12746_v4, %v30214_v34  ;;  %v12368_v31 = vpop.permute.xlu1 %12367 }
 0x628   :  { %v12591_v15 = vrot.slane %v12368_v31, 1  ;;  %v12550_v30 = vsel %vm9119_vm5, %v12549_v61, %v12548_v3  ;;  %v28081_v61 = vld [vmem:[#allocation2 + $0x10] sm:$0xff] }
 0x629   :  { %v12809_v52 = vcombine.low %v12753_v49, %v12769_v11  ;;  %v12810_v25 = vcombine.high %v12753_v49, %v12769_v11  ;;  %v12825_v2 = vcombine.low %v12760_v53, %v12776_v44  ;;  %v12826_v7 = vcombine.high %v12760_v53, %v12776_v44  ;;  %v12336_v10 = vpop.permute.xlu0 %12335 }
 0x62a   :  { %v12592_v58 = vsel %vm9119_vm5, %v12591_v15, %v12590_v9  ;;  %v12577_v46 = vrot.slane %v12336_v10, 1  ;;  %v28076_v15 = vld [vmem:[#allocation2 + $0x20] sm:$0xff] }
 0x62b   :  { %v12793_v5 = vcombine.low %v12564_v24, %v12592_v58  ;;  %v12794_v42 = vcombine.high %v12564_v24, %v12592_v58  ;;  %v12817_v54 = vrot.slane %v12809_v52, %v30215_v60  ;;  %v12824_v57 = vrot.slane %v12810_v25, %v30215_v60  ;;  %v12942_v52 = vld [vmem:[%s29185_s3 + $0x18] sm:$0xff]  ;;  %v28091_v25 = vld [vmem:[#allocation2 + $0x30] sm:$0xff]  ;;  %v28120_v10 = vld [vmem:[#allocation2 + $0x80] sm:$0xff] }
 0x62c   :  { %v12578_v26 = vsel %vm9119_vm5, %v12577_v46, %v12576_v63  ;;  %v12833_v36 = vrot.slane %v12825_v2, %v30215_v60  ;;  %v12840_v56 = vrot.slane %v12826_v7, %v30215_v60  ;;  %v28095_v2 = vld [vmem:[#allocation2 + $0x40] sm:$0xff] }
 0x62d   :  { %v12777_v43 = vcombine.low %v12550_v30, %v12578_v26  ;;  %v12778_v51 = vcombine.high %v12550_v30, %v12578_v26  ;;  %v12801_v27 = vrot.slane %v12793_v5, %v30214_v34  ;;  %v12808_v14 = vrot.slane %v12794_v42, %v30214_v34  ;;  %v28108_v7 = vld [vmem:[#allocation2 + $0x60] sm:$0xff] }
 0x62e   :  { %v13367_v26 = vld [vmem:[#allocation2 + $0x2] sm:$0xff] }
 0x62f   :  { %v12785_v28 = vrot.slane %v12777_v43, %v30214_v34  ;;  %v12792_v8 = vrot.slane %v12778_v51, %v30214_v34  ;;  %v14283_v43 = vld [vmem:[#allocation2 + $0x130] sm:$0xff]  ;;  %v28174_v51 = vld [vmem:[#allocation2 + $0x22] sm:$0xff] }
 0x631   :  { %v12841_v33 = vcombine.low %v12785_v28, %v12801_v27  ;;  %v12842_v62 = vcombine.high %v12785_v28, %v12801_v27  ;;  %v12857_v19 = vcombine.low %v12792_v8, %v12808_v14  ;;  %v12858_v37 = vcombine.high %v12792_v8, %v12808_v14  ;;  %v28178_v27 = vld [vmem:[#allocation2 + $0x12] sm:$0xff]  ;;  %v12944_v14 = vld [vmem:[%s29185_s3 + $0x28] sm:$0xff] }
 0x632   :  { %v28187_v28 = vld [vmem:[#allocation2 + $0x32] sm:$0xff]  ;;  %v28191_v8 = vld [vmem:[#allocation2 + $0x42] sm:$0xff] }
 0x633   :  { %v12849_v1 = vrot.slane %v12841_v33, %v30215_v60  ;;  %v12856_v55 = vrot.slane %v12842_v62, %v30215_v60  ;;  %v12865_v21 = vrot.slane %v12857_v19, %v30215_v60  ;;  %v12872_v6 = vrot.slane %v12858_v37, %v30215_v60  ;;  %v28199_v33 = vld [vmem:[#allocation2 + $0x52] sm:$0xff]  ;;  %v14722_v62 = vld [vmem:[#allocation2 + $0x62] sm:$0xff] }
 0x634   :  { %v14723_v19 = vld [vmem:[#allocation2 + $0x72] sm:$0xff]  ;;  %v14724_v37 = vld [vmem:[#allocation2 + $0x82] sm:$0xff] }
 0x635   :  { %v12873_v20 = vcombine.low %v12817_v54, %v12849_v1  ;;  %v12874_v17 = vcombine.high %v12817_v54, %v12849_v1  ;;  %v12875_v16 = vcombine.low %v12824_v57, %v12856_v55  ;;  %v12876_v38 = vcombine.high %v12824_v57, %v12856_v55  ;;  %v13375_v54 = vld [vmem:[#allocation2 + $0xa2] sm:$0xff]  ;;  %v14725_v57 = vld [vmem:[#allocation2 + $0x92] sm:$0xff] }
 0x636   :  { %v12877_v4 = vcombine.low %v12833_v36, %v12865_v21  ;;  %v12878_v40 = vcombine.high %v12833_v36, %v12865_v21  ;;  %v12879_v50 = vcombine.low %v12840_v56, %v12872_v6  ;;  %v12880_v48 = vcombine.high %v12840_v56, %v12872_v6 }
 0x637   :  { %12931 = vst.msk [vmem:[#allocation2 + $0xb1] sm:$0xff] %vm11946_vm6, %v12873_v20  ;;  %12932 = vst.msk [vmem:[#allocation2 + $0xc1] sm:$0xff] %vm11946_vm6, %v12874_v17 }
 0x638   :  { %12933 = vst.msk [vmem:[#allocation2 + $0xd1] sm:$0xff] %vm11946_vm6, %v12875_v16  ;;  %12934 = vst.msk [vmem:[#allocation2 + $0xe1] sm:$0xff] %vm11946_vm6, %v12876_v38  ;;  %v14733_v16 = vld [vmem:[#allocation2 + $0x132] sm:$0xff] }
 0x639   :  { %12935 = vst.msk [vmem:[#allocation2 + $0xf1] sm:$0xff] %vm11946_vm6, %v12877_v4  ;;  %12936 = vst.msk [vmem:[#allocation2 + $0x101] sm:$0xff] %vm11946_vm6, %v12878_v40  ;;  %v12946_v38 = vld [vmem:[%s29185_s3 + $0x38] sm:$0xff] }
 0x63a   :  { %12937 = vst.msk [vmem:[#allocation2 + $0x111] sm:$0xff] %vm11946_vm6, %v12879_v50  ;;  %12938 = vst.msk [vmem:[#allocation2 + $0x121] sm:$0xff] %vm11946_vm6, %v12880_v48  ;;  %v14500_v4 = vld [vmem:[#allocation2 + $0x91] sm:$0xff] }
 0x63e   :  { %v12974_v18 = vld [vmem:[#allocation2 + $0xb1] sm:$0xff]  ;;  %v28034_v32 = vld [vmem:[#allocation2 + $0xc1] sm:$0xff] }
 0x63f   :  { %19668 = vmatmul.mubr.msk.f32.gmra.mxu1 %vm11946_vm6, %v12974_v18  ;;  %19771 = vmatprep.mubr.msk.f32.mxu0 %vm11946_vm6, %v12974_v18  ;;  %v28042_v11 = vld [vmem:[#allocation2 + $0xd1] sm:$0xff]  ;;  %v28048_v44 = vld [vmem:[#allocation2 + $0xe1] sm:$0xff] }
 0x640   :  { %19670 = vmatprep.mubr.msk.f32.mxu1 %vm11946_vm6, %v28034_v32  ;;  %19772 = vmatmul.mubr.msk.f32.gmra.mxu0 %vm11946_vm6, %v28034_v32  ;;  %v28054_v49 = vld [vmem:[#allocation2 + $0xf1] sm:$0xff]  ;;  %v28060_v53 = vld [vmem:[#allocation2 + $0x101] sm:$0xff] }
 0x641   :  { %19774 = vmatprep.mubr.msk.f32.mxu0 %vm11946_vm6, %v28042_v11  ;;  %v28066_v31 = vld [vmem:[#allocation2 + $0x111] sm:$0xff]  ;;  %v28072_v9 = vld [vmem:[#allocation2 + $0x121] sm:$0xff] }
 0x642   :  { %v28128_v58 = vld [vmem:[#allocation2 + $0xc0] sm:$0xff]  ;;  %v28132_v46 = vld [vmem:[#allocation2 + $0xb0] sm:$0xff] }
 0x643   :  { %19671 = vmatmul.mubr.msk.f32.gmra.mxu1 %vm11946_vm6, %v28042_v11  ;;  %v28138_v3 = vld [vmem:[#allocation2 + $0xd0] sm:$0xff]  ;;  %v28142_v63 = vld [vmem:[#allocation2 + $0xe0] sm:$0xff] }
 0x644   :  { %19673 = vmatprep.mubr.msk.f32.mxu1 %vm11946_vm6, %v28048_v44  ;;  %19775 = vmatmul.mubr.msk.f32.gmra.mxu0 %vm11946_vm6, %v28048_v44  ;;  %v28150_v24 = vld [vmem:[#allocation2 + $0xf0] sm:$0xff]  ;;  %v28154_v5 = vld [vmem:[#allocation2 + $0x100] sm:$0xff] }
 0x645   :  { %19777 = vmatprep.mubr.msk.f32.mxu0 %vm11946_vm6, %v28054_v49  ;;  %v28162_v42 = vld [vmem:[#allocation2 + $0x110] sm:$0xff]  ;;  %v28166_v30 = vld [vmem:[#allocation2 + $0x120] sm:$0xff] }
 0x646   :  { %v14726_v1 = vld [vmem:[#allocation2 + $0xc2] sm:$0xff]  ;;  %v13376_v55 = vld [vmem:[#allocation2 + $0xb2] sm:$0xff] }
 0x647   :  { %19674 = vmatmul.mubr.msk.f32.gmra.mxu1 %vm11946_vm6, %v28054_v49  ;;  %v14727_v21 = vld [vmem:[#allocation2 + $0xd2] sm:$0xff]  ;;  %v14728_v6 = vld [vmem:[#allocation2 + $0xe2] sm:$0xff] }
 0x648   :  { %19676 = vmatprep.mubr.msk.f32.mxu1 %vm11946_vm6, %v28060_v53  ;;  %19778 = vmatmul.mubr.msk.f32.gmra.mxu0 %vm11946_vm6, %v28060_v53  ;;  %v14729_v36 = vld [vmem:[#allocation2 + $0xf2] sm:$0xff]  ;;  %v14730_v56 = vld [vmem:[#allocation2 + $0x102] sm:$0xff] }
 0x649   :  { %19780 = vmatprep.mubr.msk.f32.mxu0 %vm11946_vm6, %v28066_v31  ;;  %v14731_v20 = vld [vmem:[#allocation2 + $0x112] sm:$0xff]  ;;  %v14732_v17 = vld [vmem:[#allocation2 + $0x122] sm:$0xff] }
 0x64b   :  { %19677 = vmatmul.mubr.msk.f32.gmra.mxu1 %vm11946_vm6, %v28066_v31 }
 0x64c   :  { %19781 = vmatmul.mubr.msk.f32.gmra.mxu0 %vm11946_vm6, %v28072_v9  ;;  %19681 = vmatprep.mubr.msk.f32.mxu1 %vm11946_vm6, %v12949_v22 }
 0x64d   :  { %19811 = vmatprep.mubr.msk.f32.mxu0 %vm11946_vm6, %v28076_v15 }
 0x64f   :  { %19682 = vmatmul.mubr.msk.f32.vlgmr.msra.gmra.mxu1 %vm11946_vm6, %v28081_v61 }
 0x650   :  { %19684 = vmatprep.mubr.msk.f32.mxu1 %vm11946_vm6, %v28076_v15  ;;  %19706 = vmatpush3.msra.mxu1 %v27859_v41  ;;  %v28104_v41 = vld [vmem:[#allocation2 + $0x50] sm:$0xff] }
 0x651   :  { %19812 = vmatmul.mubr.msk.f32.vlgmr.msra.gmra.mxu0 %vm11946_vm6, %v28091_v25  ;;  %19731 = vmatprep.subr.mxu1 %v12942_v52 }
 0x652   :  { %19814 = vmatprep.mubr.msk.f32.mxu0 %vm11946_vm6, %v28095_v2  ;;  %19862 = vmatpush3.msra.mxu0 %v27920_v29  ;;  %v28116_v29 = vld [vmem:[#allocation2 + $0x70] sm:$0xff] }
 0x653   :  { %19685 = vmatmul.mubr.msk.f32.gmra.mxu1 %vm11946_vm6, %v28091_v25 }
 0x654   :  { %19687 = vmatprep.mubr.msk.f32.mxu1 %vm11946_vm6, %v28095_v2 }
 0x655   :  { %19815 = vmatmul.mubr.msk.f32.gmra.mxu0 %vm11946_vm6, %v28104_v41 }
 0x656   :  { %19817 = vmatprep.mubr.msk.f32.mxu0 %vm11946_vm6, %v28108_v7 }
 0x657   :  { %19688 = vmatmul.mubr.msk.f32.gmra.mxu1 %vm11946_vm6, %v28104_v41 }
 0x658   :  { %19690 = vmatprep.mubr.msk.f32.mxu1 %vm11946_vm6, %v28108_v7 }
 0x659   :  { %19818 = vmatmul.mubr.msk.f32.gmra.mxu0 %vm11946_vm6, %v28116_v29 }
 0x65a   :  { %19820 = vmatprep.mubr.msk.f32.mxu0 %vm11946_vm6, %v28120_v10 }
 0x65b   :  { %19691 = vmatmul.mubr.msk.f32.gmra.mxu1 %vm11946_vm6, %v28116_v29 }
 0x65c   :  { %19693 = vmatprep.mubr.msk.f32.mxu1 %vm11946_vm6, %v12957_v0 }
 0x65d   :  { %19821 = vmatmul.mubr.msk.f32.gmra.mxu0 %vm11946_vm6, %v14275_v12 }
 0x65e   :  { %19823 = vmatprep.mubr.msk.f32.mxu0 %vm11946_vm6, %v28128_v58 }
 0x65f   :  { %19694 = vmatmul.mubr.msk.f32.gmra.mxu1 %vm11946_vm6, %v28132_v46 }
 0x660   :  { %19696 = vmatprep.mubr.msk.f32.mxu1 %vm11946_vm6, %v28128_v58 }
 0x661   :  { %19824 = vmatmul.mubr.msk.f32.gmra.mxu0 %vm11946_vm6, %v28138_v3 }
 0x662   :  { %19826 = vmatprep.mubr.msk.f32.mxu0 %vm11946_vm6, %v28142_v63 }
 0x663   :  { %19697 = vmatmul.mubr.msk.f32.gmra.mxu1 %vm11946_vm6, %v28138_v3 }
 0x664   :  { %19699 = vmatprep.mubr.msk.f32.mxu1 %vm11946_vm6, %v28142_v63 }
 0x665   :  { %19827 = vmatmul.mubr.msk.f32.gmra.mxu0 %vm11946_vm6, %v28150_v24 }
 0x666   :  { %19829 = vmatprep.mubr.msk.f32.mxu0 %vm11946_vm6, %v28154_v5 }
 0x667   :  { %19700 = vmatmul.mubr.msk.f32.gmra.mxu1 %vm11946_vm6, %v28150_v24 }
 0x668   :  { %19702 = vmatprep.mubr.msk.f32.mxu1 %vm11946_vm6, %v28154_v5 }
 0x669   :  { %19830 = vmatmul.mubr.msk.f32.gmra.mxu0 %vm11946_vm6, %v28162_v42 }
 0x66a   :  { %19832 = vmatprep.mubr.msk.f32.mxu0 %vm11946_vm6, %v28166_v30 }
 0x66b   :  { %19703 = vmatmul.mubr.msk.f32.gmra.mxu1 %vm11946_vm6, %v28162_v42 }
 0x66c   :  { %19707 = vmatprep.mubr.msk.f32.mxu1 %vm11946_vm6, %v13367_v26 }
 0x66d   :  { %19833 = vmatmul.mubr.msk.f32.gmra.mxu0 %vm11946_vm6, %v14283_v43 }
 0x66e   :  { %19863 = vmatprep.mubr.msk.f32.mxu0 %vm11946_vm6, %v28174_v51 }
 0x66f   :  { %19708 = vmatmul.mubr.msk.f32.vlgmr.msra.gmra.mxu1 %vm11946_vm6, %v28178_v27 }
 0x670   :  { %19710 = vmatprep.mubr.msk.f32.mxu1 %vm11946_vm6, %v28174_v51  ;;  %19732 = vmatpush3.msra.mxu1 %v12942_v52 }
 0x671   :  { %19864 = vmatmul.mubr.msk.f32.vlgmr.msra.gmra.mxu0 %vm11946_vm6, %v28187_v28  ;;  %19783 = vmatprep.subr.mxu1 %v12944_v14 }
 0x672   :  { %19866 = vmatprep.mubr.msk.f32.mxu0 %vm11946_vm6, %v28191_v8 }
 0x673   :  { %19711 = vmatmul.mubr.msk.f32.gmra.mxu1 %vm11946_vm6, %v28187_v28 }
 0x674   :  { %19713 = vmatprep.mubr.msk.f32.mxu1 %vm11946_vm6, %v28191_v8 }
 0x675   :  { %19867 = vmatmul.mubr.msk.f32.gmra.mxu0 %vm11946_vm6, %v28199_v33 }
 0x676   :  { %19869 = vmatprep.mubr.msk.f32.mxu0 %vm11946_vm6, %v14722_v62 }
 0x677   :  { %19714 = vmatmul.mubr.msk.f32.gmra.mxu1 %vm11946_vm6, %v28199_v33 }
 0x678   :  { %19716 = vmatprep.mubr.msk.f32.mxu1 %vm11946_vm6, %v14722_v62 }
 0x679   :  { %19870 = vmatmul.mubr.msk.f32.gmra.mxu0 %vm11946_vm6, %v14723_v19 }
 0x67a   :  { %19872 = vmatprep.mubr.msk.f32.mxu0 %vm11946_vm6, %v14724_v37 }
 0x67b   :  { %19717 = vmatmul.mubr.msk.f32.gmra.mxu1 %vm11946_vm6, %v14723_v19 }
 0x67c   :  { %19719 = vmatprep.mubr.msk.f32.mxu1 %vm11946_vm6, %v13375_v54 }
 0x67d   :  { %19873 = vmatmul.mubr.msk.f32.gmra.mxu0 %vm11946_vm6, %v14725_v57 }
 0x67e   :  { %19875 = vmatprep.mubr.msk.f32.mxu0 %vm11946_vm6, %v14726_v1 }
 0x67f   :  { %19720 = vmatmul.mubr.msk.f32.gmra.mxu1 %vm11946_vm6, %v13376_v55 }
 0x680   :  { %19722 = vmatprep.mubr.msk.f32.mxu1 %vm11946_vm6, %v14726_v1 }
 0x681   :  { %19876 = vmatmul.mubr.msk.f32.gmra.mxu0 %vm11946_vm6, %v14727_v21 }
 0x682   :  { %19878 = vmatprep.mubr.msk.f32.mxu0 %vm11946_vm6, %v14728_v6 }
 0x683   :  { %19723 = vmatmul.mubr.msk.f32.gmra.mxu1 %vm11946_vm6, %v14727_v21 }
 0x684   :  { %19725 = vmatprep.mubr.msk.f32.mxu1 %vm11946_vm6, %v14728_v6 }
 0x685   :  { %19879 = vmatmul.mubr.msk.f32.gmra.mxu0 %vm11946_vm6, %v14729_v36 }
 0x686   :  { %19881 = vmatprep.mubr.msk.f32.mxu0 %vm11946_vm6, %v14730_v56 }
 0x687   :  { %19726 = vmatmul.mubr.msk.f32.gmra.mxu1 %vm11946_vm6, %v14729_v36 }
 0x688   :  { %19728 = vmatprep.mubr.msk.f32.mxu1 %vm11946_vm6, %v14730_v56 }
 0x689   :  { %19882 = vmatmul.mubr.msk.f32.gmra.mxu0 %vm11946_vm6, %v14731_v20 }
 0x68a   :  { %19884 = vmatprep.mubr.msk.f32.mxu0 %vm11946_vm6, %v14732_v17 }
 0x68b   :  { %19729 = vmatmul.mubr.msk.f32.gmra.mxu1 %vm11946_vm6, %v14731_v20 }
 0x68c   :  { %19733 = vmatprep.mubr.msk.f32.mxu1 %vm11946_vm6, %v28081_v61 }
 0x68d   :  { %19885 = vmatmul.mubr.msk.f32.gmra.mxu0 %vm11946_vm6, %v14733_v16 }
 0x68f   :  { %19734 = vmatmul.mubr.msk.f32.vlgmr.msra.gmra.mxu1 %vm11946_vm6, %v28076_v15 }
 0x690   :  { %19736 = vmatprep.mubr.msk.f32.mxu1 %vm11946_vm6, %v28091_v25  ;;  %19784 = vmatpush3.msra.mxu1 %v12944_v14  ;;  %v28315_v22 = vpop.f32.mrf.mxu0 }
 0x691   :  { %19835 = vmatprep.subr.mxu1 %v12946_v38 }
 0x692   :  { %v28317_v61 = vpop.f32.mrf.mxu0 }
 0x693   :  { %19737 = vmatmul.mubr.msk.f32.gmra.mxu1 %vm11946_vm6, %v28095_v2 }
 0x694   :  { %19739 = vmatprep.mubr.msk.f32.mxu1 %vm11946_vm6, %v28104_v41  ;;  %v28319_v2 = vpop.f32.mrf.mxu0 }
 0x697   :  { %19740 = vmatmul.mubr.msk.f32.gmra.mxu1 %vm11946_vm6, %v28108_v7 }
 0x698   :  { %19742 = vmatprep.mubr.msk.f32.mxu1 %vm11946_vm6, %v28116_v29  ;;  %v28321_v29 = vpop.f32.mrf.mxu0 }
 0x69b   :  { %19743 = vmatmul.mubr.msk.f32.gmra.mxu1 %vm11946_vm6, %v28120_v10 }
 0x69c   :  { %19745 = vmatprep.mubr.msk.f32.mxu1 %vm11946_vm6, %v28132_v46 }
 0x69f   :  { %19746 = vmatmul.mubr.msk.f32.gmra.mxu1 %vm11946_vm6, %v28128_v58  ;;  %v28323_v58 = vpop.f32.mrf.mxu0 }
 0x6a0   :  { %19748 = vmatprep.mubr.msk.f32.mxu1 %vm11946_vm6, %v28138_v3 }
 0x6a3   :  { %19749 = vmatmul.mubr.msk.f32.gmra.mxu1 %vm11946_vm6, %v28142_v63 }
 0x6a4   :  { %19751 = vmatprep.mubr.msk.f32.mxu1 %vm11946_vm6, %v28150_v24 }
 0x6a7   :  { %19752 = vmatmul.mubr.msk.f32.gmra.mxu1 %vm11946_vm6, %v28154_v5  ;;  %v28325_v5 = vpop.f32.mrf.mxu0 }
 0x6a8   :  { %19754 = vmatprep.mubr.msk.f32.mxu1 %vm11946_vm6, %v28162_v42 }
 0x6ab   :  { %19755 = vmatmul.mubr.msk.f32.gmra.mxu1 %vm11946_vm6, %v28166_v30 }
 0x6ac   :  { %19785 = vmatprep.mubr.msk.f32.mxu1 %vm11946_vm6, %v28178_v27 }
 0x6af   :  { %19786 = vmatmul.mubr.msk.f32.vlgmr.msra.gmra.mxu1 %vm11946_vm6, %v28174_v51  ;;  %v28327_v51 = vpop.f32.mrf.mxu0 }
 0x6b0   :  { %19788 = vmatprep.mubr.msk.f32.mxu1 %vm11946_vm6, %v28187_v28  ;;  %19836 = vmatpush3.msra.mxu1 %v12946_v38 }
 0x6b3   :  { %19789 = vmatmul.mubr.msk.f32.gmra.mxu1 %vm11946_vm6, %v28191_v8 }
 0x6b4   :  { %19791 = vmatprep.mubr.msk.f32.mxu1 %vm11946_vm6, %v28199_v33  ;;  %v28329_v33 = vpop.f32.mrf.mxu0 }
 0x6b7   :  { %19792 = vmatmul.mubr.msk.f32.gmra.mxu1 %vm11946_vm6, %v14722_v62 }
 0x6b8   :  { %19794 = vmatprep.mubr.msk.f32.mxu1 %vm11946_vm6, %v14723_v19 }
 0x6bb   :  { %19795 = vmatmul.mubr.msk.f32.gmra.mxu1 %vm11946_vm6, %v14724_v37 }
 0x6bc   :  { %19797 = vmatprep.mubr.msk.f32.mxu1 %vm11946_vm6, %v13376_v55 }
 0x6bf   :  { %19798 = vmatmul.mubr.msk.f32.gmra.mxu1 %vm11946_vm6, %v14726_v1 }
 0x6c0   :  { %19800 = vmatprep.mubr.msk.f32.mxu1 %vm11946_vm6, %v14727_v21 }
 0x6c3   :  { %19801 = vmatmul.mubr.msk.f32.gmra.mxu1 %vm11946_vm6, %v14728_v6 }
 0x6c4   :  { %19803 = vmatprep.mubr.msk.f32.mxu1 %vm11946_vm6, %v14729_v36 }
 0x6c7   :  { %19804 = vmatmul.mubr.msk.f32.gmra.mxu1 %vm11946_vm6, %v14730_v56 }
 0x6c8   :  { %19806 = vmatprep.mubr.msk.f32.mxu1 %vm11946_vm6, %v14731_v20 }
 0x6cb   :  { %19807 = vmatmul.mubr.msk.f32.gmra.mxu1 %vm11946_vm6, %v14732_v17 }
 0x6cc   :  { %19837 = vmatprep.mubr.msk.f32.mxu1 %vm11946_vm6, %v27843_v47  ;;  %v19657_v47 = vpop.f32.mrf.mxu1 }
 0x6cf   :  { %19838 = vmatmul.mubr.msk.f32.vlgmr.msra.gmra.mxu1 %vm11946_vm6, %v27851_v39  ;;  %v13095_v39 = vpop.f32.mrf.mxu1 }
 0x6d0   :  { %19840 = vmatprep.mubr.msk.f32.mxu1 %vm11946_vm6, %v27867_v23  ;;  %v14508_v23 = vld [vmem:[#allocation2 + $0x131] sm:$0xff] }
 0x6d3   :  { %19841 = vmatmul.mubr.msk.f32.gmra.mxu1 %vm11946_vm6, %v27873_v45  ;;  %v19660_v45 = vpop.f32.mrf.mxu1 }
 0x6d4   :  { %19843 = vmatprep.mubr.msk.f32.mxu1 %vm11946_vm6, %v27879_v59 }
 0x6d5   :  { %v13105_v59 = vpop.f32.mrf.mxu1 }
 0x6d7   :  { %19844 = vmatmul.mubr.msk.f32.gmra.mxu1 %vm11946_vm6, %v27885_v13  ;;  %v19663_v13 = vpop.f32.mrf.mxu1 }
 0x6d8   :  { %19846 = vmatprep.mubr.msk.f32.mxu1 %vm11946_vm6, %v27891_v35 }
 0x6d9   :  { %v13115_v35 = vpop.f32.mrf.mxu1 }
 0x6db   :  { %19847 = vmatmul.mubr.msk.f32.gmra.mxu1 %vm11946_vm6, %v14500_v4  ;;  %v28313_v40 = vpop.f32.mrf.mxu1 }
 0x6dc   :  { %19849 = vmatprep.mubr.msk.f32.mxu1 %vm11946_vm6, %v28034_v32 }
 0x6dd   :  { %v13125_v50 = vpop.f32.mrf.mxu1 }
 0x6df   :  { %19850 = vmatmul.mubr.msk.f32.gmra.mxu1 %vm11946_vm6, %v28042_v11 }
 0x6e0   :  { %19852 = vmatprep.mubr.msk.f32.mxu1 %vm11946_vm6, %v28048_v44 }
 0x6e3   :  { %19853 = vmatmul.mubr.msk.f32.gmra.mxu1 %vm11946_vm6, %v28054_v49 }
 0x6e4   :  { %19855 = vmatprep.mubr.msk.f32.mxu1 %vm11946_vm6, %v28060_v53 }
 0x6e7   :  { %19856 = vmatmul.mubr.msk.f32.gmra.mxu1 %vm11946_vm6, %v28066_v31 }
 0x6e8   :  { %19858 = vmatprep.mubr.msk.f32.mxu1 %vm11946_vm6, %v28072_v9 }
 0x6eb   :  { %19859 = vmatmul.mubr.msk.f32.gmra.mxu1 %vm11946_vm6, %v14508_v23 }
 0x6ff   :  { %v19669_v48 = vpop.f32.mrf.mxu1 }
 0x700   :  { %v28331_v37 = vpop.f32.mrf.mxu0 }
 0x701   :  { %v13135_v18 = vpop.f32.mrf.mxu1 }
 0x702   :  { %v28335_v36 = vpop.f32.mrf.mxu0 }
 0x703   :  { %v19672_v32 = vpop.f32.mrf.mxu1 }
 0x704   :  { %v28339_v23 = vpop.f32.mrf.mxu0 }
 0x705   :  { %v13145_v11 = vpop.f32.mrf.mxu1 }
 0x707   :  { %v19675_v44 = vpop.f32.mrf.mxu1 }
 0x709   :  { %v13155_v49 = vpop.f32.mrf.mxu1 }
 0x70b   :  { %v19678_v53 = vpop.f32.mrf.mxu1 }
 0x70d   :  { %v13165_v31 = vpop.f32.mrf.mxu1 }
 0x70f   :  { %v19683_v9 = vpop.f32.mrf.mxu1 }
 0x710   :  { %v13294_v57 = vadd.f32 %v19683_v9, %v19657_v47 }
 0x711   :  { %v13288_v15 = vpop.f32.mrf.mxu1 }
 0x712   :  { %v13289_v21 = vadd.f32 %v13288_v15, %v13095_v39  ;;  %v28341_v39 = vpop.f32.mrf.mxu0 }
 0x713   :  { %v19686_v52 = vpop.f32.mrf.mxu1 }
 0x714   :  { %v13304_v20 = vadd.f32 %v19686_v52, %v19660_v45  ;;  %v28346_v9 = vpop.f32.mrf.mxu0 }
 0x715   :  { %v13298_v25 = vpop.f32.mrf.mxu1 }
 0x716   :  { %v13299_v38 = vadd.f32 %v13298_v25, %v13105_v59  ;;  %v28350_v25 = vpop.f32.mrf.mxu0 }
 0x717   :  { %v19689_v41 = vpop.f32.mrf.mxu1 }
 0x719   :  { %v13308_v7 = vpop.f32.mrf.mxu1 }
 0x71b   :  { %v19692_v10 = vpop.f32.mrf.mxu1 }
 0x71d   :  { %v13318_v0 = vpop.f32.mrf.mxu1 }
 0x71e   :  { %v13319_v12 = vadd.f32 %v13318_v0, %v13125_v50 }
 0x71f   :  { %v19695_v46 = vpop.f32.mrf.mxu1 }
 0x720   :  { %v13334_v3 = vadd.f32 %v19695_v46, %v19669_v48  ;;  %v13314_v48 = vadd.f32 %v19689_v41, %v19663_v13  ;;  %v28354_v46 = vpop.f32.mrf.mxu0 }
 0x721   :  { %v13328_v63 = vpop.f32.mrf.mxu1 }
 0x722   :  { %v13329_v24 = vadd.f32 %v13328_v63, %v13135_v18 }
 0x723   :  { %v19698_v42 = vpop.f32.mrf.mxu1 }
 0x724   :  { %v13344_v30 = vadd.f32 %v19698_v42, %v19672_v32  ;;  %v13309_v32 = vadd.f32 %v13308_v7, %v13115_v35 }
 0x725   :  { %v13338_v26 = vpop.f32.mrf.mxu1 }
 0x726   :  { %v13339_v43 = vadd.f32 %v13338_v26, %v13145_v11  ;;  %v28358_v26 = vpop.f32.mrf.mxu0 }
 0x727   :  { %v19701_v27 = vpop.f32.mrf.mxu1 }
 0x728   :  { %v13354_v14 = vadd.f32 %v19701_v27, %v19675_v44 }
 0x729   :  { %v13348_v28 = vpop.f32.mrf.mxu1 }
 0x72a   :  { %v13349_v8 = vadd.f32 %v13348_v28, %v13155_v49  ;;  %v13324_v49 = vadd.f32 %v19692_v10, %v28313_v40 }
 0x72b   :  { %v19704_v62 = vpop.f32.mrf.mxu1 }
 0x72c   :  { %v13364_v19 = vadd.f32 %v19704_v62, %v19678_v53  ;;  %v28360_v62 = vpop.f32.mrf.mxu0 }
 0x72d   :  { %v13358_v54 = vpop.f32.mrf.mxu1 }
 0x72e   :  { %v13359_v1 = vadd.f32 %v13358_v54, %v13165_v31 }
 0x72f   :  { %v19709_v55 = vpop.f32.mrf.mxu1 }
 0x730   :  { %v28333_v6 = vadd.f32 %v19709_v55, %v13294_v57 }
 0x731   :  { %v13497_v56 = vpop.f32.mrf.mxu1 }
 0x732   :  { %v28337_v17 = vadd.f32 %v13497_v56, %v13289_v21 }
 0x733   :  { %v19712_v16 = vpop.f32.mrf.mxu1 }
 0x734   :  { %v13579_v4 = vadd.f32 %v19712_v16, %v13304_v20 }
 0x735   :  { %v13507_v50 = vpop.f32.mrf.mxu1 }
 0x736   :  { %v13578_v18 = vadd.f32 %v13507_v50, %v13299_v38 }
 0x737   :  { %v19715_v47 = vpop.f32.mrf.mxu1 }
 0x738   :  { %v13581_v11 = vadd.f32 %v19715_v47, %v13314_v48 }
 0x739   :  { %v13517_v44 = vpop.f32.mrf.mxu1 }
 0x73a   :  { %v13580_v53 = vadd.f32 %v13517_v44, %v13309_v32 }
 0x73b   :  { %v19718_v45 = vpop.f32.mrf.mxu1 }
 0x73c   :  { %v28344_v31 = vadd.f32 %v19718_v45, %v13324_v49 }
 0x73d   :  { %v13527_v59 = vpop.f32.mrf.mxu1 }
 0x73e   :  { %v28348_v15 = vadd.f32 %v13527_v59, %v13319_v12 }
 0x73f   :  { %v19721_v52 = vpop.f32.mrf.mxu1 }
 0x740   :  { %v13585_v13 = vadd.f32 %v19721_v52, %v13334_v3 }
 0x741   :  { %v13537_v35 = vpop.f32.mrf.mxu1 }
 0x742   :  { %v13584_v41 = vadd.f32 %v13537_v35, %v13329_v24 }
 0x743   :  { %v19724_v7 = vpop.f32.mrf.mxu1 }
 0x744   :  { %v28352_v0 = vadd.f32 %v19724_v7, %v13344_v30  ;;  %v28362_v30 = vpop.f32.mrf.mxu0 }
 0x745   :  { %v13547_v40 = vpop.f32.mrf.mxu1 }
 0x746   :  { %v28356_v10 = vadd.f32 %v13547_v40, %v13339_v43  ;;  %v28364_v43 = vpop.f32.mrf.mxu0 }
 0x747   :  { %v19727_v63 = vpop.f32.mrf.mxu1 }
 0x748   :  { %v13589_v42 = vadd.f32 %v19727_v63, %v13354_v14  ;;  %v28366_v50 = vpop.f32.mrf.mxu0 }
 0x749   :  { %v13557_v12 = vpop.f32.mrf.mxu1  ;;  %30218 = vst [vmem:[#allocation35_spill] sm:$0xff] %v28366_v50 }
 0x74a   :  { %v13588_v27 = vadd.f32 %v13557_v12, %v13349_v8  ;;  %v28368_v47 = vpop.f32.mrf.mxu0 }
 0x74b   :  { %v19730_v28 = vpop.f32.mrf.mxu1  ;;  %30219 = vst [vmem:[#allocation86_spill] sm:$0xff] %v28368_v47 }
 0x74c   :  { %v13591_v3 = vadd.f32 %v19730_v28, %v13364_v19  ;;  %v28370_v49 = vpop.f32.mrf.mxu0 }
 0x74d   :  { %v13567_v54 = vpop.f32.mrf.mxu1  ;;  %30220 = vst [vmem:[#allocation19_spill] sm:$0xff] %v28370_v49 }
 0x74e   :  { %v13590_v24 = vadd.f32 %v13567_v54, %v13359_v1  ;;  %v28372_v52 = vpop.f32.mrf.mxu0 }
 0x74f   :  { %v19735_v57 = vpop.f32.mrf.mxu1  ;;  %30221 = vst [vmem:[#allocation68_spill] sm:$0xff] %v28372_v52 }
 0x750   :  { %v28376_v7 = vpop.f32.mrf.mxu0 }
 0x751   :  { %v13722_v55 = vpop.f32.mrf.mxu1  ;;  %30222 = vst [vmem:[#allocation36_spill] sm:$0xff] %v28376_v7 }
 0x752   :  { %v28378_v28 = vpop.f32.mrf.mxu0 }
 0x753   :  { %v19738_v21 = vpop.f32.mrf.mxu1  ;;  %30223 = vst [vmem:[#allocation39_spill] sm:$0xff] %v28378_v28 }
 0x754   :  { %v13804_v56 = vadd.f32 %v19738_v21, %v13579_v4 }
 0x755   :  { %v13732_v20 = vpop.f32.mrf.mxu1 }
 0x756   :  { %v13803_v14 = vadd.f32 %v13732_v20, %v13578_v18  ;;  %v28380_v20 = vpop.f32.mrf.mxu0 }
 0x757   :  { %v19741_v16 = vpop.f32.mrf.mxu1  ;;  %30224 = vst [vmem:[#allocation70_spill] sm:$0xff] %v28380_v20  ;;  %v13802_v20 = vadd.f32 %v19735_v57, %v28333_v6  ;;  %v14029_v57 = vadd.f32 %v28319_v2, %v13804_v56 }
 0x758   :  { %v13806_v38 = vadd.f32 %v19741_v16, %v13581_v11 }
 0x759   :  { %v13742_v8 = vpop.f32.mrf.mxu1 }
 0x75a   :  { %v13805_v19 = vadd.f32 %v13742_v8, %v13580_v53  ;;  %v28382_v8 = vpop.f32.mrf.mxu0 }
 0x75b   :  { %v19744_v48 = vpop.f32.mrf.mxu1  ;;  %30225 = vst [vmem:[#allocation76_spill] sm:$0xff] %v28382_v8  ;;  %v13801_v8 = vadd.f32 %v13722_v55, %v28337_v17 }
 0x75d   :  { %v13752_v1 = vpop.f32.mrf.mxu1  ;;  %v14026_v50 = vadd.f32 %v28317_v61, %v13801_v8 }
 0x75e   :  { %v13807_v49 = vadd.f32 %v13752_v1, %v28348_v15 }
 0x75f   :  { %v19747_v32 = vpop.f32.mrf.mxu1 }
 0x760   :  { %v13810_v44 = vadd.f32 %v19747_v32, %v13585_v13 }
 0x761   :  { %v13762_v45 = vpop.f32.mrf.mxu1 }
 0x762   :  { %v13809_v4 = vadd.f32 %v13762_v45, %v13584_v41  ;;  %v28384_v45 = vpop.f32.mrf.mxu0  ;;  %v14035_v61 = vadd.f32 %v28331_v37, %v13810_v44 }
 0x763   :  { %v19750_v59 = vpop.f32.mrf.mxu1  ;;  %30226 = vst [vmem:[#allocation23_spill] sm:$0xff] %v28384_v45  ;;  %v14027_v45 = vadd.f32 %v28315_v22, %v13802_v20  ;;  %v14028_v22 = vadd.f32 %v28321_v29, %v13803_v14  ;;  %v14031_v20 = vadd.f32 %v28323_v58, %v13806_v38 }
 0x764   :  { %v13812_v6 = vadd.f32 %v19750_v59, %v28352_v0  ;;  %v14034_v56 = vadd.f32 %v28335_v36, %v13809_v4  ;;  %v30231_v59 = vld [vmem:[#allocation35_spill] sm:$0xff] }
 0x765   :  { %v13772_v18 = vpop.f32.mrf.mxu1 }
 0x766   :  { %v13811_v17 = vadd.f32 %v13772_v18, %v28356_v10  ;;  %v14037_v58 = vadd.f32 %v28339_v23, %v13812_v6 }
 0x767   :  { %v19753_v35 = vpop.f32.mrf.mxu1 }
 0x768   :  { %v28374_v11 = vadd.f32 %v19753_v35, %v13589_v42 }
 0x769   :  { %v13782_v53 = vpop.f32.mrf.mxu1 }
 0x76a   :  { %v13813_v40 = vadd.f32 %v13782_v53, %v13588_v27  ;;  %v28386_v27 = vpop.f32.mrf.mxu0  ;;  %v14039_v44 = vadd.f32 %v28346_v9, %v28374_v11  ;;  %v30232_v11 = vld [vmem:[#allocation86_spill] sm:$0xff] }
 0x76b   :  { %v19756_v63 = vpop.f32.mrf.mxu1  ;;  %30227 = vst [vmem:[#allocation53_spill] sm:$0xff] %v28386_v27  ;;  %v13808_v27 = vadd.f32 %v19744_v48, %v28344_v31  ;;  %v14030_v31 = vadd.f32 %v28325_v5, %v13805_v19  ;;  %v14032_v48 = vadd.f32 %v28329_v33, %v13807_v49 }
 0x76c   :  { %v13816_v12 = vadd.f32 %v19756_v63, %v13591_v3  ;;  %v28388_v63 = vpop.f32.mrf.mxu0  ;;  %v14038_v36 = vadd.f32 %v28350_v25, %v13813_v40  ;;  %v30233_v40 = vld [vmem:[#allocation19_spill] sm:$0xff] }
 0x76d   :  { %v13792_v13 = vpop.f32.mrf.mxu1  ;;  %30228 = vst [vmem:[#allocation94_spill] sm:$0xff] %v28388_v63  ;;  %v14033_v15 = vadd.f32 %v28327_v51, %v13808_v27  ;;  %v14036_v51 = vadd.f32 %v28341_v39, %v13811_v17 }
 0x76e   :  { %v13815_v54 = vadd.f32 %v13792_v13, %v13590_v24  ;;  %v28391_v34 = vpop.f32.mrf.mxu0 }
 0x76f   :  { %v19787_v21 = vpop.f32.mrf.mxu1  ;;  %30229 = vst [vmem:[#allocation37_spill] sm:$0xff] %v28391_v34 }
 0x770   :  { %v28395_v52 = vpop.f32.mrf.mxu0  ;;  %v14252_v63 = vadd.f32 %v19787_v21, %v14027_v45  ;;  %v14040_v49 = vadd.f32 %v28358_v26, %v13815_v54  ;;  %v30234_v26 = vld [vmem:[#allocation68_spill] sm:$0xff] }
 0x771   :  { %v14172_v41 = vpop.f32.mrf.mxu1  ;;  %30230 = vst [vmem:[#allocation87_spill] sm:$0xff] %v28395_v52 }
 0x772   :  { %v14251_v55 = vadd.f32 %v14172_v41, %v14026_v50  ;;  %v19865_v52 = vpop.f32.mrf.mxu0  ;;  %v14478_v10 = vadd.f32 %v28360_v62, %v14252_v63  ;;  %v14041_v62 = vadd.f32 %v28354_v46, %v13816_v12 }
 0x773   :  { %v19790_v16 = vpop.f32.mrf.mxu1 }
 0x774   :  { %v14254_v1 = vadd.f32 %v19790_v16, %v14029_v57  ;;  %v14477_v33 = vadd.f32 %v28362_v30, %v14251_v55  ;;  %v14848_v37 = vpop.f32.mrf.mxu0 }
 0x775   :  { %v14182_v32 = vpop.f32.mrf.mxu1 }
 0x776   :  { %v14253_v2 = vadd.f32 %v14182_v32, %v14028_v22  ;;  %v14480_v30 = vadd.f32 %v28364_v43, %v14254_v1  ;;  %v19868_v43 = vpop.f32.mrf.mxu0  ;;  %v30236_v22 = vld [vmem:[#allocation39_spill] sm:$0xff]  ;;  %v30239_v1 = vld [vmem:[#allocation76_spill] sm:$0xff] }
 0x777   :  { %v19793_v42 = vpop.f32.mrf.mxu1 }
 0x778   :  { %v14256_v50 = vadd.f32 %v19793_v42, %v14031_v20  ;;  %v14479_v18 = vadd.f32 %v30231_v59, %v14253_v2 }
 0x779   :  { %v14192_v35 = vpop.f32.mrf.mxu1 }
 0x77a   :  { %v14255_v29 = vadd.f32 %v14192_v35, %v14030_v31  ;;  %v14482_v25 = vadd.f32 %v30232_v11, %v14256_v50 }
 0x77b   :  { %v19796_v60 = vpop.f32.mrf.mxu1 }
 0x77c   :  { %v14258_v14 = vadd.f32 %v19796_v60, %v14033_v15  ;;  %v28422_v60 = vld [vmem:[%s29186_s4] ss:$0 sm:$0xff]  ;;  %v28428_v46 = vadd.f32 %v30233_v40, %v14255_v29  ;;  %v30237_v15 = vld [vmem:[#allocation16_spill] sm:$0xff] }
 0x77d   :  { %v14202_v3 = vpop.f32.mrf.mxu1 }
 0x77e   :  { %v14257_v5 = vadd.f32 %v14202_v3, %v14032_v48  ;;  %v28431_v12 = vadd.f32 %v30234_v26, %v14258_v14 }
 0x77f   :  { %v19799_v53 = vpop.f32.mrf.mxu1 }
 0x780   :  { %v14260_v21 = vadd.f32 %v19799_v53, %v14035_v61 }
 0x781   :  { %v14212_v24 = vpop.f32.mrf.mxu1 }
 0x782   :  { %v14259_v32 = vadd.f32 %v14212_v24, %v14034_v56  ;;  %v28439_v20 = vadd.f32 %v30236_v22, %v14260_v21  ;;  %v30240_v56 = vld [vmem:[#allocation23_spill] sm:$0xff] }
 0x783   :  { %v19802_v13 = vpop.f32.mrf.mxu1 }
 0x784   :  { %v14262_v42 = vadd.f32 %v19802_v13, %v14037_v58 }
 0x785   :  { %v14222_v28 = vpop.f32.mrf.mxu1 }
 0x786   :  { %v14261_v45 = vadd.f32 %v14222_v28, %v14036_v51  ;;  %v14858_v28 = vpop.f32.mrf.mxu0  ;;  %v28447_v2 = vadd.f32 %v30239_v1, %v14262_v42 }
 0x787   :  { %v19805_v7 = vpop.f32.mrf.mxu1 }
 0x788   :  { %v14264_v35 = vadd.f32 %v19805_v7, %v14039_v44  ;;  %v30238_v7 = vld [vmem:[#allocation70_spill] sm:$0xff]  ;;  %v19871_v42 = vpop.f32.mrf.mxu0 }
 0x789   :  { %v14232_v47 = vpop.f32.mrf.mxu1  ;;  %v28444_v13 = vadd.f32 %v30238_v7, %v14259_v32 }
 0x78a   :  { %v14263_v57 = vadd.f32 %v14232_v47, %v14038_v36  ;;  %v28450_v47 = vadd.f32 %v30240_v56, %v14261_v45  ;;  %v30243_v36 = vld [vmem:[#allocation37_spill] sm:$0xff] }
 0x78b   :  { %v19808_v34 = vpop.f32.mrf.mxu1 }
 0x78c   :  { %v14266_v17 = vadd.f32 %v19808_v34, %v14041_v62  ;;  %v30241_v34 = vld [vmem:[#allocation53_spill] sm:$0xff] }
 0x78d   :  { %v14242_v0 = vpop.f32.mrf.mxu1 }
 0x78e   :  { %v14265_v55 = vadd.f32 %v14242_v0, %v14040_v49  ;;  %v28453_v0 = vadd.f32 %v30241_v34, %v14264_v35  ;;  %v28461_v62 = vadd.f32 %v30243_v36, %v14266_v17  ;;  %v30244_v49 = vld [vmem:[#allocation87_spill] sm:$0xff] }
 0x78f   :  { %v19839_v38 = vpop.f32.mrf.mxu1 }
 0x790   :  { %v14703_v19 = vadd.f32 %v19839_v38, %v14478_v10 }
 0x791   :  { %v14623_v23 = vpop.f32.mrf.mxu1 }
 0x792   :  { %v14928_v39 = vadd.f32 %v19865_v52, %v14703_v19  ;;  %v14702_v4 = vadd.f32 %v14623_v23, %v14477_v33  ;;  %v30235_v52 = vld [vmem:[#allocation36_spill] sm:$0xff]  ;;  %v30242_v19 = vld [vmem:[#allocation94_spill] sm:$0xff]  ;;  %v28464_v23 = vadd.f32 %v30244_v49, %v14265_v55 }
 0x793   :  { %v19842_v9 = vpop.f32.mrf.mxu1  ;;  %v28435_v8 = vadd.f32 %v30235_v52, %v14257_v5  ;;  %v28458_v33 = vadd.f32 %v30242_v19, %v14263_v57 }
 0x794   :  { %v14950_v54 = vadd.f32 %v28422_v60, %v14928_v39  ;;  %v14927_v41 = vadd.f32 %v14848_v37, %v14702_v4  ;;  %v14705_v16 = vadd.f32 %v19842_v9, %v14480_v30 }
 0x795   :  { %v14633_v27 = vpop.f32.mrf.mxu1 }
 0x796   :  { %v14966_v3 = vmax.f32 %v14950_v54, 0.0  ;;  %v14949_v53 = vadd.f32 %v28422_v60, %v14927_v41  ;;  %v14930_v63 = vadd.f32 %v19868_v43, %v14705_v16  ;;  %v14704_v6 = vadd.f32 %v14633_v27, %v14479_v18 }
 0x797   :  { %v19845_v58 = vpop.f32.mrf.mxu1 }
 0x798   :  { %v15014_v31 = vcombine.high %v14966_v3, %v14966_v3  ;;  %v15021_v48 = vrot.slane %v14966_v3, %v30237_v15  ;;  %v14965_v61 = vmax.f32 %v14949_v53, 0.0  ;;  %v14952_v24 = vadd.f32 %v28422_v60, %v14930_v63 }
 0x799   :  { %v14929_v14 = vadd.f32 %v14858_v28, %v14704_v6  ;;  %v14707_v59 = vadd.f32 %v19845_v58, %v14482_v25  ;;  %v14643_v57 = vpop.f32.mrf.mxu1 }
 0x79a   :  { %v15028_v10 = vrot.slane %v15014_v31, %v30237_v15  ;;  %v15029_v50 = vcombine.high %v15021_v48, %v15021_v48  ;;  %v14997_v29 = vcombine.high %v14965_v61, %v14965_v61  ;;  %v17937_v38 = vrot.slane %v15021_v48, 9 }
 0x79b   :  { %v15004_v5 = vrot.slane %v14965_v61, %v30237_v15  ;;  %v14968_v51 = vmax.f32 %v14952_v24, 0.0  ;;  %v14951_v11 = vadd.f32 %v28422_v60, %v14929_v14  ;;  %v14932_v6 = vadd.f32 %v19871_v42, %v14707_v59 }
 0x79c   :  { %v15030_v37 = vcombine.high %v15028_v10, %v15028_v10  ;;  %v17938_v44 = vrot.slane %v15029_v50, 9  ;;  %v15011_v39 = vrot.slane %v14997_v29, %v30237_v15  ;;  %v15529_v40 = vmax.f32 %v15021_v48, %v17937_v38  ;;  %v19848_v38 = vpop.f32.mrf.mxu1 }
 0x79d   :  { %v15012_v4 = vcombine.high %v15004_v5, %v15004_v5  ;;  %v15048_v30 = vcombine.high %v14968_v51, %v14968_v51  ;;  %v15055_v9 = vrot.slane %v14968_v51, %v30237_v15  ;;  %v17933_v54 = vrot.slane %v15004_v5, 9 }
 0x79e   :  { %v17940_v18 = vrot.slane %v15030_v37, 9  ;;  %v15530_v21 = vmax.f32 %v15029_v50, %v17938_v44  ;;  %v15013_v26 = vcombine.high %v15011_v39, %v15011_v39  ;;  %v17939_v45 = vrot.slane %v15028_v10, 9 }
 0x79f   :  { %v17934_v41 = vrot.slane %v15012_v4, 9  ;;  %v15062_v43 = vrot.slane %v15048_v30, %v30237_v15  ;;  %v15063_v32 = vcombine.high %v15055_v9, %v15055_v9  ;;  %v17935_v35 = vrot.slane %v15011_v39, 9 }
 0x7a0   :  { %v15532_v16 = vmax.f32 %v15030_v37, %v17940_v18  ;;  %v28469_v52 = vrot.slane %v15530_v21, 7  ;;  %v17936_v25 = vrot.slane %v15013_v26, 9  ;;  %v15525_v17 = vmax.f32 %v15004_v5, %v17933_v54  ;;  %v14868_v37 = vpop.f32.mrf.mxu0 }
 0x7a1   :  { %v15526_v27 = vmax.f32 %v15012_v4, %v17934_v41  ;;  %v15064_v53 = vcombine.high %v15062_v43, %v15062_v43  ;;  %v17946_v63 = vrot.slane %v15063_v32, 9  ;;  %v17945_v31 = vrot.slane %v15055_v9, 9 }
 0x7a2   :  { %v15670_v3 = vsel %vm9113_vm2, %v28469_v52, %v15529_v40  ;;  %v15528_v55 = vmax.f32 %v15013_v26, %v17936_v25  ;;  %v28476_v48 = vrot.slane %v15532_v16, 7  ;;  %v17947_v61 = vrot.slane %v15062_v43, 9  ;;  %v19874_v16 = vpop.f32.mrf.mxu0 }
 0x7a3   :  { %v28474_v22 = vrot.slane %v15526_v27, 7  ;;  %v17948_v24 = vrot.slane %v15064_v53, 9  ;;  %v15538_v28 = vmax.f32 %v15063_v32, %v17946_v63  ;;  %v15531_v7 = vmax.f32 %v15028_v10, %v17939_v45 }
 0x7a4   :  { %v28480_v1 = vsel %vm9115_vm3, %v28469_v52, %v15670_v3  ;;  %v15527_v56 = vmax.f32 %v15011_v39, %v17935_v35  ;;  %v14967_v34 = vmax.f32 %v14951_v11, 0.0  ;;  %v28484_v29 = vrot.slane %v15528_v55, 7 }
 0x7a5   :  { %v15656_v50 = vsel %vm9113_vm2, %v28474_v22, %v15525_v17  ;;  %v15540_v14 = vmax.f32 %v15064_v53, %v17948_v24  ;;  %v14954_v58 = vadd.f32 %v28422_v60, %v14932_v6  ;;  %v28487_v5 = vrot.slane %v15538_v28, 7 }
 0x7a6   :  { %v15031_v51 = vcombine.high %v14967_v34, %v14967_v34  ;;  %v15038_v10 = vrot.slane %v14967_v34, %v30237_v15  ;;  %v14706_v19 = vadd.f32 %v14643_v57, %v28428_v46  ;;  %v28493_v44 = vsel %vm9113_vm2, %v28476_v48, %v15531_v7 }
 0x7a7   :  { %v15537_v36 = vmax.f32 %v15055_v9, %v17945_v31  ;;  %v15539_v49 = vmax.f32 %v15062_v43, %v17947_v61  ;;  %v14970_v39 = vmax.f32 %v14954_v58, 0.0  ;;  %v28497_v4 = vsel %vm9115_vm3, %v28474_v22, %v15656_v50 }
 0x7a8   :  { %v15045_v30 = vrot.slane %v15031_v51, %v30237_v15  ;;  %v15046_v59 = vcombine.high %v15038_v10, %v15038_v10  ;;  %v14709_v18 = vadd.f32 %v19848_v38, %v28431_v12  ;;  %v28503_v46 = vsel %vm9113_vm2, %v28484_v29, %v15527_v56  ;;  %v14653_v56 = vpop.f32.mrf.mxu1 }
 0x7a9   :  { %v15082_v21 = vcombine.high %v14970_v39, %v14970_v39  ;;  %v15089_v11 = vrot.slane %v14970_v39, %v30237_v15  ;;  %v14931_v40 = vadd.f32 %v14868_v37, %v14706_v19  ;;  %v15698_v9 = vsel %vm9113_vm2, %v28487_v5, %v15537_v36 }
 0x7aa   :  { %v28508_v26 = vrot.slane %v15540_v14, 7  ;;  %v15047_v54 = vcombine.high %v15045_v30, %v15045_v30  ;;  %v17942_v41 = vrot.slane %v15046_v59, 9  ;;  %v17941_v43 = vrot.slane %v15038_v10, 9 }
 0x7ab   :  { %v15096_v32 = vrot.slane %v15082_v21, %v30237_v15  ;;  %v15097_v12 = vcombine.high %v15089_v11, %v15089_v11  ;;  %v14953_v42 = vadd.f32 %v28422_v60, %v14931_v40  ;;  %v17953_v25 = vrot.slane %v15089_v11, 9 }
 0x7ac   :  { %v17944_v45 = vrot.slane %v15047_v54, 9  ;;  %v15534_v35 = vmax.f32 %v15046_v59, %v17942_v41  ;;  %v14934_v27 = vadd.f32 %v19874_v16, %v14709_v18  ;;  %v28514_v3 = vsel %vm9115_vm3, %v28487_v5, %v15698_v9  ;;  %v14878_v59 = vpop.f32.mrf.mxu0  ;;  %v19851_v9 = vpop.f32.mrf.mxu1 }
 0x7ad   :  { %v17943_v53 = vrot.slane %v15045_v30, 9  ;;  %v15098_v63 = vcombine.high %v15096_v32, %v15096_v32  ;;  %v17954_v6 = vrot.slane %v15097_v12, 9  ;;  %v14969_v55 = vmax.f32 %v14953_v42, 0.0 }
 0x7ae   :  { %v15536_v57 = vmax.f32 %v15047_v54, %v17944_v45  ;;  %v28516_v17 = vrot.slane %v15534_v35, 7  ;;  %v14956_v31 = vadd.f32 %v28422_v60, %v14934_v27  ;;  %v28521_v61 = vsel %vm9113_vm2, %v28508_v26, %v15539_v49 }
 0x7af   :  { %v15533_v24 = vmax.f32 %v15038_v10, %v17941_v43  ;;  %v17956_v28 = vrot.slane %v15098_v63, 9  ;;  %v15546_v7 = vmax.f32 %v15097_v12, %v17954_v6  ;;  %v17955_v34 = vrot.slane %v15096_v32, 9 }
 0x7b0   :  { %v15545_v50 = vmax.f32 %v15089_v11, %v17953_v25  ;;  %v15065_v14 = vcombine.high %v14969_v55, %v14969_v55  ;;  %v15072_v58 = vrot.slane %v14969_v55, %v30237_v15  ;;  %v28526_v51 = vrot.slane %v15536_v57, 7  ;;  %v14663_v55 = vpop.f32.mrf.mxu1 }
 0x7b1   :  { %v15684_v38 = vsel %vm9113_vm2, %v28516_v17, %v15533_v24  ;;  %v28528_v19 = vrot.slane %v15546_v7, 7  ;;  %v14972_v37 = vmax.f32 %v14956_v31, 0.0  ;;  %v15535_v36 = vmax.f32 %v15045_v30, %v17943_v53  ;;  %v19877_v53 = vpop.f32.mrf.mxu0 }
 0x7b2   :  { %v15548_v49 = vmax.f32 %v15098_v63, %v17956_v28  ;;  %v15079_v10 = vrot.slane %v15065_v14, %v30237_v15  ;;  %v15080_v39 = vcombine.high %v15072_v58, %v15072_v58  ;;  %v14708_v40 = vadd.f32 %v14653_v56, %v28435_v8 }
 0x7b3   :  { %30245 = vst [vmem:[#allocation21_spill] sm:$0xff] %v28528_v19  ;;  %v15726_v18 = vsel %vm9113_vm2, %v28528_v19, %v15545_v50  ;;  %v15116_v21 = vcombine.high %v14972_v37, %v14972_v37  ;;  %v15123_v11 = vrot.slane %v14972_v37, %v30237_v15  ;;  %v28537_v54 = vsel %vm9115_vm3, %v28516_v17, %v15684_v38 }
 0x7b4   :  { %v15547_v41 = vmax.f32 %v15096_v32, %v17955_v34  ;;  %v15081_v30 = vcombine.high %v15079_v10, %v15079_v10  ;;  %v17950_v16 = vrot.slane %v15080_v39, 9  ;;  %v28541_v43 = vsel %vm9113_vm2, %v28526_v51, %v15535_v36 }
 0x7b5   :  { %v17949_v12 = vrot.slane %v15072_v58, 9  ;;  %v15130_v42 = vrot.slane %v15116_v21, %v30237_v15  ;;  %v15131_v45 = vcombine.high %v15123_v11, %v15123_v11  ;;  %v28546_v35 = vsel %vm9115_vm3, %v28528_v19, %v15726_v18 }
 0x7b6   :  { %30246 = vst [vmem:[#allocation49_spill] sm:$0xff] %v28546_v35  ;;  %v28548_v8 = vrot.slane %v15548_v49, 7  ;;  %v17952_v25 = vrot.slane %v15081_v30, 9  ;;  %v15542_v27 = vmax.f32 %v15080_v39, %v17950_v16  ;;  %v17951_v32 = vrot.slane %v15079_v10, 9  ;;  %v14888_v39 = vpop.f32.mrf.mxu0 }
 0x7b7   :  { %v15132_v63 = vcombine.high %v15130_v42, %v15130_v42  ;;  %v17962_v6 = vrot.slane %v15131_v45, 9  ;;  %v14933_v57 = vadd.f32 %v14878_v59, %v14708_v40  ;;  %v17961_v28 = vrot.slane %v15123_v11, 9  ;;  %v19854_v40 = vpop.f32.mrf.mxu1 }
 0x7b8   :  { %30247 = vst [vmem:[#allocation90_spill] sm:$0xff] %v28548_v8  ;;  %v15544_v31 = vmax.f32 %v15081_v30, %v17952_v25  ;;  %v28550_v24 = vrot.slane %v15542_v27, 7  ;;  %v14711_v7 = vadd.f32 %v19851_v9, %v28439_v20  ;;  %v17963_v56 = vrot.slane %v15130_v42, 9 }
 0x7b9   :  { %v17964_v34 = vrot.slane %v15132_v63, 9  ;;  %v15554_v50 = vmax.f32 %v15131_v45, %v17962_v6  ;;  %v14955_v14 = vadd.f32 %v28422_v60, %v14933_v57  ;;  %v28556_v38 = vsel %vm9113_vm2, %v28548_v8, %v15547_v41 }
 0x7ba   :  { %30248 = vst [vmem:[#allocation52_spill] sm:$0xff] %v28556_v38  ;;  %v15541_v37 = vmax.f32 %v15072_v58, %v17949_v12  ;;  %v14936_v36 = vadd.f32 %v19877_v53, %v14711_v7  ;;  %v14710_v49 = vadd.f32 %v14663_v55, %v28444_v13  ;;  %v15543_v59 = vmax.f32 %v15079_v10, %v17951_v32 }
 0x7bb   :  { %v28559_v18 = vrot.slane %v15544_v31, 7  ;;  %v28561_v21 = vrot.slane %v15554_v50, 7  ;;  %v14971_v20 = vmax.f32 %v14955_v14, 0.0  ;;  %v15553_v30 = vmax.f32 %v15123_v11, %v17961_v28  ;;  %v19880_v28 = vpop.f32.mrf.mxu0 }
 0x7bc   :  { %v15712_v9 = vsel %vm9113_vm2, %v28550_v24, %v15541_v37  ;;  %v14958_v16 = vadd.f32 %v28422_v60, %v14936_v36  ;;  %v14935_v41 = vadd.f32 %v14888_v39, %v14710_v49  ;;  %v15555_v45 = vmax.f32 %v15130_v42, %v17963_v56  ;;  %v14673_v49 = vpop.f32.mrf.mxu1 }
 0x7bd   :  { %30249 = vst [vmem:[#allocation92_spill] sm:$0xff] %v28559_v18  ;;  %v15556_v58 = vmax.f32 %v15132_v63, %v17964_v34  ;;  %v15099_v12 = vcombine.high %v14971_v20, %v14971_v20  ;;  %v15106_v13 = vrot.slane %v14971_v20, %v30237_v15  ;;  %v15754_v10 = vsel %vm9113_vm2, %v28561_v21, %v15553_v30 }
 0x7be   :  { %v14974_v25 = vmax.f32 %v14958_v16, 0.0  ;;  %v14957_v27 = vadd.f32 %v28422_v60, %v14935_v41  ;;  %v14713_v53 = vadd.f32 %v19854_v40, %v28447_v2  ;;  %v28573_v32 = vsel %vm9115_vm3, %v28550_v24, %v15712_v9  ;;  %v19857_v38 = vpop.f32.mrf.mxu1 }
 0x7bf   :  { %v28577_v11 = vsel %vm9113_vm2, %v28559_v18, %v15543_v59  ;;  %v15113_v42 = vrot.slane %v15099_v12, %v30237_v15  ;;  %v15114_v63 = vcombine.high %v15106_v13, %v15106_v13  ;;  %v17957_v6 = vrot.slane %v15106_v13, 9 }
 0x7c0   :  { %30250 = vst [vmem:[#allocation102_spill] sm:$0xff] %v28577_v11  ;;  %v15150_v57 = vcombine.high %v14974_v25, %v14974_v25  ;;  %v15157_v55 = vrot.slane %v14974_v25, %v30237_v15  ;;  %v14973_v31 = vmax.f32 %v14957_v27, 0.0  ;;  %v28583_v2 = vsel %vm9115_vm3, %v28561_v21, %v15754_v10  ;;  %v14898_v27 = vpop.f32.mrf.mxu0  ;;  %v14683_v35 = vpop.f32.mrf.mxu1 }
 0x7c1   :  { %v28585_v7 = vrot.slane %v15556_v58, 7  ;;  %v15115_v56 = vcombine.high %v15113_v42, %v15113_v42  ;;  %v17958_v34 = vrot.slane %v15114_v63, 9  ;;  %v14938_v36 = vadd.f32 %v19880_v28, %v14713_v53 }
 0x7c2   :  { %v15164_v50 = vrot.slane %v15150_v57, %v30237_v15  ;;  %v15165_v14 = vcombine.high %v15157_v55, %v15157_v55  ;;  %v15133_v37 = vcombine.high %v14973_v31, %v14973_v31  ;;  %v17959_v39 = vrot.slane %v15113_v42, 9  ;;  %v19883_v18 = vpop.f32.mrf.mxu0 }
 0x7c3   :  { %v17960_v59 = vrot.slane %v15115_v56, 9  ;;  %v15550_v20 = vmax.f32 %v15114_v63, %v17958_v34  ;;  %v15140_v40 = vrot.slane %v14973_v31, %v30237_v15  ;;  %v15549_v9 = vmax.f32 %v15106_v13, %v17957_v6 }
 0x7c4   :  { %v15166_v30 = vcombine.high %v15164_v50, %v15164_v50  ;;  %v17969_v16 = vrot.slane %v15157_v55, 9  ;;  %v17970_v41 = vrot.slane %v15165_v14, 9  ;;  %v15147_v10 = vrot.slane %v15133_v37, %v30237_v15 }
 0x7c5   :  { %v15552_v12 = vmax.f32 %v15115_v56, %v17960_v59  ;;  %v28589_v58 = vrot.slane %v15550_v20, 7  ;;  %v15148_v25 = vcombine.high %v15140_v40, %v15140_v40  ;;  %v17971_v57 = vrot.slane %v15164_v50, 9 }
 0x7c6   :  { %v17972_v8 = vrot.slane %v15166_v30, 9  ;;  %v15562_v53 = vmax.f32 %v15165_v14, %v17970_v41  ;;  %v14960_v28 = vadd.f32 %v28422_v60, %v14938_v36  ;;  %v28595_v63 = vsel %vm9113_vm2, %v28585_v7, %v15555_v45 }
 0x7c7   :  { %v15740_v13 = vsel %vm9113_vm2, %v28589_v58, %v15549_v9  ;;  %v15149_v6 = vcombine.high %v15147_v10, %v15147_v10  ;;  %v17966_v31 = vrot.slane %v15148_v25, 9  ;;  %v15551_v56 = vmax.f32 %v15113_v42, %v17959_v39 }
 0x7c8   :  { %v15561_v34 = vmax.f32 %v15157_v55, %v17969_v16  ;;  %v15564_v37 = vmax.f32 %v15166_v30, %v17972_v8  ;;  %v28599_v59 = vrot.slane %v15562_v53, 7  ;;  %v28601_v20 = vrot.slane %v15552_v12, 7 }
 0x7c9   :  { %v17965_v14 = vrot.slane %v15140_v40, 9  ;;  %v17968_v41 = vrot.slane %v15149_v6, 9  ;;  %v15558_v36 = vmax.f32 %v15148_v25, %v17966_v31  ;;  %v28605_v45 = vsel %vm9115_vm3, %v28589_v58, %v15740_v13  ;;  %v14908_v13 = vpop.f32.mrf.mxu0 }
 0x7ca   :  { %30251 = vst [vmem:[#allocation85_spill] sm:$0xff] %v28599_v59  ;;  %v15563_v11 = vmax.f32 %v15164_v50, %v17971_v57  ;;  %v17967_v19 = vrot.slane %v15147_v10, 9  ;;  %v14976_v9 = vmax.f32 %v14960_v28, 0.0  ;;  %v15782_v42 = vsel %vm9113_vm2, %v28599_v59, %v15561_v34 }
 0x7cb   :  { %v28609_v8 = vrot.slane %v15564_v37, 7  ;;  %v15560_v55 = vmax.f32 %v15149_v6, %v17968_v41  ;;  %v14712_v39 = vadd.f32 %v14673_v49, %v28450_v47  ;;  %v28612_v30 = vrot.slane %v15558_v36, 7 }
 0x7cc   :  { %v15184_v16 = vcombine.high %v14976_v9, %v14976_v9  ;;  %v15191_v12 = vrot.slane %v14976_v9, %v30237_v15  ;;  %v14715_v25 = vadd.f32 %v19857_v38, %v28453_v0  ;;  %v28618_v50 = vsel %vm9113_vm2, %v28601_v20, %v15551_v56 }
 0x7cd   :  { %30252 = vst [vmem:[#allocation50_spill] sm:$0xff] %v28609_v8  ;;  %30253 = vst [vmem:[#allocation98_spill] sm:$0xff] %v28612_v30  ;;  %v15557_v57 = vmax.f32 %v15140_v40, %v17965_v14  ;;  %v14937_v53 = vadd.f32 %v14898_v27, %v14712_v39  ;;  %v14714_v28 = vadd.f32 %v14683_v35, %v28458_v33  ;;  %v19860_v27 = vpop.f32.mrf.mxu1  ;;  %v28633_v35 = vrot.slane %v15560_v55, 7 }
 0x7ce   :  { %v28623_v6 = vsel %vm9115_vm3, %v28599_v59, %v15782_v42  ;;  %v15559_v47 = vmax.f32 %v15147_v10, %v17967_v19  ;;  %v15198_v49 = vrot.slane %v15184_v16, %v30237_v15  ;;  %v15199_v31 = vcombine.high %v15191_v12, %v15191_v12 }
 0x7cf   :  { %30254 = vst [vmem:[#allocation93_spill] sm:$0xff] %v28623_v6  ;;  %v28628_v0 = vsel %vm9113_vm2, %v28609_v8, %v15563_v11  ;;  %v14959_v38 = vadd.f32 %v28422_v60, %v14937_v53  ;;  %v14940_v56 = vadd.f32 %v19883_v18, %v14715_v25  ;;  %v14939_v40 = vadd.f32 %v14908_v13, %v14714_v28  ;;  %v14693_v55 = vpop.f32.mrf.mxu1 }
 0x7d0   :  { %30255 = vst [vmem:[#allocation96_spill] sm:$0xff] %v28628_v0  ;;  %v15768_v33 = vsel %vm9113_vm2, %v28612_v30, %v15557_v57  ;;  %30256 = vst [vmem:[#allocation97_spill] sm:$0xff] %v28633_v35  ;;  %v15200_v34 = vcombine.high %v15198_v49, %v15198_v49  ;;  %v17978_v37 = vrot.slane %v15199_v31, 9  ;;  %v17977_v19 = vrot.slane %v15191_v12, 9 }
 0x7d1   :  { %v14975_v10 = vmax.f32 %v14959_v38, 0.0  ;;  %v14962_v14 = vadd.f32 %v28422_v60, %v14940_v56  ;;  %v14961_v41 = vadd.f32 %v28422_v60, %v14939_v40  ;;  %v17979_v11 = vrot.slane %v15198_v49, 9 }
 0x7d2   :  { %v17980_v36 = vrot.slane %v15200_v34, 9  ;;  %v15570_v9 = vmax.f32 %v15199_v31, %v17978_v37  ;;  %v14717_v18 = vadd.f32 %v19860_v27, %v28461_v62  ;;  %v28641_v57 = vsel %vm9115_vm3, %v28612_v30, %v15768_v33  ;;  %v19886_v31 = vpop.f32.mrf.mxu0 }
 0x7d3   :  { %v15167_v42 = vcombine.high %v14975_v10, %v14975_v10  ;;  %v15174_v39 = vrot.slane %v14975_v10, %v30237_v15  ;;  %v14978_v16 = vmax.f32 %v14962_v14, 0.0  ;;  %v14977_v25 = vmax.f32 %v14961_v41, 0.0  ;;  %30257 = vst [vmem:[#allocation41_spill] sm:$0xff] %v28641_v57 }
 0x7d4   :  { %v28645_v53 = vsel %vm9113_vm2, %v28633_v35, %v15559_v47  ;;  %v15572_v28 = vmax.f32 %v15200_v34, %v17980_v36  ;;  %v28647_v13 = vrot.slane %v15570_v9, 7  ;;  %v15569_v27 = vmax.f32 %v15191_v12, %v17977_v19  ;;  %v14918_v19 = vpop.f32.mrf.mxu0 }
 0x7d5   :  { %30258 = vst [vmem:[#allocation88_spill] sm:$0xff] %v28645_v53  ;;  %v15181_v62 = vrot.slane %v15167_v42, %v30237_v15  ;;  %v15182_v38 = vcombine.high %v15174_v39, %v15174_v39  ;;  %v17973_v56 = vrot.slane %v15174_v39, 9  ;;  %v15218_v40 = vcombine.high %v14978_v16, %v14978_v16 }
 0x7d6   :  { %v15571_v37 = vmax.f32 %v15198_v49, %v17979_v11  ;;  %v15225_v10 = vrot.slane %v14978_v16, %v30237_v15  ;;  %v14716_v33 = vadd.f32 %v14693_v55, %v28464_v23  ;;  %v15201_v8 = vcombine.high %v14977_v25, %v14977_v25 }
 0x7d7   :  { %v15183_v14 = vcombine.high %v15181_v62, %v15181_v62  ;;  %v17974_v41 = vrot.slane %v15182_v38, 9  ;;  %v14942_v47 = vadd.f32 %v19886_v31, %v14717_v18  ;;  %v15810_v34 = vsel %vm9113_vm2, %v28647_v13, %v15569_v27 }
 0x7d8   :  { %v28654_v36 = vrot.slane %v15572_v28, 7  ;;  %v15232_v9 = vrot.slane %v15218_v40, %v30237_v15  ;;  %v15233_v42 = vcombine.high %v15225_v10, %v15225_v10  ;;  %v17975_v0 = vrot.slane %v15181_v62, 9 }
 0x7d9   :  { %v17976_v35 = vrot.slane %v15183_v14, 9  ;;  %v15565_v12 = vmax.f32 %v15174_v39, %v17973_v56  ;;  %v15566_v49 = vmax.f32 %v15182_v38, %v17974_v41  ;;  %v17985_v16 = vrot.slane %v15225_v10, 9 }
 0x7da   :  { %v15234_v11 = vcombine.high %v15232_v9, %v15232_v9  ;;  %v17986_v23 = vrot.slane %v15233_v42, 9  ;;  %v15208_v55 = vrot.slane %v14977_v25, %v30237_v15  ;;  %v17987_v31 = vrot.slane %v15232_v9, 9 }
 0x7db   :  { %v15568_v53 = vmax.f32 %v15183_v14, %v17976_v35  ;;  %v28658_v18 = vrot.slane %v15566_v49, 7  ;;  %v15215_v28 = vrot.slane %v15201_v8, %v30237_v15  ;;  %v14941_v6 = vadd.f32 %v14918_v19, %v14716_v33 }
 0x7dc   :  { %v17988_v27 = vrot.slane %v15234_v11, 9  ;;  %v15578_v59 = vmax.f32 %v15233_v42, %v17986_v23  ;;  %v15216_v40 = vcombine.high %v15208_v55, %v15208_v55  ;;  %v28663_v39 = vsel %vm9115_vm3, %v28647_v13, %v15810_v34 }
 0x7dd   :  { %v15796_v38 = vsel %vm9113_vm2, %v28658_v18, %v15565_v12  ;;  %v28667_v56 = vrot.slane %v15568_v53, 7  ;;  %v15217_v25 = vcombine.high %v15215_v28, %v15215_v28  ;;  %v28671_v35 = vsel %vm9113_vm2, %v28654_v36, %v15571_v37 }
 0x7de   :  { %v28673_v14 = vrot.slane %v15578_v59, 7  ;;  %v17981_v8 = vrot.slane %v15208_v55, 9  ;;  %v17982_v41 = vrot.slane %v15216_v40, 9  ;;  %v15567_v42 = vmax.f32 %v15181_v62, %v17975_v0 }
 0x7df   :  { %v15577_v33 = vmax.f32 %v15225_v10, %v17985_v16  ;;  %v15579_v49 = vmax.f32 %v15232_v9, %v17987_v31  ;;  %v15580_v19 = vmax.f32 %v15234_v11, %v17988_v27  ;;  %v28677_v34 = vsel %vm9115_vm3, %v28658_v18, %v15796_v38 }
 0x7e0   :  { %30259 = vst [vmem:[#allocation104_spill] sm:$0xff] %v28673_v14  ;;  %v17984_v12 = vrot.slane %v15217_v25, 9  ;;  %v15574_v53 = vmax.f32 %v15216_v40, %v17982_v41  ;;  %v14964_v23 = vadd.f32 %v28422_v60, %v14942_v47  ;;  %v28682_v37 = vsel %vm9113_vm2, %v28667_v56, %v15567_v42 }
 0x7e1   :  { %v15838_v59 = vsel %vm9113_vm2, %v28673_v14, %v15577_v33  ;;  %v17983_v30 = vrot.slane %v15215_v28, 9  ;;  %v14963_v0 = vadd.f32 %v28422_v60, %v14941_v6  ;;  %v15573_v62 = vmax.f32 %v15208_v55, %v17981_v8 }
 0x7e2   :  { %v28687_v10 = vrot.slane %v15574_v53, 7  ;;  %v14980_v9 = vmax.f32 %v14964_v23, 0.0  ;;  %v15658_v11 = vsel %vm9117_vm4, %v28474_v22, %v28497_v4  ;;  %v28692_v16 = vrot.slane %v15580_v19, 7 }
 0x7e3   :  { %v14979_v47 = vmax.f32 %v14963_v0, 0.0  ;;  %v15659_v31 = vsel %vm9119_vm5, %v28474_v22, %v15658_v11  ;;  %v15672_v27 = vsel %vm9117_vm4, %v28469_v52, %v28480_v1  ;;  %v28701_v60 = vsel %vm9115_vm3, %v28673_v14, %v15838_v59 }
 0x7e4   :  { %30260 = vst [vmem:[#allocation44_spill] sm:$0xff] %v28692_v16  ;;  %v15576_v6 = vmax.f32 %v15217_v25, %v17984_v12  ;;  %v15252_v55 = vcombine.high %v14980_v9, %v14980_v9  ;;  %v15259_v40 = vrot.slane %v14980_v9, %v30237_v15  ;;  %v15575_v38 = vmax.f32 %v15215_v28, %v17983_v30 }
 0x7e5   :  { %v15235_v4 = vcombine.high %v14979_v47, %v14979_v47  ;;  %v15242_v8 = vrot.slane %v14979_v47, %v30237_v15  ;;  %v15673_v41 = vsel %vm9119_vm5, %v28469_v52, %v15672_v27  ;;  %v15824_v22 = vsel %vm9113_vm2, %v28687_v10, %v15573_v62 }
 0x7e6   :  { %v15266_v1 = vrot.slane %v15252_v55, %v30237_v15  ;;  %v15267_v42 = vcombine.high %v15259_v40, %v15259_v40  ;;  %v15909_v33 = vcombine.low %v15659_v31, %v15673_v41  ;;  %v28712_v25 = vsel %vm9113_vm2, %v28692_v16, %v15579_v49  ;;  %v30262_v31 = vld [vmem:[#allocation38_spill] sm:$0xff] }
 0x7e7   :  { %30261 = vst [vmem:[#allocation82_spill] sm:$0xff] %v28712_v25  ;;  %v17993_v19 = vrot.slane %v15259_v40, 9  ;;  %v15249_v30 = vrot.slane %v15235_v4, %v30237_v15  ;;  %v15250_v28 = vcombine.high %v15242_v8, %v15242_v8  ;;  %v28715_v12 = vrot.slane %v15576_v6, 7 }
 0x7e8   :  { %v15268_v53 = vcombine.high %v15266_v1, %v15266_v1  ;;  %v17994_v23 = vrot.slane %v15267_v42, 9  ;;  %v15664_v52 = vsel %vm9115_vm3, %v28484_v29, %v28503_v46  ;;  %v28722_v59 = vsel %vm9115_vm3, %v28687_v10, %v15824_v22 }
 0x7e9   :  { %v15251_v0 = vcombine.high %v15249_v30, %v15249_v30  ;;  %v17989_v62 = vrot.slane %v15242_v8, 9  ;;  %v17990_v49 = vrot.slane %v15250_v28, 9  ;;  %v17995_v9 = vrot.slane %v15266_v1, 9 }
 0x7ea   :  { %v17996_v11 = vrot.slane %v15268_v53, 9  ;;  %v15586_v47 = vmax.f32 %v15267_v42, %v17994_v23  ;;  %v28725_v27 = vrot.slane %v15909_v33, %v30262_v31  ;;  %v15585_v6 = vmax.f32 %v15259_v40, %v17993_v19 }
 0x7eb   :  { %v17991_v55 = vrot.slane %v15249_v30, 9  ;;  %v17992_v4 = vrot.slane %v15251_v0, 9  ;;  %v15665_v41 = vsel %vm9117_vm4, %v28484_v29, %v15664_v52  ;;  %v15582_v22 = vmax.f32 %v15250_v28, %v17990_v49 }
 0x7ec   :  { %v15588_v46 = vmax.f32 %v15268_v53, %v17996_v11  ;;  %v28729_v16 = vrot.slane %v15586_v47, 7  ;;  %v30263_v25 = vmov 0.0   ;;  %v28735_v14 = vsel %vm9113_vm2, %v28715_v12, %v15575_v38 }
 0x7ed   :  { %v15917_v57 = vcombine.high %v28725_v27, %v30263_v25  ;;  %v15666_v42 = vsel %vm9119_vm5, %v28484_v29, %v15665_v41  ;;  %v15678_v40 = vsel %vm9115_vm3, %v28476_v48, %v28493_v44  ;;  %v15686_v33 = vsel %vm9117_vm4, %v28516_v17, %v28537_v54 }
 0x7ee   :  { %v15866_v19 = vsel %vm9113_vm2, %v28729_v16, %v15585_v6  ;;  %v15581_v28 = vmax.f32 %v15242_v8, %v17989_v62  ;;  %v15679_v38 = vsel %vm9117_vm4, %v28476_v48, %v15678_v40  ;;  %v28750_v23 = vmax.f32 %v15266_v1, %v17995_v9 }
 0x7ef   :  { %v16067_v53 = vrot.slane %v15917_v57, %v30237_v15  ;;  %v28752_v29 = vmax.f32 %v15249_v30, %v17991_v55  ;;  %v15584_v52 = vmax.f32 %v15251_v0, %v17992_v4  ;;  %v15680_v44 = vsel %vm9119_vm5, %v28476_v48, %v15679_v38 }
 0x7f0   :  { %v28756_v49 = vrot.slane %v15588_v46, 7  ;;  %v28758_v54 = vrot.slane %v15582_v22, 7  ;;  %v15918_v8 = vcombine.low %v15666_v42, %v15680_v44  ;;  %v15687_v57 = vsel %vm9119_vm5, %v28516_v17, %v15686_v33 }
 0x7f1   :  { %16117 = vrot.lane.b32.xlu0 %v16067_v53, %s19943_s26  ;;  %v28765_v1 = vsel %vm9115_vm3, %v28729_v16, %v15866_v19  ;;  %v15700_v30 = vsel %vm9117_vm4, %v28487_v5, %v28514_v3  ;;  %v15742_v48 = vsel %vm9117_vm4, %v28589_v58, %v28605_v45  ;;  %v15756_v0 = vsel %vm9117_vm4, %v28561_v21, %v28583_v2 }
 0x7f2   :  { %v15925_v62 = vrot.slane %v15918_v8, %v30262_v31  ;;  %v15701_v17 = vsel %vm9119_vm5, %v28487_v5, %v15700_v30  ;;  %v15743_v9 = vsel %vm9119_vm5, %v28589_v58, %v15742_v48  ;;  %v15757_v11 = vsel %vm9119_vm5, %v28561_v21, %v15756_v0  ;;  %v30265_v48 = vld [vmem:[#allocation21_spill] sm:$0xff] }
 0x7f3   :  { %v15927_v3 = vcombine.low %v15687_v57, %v15701_v17  ;;  %v15963_v47 = vcombine.low %v15743_v9, %v15757_v11  ;;  %v15692_v45 = vsel %vm9115_vm3, %v28526_v51, %v28541_v43  ;;  %v15706_v2 = vsel %vm9115_vm3, %v28508_v26, %v28521_v61  ;;  %v30266_v11 = vld [vmem:[#allocation102_spill] sm:$0xff] }
 0x7f4   :  { %v16155_v6 = vrot.slane %v15925_v62, %v30237_v15  ;;  %v15926_v5 = vcombine.high %v15925_v62, %v30263_v25  ;;  %v15693_v58 = vsel %vm9117_vm4, %v28526_v51, %v15692_v45  ;;  %v15707_v21 = vsel %vm9117_vm4, %v28508_v26, %v15706_v2 }
 0x7f5   :  { %v28796_v55 = vrot.slane %v15927_v3, %v30262_v31  ;;  %v28799_v4 = vrot.slane %v15963_v47, %v30262_v31  ;;  %v15694_v43 = vsel %vm9119_vm5, %v28526_v51, %v15693_v58  ;;  %v15708_v61 = vsel %vm9119_vm5, %v28508_v26, %v15707_v21  ;;  %v30267_v3 = vld [vmem:[#allocation92_spill] sm:$0xff]  ;;  %v30269_v58 = vld [vmem:[#allocation90_spill] sm:$0xff] }
 0x7f6   :  { %16205 = vrot.lane.b32.xlu0 %v16155_v6, %s19941_s25  ;;  %v16243_v41 = vrot.slane %v15926_v5, %v30237_v15  ;;  %v15936_v46 = vcombine.low %v15694_v43, %v15708_v61  ;;  %v15748_v22 = vsel %vm9115_vm3, %v28601_v20, %v28618_v50  ;;  %v15762_v42 = vsel %vm9115_vm3, %v28585_v7, %v28595_v63 }
 0x7f7   :  { %v15935_v40 = vcombine.high %v28796_v55, %v30263_v25  ;;  %v15971_v51 = vcombine.high %v28799_v4, %v30263_v25  ;;  %v15749_v26 = vsel %vm9117_vm4, %v28601_v20, %v15748_v22  ;;  %v15763_v33 = vsel %vm9117_vm4, %v28585_v7, %v15762_v42 }
 0x7f8   :  { %v15943_v19 = vrot.slane %v15936_v46, %v30262_v31  ;;  %v15750_v50 = vsel %vm9119_vm5, %v28601_v20, %v15749_v26  ;;  %v15764_v63 = vsel %vm9119_vm5, %v28585_v7, %v15763_v33  ;;  %v15714_v53 = vsel %vm9117_vm4, %v28550_v24, %v28573_v32  ;;  %v30264_v7 = vld [vmem:[#allocation49_spill] sm:$0xff] }
 0x7f9   :  { %v15852_v38 = vsel %vm9113_vm2, %v28758_v54, %v15581_v28  ;;  %v16088_v44 = vrot.slane %v15971_v51, %v30237_v15  ;;  %v15972_v8 = vcombine.low %v15750_v50, %v15764_v63  ;;  %v15715_v57 = vsel %vm9119_vm5, %v28550_v24, %v15714_v53  ;;  %v30270_v53 = vld [vmem:[#allocation104_spill] sm:$0xff] }
 0x7fa   :  { %v28834_v30 = vrot.slane %v15584_v52, 7  ;;  %16293 = vrot.lane.b32.xlu0 %v16243_v41, %s19944_s27  ;;  %v16074_v20 = vrot.slane %v15935_v40, %v30237_v15  ;;  %v15728_v0 = vsel %vm9117_vm4, %v30265_v48, %v30264_v7  ;;  %v15798_v32 = vsel %vm9117_vm4, %v28658_v18, %v28677_v34 }
 0x7fb   :  { %16123 = vrot.lane.b32.xlu1 %v16088_v44, %s19943_s26  ;;  %v15979_v28 = vrot.slane %v15972_v8, %v30262_v31  ;;  %v15729_v24 = vsel %vm9119_vm5, %v30265_v48, %v15728_v0  ;;  %v15799_v52 = vsel %vm9119_vm5, %v28658_v18, %v15798_v32  ;;  %v15812_v62 = vsel %vm9117_vm4, %v28647_v13, %v28663_v39  ;;  %v30272_v48 = vld [vmem:[#allocation98_spill] sm:$0xff]  ;;  %v30273_v0 = vld [vmem:[#allocation93_spill] sm:$0xff] }
 0x7fc   :  { %v16162_v17 = vrot.slane %v15943_v19, %v30237_v15  ;;  %v15945_v9 = vcombine.low %v15715_v57, %v15729_v24  ;;  %v15813_v34 = vsel %vm9119_vm5, %v28647_v13, %v15812_v62  ;;  %v15720_v47 = vsel %vm9115_vm3, %v30267_v3, %v30266_v11  ;;  %v30268_v13 = vld [vmem:[#allocation52_spill] sm:$0xff]  ;;  %v30274_v32 = vld [vmem:[#allocation85_spill] sm:$0xff]  ;;  %v30275_v11 = vld [vmem:[#allocation82_spill] sm:$0xff] }
 0x7fd   :  { %v16176_v45 = vrot.slane %v15979_v28, %v30237_v15  ;;  %v15980_v2 = vcombine.high %v15979_v28, %v30263_v25  ;;  %v15999_v6 = vcombine.low %v15799_v52, %v15813_v34  ;;  %v15721_v18 = vsel %vm9117_vm4, %v30267_v3, %v15720_v47 }
 0x7fe   :  { %16119 = vrot.lane.b32.xlu0 %v16074_v20, %s19943_s26  ;;  %v15944_v39 = vcombine.high %v15943_v19, %v30263_v25  ;;  %v15722_v5 = vsel %vm9119_vm5, %v30267_v3, %v15721_v18  ;;  %v15734_v21 = vsel %vm9115_vm3, %v30269_v58, %v30268_v13  ;;  %v15804_v43 = vsel %vm9115_vm3, %v28667_v56, %v28682_v37  ;;  %v30278_v13 = vld [vmem:[#allocation97_spill] sm:$0xff] }
 0x7ff   :  { %16211 = vrot.lane.b32.xlu1 %v16176_v45, %s19941_s25  ;;  %v28875_v61 = vrot.slane %v15945_v9, %v30262_v31  ;;  %v28878_v41 = vrot.slane %v15999_v6, %v30262_v31  ;;  %v15735_v46 = vsel %vm9117_vm4, %v30269_v58, %v15734_v21  ;;  %v15805_v22 = vsel %vm9117_vm4, %v28667_v56, %v15804_v43 }
 0x800   :  { %v16264_v42 = vrot.slane %v15980_v2, %v30237_v15  ;;  %v15736_v40 = vsel %vm9119_vm5, %v30269_v58, %v15735_v46  ;;  %v15806_v37 = vsel %vm9119_vm5, %v28667_v56, %v15805_v22  ;;  %v15818_v51 = vsel %vm9115_vm3, %v28654_v36, %v28671_v35 }
 0x801   :  { %v16007_v26 = vcombine.high %v28878_v41, %v30263_v25  ;;  %v15954_v33 = vcombine.low %v15722_v5, %v15736_v40  ;;  %v15819_v19 = vsel %vm9117_vm4, %v28654_v36, %v15818_v51  ;;  %v15826_v50 = vsel %vm9117_vm4, %v28687_v10, %v28722_v59  ;;  %v30277_v5 = vld [vmem:[#allocation88_spill] sm:$0xff] }
 0x802   :  { %16207 = vrot.lane.b32.xlu0 %v16162_v17, %s19941_s25  ;;  %v16250_v63 = vrot.slane %v15944_v39, %v30237_v15  ;;  %v15820_v56 = vsel %vm9119_vm5, %v28654_v36, %v15819_v19  ;;  %v15827_v35 = vsel %vm9119_vm5, %v28687_v10, %v15826_v50  ;;  %v15840_v44 = vsel %vm9117_vm4, %v30270_v53, %v28701_v60  ;;  %v30271_v36 = vld [vmem:[#allocation41_spill] sm:$0xff]  ;;  %v30279_v40 = vld [vmem:[#allocation96_spill] sm:$0xff] }
 0x803   :  { %16299 = vrot.lane.b32.xlu1 %v16264_v42, %s19944_s27  ;;  %v15953_v8 = vcombine.high %v28875_v61, %v30263_v25  ;;  %v15961_v59 = vrot.slane %v15954_v33, %v30262_v31  ;;  %v16008_v57 = vcombine.low %v15806_v37, %v15820_v56  ;;  %v15841_v20 = vsel %vm9119_vm5, %v30270_v53, %v15840_v44  ;;  %v30280_v37 = vld [vmem:[#allocation50_spill] sm:$0xff] }
 0x804   :  { %v16017_v7 = vcombine.low %v15827_v35, %v15841_v20  ;;  %v15770_v10 = vsel %vm9117_vm4, %v30272_v48, %v30271_v36  ;;  %v15784_v60 = vsel %vm9117_vm4, %v30274_v32, %v30273_v0  ;;  %v15832_v28 = vsel %vm9115_vm3, %v28715_v12, %v28735_v14 }
 0x805   :  { %v15873_v24 = vsel %vm9113_vm2, %v28756_v49, %v28750_v23  ;;  %v16102_v52 = vrot.slane %v16007_v26, %v30237_v15  ;;  %v16015_v62 = vrot.slane %v16008_v57, %v30262_v31  ;;  %v15771_v17 = vsel %vm9119_vm5, %v30272_v48, %v15770_v10  ;;  %v30276_v23 = vld [vmem:[#allocation44_spill] sm:$0xff] }
 0x806   :  { %v15853_v9 = vsel %vm9115_vm3, %v28758_v54, %v15852_v38  ;;  %16295 = vrot.lane.b32.xlu0 %v16250_v63, %s19944_s27  ;;  %v15785_v34 = vsel %vm9119_vm5, %v30274_v32, %v15784_v60  ;;  %v15833_v14 = vsel %vm9117_vm4, %v28715_v12, %v15832_v28  ;;  %v15846_v3 = vsel %vm9115_vm3, %v30276_v23, %v30275_v11 }
 0x807   :  { %v15859_v47 = vsel %vm9113_vm2, %v28834_v30, %v28752_v29  ;;  %v16081_v45 = vrot.slane %v15953_v8, %v30237_v15  ;;  %16127 = vrot.lane.b32.xlu1 %v16102_v52, %s19943_s26  ;;  %v28946_v38 = vrot.slane %v16017_v7, %v30262_v31  ;;  %v15981_v2 = vcombine.low %v15771_v17, %v15785_v34 }
 0x808   :  { %v16169_v6 = vrot.slane %v15961_v59, %v30237_v15  ;;  %v15834_v18 = vsel %vm9119_vm5, %v28715_v12, %v15833_v14  ;;  %v15847_v39 = vsel %vm9117_vm4, %v30276_v23, %v15846_v3  ;;  %v15776_v29 = vsel %vm9115_vm3, %v30278_v13, %v30277_v5  ;;  %v16451_v5 = vld [vmem:[%s29187_s5 + $0x68] sm:$0xff] }
 0x809   :  { %v16190_v58 = vrot.slane %v16015_v62, %v30237_v15  ;;  %v16016_v21 = vcombine.high %v16015_v62, %v30263_v25  ;;  %v15848_v43 = vsel %vm9119_vm5, %v30276_v23, %v15847_v39  ;;  %v15777_v46 = vsel %vm9117_vm4, %v30278_v13, %v15776_v29  ;;  %v16467_v39 = vld [vmem:[%s29187_s5 + $0xe8] sm:$0xff]  ;;  %v16450_v29 = vld [vmem:[%s29187_s5 + $0x60] sm:$0xff] }
 0x80a   :  { %16121 = vrot.lane.b32.xlu0 %v16081_v45, %s19943_s26  ;;  %v15962_v12 = vcombine.high %v15961_v59, %v30263_v25  ;;  %v16026_v22 = vcombine.low %v15834_v18, %v15848_v43  ;;  %v15778_v42 = vsel %vm9119_vm5, %v30278_v13, %v15777_v46  ;;  %v15790_v51 = vsel %vm9115_vm3, %v30280_v37, %v30279_v40  ;;  %v16469_v45 = vld [vmem:[%s29187_s5 + $0xf8] sm:$0xff]  ;;  %v16452_v18 = vld [vmem:[%s29187_s5 + $0x70] sm:$0xff]  ;;  %v16466_v13 = vld [vmem:[%s29187_s5 + $0xe0] sm:$0xff] }
 0x80b   :  { %16215 = vrot.lane.b32.xlu1 %v16190_v58, %s19941_s25  ;;  %v16025_v26 = vcombine.high %v28946_v38, %v30263_v25  ;;  %v15791_v33 = vsel %vm9117_vm4, %v30280_v37, %v15790_v51  ;;  %v15854_v19 = vsel %vm9117_vm4, %v28758_v54, %v15853_v9  ;;  %v15868_v50 = vsel %vm9117_vm4, %v28729_v16, %v28765_v1  ;;  %v16465_v58 = vld [vmem:[%s29187_s5 + $0xd8] sm:$0xff]  ;;  %v16464_v43 = vld [vmem:[%s29187_s5 + $0xd0] sm:$0xff]  ;;  %v16446_v40 = vld [vmem:[%s29187_s5 + $0x40] sm:$0xff] }
 0x80c   :  { %v28980_v63 = vrot.slane %v15981_v2, %v30262_v31  ;;  %v15792_v56 = vsel %vm9119_vm5, %v30280_v37, %v15791_v33  ;;  %v15855_v35 = vsel %vm9119_vm5, %v28758_v54, %v15854_v19  ;;  %v15869_v53 = vsel %vm9119_vm5, %v28729_v16, %v15868_v50  ;;  %v16453_v2 = vld [vmem:[%s29187_s5 + $0x78] sm:$0xff]  ;;  %18736 = vmatprep.subr.mxu1 %v16469_v45  ;;  %v16448_v46 = vld [vmem:[%s29187_s5 + $0x50] sm:$0xff]  ;;  %v16459_v19 = vld [vmem:[%s29187_s5 + $0xa8] sm:$0xff] }
 0x80d   :  { %v16278_v44 = vrot.slane %v16016_v21, %v30237_v15  ;;  %v15990_v8 = vcombine.low %v15778_v42, %v15792_v56  ;;  %v16035_v59 = vcombine.low %v15855_v35, %v15869_v53  ;;  %v15860_v57 = vsel %vm9115_vm3, %v28834_v30, %v15859_v47  ;;  %18737 = vmatpush3.msra.mxu1 %v16453_v2  ;;  %v16449_v21 = vld [vmem:[%s29187_s5 + $0x58] sm:$0xff]  ;;  %v16462_v42 = vld [vmem:[%s29187_s5 + $0xc0] sm:$0xff]  ;;  %v16444_v33 = vld [vmem:[%s29187_s5 + $0x30] sm:$0xff] }
 0x80e   :  { %16209 = vrot.lane.b32.xlu0 %v16169_v6, %s19941_s25  ;;  %v15861_v1 = vsel %vm9117_vm4, %v28834_v30, %v15860_v57  ;;  %v15874_v20 = vsel %vm9115_vm3, %v28756_v49, %v15873_v24  ;;  %v16257_v7 = vrot.slane %v15962_v12, %v30237_v15  ;;  %v15989_v36 = vcombine.high %v28980_v63, %v30263_v25  ;;  %v16468_v6 = vld [vmem:[%s29187_s5 + $0xf0] sm:$0xff]  ;;  %v16463_v12 = vld [vmem:[%s29187_s5 + $0xc8] sm:$0xff]  ;;  %v16461_v37 = vld [vmem:[%s29187_s5 + $0xb8] sm:$0xff] }
 0x80f   :  { %16303 = vrot.lane.b32.xlu1 %v16278_v44, %s19944_s27  ;;  %v15862_v16 = vsel %vm9119_vm5, %v28834_v30, %v15861_v1  ;;  %v15875_v54 = vsel %vm9117_vm4, %v28756_v49, %v15874_v20  ;;  %v16109_v10 = vrot.slane %v16025_v26, %v30237_v15  ;;  %v16033_v0 = vrot.slane %v16026_v22, %v30262_v31  ;;  %v16447_v22 = vld [vmem:[%s29187_s5 + $0x48] sm:$0xff]  ;;  %v16445_v51 = vld [vmem:[%s29187_s5 + $0x38] sm:$0xff]  ;;  %v16460_v26 = vld [vmem:[%s29187_s5 + $0xb0] sm:$0xff] }
 0x810   :  { %v15876_v48 = vsel %vm9119_vm5, %v28756_v49, %v15875_v54  ;;  %v16095_v30 = vrot.slane %v15989_v36, %v30237_v15  ;;  %v15997_v60 = vrot.slane %v15990_v8, %v30262_v31  ;;  %v29015_v52 = vrot.slane %v16035_v59, %v30262_v31  ;;  %18738 = vmatprep.subr.mxu1 %v16468_v6  ;;  %v16443_v50 = vld [vmem:[%s29187_s5 + $0x28] sm:$0xff]  ;;  %v16458_v56 = vld [vmem:[%s29187_s5 + $0xa0] sm:$0xff]  ;;  %v16457_v53 = vld [vmem:[%s29187_s5 + $0x98] sm:$0xff] }
 0x811   :  { %v16044_v32 = vcombine.low %v15862_v16, %v15876_v48  ;;  %v16197_v28 = vrot.slane %v16033_v0, %v30237_v15  ;;  %v16034_v24 = vcombine.high %v16033_v0, %v30263_v25  ;;  %18739 = vmatpush3.msra.mxu1 %v16452_v18  ;;  %v16442_v35 = vld [vmem:[%s29187_s5 + $0x20] sm:$0xff]  ;;  %v16441_v44 = vld [vmem:[%s29187_s5 + $0x18] sm:$0xff]  ;;  %v16456_v8 = vld [vmem:[%s29187_s5 + $0x90] sm:$0xff] }
 0x812   :  { %16297 = vrot.lane.b32.xlu0 %v16257_v7, %s19944_s27  ;;  %v16183_v49 = vrot.slane %v15997_v60, %v30237_v15  ;;  %v15998_v62 = vcombine.high %v15997_v60, %v30263_v25  ;;  %v16043_v9 = vcombine.high %v29015_v52, %v30263_v25  ;;  %18740 = vmatprep.subr.mxu1 %v16467_v39  ;;  %v16440_v59 = vld [vmem:[%s29187_s5 + $0x10] sm:$0xff] }
 0x813   :  { %16129 = vrot.lane.b32.xlu1 %v16109_v10, %s19943_s26  ;;  %v16285_v17 = vrot.slane %v16034_v24, %v30237_v15  ;;  %v16051_v11 = vrot.slane %v16044_v32, %v30262_v31  ;;  %18741 = vmatpush3.msra.mxu1 %v16451_v5 }
 0x814   :  { %v16271_v34 = vrot.slane %v15998_v62, %v30237_v15  ;;  %v16116_v14 = vrot.slane %v16043_v9, %v30237_v15  ;;  %18742 = vmatprep.subr.mxu1 %v16466_v13 }
 0x815   :  { %v16204_v23 = vrot.slane %v16051_v11, %v30237_v15  ;;  %v16052_v3 = vcombine.high %v16051_v11, %v30263_v25  ;;  %18743 = vmatpush3.msra.mxu1 %v16450_v29 }
 0x816   :  { %16125 = vrot.lane.b32.xlu0 %v16095_v30, %s19943_s26  ;;  %18744 = vmatprep.subr.mxu1 %v16465_v58 }
 0x817   :  { %16217 = vrot.lane.b32.xlu1 %v16197_v28, %s19941_s25  ;;  %v16292_v47 = vrot.slane %v16052_v3, %v30237_v15  ;;  %18745 = vmatpush3.msra.mxu1 %v16449_v21 }
 0x818   :  { %18746 = vmatprep.subr.mxu1 %v16464_v43 }
 0x819   :  { %18747 = vmatpush3.msra.mxu1 %v16448_v46 }
 0x81a   :  { %16213 = vrot.lane.b32.xlu0 %v16183_v49, %s19941_s25  ;;  %18748 = vmatprep.subr.mxu1 %v16463_v12 }
 0x81b   :  { %16305 = vrot.lane.b32.xlu1 %v16285_v17, %s19944_s27  ;;  %18749 = vmatpush3.msra.mxu1 %v16447_v22 }
 0x81c   :  { %18750 = vmatprep.subr.mxu1 %v16462_v42 }
 0x81d   :  { %18751 = vmatpush3.msra.mxu1 %v16446_v40 }
 0x81e   :  { %16301 = vrot.lane.b32.xlu0 %v16271_v34, %s19944_s27  ;;  %18752 = vmatprep.subr.mxu1 %v16461_v37 }
 0x81f   :  { %16131 = vrot.lane.b32.xlu1 %v16116_v14, %s19943_s26  ;;  %18753 = vmatpush3.msra.mxu1 %v16445_v51 }
 0x820   :  { %18754 = vmatprep.subr.mxu1 %v16460_v26 }
 0x821   :  { %18755 = vmatpush3.msra.mxu1 %v16444_v33 }
 0x822   :  { %18756 = vmatprep.subr.mxu1 %v16459_v19 }
 0x823   :  { %16219 = vrot.lane.b32.xlu1 %v16204_v23, %s19941_s25  ;;  %18757 = vmatpush3.msra.mxu1 %v16443_v50 }
 0x824   :  { %18758 = vmatprep.subr.mxu1 %v16458_v56 }
 0x825   :  { %18759 = vmatpush3.msra.mxu1 %v16442_v35 }
 0x826   :  { %18760 = vmatprep.subr.mxu1 %v16457_v53 }
 0x827   :  { %16307 = vrot.lane.b32.xlu1 %v16292_v47, %s19944_s27  ;;  %18761 = vmatpush3.msra.mxu1 %v16441_v44 }
 0x828   :  { %18762 = vmatprep.subr.mxu1 %v16456_v8 }
 0x829   :  { %18763 = vmatpush3.msra.mxu1 %v16440_v59 }
 0x863   :  { %v16118_v57 = vpop.permute.xlu0 %16117 }
 0x864   :  { %v16317_v2 = vsel %vm11963_vm7, %v28725_v27, %v16118_v57 }
 0x868   :  { %v16206_v1 = vpop.permute.xlu0 %16205 }
 0x86c   :  { %v16294_v20 = vpop.permute.xlu0 %16293 }
 0x86d   :  { %v16124_v16 = vpop.permute.xlu1 %16123 }
 0x870   :  { %v16120_v54 = vpop.permute.xlu0 %16119 }
 0x871   :  { %v16212_v7 = vpop.permute.xlu1 %16211  ;;  %v16318_v9 = vsel %vm11963_vm7, %v28796_v55, %v16120_v54  ;;  %v16320_v55 = vsel %vm11963_vm7, %v28799_v4, %v16124_v16 }
 0x872   :  { %v16328_v21 = vsel %vm11997_vm9, %v16320_v55, %v16212_v7 }
 0x874   :  { %v16208_v36 = vpop.permute.xlu0 %16207 }
 0x875   :  { %v16300_v48 = vpop.permute.xlu1 %16299  ;;  %v16326_v34 = vsel %vm11997_vm9, %v16318_v9, %v16208_v36 }
 0x876   :  { %v16336_v12 = vsel %vm12031_vm11, %v16328_v21, %v16300_v48 }
 0x877   :  { %v16352_v26 = vrot.slane %v16336_v12, 1 }
 0x878   :  { %v16296_v10 = vpop.permute.xlu0 %16295 }
 0x879   :  { %v16128_v0 = vpop.permute.xlu1 %16127  ;;  %v16334_v11 = vsel %vm12031_vm11, %v16326_v34, %v16296_v10  ;;  %v16368_v59 = vmax.f32 %v16336_v12, %v16352_v26 }
 0x87a   :  { %v16322_v6 = vsel %vm11963_vm7, %v28878_v41, %v16128_v0  ;;  %v16350_v18 = vrot.slane %v16334_v11, 1  ;;  %v16325_v41 = vsel %vm11997_vm9, %v16317_v2, %v16206_v1 }
 0x87b   :  { %v16385_v0 = vrot.slane %v16368_v59, 5 }
 0x87c   :  { %v16122_v32 = vpop.permute.xlu0 %16121  ;;  %v16366_v42 = vmax.f32 %v16334_v11, %v16350_v18 }
 0x87d   :  { %v16216_v30 = vpop.permute.xlu1 %16215  ;;  %v16319_v14 = vsel %vm11963_vm7, %v28875_v61, %v16122_v32 }
 0x87e   :  { %v16330_v61 = vsel %vm11997_vm9, %v16322_v6, %v16216_v30  ;;  %v16381_v50 = vrot.slane %v16366_v42, 7 }
 0x880   :  { %v16210_v60 = vpop.permute.xlu0 %16209 }
 0x881   :  { %v16304_v28 = vpop.permute.xlu1 %16303  ;;  %v16327_v23 = vsel %vm11997_vm9, %v16319_v14, %v16210_v60 }
 0x882   :  { %v16338_v13 = vsel %vm12031_vm11, %v16330_v61, %v16304_v28  ;;  %v16455_v28 = vld [vmem:[%s29187_s5 + $0x88] sm:$0xff] }
 0x883   :  { %18764 = vmatprep.subr.mxu1 %v16455_v28 }
 0x884   :  { %v16298_v24 = vpop.permute.xlu0 %16297 }
 0x885   :  { %v16130_v49 = vpop.permute.xlu1 %16129  ;;  %v16335_v47 = vsel %vm12031_vm11, %v16327_v23, %v16298_v24  ;;  %v16439_v24 = vld [vmem:[%s29187_s5 + $0x8] sm:$0xff] }
 0x886   :  { %v16323_v39 = vsel %vm11963_vm7, %v28946_v38, %v16130_v49  ;;  %v16351_v5 = vrot.slane %v16335_v47, 1  ;;  %v16333_v38 = vsel %vm12031_vm11, %v16325_v41, %v16294_v20  ;;  %v16454_v49 = vld [vmem:[%s29187_s5 + $0x80] sm:$0xff]  ;;  %18765 = vmatpush3.msra.mxu1 %v16439_v24 }
 0x887   :  { %v16349_v51 = vrot.slane %v16333_v38, 1  ;;  %18766 = vmatprep.subr.mxu1 %v16454_v49 }
 0x888   :  { %v16126_v62 = vpop.permute.xlu0 %16125  ;;  %v16367_v40 = vmax.f32 %v16335_v47, %v16351_v5 }
 0x889   :  { %v16218_v17 = vpop.permute.xlu1 %16217  ;;  %v16321_v29 = vsel %vm11963_vm7, %v28980_v63, %v16126_v62  ;;  %v16354_v63 = vrot.slane %v16338_v13, 1  ;;  %v16365_v8 = vmax.f32 %v16333_v38, %v16349_v51 }
 0x88a   :  { %v16331_v27 = vsel %vm11997_vm9, %v16323_v39, %v16218_v17  ;;  %v16383_v35 = vrot.slane %v16367_v40, 6  ;;  %v16438_v17 = vld [vmem:[%s29187_s5] sm:$0xff]  ;;  %s19955_s5 = smov 64  }
 0x88b   :  { %v16370_v56 = vmax.f32 %v16338_v13, %v16354_v63  ;;  %v16382_v54 = vsel %vm9113_vm2, %v16381_v50, %v16365_v8  ;;  %18767 = vmatpush3.msra.mxu1 %v16438_v17 }
 0x88c   :  { %v16214_v3 = vpop.permute.xlu0 %16213  ;;  %v16384_v48 = vsel %vm9107_vm14, %v16383_v35, %v16382_v54 }
 0x88d   :  { %v16306_v45 = vpop.permute.xlu1 %16305  ;;  %v16329_v4 = vsel %vm11997_vm9, %v16321_v29, %v16214_v3  ;;  %v16387_v7 = vrot.slane %v16370_v56, 7 }
 0x88e   :  { %v16339_v43 = vsel %vm12031_vm11, %v16331_v27, %v16306_v45 }
 0x88f   :  { %v16355_v37 = vrot.slane %v16339_v43, 1 }
 0x890   :  { %v16302_v58 = vpop.permute.xlu0 %16301 }
 0x891   :  { %v16132_v46 = vpop.permute.xlu1 %16131  ;;  %v16337_v22 = vsel %vm12031_vm11, %v16329_v4, %v16302_v58  ;;  %v16371_v53 = vmax.f32 %v16339_v43, %v16355_v37 }
 0x892   :  { %v16353_v33 = vrot.slane %v16337_v22, 1  ;;  %v16324_v44 = vsel %vm11963_vm7, %v29015_v52, %v16132_v46  ;;  %v16386_v52 = vsel %vm9115_vm3, %v16385_v0, %v16384_v48 }
 0x893   :  { %v16389_v10 = vrot.slane %v16371_v53, 6  ;;  %v16400_v34 = vrot.slane %v16386_v52, %v30237_v15 }
 0x894   :  { %v16369_v57 = vmax.f32 %v16337_v22, %v16353_v33 }
 0x895   :  { %v16220_v19 = vpop.permute.xlu1 %16219 }
 0x896   :  { %v16332_v1 = vsel %vm11997_vm9, %v16324_v44, %v16220_v19  ;;  %v16388_v32 = vsel %vm9113_vm2, %v16387_v7, %v16369_v57 }
 0x897   :  { %v16390_v62 = vsel %vm9107_vm14, %v16389_v10, %v16388_v32 }
 0x899   :  { %v16308_v20 = vpop.permute.xlu1 %16307 }
 0x89a   :  { %v16340_v16 = vsel %vm12031_vm11, %v16332_v1, %v16308_v20 }
 0x89b   :  { %v16356_v36 = vrot.slane %v16340_v16, 1 }
 0x89d   :  { %v16372_v30 = vmax.f32 %v16340_v16, %v16356_v36 }
 0x89f   :  { %v16391_v60 = vrot.slane %v16372_v30, 5 }
 0x8a1   :  { %v16392_v9 = vsel %vm9115_vm3, %v16391_v60, %v16390_v62 }
 0x8a2   :  { %v16408_v14 = vrot.slane %v16392_v9, %v30237_v15 }
 0x8a4   :  { %v16409_v11 = vcombine.low %v16400_v34, %v16408_v14  ;;  %v16410_v23 = vcombine.high %v16400_v34, %v16408_v14 }
 0x8a6   :  { %v16417_v3 = vrot.slane %v16409_v11, %v30262_v31  ;;  %v16424_v47 = vrot.slane %v16410_v23, %v30262_v31  ;;  %v17997_v31 = vld [vmem:[%s29188_s6] ss:$0 sm:$0xff] }
 0x8a8   :  { %v16425_v45 = vcombine.high %v16417_v3, %v30263_v25  ;;  %v16426_v2 = vcombine.high %v16424_v47, %v30263_v25 }
 0x8aa   :  { %v19908_v6 = vpack.i.bf16 %v16425_v45, %v16426_v2 }
 0x8ac   :  { %19909 = vrot.lane.b32.xlu0 %v19908_v6, %s19955_s5 }
 0x91e   :  { %v19910_v55 = vpop.permute.xlu0 %19909 }
 0x91f   :  { %v19912_v18 = vunpack.i.h.bf16 %v19910_v55  ;;  %v19911_v61 = vunpack.i.l.bf16 %v19910_v55 }
 0x921   :  { %v16436_v15 = vsel %vm16435_vm1, %v16417_v3, %v19912_v18  ;;  %v16437_v39 = vsel %vm16435_vm1, %v16424_v47, %v19911_v61 }
 0x922   :  { %16541 = vmatprep.mubr.f32.mxu1 %v16437_v39 }
 0x923   :  { %16542 = vmatmul.mubr.f32.vlgmr.msra.gmra.mxu1 %v16436_v15 }
 0x9e3   :  { %v18768_v5 = vpop.f32.mrf.mxu1 }
 0x9e5   :  { %v18769_v13 = vpop.f32.mrf.mxu1 }
 0x9e6   :  { %v18770_v25 = vadd.f32 %v18769_v13, %v18768_v5 }
 0x9e8   :  { %v16544_v29 = vadd.f32 %v18770_v25, %v17997_v31 }
 0x9ea   :  { %16547 = vst [vmem:[#allocation3] sm:$0x3] %v16544_v29 }
 0x9eb   :  { %19927 = shalt.err (!%p19924_p4)
}
 0x9ec   :  { %16557 = dma.vmem_to_hbm [thread:$0]  %s16555_s23, 32, %s29189_s7, [#allocation4]  }
 0x9ed   :  { %19936 = dma.done.wait [#allocation4], 32  }
 0x9ee   :  { %19937 = vsyncadd [#allocation4], 4294967264 }
 0x9ef   :  { %16561 = vsyncpa [#allocation4], 1 }

</bundles_post_ra>
